<compile_context>
chip_gen: v7x
topology: tpu7x:2x2x1
jax: 0.10.0
libtpu: 0.0.40
codegen_flags: <defaults>
</compile_context>

<pallas_src>
import numpy as np
import jax
import jax.numpy as jnp
from jax import lax
from jax.experimental import pallas as pl
from jax.experimental.pallas import tpu as pltpu


# ----------------------------------------------------------------------------
# Kernel: one grid step == one chunk of Tc timesteps.
# ----------------------------------------------------------------------------
def _simple_rnn_kernel(
    # inputs -----------------------------------------------------------------
    x_ref,                    # (Tc, Bp, D)   chunk of timesteps (compute dtype)
    w1_ref, b1_ref,           # (H+D, 2H) block-diag [hh_w1|ih_w1], (1, 2H) f32
    w2_ref, b2_ref,           # (2H, 20H) block-diag [hh_w2|ih_w2], (1, 20H) f32
    w3_ref, b3_ref,           # (4, 20H, H) per-gate columns, (4, 1, H) f32
    ho_w1_ref, ho_b1_ref,     # (H, H//2), (1, H//2)
    ho_w2_ref, ho_b2_ref,     # (H//2, O), (1, O)
    # outputs ------------------------------------------------------------------
    out_ref,                  # (Tc, Bp, O)  f32
    # scratch (persists across sequential grid steps) ---------------------------
    h_ref,                    # (Bp, H) f32 hidden carry
    c_ref,                    # (Bp, H) f32 cell carry
    hstk_ref,                 # (Tc, Bp, H) f32 per-chunk hidden stack
):
    Tc, Bp, _ = x_ref.shape
    H = h_ref.shape[1]
    O = out_ref.shape[-1]

    # h0 = c0 = 0 at the very first timestep (torch.zeros in the reference).
    @pl.when(pl.program_id(0) == 0)
    def _():
        h_ref[...] = jnp.zeros_like(h_ref)
        c_ref[...] = jnp.zeros_like(c_ref)

    wdt = w1_ref.dtype  # matmul-operand dtype (f32, or bf16 on v6e/v7x)

    # Hoist all weight loads out of the per-timestep loop.
    w1 = w1_ref[...]
    b1 = b1_ref[...]
    w2 = w2_ref[...]
    b2 = b2_ref[...]
    w3_i, w3_f, w3_c, w3_o = w3_ref[0], w3_ref[1], w3_ref[2], w3_ref[3]
    b3_i, b3_f, b3_c, b3_o = b3_ref[0], b3_ref[1], b3_ref[2], b3_ref[3]

    def step(t, carry):
        h, c = carry                              # f32 (Bp, H)
        x = x_ref[t]                              # (Bp, D) compute dtype
        # Fused small_cell(x) + small_cell(h): v = [h | x] @ block-diag weights.
        v = jnp.concatenate([h.astype(wdt), x], axis=-1)          # (Bp, H+D)
        z = jnp.dot(v, w1, preferred_element_type=jnp.float32) + b1
        z = jnp.maximum(z, 0.0)
        z = jnp.dot(z.astype(wdt), w2, preferred_element_type=jnp.float32) + b2
        z = jnp.maximum(z, 0.0).astype(wdt)                       # (Bp, 20H)

        # Per-gate matmuls: each gate comes out lane-aligned, no (k*H) slices.
        i_g = jax.nn.sigmoid(
            jnp.dot(z, w3_i, preferred_element_type=jnp.float32) + b3_i)
        f_g = jax.nn.sigmoid(
            jnp.dot(z, w3_f, preferred_element_type=jnp.float32) + b3_f)
        c_g = jnp.tanh(
            jnp.dot(z, w3_c, preferred_element_type=jnp.float32) + b3_c)
        o_g = jax.nn.sigmoid(
            jnp.dot(z, w3_o, preferred_element_type=jnp.float32) + b3_o)

        c_new = f_g * c + i_g * c_g               # f32
        h_new = o_g * jnp.tanh(c_new)             # f32
        hstk_ref[t] = h_new                       # collect for the output head
        return (h_new, c_new)

    h_fin, c_fin = lax.fori_loop(0, Tc, step, (h_ref[...], c_ref[...]),
                                 unroll=True)
    h_ref[...] = h_fin
    c_ref[...] = c_fin

    # Output head applied once to the whole chunk: (Tc*Bp, H) -> (Tc*Bp, O).
    hs = hstk_ref[...].reshape(Tc * Bp, H).astype(wdt)
    z = jnp.dot(hs, ho_w1_ref[...], preferred_element_type=jnp.float32)
    z = jnp.maximum(z + ho_b1_ref[...], 0.0).astype(wdt)
    y = jnp.dot(z, ho_w2_ref[...], preferred_element_type=jnp.float32)
    y = y + ho_b2_ref[...]
    out_ref[...] = y.reshape(Tc, Bp, O).astype(out_ref.dtype)   # one dense store


# ----------------------------------------------------------------------------
# Host-side weight fusion / packing.
# ----------------------------------------------------------------------------
def _pack_weights(p, input_size, hidden_size, compute_dtype):
    D, H = input_size, hidden_size
    f32 = jnp.float32
    zHH = jnp.zeros((H, H), f32)
    zDH = jnp.zeros((D, H), f32)
    z10 = jnp.zeros((H, 10 * H), f32)

    # Layer 1: [h | x] @ block_diag(hh_w1, ih_w1)  -> cols [0:H]=h-path, [H:2H]=x-path
    w1 = jnp.concatenate([
        jnp.concatenate([p["hh_w1"], zHH], axis=1),
        jnp.concatenate([zDH, p["ih_w1"]], axis=1),
    ], axis=0)                                                    # (H+D, 2H)
    b1 = jnp.concatenate([p["hh_b1"], p["ih_b1"]], axis=1)        # (1, 2H)

    # Layer 2: block_diag(hh_w2, ih_w2)
    w2 = jnp.concatenate([
        jnp.concatenate([p["hh_w2"], z10], axis=1),
        jnp.concatenate([z10, p["ih_w2"]], axis=1),
    ], axis=0)                                                    # (2H, 20H)
    b2 = jnp.concatenate([p["hh_b2"], p["ih_b2"]], axis=1)        # (1, 20H)

    # Layer 3: stacked rows [hh_w3; ih_w3]; bias summed; split per-gate columns.
    w3_full = jnp.concatenate([p["hh_w3"], p["ih_w3"]], axis=0)   # (20H, 4H)
    b3_full = p["hh_b3"] + p["ih_b3"]                             # (1, 4H)
    w3s = jnp.stack([w3_full[:, g * H:(g + 1) * H] for g in range(4)], axis=0)
    b3s = jnp.stack([b3_full[:, g * H:(g + 1) * H] for g in range(4)], axis=0)

    cd = compute_dtype
    return [
        w1.astype(cd), b1,
        w2.astype(cd), b2,
        w3s.astype(cd), b3s,
        p["ho_w1"].astype(cd), p["ho_b1"],
        p["ho_w2"].astype(cd), p["ho_b2"],
    ]


# ----------------------------------------------------------------------------
# Wrapper
# ----------------------------------------------------------------------------
def simple_rnn_forward(inputs, params, hidden_size, output_size, *,
                       chunk=8, use_bf16_matmul=False):
    """inputs: (T, B, input_size) float32. Returns (T, B, output_size) float32.

    chunk: timesteps processed per grid step (amortizes per-step overhead).
    use_bf16_matmul: cast MXU operands to bf16 (v6e/v7x); carries/gates stay f32.
    """
    T, B, D = inputs.shape
    H, O = hidden_size, output_size
    compute_dtype = jnp.bfloat16 if use_bf16_matmul else jnp.float32

    Tc = max(1, int(chunk))
    Tp = ((T + Tc - 1) // Tc) * Tc          # pad time to a multiple of the chunk
    Bp = ((B + 7) // 8) * 8                 # pad batch to the f32 sublane tile

    x = inputs
    if Tp != T or Bp != B:
        x = jnp.pad(inputs, ((0, Tp - T), (0, Bp - B), (0, 0)))
    x = x.astype(compute_dtype)

    weight_args = _pack_weights(params, D, H, compute_dtype)

    def _const_spec(a):
        # Small weight arrays: resident in VMEM, constant block index.
        return pl.BlockSpec(a.shape, lambda c, _r=a.ndim: (0,) * _r)

    grid_spec = pltpu.PrefetchScalarGridSpec(
        num_scalar_prefetch=0,
        grid=(Tp // Tc,),
        in_specs=[pl.BlockSpec((Tc, Bp, D), lambda c: (c, 0, 0))]
                 + [_const_spec(a) for a in weight_args],
        out_specs=pl.BlockSpec((Tc, Bp, O), lambda c: (c, 0, 0)),
        scratch_shapes=[
            pltpu.VMEM((Bp, H), jnp.float32),       # h carry
            pltpu.VMEM((Bp, H), jnp.float32),       # c carry
            pltpu.VMEM((Tc, Bp, H), jnp.float32),   # per-chunk hidden stack
        ],
    )

    out = pl.pallas_call(
        _simple_rnn_kernel,
        out_shape=jax.ShapeDtypeStruct((Tp, Bp, O), jnp.float32),
        grid_spec=grid_spec,
        compiler_params=pltpu.CompilerParams(
            # The recurrence makes the time-chunk axis strictly sequential.
            # TODO(synk): on v7x a leading "parallel" batch axis would occupy the
            # second TensorCore, but only if the workload provides a larger batch.
            dimension_semantics=("arbitrary",),
        ),
    )(x, *weight_args)

    return out[:T, :B, :]


# ----------------------------------------------------------------------------
# Deterministic parameter init (PyTorch-style uniform(-1/sqrt(fan_in), ...))
# ----------------------------------------------------------------------------
def init_params(key, input_size, hidden_size, output_size):
    D, H, O = input_size, hidden_size, output_size

    def linear(key, fan_in, fan_out):
        kw, kb = jax.random.split(key)
        bound = 1.0 / np.sqrt(fan_in)
        w = jax.random.uniform(kw, (fan_in, fan_out), jnp.float32, -bound, bound)
        b = jax.random.uniform(kb, (1, fan_out), jnp.float32, -bound, bound)
        return w, b

    keys = jax.random.split(key, 8)
    params = {}
    # w_ih[0] = small_cell(D, H):  D->H, H->10H, 10H->4H
    params["ih_w1"], params["ih_b1"] = linear(keys[0], D, H)
    params["ih_w2"], params["ih_b2"] = linear(keys[1], H, 10 * H)
    params["ih_w3"], params["ih_b3"] = linear(keys[2], 10 * H, 4 * H)
    # w_hh[0] = small_cell(H, H):  H->H, H->10H, 10H->4H
    params["hh_w1"], params["hh_b1"] = linear(keys[3], H, H)
    params["hh_w2"], params["hh_b2"] = linear(keys[4], H, 10 * H)
    params["hh_w3"], params["hh_b3"] = linear(keys[5], 10 * H, 4 * H)
    # output head: H -> H//2 -> O
    params["ho_w1"], params["ho_b1"] = linear(keys[6], H, H // 2)
    params["ho_w2"], params["ho_b2"] = linear(keys[7], H // 2, O)
    return params


# ----------------------------------------------------------------------------
# Pure-JAX reference (mirrors the PyTorch forward, unfused) for correctness.
# ----------------------------------------------------------------------------
def reference_forward(inputs, p, hidden_size):
    T, B, D = inputs.shape
    H = hidden_size

    def small(v, w1, b1, w2, b2, w3, b3):
        z = jnp.maximum(v @ w1 + b1, 0.0)
        z = jnp.maximum(z @ w2 + b2, 0.0)
        return z @ w3 + b3

    h = jnp.zeros((B, H), jnp.float32)
    c = jnp.zeros((B, H), jnp.float32)
    outs = []
    for t in range(T):
        x = inputs[t]
        gates = (small(x, p["ih_w1"], p["ih_b1"], p["ih_w2"], p["ih_b2"],
                       p["ih_w3"], p["ih_b3"])
                 + small(h, p["hh_w1"], p["hh_b1"], p["hh_w2"], p["hh_b2"],
                         p["hh_w3"], p["hh_b3"]))
        i_g = jax.nn.sigmoid(gates[:, 0 * H:1 * H])
        f_g = jax.nn.sigmoid(gates[:, 1 * H:2 * H])
        c_g = jnp.tanh(gates[:, 2 * H:3 * H])
        o_g = jax.nn.sigmoid(gates[:, 3 * H:4 * H])
        c = f_g * c + i_g * c_g
        h = o_g * jnp.tanh(c)
        y = jnp.maximum(h @ p["ho_w1"] + p["ho_b1"], 0.0) @ p["ho_w2"] + p["ho_b2"]
        outs.append(y)
    return jnp.stack(outs, 0)


if __name__ == "__main__":
    INPUT_SIZE = 16
    HIDDEN_SIZE = 32
    OUTPUT_SIZE = 8
    T, B = 16, 4      # 2 time-chunks of 8; batch padded to 8 inside the wrapper

    root = jax.random.PRNGKey(0)
    k_x, k_p = jax.random.split(root)
    inputs = jax.random.normal(k_x, (T, B, INPUT_SIZE), jnp.float32)
    params = init_params(k_p, INPUT_SIZE, HIDDEN_SIZE, OUTPUT_SIZE)

    ref = reference_forward(inputs, params, HIDDEN_SIZE)

    # f32 path: must match the (PyTorch-equivalent) reference tightly.
    out = simple_rnn_forward(inputs, params, HIDDEN_SIZE, OUTPUT_SIZE, chunk=8)
    out = jax.block_until_ready(out)
    np.testing.assert_allclose(np.asarray(out), np.asarray(ref),
                               rtol=1e-4, atol=1e-4)

    # bf16 MXU-operand path (v6e/v7x optimization): f32 carries + gate math,
    # so only matmul operand rounding differs -> loose tolerance.
    out_bf16 = simple_rnn_forward(inputs, params, HIDDEN_SIZE, OUTPUT_SIZE,
                                  chunk=8, use_bf16_matmul=True)
    out_bf16 = jax.block_until_ready(out_bf16)
    np.testing.assert_allclose(np.asarray(out_bf16), np.asarray(ref),
                               rtol=5e-2, atol=5e-2)

    print("KERNEL_OK")
</pallas_src>

<mosaic_0001>
module attributes {stable_mosaic.version = 11 : i64} {
  func.func @_simple_rnn_kernel(%arg0: i32, %arg1: memref<8x8x16xf32, #tpu.memory_space<vmem>>, %arg2: memref<48x64xf32, #tpu.memory_space<vmem>>, %arg3: memref<1x64xf32, #tpu.memory_space<vmem>>, %arg4: memref<64x640xf32, #tpu.memory_space<vmem>>, %arg5: memref<1x640xf32, #tpu.memory_space<vmem>>, %arg6: memref<4x640x32xf32, #tpu.memory_space<vmem>>, %arg7: memref<4x1x32xf32, #tpu.memory_space<vmem>>, %arg8: memref<32x16xf32, #tpu.memory_space<vmem>>, %arg9: memref<1x16xf32, #tpu.memory_space<vmem>>, %arg10: memref<16x8xf32, #tpu.memory_space<vmem>>, %arg11: memref<1x8xf32, #tpu.memory_space<vmem>>, %arg12: memref<8x8x8xf32, #tpu.memory_space<vmem>>, %arg13: memref<8x32xf32, #tpu.memory_space<vmem>>, %arg14: memref<8x32xf32, #tpu.memory_space<vmem>>, %arg15: memref<8x8x32xf32, #tpu.memory_space<vmem>>) attributes {dimension_semantics = [#tpu.dimension_semantics<arbitrary>], iteration_bounds = array<i64: 2>, scalar_prefetch = 0 : i64, scratch_operands = 3 : i64, tpu.core_type = #tpu.core_type<tc>, window_params = [{transform_indices = @transform_0, window_bounds = array<i64: 8, 8, 16>}, {pipeline_mode = #tpu.pipeline_mode<synchronous>, transform_indices = @transform_1, window_bounds = array<i64: 48, 64>}, {pipeline_mode = #tpu.pipeline_mode<synchronous>, transform_indices = @transform_2, window_bounds = array<i64: 1, 64>}, {pipeline_mode = #tpu.pipeline_mode<synchronous>, transform_indices = @transform_3, window_bounds = array<i64: 64, 640>}, {pipeline_mode = #tpu.pipeline_mode<synchronous>, transform_indices = @transform_4, window_bounds = array<i64: 1, 640>}, {pipeline_mode = #tpu.pipeline_mode<synchronous>, transform_indices = @transform_5, window_bounds = array<i64: 4, 640, 32>}, {pipeline_mode = #tpu.pipeline_mode<synchronous>, transform_indices = @transform_6, window_bounds = array<i64: 4, 1, 32>}, {pipeline_mode = #tpu.pipeline_mode<synchronous>, transform_indices = @transform_7, window_bounds = array<i64: 32, 16>}, {pipeline_mode = #tpu.pipeline_mode<synchronous>, transform_indices = @transform_8, window_bounds = array<i64: 1, 16>}, {pipeline_mode = #tpu.pipeline_mode<synchronous>, transform_indices = @transform_9, window_bounds = array<i64: 16, 8>}, {pipeline_mode = #tpu.pipeline_mode<synchronous>, transform_indices = @transform_10, window_bounds = array<i64: 1, 8>}, {transform_indices = @transform_11, window_bounds = array<i64: 8, 8, 8>}]} {
    %c0_i32 = arith.constant 0 : i32
    %0 = arith.cmpi eq, %arg0, %c0_i32 : i32
    %1 = arith.extui %0 : i1 to i32
    %c0_i32_0 = arith.constant 0 : i32
    %2 = arith.cmpi ne, %1, %c0_i32_0 : i32
    scf.if %2 {
      %cst_174 = arith.constant 0.000000e+00 : f32
      %451 = vector.broadcast %cst_174 : f32 to vector<8x32xf32>
      %c0_175 = arith.constant 0 : index
      %c0_176 = arith.constant 0 : index
      %452 = vector.load %arg13[%c0_175, %c0_176] : memref<8x32xf32, #tpu.memory_space<vmem>>, vector<8x32xf32>
      tpu.vector_store %arg13[%c0_175, %c0_176], %451 {strides = array<i32>} : memref<8x32xf32, #tpu.memory_space<vmem>>, vector<8x32xf32>,
      %cst_177 = arith.constant 0.000000e+00 : f32
      %453 = vector.broadcast %cst_177 : f32 to vector<8x32xf32>
      %c0_178 = arith.constant 0 : index
      %c0_179 = arith.constant 0 : index
      %454 = vector.load %arg14[%c0_178, %c0_179] : memref<8x32xf32, #tpu.memory_space<vmem>>, vector<8x32xf32>
      tpu.vector_store %arg14[%c0_178, %c0_179], %453 {strides = array<i32>} : memref<8x32xf32, #tpu.memory_space<vmem>>, vector<8x32xf32>,
    } else {
    }
    %c0 = arith.constant 0 : index
    %c0_1 = arith.constant 0 : index
    %3 = vector.load %arg2[%c0, %c0_1] : memref<48x64xf32, #tpu.memory_space<vmem>>, vector<48x64xf32>
    %c0_2 = arith.constant 0 : index
    %c0_3 = arith.constant 0 : index
    %4 = vector.load %arg3[%c0_2, %c0_3] : memref<1x64xf32, #tpu.memory_space<vmem>>, vector<1x64xf32>
    %c0_4 = arith.constant 0 : index
    %c0_5 = arith.constant 0 : index
    %5 = vector.load %arg4[%c0_4, %c0_5] : memref<64x640xf32, #tpu.memory_space<vmem>>, vector<64x640xf32>
    %c0_6 = arith.constant 0 : index
    %c0_7 = arith.constant 0 : index
    %6 = vector.load %arg5[%c0_6, %c0_7] : memref<1x640xf32, #tpu.memory_space<vmem>>, vector<1x640xf32>
    %c0_8 = arith.constant 0 : index
    %c0_9 = arith.constant 0 : index
    %c0_10 = arith.constant 0 : index
    %7 = vector.load %arg6[%c0_8, %c0_9, %c0_10] : memref<4x640x32xf32, #tpu.memory_space<vmem>>, vector<1x640x32xf32>
    %8 = vector.shape_cast %7 : vector<1x640x32xf32> to vector<640x32xf32>
    %c1 = arith.constant 1 : index
    %c0_11 = arith.constant 0 : index
    %c0_12 = arith.constant 0 : index
    %9 = vector.load %arg6[%c1, %c0_11, %c0_12] : memref<4x640x32xf32, #tpu.memory_space<vmem>>, vector<1x640x32xf32>
    %10 = vector.shape_cast %9 : vector<1x640x32xf32> to vector<640x32xf32>
    %c2 = arith.constant 2 : index
    %c0_13 = arith.constant 0 : index
    %c0_14 = arith.constant 0 : index
    %11 = vector.load %arg6[%c2, %c0_13, %c0_14] : memref<4x640x32xf32, #tpu.memory_space<vmem>>, vector<1x640x32xf32>
    %12 = vector.shape_cast %11 : vector<1x640x32xf32> to vector<640x32xf32>
    %c3 = arith.constant 3 : index
    %c0_15 = arith.constant 0 : index
    %c0_16 = arith.constant 0 : index
    %13 = vector.load %arg6[%c3, %c0_15, %c0_16] : memref<4x640x32xf32, #tpu.memory_space<vmem>>, vector<1x640x32xf32>
    %14 = vector.shape_cast %13 : vector<1x640x32xf32> to vector<640x32xf32>
    %c0_17 = arith.constant 0 : index
    %c0_18 = arith.constant 0 : index
    %c0_19 = arith.constant 0 : index
    %15 = vector.load %arg7[%c0_17, %c0_18, %c0_19] : memref<4x1x32xf32, #tpu.memory_space<vmem>>, vector<1x1x32xf32>
    %16 = vector.shape_cast %15 : vector<1x1x32xf32> to vector<1x32xf32>
    %c1_20 = arith.constant 1 : index
    %c0_21 = arith.constant 0 : index
    %c0_22 = arith.constant 0 : index
    %17 = vector.load %arg7[%c1_20, %c0_21, %c0_22] : memref<4x1x32xf32, #tpu.memory_space<vmem>>, vector<1x1x32xf32>
    %18 = vector.shape_cast %17 : vector<1x1x32xf32> to vector<1x32xf32>
    %c2_23 = arith.constant 2 : index
    %c0_24 = arith.constant 0 : index
    %c0_25 = arith.constant 0 : index
    %19 = vector.load %arg7[%c2_23, %c0_24, %c0_25] : memref<4x1x32xf32, #tpu.memory_space<vmem>>, vector<1x1x32xf32>
    %20 = vector.shape_cast %19 : vector<1x1x32xf32> to vector<1x32xf32>
    %c3_26 = arith.constant 3 : index
    %c0_27 = arith.constant 0 : index
    %c0_28 = arith.constant 0 : index
    %21 = vector.load %arg7[%c3_26, %c0_27, %c0_28] : memref<4x1x32xf32, #tpu.memory_space<vmem>>, vector<1x1x32xf32>
    %22 = vector.shape_cast %21 : vector<1x1x32xf32> to vector<1x32xf32>
    %c0_29 = arith.constant 0 : index
    %c0_30 = arith.constant 0 : index
    %23 = vector.load %arg13[%c0_29, %c0_30] : memref<8x32xf32, #tpu.memory_space<vmem>>, vector<8x32xf32>
    %c0_31 = arith.constant 0 : index
    %c0_32 = arith.constant 0 : index
    %24 = vector.load %arg14[%c0_31, %c0_32] : memref<8x32xf32, #tpu.memory_space<vmem>>, vector<8x32xf32>
    %c0_i32_33 = arith.constant 0 : i32
    %25 = arith.index_cast %c0_i32_33 : i32 to index
    %c0_34 = arith.constant 0 : index
    %c0_35 = arith.constant 0 : index
    %26 = vector.load %arg1[%25, %c0_34, %c0_35] : memref<8x8x16xf32, #tpu.memory_space<vmem>>, vector<1x8x16xf32>
    %27 = vector.shape_cast %26 : vector<1x8x16xf32> to vector<8x16xf32>
    %28 = tpu.concatenate %23, %27 in 1 : vector<8x32xf32>, vector<8x16xf32> -> vector<8x48xf32>
    %cst = arith.constant dense<0.000000e+00> : vector<8x64xf32>
    %29 = tpu.matmul %28, %3, %cst {dimension_numbers = #tpu.dot_dimension_numbers<[1], [0], [0], [1], [0, 0, 1, 1], [], []>} : vector<8x48xf32>, vector<48x64xf32>, vector<8x64xf32> -> vector<8x64xf32>
    %30 = vector.broadcast %4 : vector<1x64xf32> to vector<8x64xf32>
    %31 = arith.addf %29, %30 : vector<8x64xf32>
    %cst_36 = arith.constant 0.000000e+00 : f32
    %32 = vector.broadcast %cst_36 : f32 to vector<8x64xf32>
    %33 = arith.maximumf %31, %32 : vector<8x64xf32>
    %cst_37 = arith.constant dense<0.000000e+00> : vector<8x640xf32>
    %34 = tpu.matmul %33, %5, %cst_37 {dimension_numbers = #tpu.dot_dimension_numbers<[1], [0], [0], [1], [0, 0, 1, 1], [], []>} : vector<8x64xf32>, vector<64x640xf32>, vector<8x640xf32> -> vector<8x640xf32>
    %35 = vector.broadcast %6 : vector<1x640xf32> to vector<8x640xf32>
    %36 = arith.addf %34, %35 : vector<8x640xf32>
    %cst_38 = arith.constant 0.000000e+00 : f32
    %37 = vector.broadcast %cst_38 : f32 to vector<8x640xf32>
    %38 = arith.maximumf %36, %37 : vector<8x640xf32>
    %cst_39 = arith.constant dense<0.000000e+00> : vector<8x32xf32>
    %39 = tpu.matmul %38, %8, %cst_39 {dimension_numbers = #tpu.dot_dimension_numbers<[1], [0], [0], [1], [0, 0, 1, 1], [], []>} : vector<8x640xf32>, vector<640x32xf32>, vector<8x32xf32> -> vector<8x32xf32>
    %40 = vector.broadcast %16 : vector<1x32xf32> to vector<8x32xf32>
    %41 = arith.addf %39, %40 : vector<8x32xf32>
    %42 = arith.negf %41 : vector<8x32xf32>
    %43 = math.exp %42 : vector<8x32xf32>
    %cst_40 = arith.constant 1.000000e+00 : f32
    %44 = vector.broadcast %cst_40 : f32 to vector<8x32xf32>
    %45 = arith.addf %44, %43 : vector<8x32xf32>
    %46 = arith.divf %44, %45 : vector<8x32xf32>
    %cst_41 = arith.constant dense<0.000000e+00> : vector<8x32xf32>
    %47 = tpu.matmul %38, %10, %cst_41 {dimension_numbers = #tpu.dot_dimension_numbers<[1], [0], [0], [1], [0, 0, 1, 1], [], []>} : vector<8x640xf32>, vector<640x32xf32>, vector<8x32xf32> -> vector<8x32xf32>
    %48 = vector.broadcast %18 : vector<1x32xf32> to vector<8x32xf32>
    %49 = arith.addf %47, %48 : vector<8x32xf32>
    %50 = arith.negf %49 : vector<8x32xf32>
    %51 = math.exp %50 : vector<8x32xf32>
    %cst_42 = arith.constant 1.000000e+00 : f32
    %52 = vector.broadcast %cst_42 : f32 to vector<8x32xf32>
    %53 = arith.addf %52, %51 : vector<8x32xf32>
    %54 = arith.divf %52, %53 : vector<8x32xf32>
    %cst_43 = arith.constant dense<0.000000e+00> : vector<8x32xf32>
    %55 = tpu.matmul %38, %12, %cst_43 {dimension_numbers = #tpu.dot_dimension_numbers<[1], [0], [0], [1], [0, 0, 1, 1], [], []>} : vector<8x640xf32>, vector<640x32xf32>, vector<8x32xf32> -> vector<8x32xf32>
    %56 = vector.broadcast %20 : vector<1x32xf32> to vector<8x32xf32>
    %57 = arith.addf %55, %56 : vector<8x32xf32>
    %58 = math.tanh %57 : vector<8x32xf32>
    %cst_44 = arith.constant dense<0.000000e+00> : vector<8x32xf32>
    %59 = tpu.matmul %38, %14, %cst_44 {dimension_numbers = #tpu.dot_dimension_numbers<[1], [0], [0], [1], [0, 0, 1, 1], [], []>} : vector<8x640xf32>, vector<640x32xf32>, vector<8x32xf32> -> vector<8x32xf32>
    %60 = vector.broadcast %22 : vector<1x32xf32> to vector<8x32xf32>
    %61 = arith.addf %59, %60 : vector<8x32xf32>
    %62 = arith.negf %61 : vector<8x32xf32>
    %63 = math.exp %62 : vector<8x32xf32>
    %cst_45 = arith.constant 1.000000e+00 : f32
    %64 = vector.broadcast %cst_45 : f32 to vector<8x32xf32>
    %65 = arith.addf %64, %63 : vector<8x32xf32>
    %66 = arith.divf %64, %65 : vector<8x32xf32>
    %67 = arith.mulf %54, %24 : vector<8x32xf32>
    %68 = arith.mulf %46, %58 : vector<8x32xf32>
    %69 = arith.addf %67, %68 : vector<8x32xf32>
    %70 = math.tanh %69 : vector<8x32xf32>
    %71 = arith.mulf %66, %70 : vector<8x32xf32>
    %72 = arith.index_cast %c0_i32_33 : i32 to index
    %c0_46 = arith.constant 0 : index
    %c0_47 = arith.constant 0 : index
    %73 = vector.load %arg15[%72, %c0_46, %c0_47] : memref<8x8x32xf32, #tpu.memory_space<vmem>>, vector<1x8x32xf32>
    %74 = vector.shape_cast %73 : vector<1x8x32xf32> to vector<8x32xf32>
    %75 = vector.shape_cast %71 : vector<8x32xf32> to vector<1x8x32xf32>
    tpu.vector_store %arg15[%72, %c0_46, %c0_47], %75 {strides = array<i32>} : memref<8x8x32xf32, #tpu.memory_space<vmem>>, vector<1x8x32xf32>,
    %c1_i32 = arith.constant 1 : i32
    %76 = arith.index_cast %c1_i32 : i32 to index
    %c0_48 = arith.constant 0 : index
    %c0_49 = arith.constant 0 : index
    %77 = vector.load %arg1[%76, %c0_48, %c0_49] : memref<8x8x16xf32, #tpu.memory_space<vmem>>, vector<1x8x16xf32>
    %78 = vector.shape_cast %77 : vector<1x8x16xf32> to vector<8x16xf32>
    %79 = tpu.concatenate %71, %78 in 1 : vector<8x32xf32>, vector<8x16xf32> -> vector<8x48xf32>
    %cst_50 = arith.constant dense<0.000000e+00> : vector<8x64xf32>
    %80 = tpu.matmul %79, %3, %cst_50 {dimension_numbers = #tpu.dot_dimension_numbers<[1], [0], [0], [1], [0, 0, 1, 1], [], []>} : vector<8x48xf32>, vector<48x64xf32>, vector<8x64xf32> -> vector<8x64xf32>
    %81 = vector.broadcast %4 : vector<1x64xf32> to vector<8x64xf32>
    %82 = arith.addf %80, %81 : vector<8x64xf32>
    %cst_51 = arith.constant 0.000000e+00 : f32
    %83 = vector.broadcast %cst_51 : f32 to vector<8x64xf32>
    %84 = arith.maximumf %82, %83 : vector<8x64xf32>
    %cst_52 = arith.constant dense<0.000000e+00> : vector<8x640xf32>
    %85 = tpu.matmul %84, %5, %cst_52 {dimension_numbers = #tpu.dot_dimension_numbers<[1], [0], [0], [1], [0, 0, 1, 1], [], []>} : vector<8x64xf32>, vector<64x640xf32>, vector<8x640xf32> -> vector<8x640xf32>
    %86 = vector.broadcast %6 : vector<1x640xf32> to vector<8x640xf32>
    %87 = arith.addf %85, %86 : vector<8x640xf32>
    %cst_53 = arith.constant 0.000000e+00 : f32
    %88 = vector.broadcast %cst_53 : f32 to vector<8x640xf32>
    %89 = arith.maximumf %87, %88 : vector<8x640xf32>
    %cst_54 = arith.constant dense<0.000000e+00> : vector<8x32xf32>
    %90 = tpu.matmul %89, %8, %cst_54 {dimension_numbers = #tpu.dot_dimension_numbers<[1], [0], [0], [1], [0, 0, 1, 1], [], []>} : vector<8x640xf32>, vector<640x32xf32>, vector<8x32xf32> -> vector<8x32xf32>
    %91 = vector.broadcast %16 : vector<1x32xf32> to vector<8x32xf32>
    %92 = arith.addf %90, %91 : vector<8x32xf32>
    %93 = arith.negf %92 : vector<8x32xf32>
    %94 = math.exp %93 : vector<8x32xf32>
    %cst_55 = arith.constant 1.000000e+00 : f32
    %95 = vector.broadcast %cst_55 : f32 to vector<8x32xf32>
    %96 = arith.addf %95, %94 : vector<8x32xf32>
    %97 = arith.divf %95, %96 : vector<8x32xf32>
    %cst_56 = arith.constant dense<0.000000e+00> : vector<8x32xf32>
    %98 = tpu.matmul %89, %10, %cst_56 {dimension_numbers = #tpu.dot_dimension_numbers<[1], [0], [0], [1], [0, 0, 1, 1], [], []>} : vector<8x640xf32>, vector<640x32xf32>, vector<8x32xf32> -> vector<8x32xf32>
    %99 = vector.broadcast %18 : vector<1x32xf32> to vector<8x32xf32>
    %100 = arith.addf %98, %99 : vector<8x32xf32>
    %101 = arith.negf %100 : vector<8x32xf32>
    %102 = math.exp %101 : vector<8x32xf32>
    %cst_57 = arith.constant 1.000000e+00 : f32
    %103 = vector.broadcast %cst_57 : f32 to vector<8x32xf32>
    %104 = arith.addf %103, %102 : vector<8x32xf32>
    %105 = arith.divf %103, %104 : vector<8x32xf32>
    %cst_58 = arith.constant dense<0.000000e+00> : vector<8x32xf32>
    %106 = tpu.matmul %89, %12, %cst_58 {dimension_numbers = #tpu.dot_dimension_numbers<[1], [0], [0], [1], [0, 0, 1, 1], [], []>} : vector<8x640xf32>, vector<640x32xf32>, vector<8x32xf32> -> vector<8x32xf32>
    %107 = vector.broadcast %20 : vector<1x32xf32> to vector<8x32xf32>
    %108 = arith.addf %106, %107 : vector<8x32xf32>
    %109 = math.tanh %108 : vector<8x32xf32>
    %cst_59 = arith.constant dense<0.000000e+00> : vector<8x32xf32>
    %110 = tpu.matmul %89, %14, %cst_59 {dimension_numbers = #tpu.dot_dimension_numbers<[1], [0], [0], [1], [0, 0, 1, 1], [], []>} : vector<8x640xf32>, vector<640x32xf32>, vector<8x32xf32> -> vector<8x32xf32>
    %111 = vector.broadcast %22 : vector<1x32xf32> to vector<8x32xf32>
    %112 = arith.addf %110, %111 : vector<8x32xf32>
    %113 = arith.negf %112 : vector<8x32xf32>
    %114 = math.exp %113 : vector<8x32xf32>
    %cst_60 = arith.constant 1.000000e+00 : f32
    %115 = vector.broadcast %cst_60 : f32 to vector<8x32xf32>
    %116 = arith.addf %115, %114 : vector<8x32xf32>
    %117 = arith.divf %115, %116 : vector<8x32xf32>
    %118 = arith.mulf %105, %69 : vector<8x32xf32>
    %119 = arith.mulf %97, %109 : vector<8x32xf32>
    %120 = arith.addf %118, %119 : vector<8x32xf32>
    %121 = math.tanh %120 : vector<8x32xf32>
    %122 = arith.mulf %117, %121 : vector<8x32xf32>
    %123 = arith.index_cast %c1_i32 : i32 to index
    %c0_61 = arith.constant 0 : index
    %c0_62 = arith.constant 0 : index
    %124 = vector.load %arg15[%123, %c0_61, %c0_62] : memref<8x8x32xf32, #tpu.memory_space<vmem>>, vector<1x8x32xf32>
    %125 = vector.shape_cast %124 : vector<1x8x32xf32> to vector<8x32xf32>
    %126 = vector.shape_cast %122 : vector<8x32xf32> to vector<1x8x32xf32>
    tpu.vector_store %arg15[%123, %c0_61, %c0_62], %126 {strides = array<i32>} : memref<8x8x32xf32, #tpu.memory_space<vmem>>, vector<1x8x32xf32>,
    %c2_i32 = arith.constant 2 : i32
    %127 = arith.index_cast %c2_i32 : i32 to index
    %c0_63 = arith.constant 0 : index
    %c0_64 = arith.constant 0 : index
    %128 = vector.load %arg1[%127, %c0_63, %c0_64] : memref<8x8x16xf32, #tpu.memory_space<vmem>>, vector<1x8x16xf32>
    %129 = vector.shape_cast %128 : vector<1x8x16xf32> to vector<8x16xf32>
    %130 = tpu.concatenate %122, %129 in 1 : vector<8x32xf32>, vector<8x16xf32> -> vector<8x48xf32>
    %cst_65 = arith.constant dense<0.000000e+00> : vector<8x64xf32>
    %131 = tpu.matmul %130, %3, %cst_65 {dimension_numbers = #tpu.dot_dimension_numbers<[1], [0], [0], [1], [0, 0, 1, 1], [], []>} : vector<8x48xf32>, vector<48x64xf32>, vector<8x64xf32> -> vector<8x64xf32>
    %132 = vector.broadcast %4 : vector<1x64xf32> to vector<8x64xf32>
    %133 = arith.addf %131, %132 : vector<8x64xf32>
    %cst_66 = arith.constant 0.000000e+00 : f32
    %134 = vector.broadcast %cst_66 : f32 to vector<8x64xf32>
    %135 = arith.maximumf %133, %134 : vector<8x64xf32>
    %cst_67 = arith.constant dense<0.000000e+00> : vector<8x640xf32>
    %136 = tpu.matmul %135, %5, %cst_67 {dimension_numbers = #tpu.dot_dimension_numbers<[1], [0], [0], [1], [0, 0, 1, 1], [], []>} : vector<8x64xf32>, vector<64x640xf32>, vector<8x640xf32> -> vector<8x640xf32>
    %137 = vector.broadcast %6 : vector<1x640xf32> to vector<8x640xf32>
    %138 = arith.addf %136, %137 : vector<8x640xf32>
    %cst_68 = arith.constant 0.000000e+00 : f32
    %139 = vector.broadcast %cst_68 : f32 to vector<8x640xf32>
    %140 = arith.maximumf %138, %139 : vector<8x640xf32>
    %cst_69 = arith.constant dense<0.000000e+00> : vector<8x32xf32>
    %141 = tpu.matmul %140, %8, %cst_69 {dimension_numbers = #tpu.dot_dimension_numbers<[1], [0], [0], [1], [0, 0, 1, 1], [], []>} : vector<8x640xf32>, vector<640x32xf32>, vector<8x32xf32> -> vector<8x32xf32>
    %142 = vector.broadcast %16 : vector<1x32xf32> to vector<8x32xf32>
    %143 = arith.addf %141, %142 : vector<8x32xf32>
    %144 = arith.negf %143 : vector<8x32xf32>
    %145 = math.exp %144 : vector<8x32xf32>
    %cst_70 = arith.constant 1.000000e+00 : f32
    %146 = vector.broadcast %cst_70 : f32 to vector<8x32xf32>
    %147 = arith.addf %146, %145 : vector<8x32xf32>
    %148 = arith.divf %146, %147 : vector<8x32xf32>
    %cst_71 = arith.constant dense<0.000000e+00> : vector<8x32xf32>
    %149 = tpu.matmul %140, %10, %cst_71 {dimension_numbers = #tpu.dot_dimension_numbers<[1], [0], [0], [1], [0, 0, 1, 1], [], []>} : vector<8x640xf32>, vector<640x32xf32>, vector<8x32xf32> -> vector<8x32xf32>
    %150 = vector.broadcast %18 : vector<1x32xf32> to vector<8x32xf32>
    %151 = arith.addf %149, %150 : vector<8x32xf32>
    %152 = arith.negf %151 : vector<8x32xf32>
    %153 = math.exp %152 : vector<8x32xf32>
    %cst_72 = arith.constant 1.000000e+00 : f32
    %154 = vector.broadcast %cst_72 : f32 to vector<8x32xf32>
    %155 = arith.addf %154, %153 : vector<8x32xf32>
    %156 = arith.divf %154, %155 : vector<8x32xf32>
    %cst_73 = arith.constant dense<0.000000e+00> : vector<8x32xf32>
    %157 = tpu.matmul %140, %12, %cst_73 {dimension_numbers = #tpu.dot_dimension_numbers<[1], [0], [0], [1], [0, 0, 1, 1], [], []>} : vector<8x640xf32>, vector<640x32xf32>, vector<8x32xf32> -> vector<8x32xf32>
    %158 = vector.broadcast %20 : vector<1x32xf32> to vector<8x32xf32>
    %159 = arith.addf %157, %158 : vector<8x32xf32>
    %160 = math.tanh %159 : vector<8x32xf32>
    %cst_74 = arith.constant dense<0.000000e+00> : vector<8x32xf32>
    %161 = tpu.matmul %140, %14, %cst_74 {dimension_numbers = #tpu.dot_dimension_numbers<[1], [0], [0], [1], [0, 0, 1, 1], [], []>} : vector<8x640xf32>, vector<640x32xf32>, vector<8x32xf32> -> vector<8x32xf32>
    %162 = vector.broadcast %22 : vector<1x32xf32> to vector<8x32xf32>
    %163 = arith.addf %161, %162 : vector<8x32xf32>
    %164 = arith.negf %163 : vector<8x32xf32>
    %165 = math.exp %164 : vector<8x32xf32>
    %cst_75 = arith.constant 1.000000e+00 : f32
    %166 = vector.broadcast %cst_75 : f32 to vector<8x32xf32>
    %167 = arith.addf %166, %165 : vector<8x32xf32>
    %168 = arith.divf %166, %167 : vector<8x32xf32>
    %169 = arith.mulf %156, %120 : vector<8x32xf32>
    %170 = arith.mulf %148, %160 : vector<8x32xf32>
    %171 = arith.addf %169, %170 : vector<8x32xf32>
    %172 = math.tanh %171 : vector<8x32xf32>
    %173 = arith.mulf %168, %172 : vector<8x32xf32>
    %174 = arith.index_cast %c2_i32 : i32 to index
    %c0_76 = arith.constant 0 : index
    %c0_77 = arith.constant 0 : index
    %175 = vector.load %arg15[%174, %c0_76, %c0_77] : memref<8x8x32xf32, #tpu.memory_space<vmem>>, vector<1x8x32xf32>
    %176 = vector.shape_cast %175 : vector<1x8x32xf32> to vector<8x32xf32>
    %177 = vector.shape_cast %173 : vector<8x32xf32> to vector<1x8x32xf32>
    tpu.vector_store %arg15[%174, %c0_76, %c0_77], %177 {strides = array<i32>} : memref<8x8x32xf32, #tpu.memory_space<vmem>>, vector<1x8x32xf32>,
    %c3_i32 = arith.constant 3 : i32
    %178 = arith.index_cast %c3_i32 : i32 to index
    %c0_78 = arith.constant 0 : index
    %c0_79 = arith.constant 0 : index
    %179 = vector.load %arg1[%178, %c0_78, %c0_79] : memref<8x8x16xf32, #tpu.memory_space<vmem>>, vector<1x8x16xf32>
    %180 = vector.shape_cast %179 : vector<1x8x16xf32> to vector<8x16xf32>
    %181 = tpu.concatenate %173, %180 in 1 : vector<8x32xf32>, vector<8x16xf32> -> vector<8x48xf32>
    %cst_80 = arith.constant dense<0.000000e+00> : vector<8x64xf32>
    %182 = tpu.matmul %181, %3, %cst_80 {dimension_numbers = #tpu.dot_dimension_numbers<[1], [0], [0], [1], [0, 0, 1, 1], [], []>} : vector<8x48xf32>, vector<48x64xf32>, vector<8x64xf32> -> vector<8x64xf32>
    %183 = vector.broadcast %4 : vector<1x64xf32> to vector<8x64xf32>
    %184 = arith.addf %182, %183 : vector<8x64xf32>
    %cst_81 = arith.constant 0.000000e+00 : f32
    %185 = vector.broadcast %cst_81 : f32 to vector<8x64xf32>
    %186 = arith.maximumf %184, %185 : vector<8x64xf32>
    %cst_82 = arith.constant dense<0.000000e+00> : vector<8x640xf32>
    %187 = tpu.matmul %186, %5, %cst_82 {dimension_numbers = #tpu.dot_dimension_numbers<[1], [0], [0], [1], [0, 0, 1, 1], [], []>} : vector<8x64xf32>, vector<64x640xf32>, vector<8x640xf32> -> vector<8x640xf32>
    %188 = vector.broadcast %6 : vector<1x640xf32> to vector<8x640xf32>
    %189 = arith.addf %187, %188 : vector<8x640xf32>
    %cst_83 = arith.constant 0.000000e+00 : f32
    %190 = vector.broadcast %cst_83 : f32 to vector<8x640xf32>
    %191 = arith.maximumf %189, %190 : vector<8x640xf32>
    %cst_84 = arith.constant dense<0.000000e+00> : vector<8x32xf32>
    %192 = tpu.matmul %191, %8, %cst_84 {dimension_numbers = #tpu.dot_dimension_numbers<[1], [0], [0], [1], [0, 0, 1, 1], [], []>} : vector<8x640xf32>, vector<640x32xf32>, vector<8x32xf32> -> vector<8x32xf32>
    %193 = vector.broadcast %16 : vector<1x32xf32> to vector<8x32xf32>
    %194 = arith.addf %192, %193 : vector<8x32xf32>
    %195 = arith.negf %194 : vector<8x32xf32>
    %196 = math.exp %195 : vector<8x32xf32>
    %cst_85 = arith.constant 1.000000e+00 : f32
    %197 = vector.broadcast %cst_85 : f32 to vector<8x32xf32>
    %198 = arith.addf %197, %196 : vector<8x32xf32>
    %199 = arith.divf %197, %198 : vector<8x32xf32>
    %cst_86 = arith.constant dense<0.000000e+00> : vector<8x32xf32>
    %200 = tpu.matmul %191, %10, %cst_86 {dimension_numbers = #tpu.dot_dimension_numbers<[1], [0], [0], [1], [0, 0, 1, 1], [], []>} : vector<8x640xf32>, vector<640x32xf32>, vector<8x32xf32> -> vector<8x32xf32>
    %201 = vector.broadcast %18 : vector<1x32xf32> to vector<8x32xf32>
    %202 = arith.addf %200, %201 : vector<8x32xf32>
    %203 = arith.negf %202 : vector<8x32xf32>
    %204 = math.exp %203 : vector<8x32xf32>
    %cst_87 = arith.constant 1.000000e+00 : f32
    %205 = vector.broadcast %cst_87 : f32 to vector<8x32xf32>
    %206 = arith.addf %205, %204 : vector<8x32xf32>
    %207 = arith.divf %205, %206 : vector<8x32xf32>
    %cst_88 = arith.constant dense<0.000000e+00> : vector<8x32xf32>
    %208 = tpu.matmul %191, %12, %cst_88 {dimension_numbers = #tpu.dot_dimension_numbers<[1], [0], [0], [1], [0, 0, 1, 1], [], []>} : vector<8x640xf32>, vector<640x32xf32>, vector<8x32xf32> -> vector<8x32xf32>
    %209 = vector.broadcast %20 : vector<1x32xf32> to vector<8x32xf32>
    %210 = arith.addf %208, %209 : vector<8x32xf32>
    %211 = math.tanh %210 : vector<8x32xf32>
    %cst_89 = arith.constant dense<0.000000e+00> : vector<8x32xf32>
    %212 = tpu.matmul %191, %14, %cst_89 {dimension_numbers = #tpu.dot_dimension_numbers<[1], [0], [0], [1], [0, 0, 1, 1], [], []>} : vector<8x640xf32>, vector<640x32xf32>, vector<8x32xf32> -> vector<8x32xf32>
    %213 = vector.broadcast %22 : vector<1x32xf32> to vector<8x32xf32>
    %214 = arith.addf %212, %213 : vector<8x32xf32>
    %215 = arith.negf %214 : vector<8x32xf32>
    %216 = math.exp %215 : vector<8x32xf32>
    %cst_90 = arith.constant 1.000000e+00 : f32
    %217 = vector.broadcast %cst_90 : f32 to vector<8x32xf32>
    %218 = arith.addf %217, %216 : vector<8x32xf32>
    %219 = arith.divf %217, %218 : vector<8x32xf32>
    %220 = arith.mulf %207, %171 : vector<8x32xf32>
    %221 = arith.mulf %199, %211 : vector<8x32xf32>
    %222 = arith.addf %220, %221 : vector<8x32xf32>
    %223 = math.tanh %222 : vector<8x32xf32>
    %224 = arith.mulf %219, %223 : vector<8x32xf32>
    %225 = arith.index_cast %c3_i32 : i32 to index
    %c0_91 = arith.constant 0 : index
    %c0_92 = arith.constant 0 : index
    %226 = vector.load %arg15[%225, %c0_91, %c0_92] : memref<8x8x32xf32, #tpu.memory_space<vmem>>, vector<1x8x32xf32>
    %227 = vector.shape_cast %226 : vector<1x8x32xf32> to vector<8x32xf32>
    %228 = vector.shape_cast %224 : vector<8x32xf32> to vector<1x8x32xf32>
    tpu.vector_store %arg15[%225, %c0_91, %c0_92], %228 {strides = array<i32>} : memref<8x8x32xf32, #tpu.memory_space<vmem>>, vector<1x8x32xf32>,
    %c4_i32 = arith.constant 4 : i32
    %229 = arith.index_cast %c4_i32 : i32 to index
    %c0_93 = arith.constant 0 : index
    %c0_94 = arith.constant 0 : index
    %230 = vector.load %arg1[%229, %c0_93, %c0_94] : memref<8x8x16xf32, #tpu.memory_space<vmem>>, vector<1x8x16xf32>
    %231 = vector.shape_cast %230 : vector<1x8x16xf32> to vector<8x16xf32>
    %232 = tpu.concatenate %224, %231 in 1 : vector<8x32xf32>, vector<8x16xf32> -> vector<8x48xf32>
    %cst_95 = arith.constant dense<0.000000e+00> : vector<8x64xf32>
    %233 = tpu.matmul %232, %3, %cst_95 {dimension_numbers = #tpu.dot_dimension_numbers<[1], [0], [0], [1], [0, 0, 1, 1], [], []>} : vector<8x48xf32>, vector<48x64xf32>, vector<8x64xf32> -> vector<8x64xf32>
    %234 = vector.broadcast %4 : vector<1x64xf32> to vector<8x64xf32>
    %235 = arith.addf %233, %234 : vector<8x64xf32>
    %cst_96 = arith.constant 0.000000e+00 : f32
    %236 = vector.broadcast %cst_96 : f32 to vector<8x64xf32>
    %237 = arith.maximumf %235, %236 : vector<8x64xf32>
    %cst_97 = arith.constant dense<0.000000e+00> : vector<8x640xf32>
    %238 = tpu.matmul %237, %5, %cst_97 {dimension_numbers = #tpu.dot_dimension_numbers<[1], [0], [0], [1], [0, 0, 1, 1], [], []>} : vector<8x64xf32>, vector<64x640xf32>, vector<8x640xf32> -> vector<8x640xf32>
    %239 = vector.broadcast %6 : vector<1x640xf32> to vector<8x640xf32>
    %240 = arith.addf %238, %239 : vector<8x640xf32>
    %cst_98 = arith.constant 0.000000e+00 : f32
    %241 = vector.broadcast %cst_98 : f32 to vector<8x640xf32>
    %242 = arith.maximumf %240, %241 : vector<8x640xf32>
    %cst_99 = arith.constant dense<0.000000e+00> : vector<8x32xf32>
    %243 = tpu.matmul %242, %8, %cst_99 {dimension_numbers = #tpu.dot_dimension_numbers<[1], [0], [0], [1], [0, 0, 1, 1], [], []>} : vector<8x640xf32>, vector<640x32xf32>, vector<8x32xf32> -> vector<8x32xf32>
    %244 = vector.broadcast %16 : vector<1x32xf32> to vector<8x32xf32>
    %245 = arith.addf %243, %244 : vector<8x32xf32>
    %246 = arith.negf %245 : vector<8x32xf32>
    %247 = math.exp %246 : vector<8x32xf32>
    %cst_100 = arith.constant 1.000000e+00 : f32
    %248 = vector.broadcast %cst_100 : f32 to vector<8x32xf32>
    %249 = arith.addf %248, %247 : vector<8x32xf32>
    %250 = arith.divf %248, %249 : vector<8x32xf32>
    %cst_101 = arith.constant dense<0.000000e+00> : vector<8x32xf32>
    %251 = tpu.matmul %242, %10, %cst_101 {dimension_numbers = #tpu.dot_dimension_numbers<[1], [0], [0], [1], [0, 0, 1, 1], [], []>} : vector<8x640xf32>, vector<640x32xf32>, vector<8x32xf32> -> vector<8x32xf32>
    %252 = vector.broadcast %18 : vector<1x32xf32> to vector<8x32xf32>
    %253 = arith.addf %251, %252 : vector<8x32xf32>
    %254 = arith.negf %253 : vector<8x32xf32>
    %255 = math.exp %254 : vector<8x32xf32>
    %cst_102 = arith.constant 1.000000e+00 : f32
    %256 = vector.broadcast %cst_102 : f32 to vector<8x32xf32>
    %257 = arith.addf %256, %255 : vector<8x32xf32>
    %258 = arith.divf %256, %257 : vector<8x32xf32>
    %cst_103 = arith.constant dense<0.000000e+00> : vector<8x32xf32>
    %259 = tpu.matmul %242, %12, %cst_103 {dimension_numbers = #tpu.dot_dimension_numbers<[1], [0], [0], [1], [0, 0, 1, 1], [], []>} : vector<8x640xf32>, vector<640x32xf32>, vector<8x32xf32> -> vector<8x32xf32>
    %260 = vector.broadcast %20 : vector<1x32xf32> to vector<8x32xf32>
    %261 = arith.addf %259, %260 : vector<8x32xf32>
    %262 = math.tanh %261 : vector<8x32xf32>
    %cst_104 = arith.constant dense<0.000000e+00> : vector<8x32xf32>
    %263 = tpu.matmul %242, %14, %cst_104 {dimension_numbers = #tpu.dot_dimension_numbers<[1], [0], [0], [1], [0, 0, 1, 1], [], []>} : vector<8x640xf32>, vector<640x32xf32>, vector<8x32xf32> -> vector<8x32xf32>
    %264 = vector.broadcast %22 : vector<1x32xf32> to vector<8x32xf32>
    %265 = arith.addf %263, %264 : vector<8x32xf32>
    %266 = arith.negf %265 : vector<8x32xf32>
    %267 = math.exp %266 : vector<8x32xf32>
    %cst_105 = arith.constant 1.000000e+00 : f32
    %268 = vector.broadcast %cst_105 : f32 to vector<8x32xf32>
    %269 = arith.addf %268, %267 : vector<8x32xf32>
    %270 = arith.divf %268, %269 : vector<8x32xf32>
    %271 = arith.mulf %258, %222 : vector<8x32xf32>
    %272 = arith.mulf %250, %262 : vector<8x32xf32>
    %273 = arith.addf %271, %272 : vector<8x32xf32>
    %274 = math.tanh %273 : vector<8x32xf32>
    %275 = arith.mulf %270, %274 : vector<8x32xf32>
    %276 = arith.index_cast %c4_i32 : i32 to index
    %c0_106 = arith.constant 0 : index
    %c0_107 = arith.constant 0 : index
    %277 = vector.load %arg15[%276, %c0_106, %c0_107] : memref<8x8x32xf32, #tpu.memory_space<vmem>>, vector<1x8x32xf32>
    %278 = vector.shape_cast %277 : vector<1x8x32xf32> to vector<8x32xf32>
    %279 = vector.shape_cast %275 : vector<8x32xf32> to vector<1x8x32xf32>
    tpu.vector_store %arg15[%276, %c0_106, %c0_107], %279 {strides = array<i32>} : memref<8x8x32xf32, #tpu.memory_space<vmem>>, vector<1x8x32xf32>,
    %c5_i32 = arith.constant 5 : i32
    %280 = arith.index_cast %c5_i32 : i32 to index
    %c0_108 = arith.constant 0 : index
    %c0_109 = arith.constant 0 : index
    %281 = vector.load %arg1[%280, %c0_108, %c0_109] : memref<8x8x16xf32, #tpu.memory_space<vmem>>, vector<1x8x16xf32>
    %282 = vector.shape_cast %281 : vector<1x8x16xf32> to vector<8x16xf32>
    %283 = tpu.concatenate %275, %282 in 1 : vector<8x32xf32>, vector<8x16xf32> -> vector<8x48xf32>
    %cst_110 = arith.constant dense<0.000000e+00> : vector<8x64xf32>
    %284 = tpu.matmul %283, %3, %cst_110 {dimension_numbers = #tpu.dot_dimension_numbers<[1], [0], [0], [1], [0, 0, 1, 1], [], []>} : vector<8x48xf32>, vector<48x64xf32>, vector<8x64xf32> -> vector<8x64xf32>
    %285 = vector.broadcast %4 : vector<1x64xf32> to vector<8x64xf32>
    %286 = arith.addf %284, %285 : vector<8x64xf32>
    %cst_111 = arith.constant 0.000000e+00 : f32
    %287 = vector.broadcast %cst_111 : f32 to vector<8x64xf32>
    %288 = arith.maximumf %286, %287 : vector<8x64xf32>
    %cst_112 = arith.constant dense<0.000000e+00> : vector<8x640xf32>
    %289 = tpu.matmul %288, %5, %cst_112 {dimension_numbers = #tpu.dot_dimension_numbers<[1], [0], [0], [1], [0, 0, 1, 1], [], []>} : vector<8x64xf32>, vector<64x640xf32>, vector<8x640xf32> -> vector<8x640xf32>
    %290 = vector.broadcast %6 : vector<1x640xf32> to vector<8x640xf32>
    %291 = arith.addf %289, %290 : vector<8x640xf32>
    %cst_113 = arith.constant 0.000000e+00 : f32
    %292 = vector.broadcast %cst_113 : f32 to vector<8x640xf32>
    %293 = arith.maximumf %291, %292 : vector<8x640xf32>
    %cst_114 = arith.constant dense<0.000000e+00> : vector<8x32xf32>
    %294 = tpu.matmul %293, %8, %cst_114 {dimension_numbers = #tpu.dot_dimension_numbers<[1], [0], [0], [1], [0, 0, 1, 1], [], []>} : vector<8x640xf32>, vector<640x32xf32>, vector<8x32xf32> -> vector<8x32xf32>
    %295 = vector.broadcast %16 : vector<1x32xf32> to vector<8x32xf32>
    %296 = arith.addf %294, %295 : vector<8x32xf32>
    %297 = arith.negf %296 : vector<8x32xf32>
    %298 = math.exp %297 : vector<8x32xf32>
    %cst_115 = arith.constant 1.000000e+00 : f32
    %299 = vector.broadcast %cst_115 : f32 to vector<8x32xf32>
    %300 = arith.addf %299, %298 : vector<8x32xf32>
    %301 = arith.divf %299, %300 : vector<8x32xf32>
    %cst_116 = arith.constant dense<0.000000e+00> : vector<8x32xf32>
    %302 = tpu.matmul %293, %10, %cst_116 {dimension_numbers = #tpu.dot_dimension_numbers<[1], [0], [0], [1], [0, 0, 1, 1], [], []>} : vector<8x640xf32>, vector<640x32xf32>, vector<8x32xf32> -> vector<8x32xf32>
    %303 = vector.broadcast %18 : vector<1x32xf32> to vector<8x32xf32>
    %304 = arith.addf %302, %303 : vector<8x32xf32>
    %305 = arith.negf %304 : vector<8x32xf32>
    %306 = math.exp %305 : vector<8x32xf32>
    %cst_117 = arith.constant 1.000000e+00 : f32
    %307 = vector.broadcast %cst_117 : f32 to vector<8x32xf32>
    %308 = arith.addf %307, %306 : vector<8x32xf32>
    %309 = arith.divf %307, %308 : vector<8x32xf32>
    %cst_118 = arith.constant dense<0.000000e+00> : vector<8x32xf32>
    %310 = tpu.matmul %293, %12, %cst_118 {dimension_numbers = #tpu.dot_dimension_numbers<[1], [0], [0], [1], [0, 0, 1, 1], [], []>} : vector<8x640xf32>, vector<640x32xf32>, vector<8x32xf32> -> vector<8x32xf32>
    %311 = vector.broadcast %20 : vector<1x32xf32> to vector<8x32xf32>
    %312 = arith.addf %310, %311 : vector<8x32xf32>
    %313 = math.tanh %312 : vector<8x32xf32>
    %cst_119 = arith.constant dense<0.000000e+00> : vector<8x32xf32>
    %314 = tpu.matmul %293, %14, %cst_119 {dimension_numbers = #tpu.dot_dimension_numbers<[1], [0], [0], [1], [0, 0, 1, 1], [], []>} : vector<8x640xf32>, vector<640x32xf32>, vector<8x32xf32> -> vector<8x32xf32>
    %315 = vector.broadcast %22 : vector<1x32xf32> to vector<8x32xf32>
    %316 = arith.addf %314, %315 : vector<8x32xf32>
    %317 = arith.negf %316 : vector<8x32xf32>
    %318 = math.exp %317 : vector<8x32xf32>
    %cst_120 = arith.constant 1.000000e+00 : f32
    %319 = vector.broadcast %cst_120 : f32 to vector<8x32xf32>
    %320 = arith.addf %319, %318 : vector<8x32xf32>
    %321 = arith.divf %319, %320 : vector<8x32xf32>
    %322 = arith.mulf %309, %273 : vector<8x32xf32>
    %323 = arith.mulf %301, %313 : vector<8x32xf32>
    %324 = arith.addf %322, %323 : vector<8x32xf32>
    %325 = math.tanh %324 : vector<8x32xf32>
    %326 = arith.mulf %321, %325 : vector<8x32xf32>
    %327 = arith.index_cast %c5_i32 : i32 to index
    %c0_121 = arith.constant 0 : index
    %c0_122 = arith.constant 0 : index
    %328 = vector.load %arg15[%327, %c0_121, %c0_122] : memref<8x8x32xf32, #tpu.memory_space<vmem>>, vector<1x8x32xf32>
    %329 = vector.shape_cast %328 : vector<1x8x32xf32> to vector<8x32xf32>
    %330 = vector.shape_cast %326 : vector<8x32xf32> to vector<1x8x32xf32>
    tpu.vector_store %arg15[%327, %c0_121, %c0_122], %330 {strides = array<i32>} : memref<8x8x32xf32, #tpu.memory_space<vmem>>, vector<1x8x32xf32>,
    %c6_i32 = arith.constant 6 : i32
    %331 = arith.index_cast %c6_i32 : i32 to index
    %c0_123 = arith.constant 0 : index
    %c0_124 = arith.constant 0 : index
    %332 = vector.load %arg1[%331, %c0_123, %c0_124] : memref<8x8x16xf32, #tpu.memory_space<vmem>>, vector<1x8x16xf32>
    %333 = vector.shape_cast %332 : vector<1x8x16xf32> to vector<8x16xf32>
    %334 = tpu.concatenate %326, %333 in 1 : vector<8x32xf32>, vector<8x16xf32> -> vector<8x48xf32>
    %cst_125 = arith.constant dense<0.000000e+00> : vector<8x64xf32>
    %335 = tpu.matmul %334, %3, %cst_125 {dimension_numbers = #tpu.dot_dimension_numbers<[1], [0], [0], [1], [0, 0, 1, 1], [], []>} : vector<8x48xf32>, vector<48x64xf32>, vector<8x64xf32> -> vector<8x64xf32>
    %336 = vector.broadcast %4 : vector<1x64xf32> to vector<8x64xf32>
    %337 = arith.addf %335, %336 : vector<8x64xf32>
    %cst_126 = arith.constant 0.000000e+00 : f32
    %338 = vector.broadcast %cst_126 : f32 to vector<8x64xf32>
    %339 = arith.maximumf %337, %338 : vector<8x64xf32>
    %cst_127 = arith.constant dense<0.000000e+00> : vector<8x640xf32>
    %340 = tpu.matmul %339, %5, %cst_127 {dimension_numbers = #tpu.dot_dimension_numbers<[1], [0], [0], [1], [0, 0, 1, 1], [], []>} : vector<8x64xf32>, vector<64x640xf32>, vector<8x640xf32> -> vector<8x640xf32>
    %341 = vector.broadcast %6 : vector<1x640xf32> to vector<8x640xf32>
    %342 = arith.addf %340, %341 : vector<8x640xf32>
    %cst_128 = arith.constant 0.000000e+00 : f32
    %343 = vector.broadcast %cst_128 : f32 to vector<8x640xf32>
    %344 = arith.maximumf %342, %343 : vector<8x640xf32>
    %cst_129 = arith.constant dense<0.000000e+00> : vector<8x32xf32>
    %345 = tpu.matmul %344, %8, %cst_129 {dimension_numbers = #tpu.dot_dimension_numbers<[1], [0], [0], [1], [0, 0, 1, 1], [], []>} : vector<8x640xf32>, vector<640x32xf32>, vector<8x32xf32> -> vector<8x32xf32>
    %346 = vector.broadcast %16 : vector<1x32xf32> to vector<8x32xf32>
    %347 = arith.addf %345, %346 : vector<8x32xf32>
    %348 = arith.negf %347 : vector<8x32xf32>
    %349 = math.exp %348 : vector<8x32xf32>
    %cst_130 = arith.constant 1.000000e+00 : f32
    %350 = vector.broadcast %cst_130 : f32 to vector<8x32xf32>
    %351 = arith.addf %350, %349 : vector<8x32xf32>
    %352 = arith.divf %350, %351 : vector<8x32xf32>
    %cst_131 = arith.constant dense<0.000000e+00> : vector<8x32xf32>
    %353 = tpu.matmul %344, %10, %cst_131 {dimension_numbers = #tpu.dot_dimension_numbers<[1], [0], [0], [1], [0, 0, 1, 1], [], []>} : vector<8x640xf32>, vector<640x32xf32>, vector<8x32xf32> -> vector<8x32xf32>
    %354 = vector.broadcast %18 : vector<1x32xf32> to vector<8x32xf32>
    %355 = arith.addf %353, %354 : vector<8x32xf32>
    %356 = arith.negf %355 : vector<8x32xf32>
    %357 = math.exp %356 : vector<8x32xf32>
    %cst_132 = arith.constant 1.000000e+00 : f32
    %358 = vector.broadcast %cst_132 : f32 to vector<8x32xf32>
    %359 = arith.addf %358, %357 : vector<8x32xf32>
    %360 = arith.divf %358, %359 : vector<8x32xf32>
    %cst_133 = arith.constant dense<0.000000e+00> : vector<8x32xf32>
    %361 = tpu.matmul %344, %12, %cst_133 {dimension_numbers = #tpu.dot_dimension_numbers<[1], [0], [0], [1], [0, 0, 1, 1], [], []>} : vector<8x640xf32>, vector<640x32xf32>, vector<8x32xf32> -> vector<8x32xf32>
    %362 = vector.broadcast %20 : vector<1x32xf32> to vector<8x32xf32>
    %363 = arith.addf %361, %362 : vector<8x32xf32>
    %364 = math.tanh %363 : vector<8x32xf32>
    %cst_134 = arith.constant dense<0.000000e+00> : vector<8x32xf32>
    %365 = tpu.matmul %344, %14, %cst_134 {dimension_numbers = #tpu.dot_dimension_numbers<[1], [0], [0], [1], [0, 0, 1, 1], [], []>} : vector<8x640xf32>, vector<640x32xf32>, vector<8x32xf32> -> vector<8x32xf32>
    %366 = vector.broadcast %22 : vector<1x32xf32> to vector<8x32xf32>
    %367 = arith.addf %365, %366 : vector<8x32xf32>
    %368 = arith.negf %367 : vector<8x32xf32>
    %369 = math.exp %368 : vector<8x32xf32>
    %cst_135 = arith.constant 1.000000e+00 : f32
    %370 = vector.broadcast %cst_135 : f32 to vector<8x32xf32>
    %371 = arith.addf %370, %369 : vector<8x32xf32>
    %372 = arith.divf %370, %371 : vector<8x32xf32>
    %373 = arith.mulf %360, %324 : vector<8x32xf32>
    %374 = arith.mulf %352, %364 : vector<8x32xf32>
    %375 = arith.addf %373, %374 : vector<8x32xf32>
    %376 = math.tanh %375 : vector<8x32xf32>
    %377 = arith.mulf %372, %376 : vector<8x32xf32>
    %378 = arith.index_cast %c6_i32 : i32 to index
    %c0_136 = arith.constant 0 : index
    %c0_137 = arith.constant 0 : index
    %379 = vector.load %arg15[%378, %c0_136, %c0_137] : memref<8x8x32xf32, #tpu.memory_space<vmem>>, vector<1x8x32xf32>
    %380 = vector.shape_cast %379 : vector<1x8x32xf32> to vector<8x32xf32>
    %381 = vector.shape_cast %377 : vector<8x32xf32> to vector<1x8x32xf32>
    tpu.vector_store %arg15[%378, %c0_136, %c0_137], %381 {strides = array<i32>} : memref<8x8x32xf32, #tpu.memory_space<vmem>>, vector<1x8x32xf32>,
    %c7_i32 = arith.constant 7 : i32
    %382 = arith.index_cast %c7_i32 : i32 to index
    %c0_138 = arith.constant 0 : index
    %c0_139 = arith.constant 0 : index
    %383 = vector.load %arg1[%382, %c0_138, %c0_139] : memref<8x8x16xf32, #tpu.memory_space<vmem>>, vector<1x8x16xf32>
    %384 = vector.shape_cast %383 : vector<1x8x16xf32> to vector<8x16xf32>
    %385 = tpu.concatenate %377, %384 in 1 : vector<8x32xf32>, vector<8x16xf32> -> vector<8x48xf32>
    %cst_140 = arith.constant dense<0.000000e+00> : vector<8x64xf32>
    %386 = tpu.matmul %385, %3, %cst_140 {dimension_numbers = #tpu.dot_dimension_numbers<[1], [0], [0], [1], [0, 0, 1, 1], [], []>} : vector<8x48xf32>, vector<48x64xf32>, vector<8x64xf32> -> vector<8x64xf32>
    %387 = vector.broadcast %4 : vector<1x64xf32> to vector<8x64xf32>
    %388 = arith.addf %386, %387 : vector<8x64xf32>
    %cst_141 = arith.constant 0.000000e+00 : f32
    %389 = vector.broadcast %cst_141 : f32 to vector<8x64xf32>
    %390 = arith.maximumf %388, %389 : vector<8x64xf32>
    %cst_142 = arith.constant dense<0.000000e+00> : vector<8x640xf32>
    %391 = tpu.matmul %390, %5, %cst_142 {dimension_numbers = #tpu.dot_dimension_numbers<[1], [0], [0], [1], [0, 0, 1, 1], [], []>} : vector<8x64xf32>, vector<64x640xf32>, vector<8x640xf32> -> vector<8x640xf32>
    %392 = vector.broadcast %6 : vector<1x640xf32> to vector<8x640xf32>
    %393 = arith.addf %391, %392 : vector<8x640xf32>
    %cst_143 = arith.constant 0.000000e+00 : f32
    %394 = vector.broadcast %cst_143 : f32 to vector<8x640xf32>
    %395 = arith.maximumf %393, %394 : vector<8x640xf32>
    %cst_144 = arith.constant dense<0.000000e+00> : vector<8x32xf32>
    %396 = tpu.matmul %395, %8, %cst_144 {dimension_numbers = #tpu.dot_dimension_numbers<[1], [0], [0], [1], [0, 0, 1, 1], [], []>} : vector<8x640xf32>, vector<640x32xf32>, vector<8x32xf32> -> vector<8x32xf32>
    %397 = vector.broadcast %16 : vector<1x32xf32> to vector<8x32xf32>
    %398 = arith.addf %396, %397 : vector<8x32xf32>
    %399 = arith.negf %398 : vector<8x32xf32>
    %400 = math.exp %399 : vector<8x32xf32>
    %cst_145 = arith.constant 1.000000e+00 : f32
    %401 = vector.broadcast %cst_145 : f32 to vector<8x32xf32>
    %402 = arith.addf %401, %400 : vector<8x32xf32>
    %403 = arith.divf %401, %402 : vector<8x32xf32>
    %cst_146 = arith.constant dense<0.000000e+00> : vector<8x32xf32>
    %404 = tpu.matmul %395, %10, %cst_146 {dimension_numbers = #tpu.dot_dimension_numbers<[1], [0], [0], [1], [0, 0, 1, 1], [], []>} : vector<8x640xf32>, vector<640x32xf32>, vector<8x32xf32> -> vector<8x32xf32>
    %405 = vector.broadcast %18 : vector<1x32xf32> to vector<8x32xf32>
    %406 = arith.addf %404, %405 : vector<8x32xf32>
    %407 = arith.negf %406 : vector<8x32xf32>
    %408 = math.exp %407 : vector<8x32xf32>
    %cst_147 = arith.constant 1.000000e+00 : f32
    %409 = vector.broadcast %cst_147 : f32 to vector<8x32xf32>
    %410 = arith.addf %409, %408 : vector<8x32xf32>
    %411 = arith.divf %409, %410 : vector<8x32xf32>
    %cst_148 = arith.constant dense<0.000000e+00> : vector<8x32xf32>
    %412 = tpu.matmul %395, %12, %cst_148 {dimension_numbers = #tpu.dot_dimension_numbers<[1], [0], [0], [1], [0, 0, 1, 1], [], []>} : vector<8x640xf32>, vector<640x32xf32>, vector<8x32xf32> -> vector<8x32xf32>
    %413 = vector.broadcast %20 : vector<1x32xf32> to vector<8x32xf32>
    %414 = arith.addf %412, %413 : vector<8x32xf32>
    %415 = math.tanh %414 : vector<8x32xf32>
    %cst_149 = arith.constant dense<0.000000e+00> : vector<8x32xf32>
    %416 = tpu.matmul %395, %14, %cst_149 {dimension_numbers = #tpu.dot_dimension_numbers<[1], [0], [0], [1], [0, 0, 1, 1], [], []>} : vector<8x640xf32>, vector<640x32xf32>, vector<8x32xf32> -> vector<8x32xf32>
    %417 = vector.broadcast %22 : vector<1x32xf32> to vector<8x32xf32>
    %418 = arith.addf %416, %417 : vector<8x32xf32>
    %419 = arith.negf %418 : vector<8x32xf32>
    %420 = math.exp %419 : vector<8x32xf32>
    %cst_150 = arith.constant 1.000000e+00 : f32
    %421 = vector.broadcast %cst_150 : f32 to vector<8x32xf32>
    %422 = arith.addf %421, %420 : vector<8x32xf32>
    %423 = arith.divf %421, %422 : vector<8x32xf32>
    %424 = arith.mulf %411, %375 : vector<8x32xf32>
    %425 = arith.mulf %403, %415 : vector<8x32xf32>
    %426 = arith.addf %424, %425 : vector<8x32xf32>
    %427 = math.tanh %426 : vector<8x32xf32>
    %428 = arith.mulf %423, %427 : vector<8x32xf32>
    %429 = arith.index_cast %c7_i32 : i32 to index
    %c0_151 = arith.constant 0 : index
    %c0_152 = arith.constant 0 : index
    %430 = vector.load %arg15[%429, %c0_151, %c0_152] : memref<8x8x32xf32, #tpu.memory_space<vmem>>, vector<1x8x32xf32>
    %431 = vector.shape_cast %430 : vector<1x8x32xf32> to vector<8x32xf32>
    %432 = vector.shape_cast %428 : vector<8x32xf32> to vector<1x8x32xf32>
    tpu.vector_store %arg15[%429, %c0_151, %c0_152], %432 {strides = array<i32>} : memref<8x8x32xf32, #tpu.memory_space<vmem>>, vector<1x8x32xf32>,
    %c8_i32 = arith.constant 8 : i32
    %c0_153 = arith.constant 0 : index
    %c0_154 = arith.constant 0 : index
    %433 = vector.load %arg13[%c0_153, %c0_154] : memref<8x32xf32, #tpu.memory_space<vmem>>, vector<8x32xf32>
    tpu.vector_store %arg13[%c0_153, %c0_154], %428 {strides = array<i32>} : memref<8x32xf32, #tpu.memory_space<vmem>>, vector<8x32xf32>,
    %c0_155 = arith.constant 0 : index
    %c0_156 = arith.constant 0 : index
    %434 = vector.load %arg14[%c0_155, %c0_156] : memref<8x32xf32, #tpu.memory_space<vmem>>, vector<8x32xf32>
    tpu.vector_store %arg14[%c0_155, %c0_156], %426 {strides = array<i32>} : memref<8x32xf32, #tpu.memory_space<vmem>>, vector<8x32xf32>,
    %c0_157 = arith.constant 0 : index
    %c0_158 = arith.constant 0 : index
    %c0_159 = arith.constant 0 : index
    %435 = vector.load %arg15[%c0_157, %c0_158, %c0_159] : memref<8x8x32xf32, #tpu.memory_space<vmem>>, vector<8x8x32xf32>
    %436 = vector.shape_cast %435 : vector<8x8x32xf32> to vector<64x32xf32>
    %c0_160 = arith.constant 0 : index
    %c0_161 = arith.constant 0 : index
    %437 = vector.load %arg8[%c0_160, %c0_161] : memref<32x16xf32, #tpu.memory_space<vmem>>, vector<32x16xf32>
    %cst_162 = arith.constant dense<0.000000e+00> : vector<64x16xf32>
    %438 = tpu.matmul %436, %437, %cst_162 {dimension_numbers = #tpu.dot_dimension_numbers<[1], [0], [0], [1], [0, 0, 1, 1], [], []>} : vector<64x32xf32>, vector<32x16xf32>, vector<64x16xf32> -> vector<64x16xf32>
    %c0_163 = arith.constant 0 : index
    %c0_164 = arith.constant 0 : index
    %439 = vector.load %arg9[%c0_163, %c0_164] : memref<1x16xf32, #tpu.memory_space<vmem>>, vector<1x16xf32>
    %440 = vector.broadcast %439 : vector<1x16xf32> to vector<64x16xf32>
    %441 = arith.addf %438, %440 : vector<64x16xf32>
    %cst_165 = arith.constant 0.000000e+00 : f32
    %442 = vector.broadcast %cst_165 : f32 to vector<64x16xf32>
    %443 = arith.maximumf %441, %442 : vector<64x16xf32>
    %c0_166 = arith.constant 0 : index
    %c0_167 = arith.constant 0 : index
    %444 = vector.load %arg10[%c0_166, %c0_167] : memref<16x8xf32, #tpu.memory_space<vmem>>, vector<16x8xf32>
    %cst_168 = arith.constant dense<0.000000e+00> : vector<64x8xf32>
    %445 = tpu.matmul %443, %444, %cst_168 {dimension_numbers = #tpu.dot_dimension_numbers<[1], [0], [0], [1], [0, 0, 1, 1], [], []>} : vector<64x16xf32>, vector<16x8xf32>, vector<64x8xf32> -> vector<64x8xf32>
    %c0_169 = arith.constant 0 : index
    %c0_170 = arith.constant 0 : index
    %446 = vector.load %arg11[%c0_169, %c0_170] : memref<1x8xf32, #tpu.memory_space<vmem>>, vector<1x8xf32>
    %447 = vector.broadcast %446 : vector<1x8xf32> to vector<64x8xf32>
    %448 = arith.addf %445, %447 : vector<64x8xf32>
    %449 = vector.shape_cast %448 : vector<64x8xf32> to vector<8x8x8xf32>
    %c0_171 = arith.constant 0 : index
    %c0_172 = arith.constant 0 : index
    %c0_173 = arith.constant 0 : index
    %450 = vector.load %arg12[%c0_171, %c0_172, %c0_173] : memref<8x8x8xf32, #tpu.memory_space<vmem>>, vector<8x8x8xf32>
    tpu.vector_store %arg12[%c0_171, %c0_172, %c0_173], %449 {strides = array<i32>} : memref<8x8x8xf32, #tpu.memory_space<vmem>>, vector<8x8x8xf32>,
    return
  }
  func.func @transform_0(%arg0: i32) -> (i32, i32, i32) {
    %c0_i32 = arith.constant 0 : i32
    %c0_i32_0 = arith.constant 0 : i32
    %c0_i32_1 = arith.constant 0 : i32
    return %arg0, %c0_i32, %c0_i32_0 : i32, i32, i32
  }
  func.func @transform_1(%arg0: i32) -> (i32, i32) {
    %c0_i32 = arith.constant 0 : i32
    %c0_i32_0 = arith.constant 0 : i32
    %c0_i32_1 = arith.constant 0 : i32
    return %c0_i32, %c0_i32_0 : i32, i32
  }
  func.func @transform_2(%arg0: i32) -> (i32, i32) {
    %c0_i32 = arith.constant 0 : i32
    %c0_i32_0 = arith.constant 0 : i32
    %c0_i32_1 = arith.constant 0 : i32
    return %c0_i32, %c0_i32_0 : i32, i32
  }
  func.func @transform_3(%arg0: i32) -> (i32, i32) {
    %c0_i32 = arith.constant 0 : i32
    %c0_i32_0 = arith.constant 0 : i32
    %c0_i32_1 = arith.constant 0 : i32
    return %c0_i32, %c0_i32_0 : i32, i32
  }
  func.func @transform_4(%arg0: i32) -> (i32, i32) {
    %c0_i32 = arith.constant 0 : i32
    %c0_i32_0 = arith.constant 0 : i32
    %c0_i32_1 = arith.constant 0 : i32
    return %c0_i32, %c0_i32_0 : i32, i32
  }
  func.func @transform_5(%arg0: i32) -> (i32, i32, i32) {
    %c0_i32 = arith.constant 0 : i32
    %c0_i32_0 = arith.constant 0 : i32
    %c0_i32_1 = arith.constant 0 : i32
    %c0_i32_2 = arith.constant 0 : i32
    return %c0_i32, %c0_i32_0, %c0_i32_1 : i32, i32, i32
  }
  func.func @transform_6(%arg0: i32) -> (i32, i32, i32) {
    %c0_i32 = arith.constant 0 : i32
    %c0_i32_0 = arith.constant 0 : i32
    %c0_i32_1 = arith.constant 0 : i32
    %c0_i32_2 = arith.constant 0 : i32
    return %c0_i32, %c0_i32_0, %c0_i32_1 : i32, i32, i32
  }
  func.func @transform_7(%arg0: i32) -> (i32, i32) {
    %c0_i32 = arith.constant 0 : i32
    %c0_i32_0 = arith.constant 0 : i32
    %c0_i32_1 = arith.constant 0 : i32
    return %c0_i32, %c0_i32_0 : i32, i32
  }
  func.func @transform_8(%arg0: i32) -> (i32, i32) {
    %c0_i32 = arith.constant 0 : i32
    %c0_i32_0 = arith.constant 0 : i32
    %c0_i32_1 = arith.constant 0 : i32
    return %c0_i32, %c0_i32_0 : i32, i32
  }
  func.func @transform_9(%arg0: i32) -> (i32, i32) {
    %c0_i32 = arith.constant 0 : i32
    %c0_i32_0 = arith.constant 0 : i32
    %c0_i32_1 = arith.constant 0 : i32
    return %c0_i32, %c0_i32_0 : i32, i32
  }
  func.func @transform_10(%arg0: i32) -> (i32, i32) {
    %c0_i32 = arith.constant 0 : i32
    %c0_i32_0 = arith.constant 0 : i32
    %c0_i32_1 = arith.constant 0 : i32
    return %c0_i32, %c0_i32_0 : i32, i32
  }
  func.func @transform_11(%arg0: i32) -> (i32, i32, i32) {
    %c0_i32 = arith.constant 0 : i32
    %c0_i32_0 = arith.constant 0 : i32
    %c0_i32_1 = arith.constant 0 : i32
    return %arg0, %c0_i32, %c0_i32_0 : i32, i32, i32
  }
}

</mosaic_0001>

<bundles_post_ra>
// kernel: tpu_custom_call.1
= control target key start
LH: loop header
LB: loop body
LE: loop exit
PB: predicated region body
PF: predicated region fallthrough
CT: control target
= control target key end

     0   :  { %s18719_s17 = smov 0   ;;  %s22693_s0 = inlined_call_operand.vmem [shape: f32[16,8,16], index: 0, kind: input, shape index: {}]   ;;  %s22694_s1 = inlined_call_operand.vmem [shape: f32[48,64], index: 1, kind: input, shape index: {}]   ;;  %s22695_s2 = inlined_call_operand.vmem [shape: f32[1,64], index: 2, kind: input, shape index: {}]   ;;  %s22696_s3 = inlined_call_operand.vmem [shape: f32[64,640], index: 3, kind: input, shape index: {}]   ;;  %s22697_s4 = inlined_call_operand.vmem [shape: f32[1,640], index: 4, kind: input, shape index: {}]   ;;  %s22698_s5 = inlined_call_operand.vmem [shape: f32[4,640,32], index: 5, kind: input, shape index: {}]   ;;  %s22699_s6 = inlined_call_operand.vmem [shape: f32[4,1,32], index: 6, kind: input, shape index: {}]   ;;  %s22700_s7 = inlined_call_operand.vmem [shape: f32[32,16], index: 7, kind: input, shape index: {}]   ;;  %s22701_s8 = inlined_call_operand.vmem [shape: f32[1,16], index: 8, kind: input, shape index: {}]   ;;  %s22702_s9 = inlined_call_operand.vmem [shape: f32[16,8], index: 9, kind: input, shape index: {}]   ;;  %s22703_s10 = inlined_call_operand.vmem [shape: f32[1,8], index: 10, kind: input, shape index: {}]   ;;  %s22704_s11 = inlined_call_operand.vmem [shape: f32[16,8,8], index: 11, kind: output, shape index: {}]  }
   0x1 LB: > { %s10532_s18 = sadd.s32 4294967295, %s18652_s17   ;;  %p10536_p0 = scmp.ge.s32.totalorder %s18652_s17, 1  ;;  %s18652_s17 = sphi %s18719_s17, %s21_s17  }
   0x2   : > { %p338_p1 = scmp.lt.s32.totalorder %s18652_s17, 3 }
   0x4   : > { %p339_p2 = pnand %p10536_p0, %p338_p1 }
   0x6   : > { %342 = sbr.rel (%p339_p2) target bundleno = 7316 (0x1c94), region = 64 }
   0xd   : > { %s10537_s19 = sshll.u32 %s10532_s18, 3  ;;  %p10541_p4 = scmp.ne.s32.totalorder %s10532_s18, 0 }
   0xe   : > { %p379_p3 = scmp.lt.s32.totalorder %s10537_s19, 15  ;;  %vm394_vm0 = vcmask (!%p10541_p4), 261120   ;;  %v18654_v0 = vmov (!%p10541_p4), 0.0  }
   0xf   : > { %393 = sbr.rel (%p10541_p4) target bundleno = 22 (0x16), region = 68  ;;  %395 = vst.msk [vmem:[#allocation2] sm:$0xff] (!%p10541_p4), %vm394_vm0, %v18654_v0  ;;  %396 = vst.msk [vmem:[#allocation3] sm:$0xff] (!%p10541_p4), %vm394_vm0, %v18654_v0 }
  0x10   : > { %s24288_s19 = smov (!%p379_p3, %s10537_s19), 15 }
  0x11   : > { %s10538_s20 = sshll.u32 %s24288_s19, 3 }
  0x12   : > { %s18730_s23 = scalar_lea.vmem %s22693_s0, %s10538_s20  ;;  %s18735_s26 = scalar_lea.vmem %s22704_s11, %s10538_s20 }
  0x16 PF: > { %v777_v1 = vld [vmem:[%s18730_s23] sm:$0xff]  ;;  %v398_v3 = vld [vmem:[%s22694_s1 + $0x8] sm:$0xff]  ;;  %s18655_s12 = smov 32   ;;  %v22709_v4 = vmov 0.0|0.0   ;;  %v399_v6 = vld [vmem:[%s22694_s1 + $0x10] sm:$0xff]  ;;  %vm18657_vm1 = vmmov 0  }
  0x17   : > { %v397_v2 = vld [vmem:[%s22694_s1] sm:$0xff]  ;;  %779 = vrot.lane.b32.xlu0 %v777_v1, %s18655_s12  ;;  %15235 = vmatprep.subr.bf16.mxu0 %v22709_v4  ;;  %v400_v7 = vld [vmem:[%s22694_s1 + $0x18] sm:$0xff]  ;;  %v22705_v8 = vmov 0.0   ;;  %v405_v9 = vld [vmem:[%s22696_s3 + $0x8] sm:$0xff]  ;;  %vm782_vm2 = vcmask 261120   ;;  %vm790_vm3 = vcmask 392192  }
  0x18   : > { %v18746_v5 = vpack.c.bf16 %v398_v3, %v397_v2  ;;  %13819 = vmatprep.mubr.msk.f32.mxu0 %vm18657_vm1, %v22705_v8  ;;  %959 = vmatprep.mubr.f32.mxu1 %v22705_v8  ;;  %v18761_v10 = vpack.c.bf16 %v400_v7, %v399_v6  ;;  %v410_v11 = vld [vmem:[%s22696_s3 + $0x30] sm:$0xff]  ;;  %v404_v12 = vld [vmem:[%s22696_s3] sm:$0xff]  ;;  %v409_v13 = vld [vmem:[%s22696_s3 + $0x28] sm:$0xff]  ;;  %vm891_vm4 = vcmask 523264   ;;  %vm10337_vm5 = vcmask 130048  }
  0x19   : > { %v401_v14 = vld [vmem:[%s22694_s1 + $0x20] sm:$0xff]  ;;  %v402_v15 = vld [vmem:[%s22694_s1 + $0x28] sm:$0xff]  ;;  %v18779_v16 = vpack.c.bf16 %v410_v11, %v405_v9  ;;  %v18781_v17 = vpack.c.bf16 %v409_v13, %v404_v12  ;;  %v407_v18 = vld [vmem:[%s22696_s3 + $0x18] sm:$0xff]  ;;  %vm10467_vm6 = vcmask 64512  }
  0x1a   : > { %23074 = vst [vmem:[#allocation5_spill] sm:$0xff] %v18746_v5  ;;  %15237 = vmatpush3.bf16.msra.mxu0 %v18746_v5  ;;  %23075 = vst [vmem:[#allocation6_spill] sm:$0xff] %v18761_v10  ;;  %v412_v19 = vld [vmem:[%s22696_s3 + $0x40] sm:$0xff]  ;;  %v415_v20 = vld [vmem:[%s22696_s3 + $0x58] sm:$0xff]  ;;  %v18805_v25 = vpack.c.bf16 %v402_v15, %v401_v14 }
  0x1b   : > { %15238 = vmatprep.subr.bf16.mxu0 %v22709_v4  ;;  %23076 = vst [vmem:[#allocation7_spill] sm:$0xff] %v18779_v16  ;;  %23077 = vst [vmem:[#allocation8_spill] sm:$0xff] %v18781_v17  ;;  %v420_v21 = vld [vmem:[%s22696_s3 + $0x80] sm:$0xff]  ;;  %15245 = vmatprep.subr.bf16.mxu1 %v18779_v16  ;;  %v414_v23 = vld [vmem:[%s22696_s3 + $0x50] sm:$0xff]  ;;  %v18811_v27 = vpack.c.bf16 %v412_v19, %v407_v18 }
  0x1c   : > { %v18796_v22 = vpack.c.bf16 %v420_v21, %v415_v20  ;;  %v419_v24 = vld [vmem:[%s22696_s3 + $0x78] sm:$0xff]  ;;  %23079 = vst [vmem:[#allocation10_spill] sm:$0xff] %v18805_v25  ;;  %15247 = vmatpush1.bf16.msra.mxu1 %v18781_v17  ;;  %v425_v28 = vld [vmem:[%s22696_s3 + $0xa8] sm:$0xff]  ;;  %v430_v29 = vld [vmem:[%s22696_s3 + $0xd0] sm:$0xff] }
  0x1d   : > { %v18808_v26 = vpack.c.bf16 %v419_v24, %v414_v23  ;;  %23081 = vst [vmem:[#allocation12_spill] sm:$0xff] %v18811_v27  ;;  %v424_v30 = vld [vmem:[%s22696_s3 + $0xa0] sm:$0xff]  ;;  %v18823_v31 = vpack.c.bf16 %v430_v29, %v425_v28  ;;  %v429_v32 = vld [vmem:[%s22696_s3 + $0xc8] sm:$0xff]  ;;  %v406_v34 = vld [vmem:[%s22696_s3 + $0x10] sm:$0xff] }
  0x1e   : > { %23078 = vst [vmem:[#allocation9_spill] sm:$0xff] %v18796_v22  ;;  %15240 = vmatpush3.bf16.msra.mxu0 %v18761_v10  ;;  %15249 = vmatprep.subr.bf16.mxu1 %v18796_v22  ;;  %v18830_v33 = vpack.c.bf16 %v429_v32, %v424_v30  ;;  %v411_v35 = vld [vmem:[%s22696_s3 + $0x38] sm:$0xff]  ;;  %v417_v36 = vld [vmem:[%s22696_s3 + $0x68] sm:$0xff]  ;;  %v422_v37 = vld [vmem:[%s22696_s3 + $0x90] sm:$0xff] }
  0x1f   : > { %23080 = vst [vmem:[#allocation11_spill] sm:$0xff] %v18808_v26  ;;  %15241 = vmatprep.subr.bf16.mxu0 %v22709_v4  ;;  %23082 = vst [vmem:[#allocation13_spill] sm:$0xff] %v18823_v31  ;;  %v775_v38 = vld [vmem:[#allocation2] sm:$0xff]  ;;  %v18847_v39 = vpack.c.bf16 %v411_v35, %v406_v34  ;;  %v18849_v41 = vpack.c.bf16 %v422_v37, %v417_v36  ;;  %v421_v43 = vld [vmem:[%s22696_s3 + $0x88] sm:$0xff] }
  0x20   : > { %15251 = vmatpush1.bf16.msra.mxu1 %v18808_v26  ;;  %23083 = vst [vmem:[#allocation14_spill] sm:$0xff] %v18830_v33  ;;  %v416_v42 = vld [vmem:[%s22696_s3 + $0x60] sm:$0xff]  ;;  %v427_v45 = vld [vmem:[%s22696_s3 + $0xb8] sm:$0xff]  ;;  %v426_v49 = vld [vmem:[%s22696_s3 + $0xb0] sm:$0xff] }
  0x21   : > { %15253 = vmatprep.subr.bf16.mxu1 %v18823_v31  ;;  %23084 = vst [vmem:[#allocation15_spill] sm:$0xff] %v18847_v39  ;;  %23085 = vst [vmem:[#allocation16_spill] sm:$0xff] %v18849_v41  ;;  %v432_v46 = vld [vmem:[%s22696_s3 + $0xe0] sm:$0xff]  ;;  %v18866_v47 = vpack.c.bf16 %v421_v43, %v416_v42  ;;  %v431_v50 = vld [vmem:[%s22696_s3 + $0xd8] sm:$0xff] }
  0x22   : > { %15243 = vmatpush3.bf16.msra.mxu0 %v18805_v25  ;;  %v18870_v48 = vpack.c.bf16 %v432_v46, %v427_v45  ;;  %v18879_v51 = vpack.c.bf16 %v431_v50, %v426_v49  ;;  %v435_v52 = vld [vmem:[%s22696_s3 + $0xf8] sm:$0xff]  ;;  %v440_v53 = vld [vmem:[%s22696_s3 + $0x120] sm:$0xff]  ;;  %v434_v55 = vld [vmem:[%s22696_s3 + $0xf0] sm:$0xff] }
  0x23   : > { %15261 = vmatprep.subr.bf16.mxu0 %v18811_v27  ;;  %23086 = vst [vmem:[#allocation17_spill] sm:$0xff] %v18866_v47  ;;  %v18889_v54 = vpack.c.bf16 %v440_v53, %v435_v52  ;;  %v439_v56 = vld [vmem:[%s22696_s3 + $0x118] sm:$0xff]  ;;  %v437_v57 = vld [vmem:[%s22696_s3 + $0x108] sm:$0xff]  ;;  %v442_v59 = vld [vmem:[%s22696_s3 + $0x130] sm:$0xff] }
  0x24   : > { %15255 = vmatpush1.bf16.msra.mxu1 %v18830_v33  ;;  %23087 = vst [vmem:[#allocation18_spill] sm:$0xff] %v18870_v48  ;;  %23088 = vst [vmem:[#allocation19_spill] sm:$0xff] %v18879_v51  ;;  %v18900_v58 = vpack.c.bf16 %v439_v56, %v434_v55  ;;  %v436_v60 = vld [vmem:[%s22696_s3 + $0x100] sm:$0xff]  ;;  %v441_v61 = vld [vmem:[%s22696_s3 + $0x128] sm:$0xff]  ;;  %v18912_v62 = vpack.c.bf16 %v442_v59, %v437_v57 }
  0x25   : > { %23089 = vst [vmem:[#allocation20_spill] sm:$0xff] %v18889_v54  ;;  %15257 = vmatprep.subr.bf16.mxu1 %v18889_v54  ;;  %v18914_v63 = vpack.c.bf16 %v441_v61, %v436_v60  ;;  %v461_v0 = vld [vmem:[%s22698_s5 + $0x80] sm:$0xff]  ;;  %v462_v1 = vld [vmem:[%s22698_s5 + $0x88] sm:$0xff]  ;;  %v463_v15 = vld [vmem:[%s22698_s5 + $0x90] sm:$0xff] }
  0x26   : > { %23090 = vst [vmem:[#allocation21_spill] sm:$0xff] %v18900_v58  ;;  %23091 = vst [vmem:[#allocation22_spill] sm:$0xff] %v18912_v62  ;;  %v18926_v2 = vpack.c.bf16 %v462_v1, %v461_v0  ;;  %v10785_v3 = vld [vmem:[%s22695_s2] ss:$0 sm:$0xff]  ;;  %v413_v7 = vld [vmem:[%s22696_s3 + $0x48] sm:$0xff] }
  0x27   : > { %23092 = vst [vmem:[#allocation23_spill] sm:$0xff] %v18914_v63  ;;  %v408_v6 = vld [vmem:[%s22696_s3 + $0x20] sm:$0xff]  ;;  %v446_v12 = vld [vmem:[%s22698_s5 + $0x8] sm:$0xff]  ;;  %v464_v18 = vld [vmem:[%s22698_s5 + $0x98] sm:$0xff] }
  0x28   : > { %15259 = vmatpush1.bf16.msra.mxu1 %v18900_v58  ;;  %23093 = vst [vmem:[#allocation24_spill] sm:$0xff] %v18926_v2  ;;  %v445_v11 = vld [vmem:[%s22698_s5] sm:$0xff]  ;;  %v18950_v19 = vpack.c.bf16 %v413_v7, %v408_v6  ;;  %v418_v21 = vld [vmem:[%s22696_s3 + $0x70] sm:$0xff]  ;;  %v423_v23 = vld [vmem:[%s22696_s3 + $0x98] sm:$0xff]  ;;  %v18962_v28 = vpack.c.bf16 %v464_v18, %v463_v15 }
  0x29   : > { %15276 = vmatprep.subr.bf16.mxu1 %v22709_v4  ;;  %v18960_v24 = vpack.c.bf16 %v446_v12, %v445_v11  ;;  %v447_v29 = vld [vmem:[%s22698_s5 + $0x10] sm:$0xff]  ;;  %v448_v30 = vld [vmem:[%s22698_s5 + $0x18] sm:$0xff]  ;;  %v465_v32 = vld [vmem:[%s22698_s5 + $0xa0] sm:$0xff]  ;;  %v18981_v35 = vpack.c.bf16 %v423_v23, %v418_v21 }
  0x2a   : > { %v466_v34 = vld [vmem:[%s22698_s5 + $0xa8] sm:$0xff]  ;;  %v428_v36 = vld [vmem:[%s22696_s3 + $0xc0] sm:$0xff]  ;;  %v468_v45 = vld [vmem:[%s22698_s5 + $0xb8] sm:$0xff] }
  0x2b   : > { %v433_v37 = vld [vmem:[%s22696_s3 + $0xe8] sm:$0xff]  ;;  %v449_v42 = vld [vmem:[%s22698_s5 + $0x20] sm:$0xff]  ;;  %v438_v49 = vld [vmem:[%s22696_s3 + $0x110] sm:$0xff] }
  0x2c   : > { %v450_v43 = vld [vmem:[%s22698_s5 + $0x28] sm:$0xff]  ;;  %v19011_v46 = vpack.c.bf16 %v433_v37, %v428_v36  ;;  %v443_v50 = vld [vmem:[%s22696_s3 + $0x138] sm:$0xff]  ;;  %v493_v52 = vld [vmem:[%s22698_s5 + $0x180] sm:$0xff] }
  0x2d   : > { %v19024_v53 = vpack.c.bf16 %v450_v43, %v449_v42  ;;  %v494_v55 = vld [vmem:[%s22698_s5 + $0x188] sm:$0xff]  ;;  %v451_v57 = vld [vmem:[%s22698_s5 + $0x30] sm:$0xff]  ;;  %v452_v59 = vld [vmem:[%s22698_s5 + $0x38] sm:$0xff]  ;;  %v19045_v0 = vpack.c.bf16 %v443_v50, %v438_v49 }
  0x2e   : > { %v469_v60 = vld [vmem:[%s22698_s5 + $0xc0] sm:$0xff]  ;;  %v470_v61 = vld [vmem:[%s22698_s5 + $0xc8] sm:$0xff]  ;;  %v19048_v1 = vpack.c.bf16 %v494_v55, %v493_v52  ;;  %v495_v7 = vld [vmem:[%s22698_s5 + $0x190] sm:$0xff] }
  0x2f   : > { %v478_v6 = vld [vmem:[%s22698_s5 + $0x108] sm:$0xff]  ;;  %v496_v11 = vld [vmem:[%s22698_s5 + $0x198] sm:$0xff]  ;;  %v19066_v12 = vpack.c.bf16 %v470_v61, %v469_v60  ;;  %v471_v15 = vld [vmem:[%s22698_s5 + $0xd0] sm:$0xff] }
  0x30   : > { %v472_v18 = vld [vmem:[%s22698_s5 + $0xd8] sm:$0xff]  ;;  %v19084_v23 = vpack.c.bf16 %v496_v11, %v495_v7  ;;  %v498_v36 = vld [vmem:[%s22698_s5 + $0x1a8] sm:$0xff]  ;;  %v455_v42 = vld [vmem:[%s22698_s5 + $0x50] sm:$0xff] }
  0x31   : > { %v19102_v37 = vpack.c.bf16 %v472_v18, %v471_v15  ;;  %v456_v43 = vld [vmem:[%s22698_s5 + $0x58] sm:$0xff]  ;;  %v482_v52 = vld [vmem:[%s22698_s5 + $0x128] sm:$0xff]  ;;  %v499_v55 = vld [vmem:[%s22698_s5 + $0x1b0] sm:$0xff] }
  0x32   : > { %v457_v61 = vld [vmem:[%s22698_s5 + $0x60] sm:$0xff]  ;;  %v483_v11 = vld [vmem:[%s22698_s5 + $0x130] sm:$0xff]  ;;  %v502_v18 = vld [vmem:[%s22698_s5 + $0x1c8] sm:$0xff] }
  0x33   : > { %v501_v15 = vld [vmem:[%s22698_s5 + $0x1c0] sm:$0xff] }
  0x89   : > { %v780_v40 = vpop.permute.xlu0 %779 }
  0x8a   : > { %v783_v44 = vsel %vm782_vm2, %v775_v38, %v780_v40  ;;  %v18993_v38 = vpack.c.bf16 %v448_v30, %v447_v29  ;;  %v18996_v40 = vpack.c.bf16 %v466_v34, %v465_v32  ;;  %v479_v29 = vld [vmem:[%s22698_s5 + $0x110] sm:$0xff]  ;;  %v480_v30 = vld [vmem:[%s22698_s5 + $0x118] sm:$0xff]  ;;  %v497_v32 = vld [vmem:[%s22698_s5 + $0x1a0] sm:$0xff] }
  0x8b   : > { %13820 = vmatmul.mubr.msk.f32.vlgmr.msra.gmra.mrb[0].mxu0 %vm790_vm3, %v783_v44  ;;  %v467_v44 = vld [vmem:[%s22698_s5 + $0xb0] sm:$0xff]  ;;  %v19119_v49 = vpack.c.bf16 %v480_v30, %v479_v29  ;;  %v19122_v50 = vpack.c.bf16 %v498_v36, %v497_v32  ;;  %v19174_v30 = vpack.c.bf16 %v502_v18, %v501_v15  ;;  %v485_v32 = vld [vmem:[%s22698_s5 + $0x140] sm:$0xff]  ;;  %v486_v36 = vld [vmem:[%s22698_s5 + $0x148] sm:$0xff] }
  0x8c   : > { %15263 = vmatpush1.bf16.msra.mxu0 %v18847_v39  ;;  %1030 = vmatprep.mubr.f32.mxu0 %v22705_v8  ;;  %v19030_v56 = vpack.c.bf16 %v468_v45, %v467_v44  ;;  %v473_v44 = vld [vmem:[%s22698_s5 + $0xe0] sm:$0xff]  ;;  %v474_v45 = vld [vmem:[%s22698_s5 + $0xe8] sm:$0xff]  ;;  %v475_v18 = vld [vmem:[%s22698_s5 + $0xf0] sm:$0xff] }
  0x8d   : > { %15265 = vmatprep.subr.bf16.mxu0 %v18849_v41  ;;  %v19140_v60 = vpack.c.bf16 %v474_v45, %v473_v44  ;;  %23099 = vst [vmem:[#allocation30_spill] sm:$0xff] %v19174_v30  ;;  %v19190_v44 = vpack.c.bf16 %v486_v36, %v485_v32  ;;  %v476_v32 = vld [vmem:[%s22698_s5 + $0xf8] sm:$0xff]  ;;  %v507_v36 = vld [vmem:[%s22698_s5 + $0x1f0] sm:$0xff] }
  0x8f   : > { %23094 = vst [vmem:[#allocation25_spill] sm:$0xff] %v19140_v60  ;;  %23100 = vst [vmem:[#allocation31_spill] sm:$0xff] %v19190_v44 }
  0x90   : > { %15267 = vmatpush1.bf16.msra.mxu0 %v18866_v47 }
  0x91   : > { %15269 = vmatprep.subr.bf16.mxu0 %v18870_v48 }
  0x94   : > { %15271 = vmatpush1.bf16.msra.mxu0 %v18879_v51 }
  0x95   : > { %15273 = vmatprep.subr.bf16.mxu0 %v18912_v62 }
  0x98   : > { %15275 = vmatpush1.bf16.msra.mxu0 %v18914_v63 }
  0x99   : > { %15289 = vmatprep.subr.bf16.mxu0 %v18926_v2 }
 0x15e   : > { %v860_v9 = vpop.f32.mrb[0].mxu0 }
 0x15f   : > { %v861_v13 = vadd.f32 %v10785_v3, %v860_v9  ;;  %v13821_v14 = vpop.f32.mrb[1].mxu0  ;;  %v477_v3 = vld [vmem:[%s22698_s5 + $0x100] sm:$0xff]  ;;  %v19060_v9 = vpack.c.bf16 %v452_v59, %v451_v57  ;;  %v19134_v57 = vpack.c.bf16 %v456_v43, %v455_v42  ;;  %v500_v59 = vld [vmem:[%s22698_s5 + $0x1b8] sm:$0xff]  ;;  %v503_v42 = vld [vmem:[%s22698_s5 + $0x1d0] sm:$0xff] }
 0x160   : > { %v454_v14 = vld [vmem:[%s22698_s5 + $0x48] sm:$0xff]  ;;  %v19081_v21 = vpack.c.bf16 %v478_v6, %v477_v3  ;;  %v19152_v7 = vpack.c.bf16 %v500_v59, %v499_v55  ;;  %v504_v43 = vld [vmem:[%s22698_s5 + $0x1d8] sm:$0xff]  ;;  %v505_v55 = vld [vmem:[%s22698_s5 + $0x1e0] sm:$0xff] }
 0x161   : > { %v18952_v20 = vmax.f32 %v861_v13, 0.0  ;;  %v453_v13 = vld [vmem:[%s22698_s5 + $0x40] sm:$0xff]  ;;  %v458_v3 = vld [vmem:[%s22698_s5 + $0x68] sm:$0xff]  ;;  %v19193_v45 = vpack.c.bf16 %v504_v43, %v503_v42  ;;  %v19233_v42 = vpack.c.bf16 %v476_v32, %v475_v18  ;;  %v508_v43 = vld [vmem:[%s22698_s5 + $0x1f8] sm:$0xff] }
 0x162   : > { %v19096_v34 = vpack.c.bf16 %v454_v14, %v453_v13  ;;  %23096 = vst [vmem:[#allocation27_spill] sm:$0xff] %v19152_v7  ;;  %v484_v13 = vld [vmem:[%s22698_s5 + $0x138] sm:$0xff]  ;;  %v19161_v14 = vpack.c.bf16 %v458_v3, %v457_v61  ;;  %v506_v59 = vld [vmem:[%s22698_s5 + $0x1e8] sm:$0xff]  ;;  %v10558_v32 = vld [vmem:[%s22698_s5 + $0x300] sm:$0xff] }
 0x163   : > { %10787 = vmatmul.mubr.msk.f32.vlgmr.msra.gmra.mrb[0].mxu1 %vm891_vm4, %v18952_v20  ;;  %10788 = vmatmul.mubr.msk.f32.vlgmr.msra.gmra.mrb[2].mxu0 %vm891_vm4, %v18952_v20  ;;  %v19171_v29 = vpack.c.bf16 %v484_v13, %v483_v11  ;;  %23101 = vst [vmem:[#allocation32_spill] sm:$0xff] %v19193_v45  ;;  %v19211_v3 = vpack.c.bf16 %v506_v59, %v505_v55  ;;  %v489_v11 = vld [vmem:[%s22698_s5 + $0x160] sm:$0xff]  ;;  %v490_v13 = vld [vmem:[%s22698_s5 + $0x168] sm:$0xff]  ;;  %23105 = vst [vmem:[#allocation36_spill] sm:$0xff] %v19233_v42 }
 0x164   : > { %15278 = vmatpush3.bf16.msra.mxu1 %v18950_v19  ;;  %13838 = vmatprep.mubr.msk.f32.mxu1 %vm18657_vm1, %v22705_v8  ;;  %23097 = vst [vmem:[#allocation28_spill] sm:$0xff] %v19161_v14  ;;  %v19220_v15 = vpack.c.bf16 %v490_v13, %v489_v11  ;;  %v19244_v55 = vpack.c.bf16 %v508_v43, %v507_v36  ;;  %v491_v11 = vld [vmem:[%s22698_s5 + $0x170] sm:$0xff]  ;;  %v492_v13 = vld [vmem:[%s22698_s5 + $0x178] sm:$0xff]  ;;  %v10559_v36 = vld [vmem:[%s22698_s5 + $0x308] sm:$0xff] }
 0x165   : > { %15279 = vmatprep.subr.bf16.mxu1 %v22709_v4  ;;  %15291 = vmatpush3.bf16.msra.mxu0 %v18960_v24  ;;  %23098 = vst [vmem:[#allocation29_spill] sm:$0xff] %v19171_v29  ;;  %23103 = vst [vmem:[#allocation34_spill] sm:$0xff] %v19211_v3  ;;  %v19255_v18 = vpack.c.bf16 %v492_v13, %v491_v11  ;;  %v19267_v43 = vpack.c.bf16 %v10559_v36, %v10558_v32  ;;  %v19277_v8 = vld [vmem:[%s22697_s4] sm:$0x1f] }
 0x166   : > { %15293 = vmatprep.subr.bf16.mxu0 %v18962_v28  ;;  %23104 = vst [vmem:[#allocation35_spill] sm:$0xff] %v19220_v15  ;;  %23106 = vst [vmem:[#allocation37_spill] sm:$0xff] %v19244_v55 }
 0x167   : > { %23108 = vst [vmem:[#allocation39_spill] sm:$0xff] %v19255_v18  ;;  %23109 = vst [vmem:[#allocation40_spill] sm:$0xff] %v19267_v43 }
 0x168   : > { %15281 = vmatpush3.bf16.msra.mxu1 %v18981_v35 }
 0x169   : > { %15282 = vmatprep.subr.bf16.mxu1 %v22709_v4  ;;  %15295 = vmatpush3.bf16.msra.mxu0 %v18993_v38 }
 0x16a   : > { %15297 = vmatprep.subr.bf16.mxu0 %v18996_v40 }
 0x16c   : > { %15284 = vmatpush3.bf16.msra.mxu1 %v19011_v46 }
 0x16d   : > { %15285 = vmatprep.subr.bf16.mxu1 %v22709_v4  ;;  %15299 = vmatpush3.bf16.msra.mxu0 %v19024_v53 }
 0x16e   : > { %15301 = vmatprep.subr.bf16.mxu0 %v19030_v56 }
 0x170   : > { %15287 = vmatpush3.bf16.msra.mxu1 %v19045_v0 }
 0x171   : > { %15321 = vmatprep.subr.bf16.mxu1 %v19048_v1  ;;  %15303 = vmatpush3.bf16.msra.mxu0 %v19060_v9 }
 0x172   : > { %15305 = vmatprep.subr.bf16.mxu0 %v19066_v12 }
 0x173   : > { %13839 = vmatmul.mubr.msk.f32.vlgmr.msra.gmra.mrb[2].mxu1 %vm891_vm4, %v18952_v20  ;;  %v481_v20 = vld [vmem:[%s22698_s5 + $0x120] sm:$0xff] }
 0x174   : > { %15323 = vmatpush3.bf16.msra.mxu1 %v19081_v21  ;;  %v19149_v6 = vpack.c.bf16 %v482_v52, %v481_v20  ;;  %v487_v20 = vld [vmem:[%s22698_s5 + $0x150] sm:$0xff]  ;;  %v488_v52 = vld [vmem:[%s22698_s5 + $0x158] sm:$0xff] }
 0x175   : > { %15325 = vmatprep.subr.bf16.mxu1 %v19084_v23  ;;  %15307 = vmatpush3.bf16.msra.mxu0 %v19096_v34  ;;  %v19208_v61 = vpack.c.bf16 %v488_v52, %v487_v20  ;;  %v459_v20 = vld [vmem:[%s22698_s5 + $0x70] sm:$0xff]  ;;  %v460_v52 = vld [vmem:[%s22698_s5 + $0x78] sm:$0xff] }
 0x176   : > { %15309 = vmatprep.subr.bf16.mxu0 %v19102_v37  ;;  %23095 = vst [vmem:[#allocation26_spill] sm:$0xff] %v19149_v6  ;;  %v19246_v59 = vpack.c.bf16 %v460_v52, %v459_v20  ;;  %v866_v20 = vlaneseq }
 0x177   : > { %23102 = vst [vmem:[#allocation33_spill] sm:$0xff] %v19208_v61 }
 0x178   : > { %15327 = vmatpush3.bf16.msra.mxu1 %v19119_v49  ;;  %23107 = vst [vmem:[#allocation38_spill] sm:$0xff] %v19246_v59  ;;  %v19270_v52 = vshrl.u32 %v866_v20, 7 }
 0x179   : > { %15329 = vmatprep.subr.bf16.mxu1 %v19122_v50  ;;  %15311 = vmatpush3.bf16.msra.mxu0 %v19134_v57 }
 0x17a   : > { %15313 = vmatprep.subr.bf16.mxu0 %v19140_v60  ;;  %v868_v11 = vsub.s32 0, %v19270_v52  ;;  %v876_v13 = vsub.s32 2, %v19270_v52  ;;  %v10627_v60 = vld [vmem:[%s22698_s5 + $0x528] sm:$0xff] }
 0x17c   : > { %15331 = vmatpush3.bf16.msra.mxu1 %v19149_v6  ;;  %v19282_v32 = vrot.slane %v19277_v8, %v868_v11  ;;  %v19285_v36 = vrot.slane %v19277_v8, %v876_v13  ;;  %v10543_v13 = vld [vmem:[%s22698_s5 + $0x288] sm:$0xff] }
 0x17d   : > { %15333 = vmatprep.subr.bf16.mxu1 %v19152_v7  ;;  %15315 = vmatpush3.bf16.msra.mxu0 %v19161_v14 }
 0x17e   : > { %15317 = vmatprep.subr.bf16.mxu0 %v19233_v42  ;;  %23110 = vst [vmem:[#allocation41_spill] sm:$0xff] %v19282_v32  ;;  %23111 = vst [vmem:[#allocation42_spill] sm:$0xff] %v19285_v36 }
 0x180   : > { %15335 = vmatpush3.bf16.msra.mxu1 %v19171_v29 }
 0x181   : > { %15337 = vmatprep.subr.bf16.mxu1 %v19174_v30  ;;  %15319 = vmatpush3.bf16.msra.mxu0 %v19246_v59 }
 0x182   : > { %15352 = vmatprep.subr.bf16.mxu0 %v22709_v4  ;;  %v880_v4 = vsub.s32 3, %v19270_v52 }
 0x184   : > { %15339 = vmatpush3.bf16.msra.mxu1 %v19190_v44 }
 0x185   : > { %15341 = vmatprep.subr.bf16.mxu1 %v19193_v45 }
 0x188   : > { %15343 = vmatpush3.bf16.msra.mxu1 %v19208_v61 }
 0x189   : > { %15345 = vmatprep.subr.bf16.mxu1 %v19211_v3  ;;  %v509_v3 = vld [vmem:[%s22698_s5 + $0x200] sm:$0xff] }
 0x18c   : > { %15347 = vmatpush3.bf16.msra.mxu1 %v19220_v15 }
 0x18d   : > { %15349 = vmatprep.subr.bf16.mxu1 %v19244_v55 }
 0x190   : > { %15351 = vmatpush3.bf16.msra.mxu1 %v19255_v18  ;;  %v872_v18 = vsub.s32 1, %v19270_v52 }
 0x191   : > { %15377 = vmatprep.subr.bf16.mxu1 %v19267_v43  ;;  %v19291_v43 = vrot.slane %v19277_v8, %v880_v4  ;;  %v10542_v4 = vld [vmem:[%s22698_s5 + $0x280] sm:$0xff] }
 0x192   : > { %v19288_v20 = vrot.slane %v19277_v8, %v872_v18  ;;  %v510_v18 = vld [vmem:[%s22698_s5 + $0x208] sm:$0xff]  ;;  %v19321_v42 = vpack.c.bf16 %v10543_v13, %v10542_v4  ;;  %v513_v13 = vld [vmem:[%s22698_s5 + $0x220] sm:$0xff] }
 0x193   : > { %23113 = vst [vmem:[#allocation44_spill] sm:$0xff] %v19291_v43  ;;  %v19319_v29 = vpack.c.bf16 %v510_v18, %v509_v3  ;;  %v10545_v3 = vld [vmem:[%s22698_s5 + $0x298] sm:$0xff]  ;;  %v10563_v18 = vld [vmem:[%s22698_s5 + $0x328] sm:$0xff] }
 0x194   : > { %23112 = vst [vmem:[#allocation43_spill] sm:$0xff] %v19288_v20  ;;  %23115 = vst [vmem:[#allocation46_spill] sm:$0xff] %v19321_v42 }
 0x195   : > { %23114 = vst [vmem:[#allocation45_spill] sm:$0xff] %v19319_v29 }
 0x236   : > { %v961_v55 = vpop.f32.mrb[0].mxu1  ;;  %v1032_v15 = vpop.f32.mrb[2].mxu0 }
 0x237   : > { %v962_v61 = vadd.f32 %v961_v55, %v19282_v32  ;;  %v1033_v11 = vadd.f32 %v1032_v15, %v19285_v36  ;;  %v963_v45 = vpop.f32.mrb[1].mxu1  ;;  %v1034_v44 = vpop.f32.mrb[3].mxu0  ;;  %v10560_v15 = vld [vmem:[%s22698_s5 + $0x310] sm:$0xff]  ;;  %v10561_v36 = vld [vmem:[%s22698_s5 + $0x318] sm:$0xff] }
 0x238   : > { %v964_v59 = vadd.f32 %v963_v45, %v19288_v20  ;;  %v1035_v55 = vadd.f32 %v1034_v44, %v19291_v43  ;;  %v511_v44 = vld [vmem:[%s22698_s5 + $0x210] sm:$0xff]  ;;  %v512_v20 = vld [vmem:[%s22698_s5 + $0x218] sm:$0xff] }
 0x239   : > { %v19326_v45 = vmax.f32 %v962_v61, 0.0  ;;  %v19328_v43 = vmax.f32 %v1033_v11, 0.0  ;;  %v19341_v61 = vpack.c.bf16 %v10561_v36, %v10560_v15  ;;  %v10562_v11 = vld [vmem:[%s22698_s5 + $0x320] sm:$0xff]  ;;  %v19353_v4 = vpack.c.bf16 %v512_v20, %v511_v44  ;;  %v10547_v44 = vld [vmem:[%s22698_s5 + $0x2a8] sm:$0xff] }
 0x23a   : > { %v19315_v32 = vmax.f32 %v964_v59, 0.0  ;;  %v19317_v30 = vmax.f32 %v1035_v55, 0.0  ;;  %v10544_v59 = vld [vmem:[%s22698_s5 + $0x290] sm:$0xff]  ;;  %v23119_v55 = vmov 0.0|0.0   ;;  %v19362_v15 = vpack.c.bf16 %v10563_v18, %v10562_v11  ;;  %v10546_v20 = vld [vmem:[%s22698_s5 + $0x2a0] sm:$0xff] }
 0x23b   : > { %23116 = vst [vmem:[#allocation47_spill] sm:$0xff] %v19341_v61  ;;  %23117 = vst [vmem:[#allocation48_spill] sm:$0xff] %v19353_v4  ;;  %v19355_v36 = vpack.c.bf16 %v10545_v3, %v10544_v59  ;;  %v10564_v59 = vld [vmem:[%s22698_s5 + $0x330] sm:$0xff]  ;;  %v10565_v3 = vld [vmem:[%s22698_s5 + $0x338] sm:$0xff]  ;;  %v23121_v11 = vmov 0.0  }
 0x23c   : > { %1182 = vmatprep.mubr.f32.mxu0 %v19315_v32  ;;  %1252 = vmatprep.mubr.f32.mxu1 %v19317_v30  ;;  %23120 = vst [vmem:[#allocation50_spill] sm:$0xff] %v19362_v15  ;;  %v19393_v14 = vpack.c.bf16 %v10565_v3, %v10564_v59 }
 0x23d   : > { %1183 = vmatmul.mubr.f32.vlgmr.msra.gmra.mrb[4].mxu0 %v19326_v45  ;;  %1253 = vmatmul.mubr.f32.vlgmr.msra.gmra.mrb[4].mxu1 %v19328_v43  ;;  %23118 = vst [vmem:[#allocation49_spill] sm:$0xff] %v19355_v36 }
 0x23e   : > { %15354 = vmatpush3.bf16.msra.mxu0 %v19319_v29  ;;  %15379 = vmatpush3.bf16.msra.mxu1 %v19321_v42  ;;  %v514_v29 = vld [vmem:[%s22698_s5 + $0x228] sm:$0xff]  ;;  %v19386_v42 = vpack.c.bf16 %v10547_v44, %v10546_v20  ;;  %23124 = vst [vmem:[#allocation53_spill] sm:$0xff] %v19393_v14  ;;  %v10566_v20 = vld [vmem:[%s22698_s5 + $0x340] sm:$0xff] }
 0x23f   : > { %1404 = vmatprep.mubr.f32.mxu1 %v19315_v32  ;;  %15355 = vmatprep.subr.bf16.mxu0 %v23119_v55  ;;  %v19384_v18 = vpack.c.bf16 %v514_v29, %v513_v13  ;;  %v10548_v29 = vld [vmem:[%s22698_s5 + $0x2b0] sm:$0xff]  ;;  %v10549_v13 = vld [vmem:[%s22698_s5 + $0x2b8] sm:$0xff]  ;;  %v10567_v44 = vld [vmem:[%s22698_s5 + $0x348] sm:$0xff] }
 0x240   : > { %15381 = vmatprep.subr.bf16.mxu1 %v19341_v61  ;;  %13873 = vmatprep.mubr.msk.f32.mxu0 %vm18657_vm1, %v23121_v11  ;;  %23123 = vst [vmem:[#allocation52_spill] sm:$0xff] %v19386_v42  ;;  %v515_v61 = vld [vmem:[%s22698_s5 + $0x230] sm:$0xff]  ;;  %v19421_v6 = vpack.c.bf16 %v10567_v44, %v10566_v20 }
 0x241   : > { %23122 = vst [vmem:[#allocation51_spill] sm:$0xff] %v19384_v18  ;;  %v519_v44 = vld [vmem:[%s22698_s5 + $0x250] sm:$0xff] }
 0x242   : > { %15357 = vmatpush3.bf16.msra.mxu0 %v19353_v4  ;;  %15383 = vmatpush3.bf16.msra.mxu1 %v19355_v36  ;;  %v516_v4 = vld [vmem:[%s22698_s5 + $0x238] sm:$0xff]  ;;  %v517_v36 = vld [vmem:[%s22698_s5 + $0x240] sm:$0xff]  ;;  %23127 = vst [vmem:[#allocation56_spill] sm:$0xff] %v19421_v6 }
 0x243   : > { %15358 = vmatprep.subr.bf16.mxu0 %v23119_v55  ;;  %15385 = vmatprep.subr.bf16.mxu1 %v19362_v15  ;;  %v19412_v3 = vpack.c.bf16 %v516_v4, %v515_v61  ;;  %v19414_v15 = vpack.c.bf16 %v10549_v13, %v10548_v29  ;;  %v10550_v61 = vld [vmem:[%s22698_s5 + $0x2c0] sm:$0xff]  ;;  %v10551_v4 = vld [vmem:[%s22698_s5 + $0x2c8] sm:$0xff]  ;;  %v10569_v29 = vld [vmem:[%s22698_s5 + $0x358] sm:$0xff] }
 0x244   : > { %v19442_v20 = vpack.c.bf16 %v10551_v4, %v10550_v61  ;;  %v10570_v61 = vld [vmem:[%s22698_s5 + $0x360] sm:$0xff]  ;;  %v10571_v4 = vld [vmem:[%s22698_s5 + $0x368] sm:$0xff] }
 0x245   : > { %23125 = vst [vmem:[#allocation54_spill] sm:$0xff] %v19412_v3  ;;  %23126 = vst [vmem:[#allocation55_spill] sm:$0xff] %v19414_v15 }
 0x246   : > { %v1103_v59 = vpop.f32.mrb[2].mxu1  ;;  %15360 = vmatpush3.bf16.msra.mxu0 %v19384_v18  ;;  %15387 = vmatpush3.bf16.msra.mxu1 %v19386_v42  ;;  %v518_v18 = vld [vmem:[%s22698_s5 + $0x248] sm:$0xff]  ;;  %23129 = vst [vmem:[#allocation58_spill] sm:$0xff] %v19442_v20  ;;  %v19478_v42 = vpack.c.bf16 %v10571_v4, %v10570_v61  ;;  %v523_v4 = vld [vmem:[%s22698_s5 + $0x270] sm:$0xff] }
 0x247   : > { %v13840_v7 = vpop.f32.mrb[3].mxu1  ;;  %15361 = vmatprep.subr.bf16.mxu0 %v23119_v55  ;;  %15389 = vmatprep.subr.bf16.mxu1 %v19393_v14  ;;  %v19440_v13 = vpack.c.bf16 %v518_v18, %v517_v36  ;;  %v10552_v36 = vld [vmem:[%s22698_s5 + $0x2d0] sm:$0xff]  ;;  %v10553_v18 = vld [vmem:[%s22698_s5 + $0x2d8] sm:$0xff] }
 0x248   : > { %v10568_v7 = vld [vmem:[%s22698_s5 + $0x350] sm:$0xff]  ;;  %23133 = vst [vmem:[#allocation62_spill] sm:$0xff] %v19478_v42 }
 0x249   : > { %23128 = vst [vmem:[#allocation57_spill] sm:$0xff] %v19440_v13  ;;  %v19449_v14 = vpack.c.bf16 %v10569_v29, %v10568_v7  ;;  %v19470_v29 = vpack.c.bf16 %v10553_v18, %v10552_v36  ;;  %v10573_v36 = vld [vmem:[%s22698_s5 + $0x378] sm:$0xff] }
 0x24a   : > { %15363 = vmatpush3.bf16.msra.mxu0 %v19412_v3  ;;  %15391 = vmatpush3.bf16.msra.mxu1 %v19414_v15  ;;  %v520_v3 = vld [vmem:[%s22698_s5 + $0x258] sm:$0xff]  ;;  %v884_v15 = vsub.s32 4, %v19270_v52  ;;  %v10572_v52 = vld [vmem:[%s22698_s5 + $0x370] sm:$0xff] }
 0x24b   : > { %15364 = vmatprep.subr.bf16.mxu0 %v23119_v55  ;;  %15393 = vmatprep.subr.bf16.mxu1 %v19421_v6  ;;  %23130 = vst [vmem:[#allocation59_spill] sm:$0xff] %v19449_v14  ;;  %v19468_v7 = vpack.c.bf16 %v520_v3, %v519_v44  ;;  %23132 = vst [vmem:[#allocation61_spill] sm:$0xff] %v19470_v29  ;;  %v521_v6 = vld [vmem:[%s22698_s5 + $0x260] sm:$0xff]  ;;  %v10555_v44 = vld [vmem:[%s22698_s5 + $0x2e8] sm:$0xff] }
 0x24c   : > { %v10554_v3 = vld [vmem:[%s22698_s5 + $0x2e0] sm:$0xff] }
 0x24d   : > { %23131 = vst [vmem:[#allocation60_spill] sm:$0xff] %v19468_v7  ;;  %v19499_v61 = vpack.c.bf16 %v10555_v44, %v10554_v3  ;;  %v10557_v3 = vld [vmem:[%s22698_s5 + $0x2f8] sm:$0xff] }
 0x24e   : > { %15366 = vmatpush3.bf16.msra.mxu0 %v19440_v13  ;;  %15395 = vmatpush3.bf16.msra.mxu1 %v19442_v20  ;;  %v522_v20 = vld [vmem:[%s22698_s5 + $0x268] sm:$0xff]  ;;  %v19509_v13 = vpack.c.bf16 %v10573_v36, %v10572_v52 }
 0x24f   : > { %15367 = vmatprep.subr.bf16.mxu0 %v23119_v55  ;;  %15397 = vmatprep.subr.bf16.mxu1 %v19449_v14  ;;  %v19497_v18 = vpack.c.bf16 %v522_v20, %v521_v6  ;;  %23135 = vst [vmem:[#allocation64_spill] sm:$0xff] %v19499_v61  ;;  %v19505_v14 = vrot.slane %v19277_v8, %v884_v15  ;;  %v524_v6 = vld [vmem:[%s22698_s5 + $0x278] sm:$0xff]  ;;  %v10556_v20 = vld [vmem:[%s22698_s5 + $0x2f0] sm:$0xff]  ;;  %v10590_v8 = vld [vmem:[%s22698_s5 + $0x400] sm:$0xff] }
 0x250   : > { %23137 = vst [vmem:[#allocation66_spill] sm:$0xff] %v19509_v13  ;;  %v10591_v15 = vld [vmem:[%s22698_s5 + $0x408] sm:$0xff]  ;;  %v19528_v44 = vpack.c.bf16 %v524_v6, %v523_v4  ;;  %v19530_v52 = vpack.c.bf16 %v10557_v3, %v10556_v20  ;;  %v10606_v4 = vld [vmem:[%s22698_s5 + $0x480] sm:$0xff]  ;;  %v10592_v6 = vld [vmem:[%s22698_s5 + $0x410] sm:$0xff] }
 0x251   : > { %23134 = vst [vmem:[#allocation63_spill] sm:$0xff] %v19497_v18  ;;  %23136 = vst [vmem:[#allocation65_spill] sm:$0xff] %v19505_v14  ;;  %v1104_v36 = vadd.f32 %v1103_v59, %v19505_v14  ;;  %v10607_v59 = vld [vmem:[%s22698_s5 + $0x488] sm:$0xff]  ;;  %v10593_v20 = vld [vmem:[%s22698_s5 + $0x418] sm:$0xff] }
 0x252   : > { %15369 = vmatpush3.bf16.msra.mxu0 %v19468_v7  ;;  %15399 = vmatpush3.bf16.msra.mxu1 %v19470_v29  ;;  %23138 = vst [vmem:[#allocation67_spill] sm:$0xff] %v19528_v44  ;;  %23139 = vst [vmem:[#allocation68_spill] sm:$0xff] %v19530_v52  ;;  %v10574_v29 = vld [vmem:[%s22698_s5 + $0x380] sm:$0xff]  ;;  %v10576_v14 = vld [vmem:[%s22698_s5 + $0x390] sm:$0xff] }
 0x253   : > { %15370 = vmatprep.subr.bf16.mxu0 %v23119_v55  ;;  %15401 = vmatprep.subr.bf16.mxu1 %v19478_v42  ;;  %v19535_v42 = vpack.c.bf16 %v10591_v15, %v10590_v8  ;;  %v19559_v8 = vmax.f32 %v1104_v36, 0.0  ;;  %v19563_v15 = vpack.c.bf16 %v10607_v59, %v10606_v4  ;;  %v10594_v36 = vld [vmem:[%s22698_s5 + $0x420] sm:$0xff]  ;;  %v10595_v4 = vld [vmem:[%s22698_s5 + $0x428] sm:$0xff] }
 0x254   : > { %v10623_v7 = vld [vmem:[%s22698_s5 + $0x508] sm:$0xff] }
 0x255   : > { %23140 = vst [vmem:[#allocation69_spill] sm:$0xff] %v19535_v42  ;;  %23142 = vst [vmem:[#allocation71_spill] sm:$0xff] %v19563_v15 }
 0x256   : > { %15372 = vmatpush3.bf16.msra.mxu0 %v19497_v18  ;;  %15403 = vmatpush3.bf16.msra.mxu1 %v19499_v61  ;;  %v10575_v61 = vld [vmem:[%s22698_s5 + $0x388] sm:$0xff]  ;;  %v10622_v18 = vld [vmem:[%s22698_s5 + $0x500] sm:$0xff] }
 0x257   : > { %15373 = vmatprep.subr.bf16.mxu0 %v23119_v55  ;;  %15405 = vmatprep.subr.bf16.mxu1 %v19509_v13  ;;  %v19557_v3 = vpack.c.bf16 %v10575_v61, %v10574_v29  ;;  %v19565_v13 = vpack.c.bf16 %v10593_v20, %v10592_v6  ;;  %v10608_v29 = vld [vmem:[%s22698_s5 + $0x490] sm:$0xff]  ;;  %v10609_v61 = vld [vmem:[%s22698_s5 + $0x498] sm:$0xff]  ;;  %v19595_v20 = vpack.c.bf16 %v10595_v4, %v10594_v36 }
 0x258   : > { %v19593_v6 = vpack.c.bf16 %v10609_v61, %v10608_v29  ;;  %v10596_v29 = vld [vmem:[%s22698_s5 + $0x430] sm:$0xff]  ;;  %v10597_v61 = vld [vmem:[%s22698_s5 + $0x438] sm:$0xff] }
 0x259   : > { %23141 = vst [vmem:[#allocation70_spill] sm:$0xff] %v19557_v3  ;;  %23143 = vst [vmem:[#allocation72_spill] sm:$0xff] %v19565_v13 }
 0x25a   : > { %15375 = vmatpush3.bf16.msra.mxu0 %v19528_v44  ;;  %15407 = vmatpush3.bf16.msra.mxu1 %v19530_v52  ;;  %v10577_v52 = vld [vmem:[%s22698_s5 + $0x398] sm:$0xff]  ;;  %23145 = vst [vmem:[#allocation74_spill] sm:$0xff] %v19593_v6  ;;  %23146 = vst [vmem:[#allocation75_spill] sm:$0xff] %v19595_v20 }
 0x25b   : > { %15409 = vmatprep.subr.bf16.mxu0 %v19535_v42  ;;  %15440 = vmatprep.subr.bf16.mxu1 %v23119_v55  ;;  %v19589_v59 = vpack.c.bf16 %v10577_v52, %v10576_v14  ;;  %v10578_v42 = vld [vmem:[%s22698_s5 + $0x3a0] sm:$0xff]  ;;  %v10611_v52 = vld [vmem:[%s22698_s5 + $0x4a8] sm:$0xff]  ;;  %v10581_v44 = vld [vmem:[%s22698_s5 + $0x3b8] sm:$0xff] }
 0x25c   : > { %v10610_v14 = vld [vmem:[%s22698_s5 + $0x4a0] sm:$0xff] }
 0x25d   : > { %13874 = vmatmul.mubr.f32.vlgmr.msra.gmra.mrb[6].mxu0 %v19559_v8  ;;  %1405 = vmatmul.mubr.f32.vlgmr.msra.gmra.mrb[6].mxu1 %v19326_v45  ;;  %23144 = vst [vmem:[#allocation73_spill] sm:$0xff] %v19589_v59  ;;  %v19623_v4 = vpack.c.bf16 %v10611_v52, %v10610_v14  ;;  %v10598_v14 = vld [vmem:[%s22698_s5 + $0x440] sm:$0xff]  ;;  %v10599_v52 = vld [vmem:[%s22698_s5 + $0x448] sm:$0xff] }
 0x25e   : > { %15411 = vmatpush3.bf16.msra.mxu0 %v19557_v3  ;;  %1474 = vmatprep.mubr.f32.mxu0 %v19317_v30  ;;  %v10579_v3 = vld [vmem:[%s22698_s5 + $0x3a8] sm:$0xff] }
 0x25f   : > { %15442 = vmatpush3.bf16.msra.mxu1 %v19563_v15  ;;  %15413 = vmatprep.subr.bf16.mxu0 %v19565_v13  ;;  %v19619_v36 = vpack.c.bf16 %v10579_v3, %v10578_v42  ;;  %23148 = vst [vmem:[#allocation77_spill] sm:$0xff] %v19623_v4  ;;  %v19625_v13 = vpack.c.bf16 %v10597_v61, %v10596_v29  ;;  %v10580_v15 = vld [vmem:[%s22698_s5 + $0x3b0] sm:$0xff]  ;;  %v10613_v3 = vld [vmem:[%s22698_s5 + $0x4b8] sm:$0xff] }
 0x260   : > { %15443 = vmatprep.subr.bf16.mxu1 %v23119_v55  ;;  %13908 = vmatprep.mubr.msk.f32.mxu1 %vm18657_vm1, %v23121_v11  ;;  %v10612_v42 = vld [vmem:[%s22698_s5 + $0x4b0] sm:$0xff]  ;;  %v19647_v29 = vpack.c.bf16 %v10581_v44, %v10580_v15  ;;  %v10614_v44 = vld [vmem:[%s22698_s5 + $0x4c0] sm:$0xff]  ;;  %v10615_v15 = vld [vmem:[%s22698_s5 + $0x4c8] sm:$0xff] }
 0x261   : > { %23147 = vst [vmem:[#allocation76_spill] sm:$0xff] %v19619_v36  ;;  %23149 = vst [vmem:[#allocation78_spill] sm:$0xff] %v19625_v13  ;;  %v19651_v61 = vpack.c.bf16 %v10613_v3, %v10612_v42  ;;  %v10600_v42 = vld [vmem:[%s22698_s5 + $0x450] sm:$0xff]  ;;  %v10601_v3 = vld [vmem:[%s22698_s5 + $0x458] sm:$0xff] }
 0x262   : > { %15415 = vmatpush3.bf16.msra.mxu0 %v19589_v59  ;;  %23150 = vst [vmem:[#allocation79_spill] sm:$0xff] %v19647_v29  ;;  %v10583_v59 = vld [vmem:[%s22698_s5 + $0x3c8] sm:$0xff] }
 0x263   : > { %15445 = vmatpush3.bf16.msra.mxu1 %v19593_v6  ;;  %15417 = vmatprep.subr.bf16.mxu0 %v19595_v20  ;;  %23151 = vst [vmem:[#allocation80_spill] sm:$0xff] %v19651_v61  ;;  %v19653_v20 = vpack.c.bf16 %v10599_v52, %v10598_v14  ;;  %v10582_v6 = vld [vmem:[%s22698_s5 + $0x3c0] sm:$0xff]  ;;  %v19679_v52 = vpack.c.bf16 %v10615_v15, %v10614_v44  ;;  %v10603_v15 = vld [vmem:[%s22698_s5 + $0x468] sm:$0xff] }
 0x264   : > { %15446 = vmatprep.subr.bf16.mxu1 %v23119_v55  ;;  %v19675_v14 = vpack.c.bf16 %v10583_v59, %v10582_v6  ;;  %v10616_v59 = vld [vmem:[%s22698_s5 + $0x4d0] sm:$0xff]  ;;  %v10617_v6 = vld [vmem:[%s22698_s5 + $0x4d8] sm:$0xff]  ;;  %v10602_v44 = vld [vmem:[%s22698_s5 + $0x460] sm:$0xff] }
 0x265   : > { %23152 = vst [vmem:[#allocation81_spill] sm:$0xff] %v19653_v20  ;;  %23154 = vst [vmem:[#allocation83_spill] sm:$0xff] %v19679_v52 }
 0x266   : > { %15419 = vmatpush3.bf16.msra.mxu0 %v19619_v36  ;;  %23153 = vst [vmem:[#allocation82_spill] sm:$0xff] %v19675_v14  ;;  %v10585_v36 = vld [vmem:[%s22698_s5 + $0x3d8] sm:$0xff] }
 0x267   : > { %15448 = vmatpush3.bf16.msra.mxu1 %v19623_v4  ;;  %15421 = vmatprep.subr.bf16.mxu0 %v19625_v13  ;;  %v19681_v13 = vpack.c.bf16 %v10601_v3, %v10600_v42  ;;  %v10584_v4 = vld [vmem:[%s22698_s5 + $0x3d0] sm:$0xff]  ;;  %v19707_v3 = vpack.c.bf16 %v10617_v6, %v10616_v59  ;;  %v10605_v6 = vld [vmem:[%s22698_s5 + $0x478] sm:$0xff] }
 0x268   : > { %15449 = vmatprep.subr.bf16.mxu1 %v23119_v55  ;;  %v19703_v42 = vpack.c.bf16 %v10585_v36, %v10584_v4  ;;  %v10618_v36 = vld [vmem:[%s22698_s5 + $0x4e0] sm:$0xff]  ;;  %v10619_v4 = vld [vmem:[%s22698_s5 + $0x4e8] sm:$0xff]  ;;  %v10604_v59 = vld [vmem:[%s22698_s5 + $0x470] sm:$0xff] }
 0x269   : > { %23155 = vst [vmem:[#allocation84_spill] sm:$0xff] %v19681_v13  ;;  %23157 = vst [vmem:[#allocation86_spill] sm:$0xff] %v19707_v3 }
 0x26a   : > { %15423 = vmatpush3.bf16.msra.mxu0 %v19647_v29  ;;  %23156 = vst [vmem:[#allocation85_spill] sm:$0xff] %v19703_v42  ;;  %v10587_v29 = vld [vmem:[%s22698_s5 + $0x3e8] sm:$0xff] }
 0x26b   : > { %15451 = vmatpush3.bf16.msra.mxu1 %v19651_v61  ;;  %15425 = vmatprep.subr.bf16.mxu0 %v19653_v20  ;;  %v19709_v20 = vpack.c.bf16 %v10603_v15, %v10602_v44  ;;  %v10586_v61 = vld [vmem:[%s22698_s5 + $0x3e0] sm:$0xff]  ;;  %v19735_v15 = vpack.c.bf16 %v10619_v4, %v10618_v36  ;;  %v10639_v4 = vld [vmem:[%s22698_s5 + $0x588] sm:$0xff] }
 0x26c   : > { %15452 = vmatprep.subr.bf16.mxu1 %v23119_v55  ;;  %v19731_v44 = vpack.c.bf16 %v10587_v29, %v10586_v61  ;;  %v10620_v29 = vld [vmem:[%s22698_s5 + $0x4f0] sm:$0xff]  ;;  %v10621_v61 = vld [vmem:[%s22698_s5 + $0x4f8] sm:$0xff]  ;;  %v10638_v36 = vld [vmem:[%s22698_s5 + $0x580] sm:$0xff] }
 0x26d   : > { %23158 = vst [vmem:[#allocation87_spill] sm:$0xff] %v19709_v20  ;;  %23160 = vst [vmem:[#allocation89_spill] sm:$0xff] %v19735_v15 }
 0x26e   : > { %15427 = vmatpush3.bf16.msra.mxu0 %v19675_v14  ;;  %23159 = vst [vmem:[#allocation88_spill] sm:$0xff] %v19731_v44  ;;  %v10589_v14 = vld [vmem:[%s22698_s5 + $0x3f8] sm:$0xff] }
 0x26f   : > { %15454 = vmatpush3.bf16.msra.mxu1 %v19679_v52  ;;  %15429 = vmatprep.subr.bf16.mxu0 %v19681_v13  ;;  %v19737_v13 = vpack.c.bf16 %v10605_v6, %v10604_v59  ;;  %v10588_v52 = vld [vmem:[%s22698_s5 + $0x3f0] sm:$0xff]  ;;  %v10670_v59 = vld [vmem:[%s22698_s5 + $0x680] sm:$0xff]  ;;  %v10671_v6 = vld [vmem:[%s22698_s5 + $0x688] sm:$0xff] }
 0x270   : > { %15455 = vmatprep.subr.bf16.mxu1 %v23119_v55 }
 0x271   : > { %23161 = vst [vmem:[#allocation90_spill] sm:$0xff] %v19737_v13 }
 0x272   : > { %15431 = vmatpush3.bf16.msra.mxu0 %v19703_v42  ;;  %v19771_v42 = vpack.c.bf16 %v10639_v4, %v10638_v36  ;;  %v10641_v36 = vld [vmem:[%s22698_s5 + $0x598] sm:$0xff]  ;;  %v19795_v4 = vpack.c.bf16 %v10623_v7, %v10622_v18  ;;  %v10656_v18 = vld [vmem:[%s22698_s5 + $0x610] sm:$0xff] }
 0x273   : > { %15457 = vmatpush3.bf16.msra.mxu1 %v19707_v3  ;;  %15433 = vmatprep.subr.bf16.mxu0 %v19709_v20  ;;  %v19765_v20 = vpack.c.bf16 %v10589_v14, %v10588_v52  ;;  %v19769_v3 = vpack.c.bf16 %v10621_v61, %v10620_v29  ;;  %v19780_v14 = vpack.c.bf16 %v10671_v6, %v10670_v59  ;;  %v10654_v52 = vld [vmem:[%s22698_s5 + $0x600] sm:$0xff]  ;;  %v10655_v29 = vld [vmem:[%s22698_s5 + $0x608] sm:$0xff]  ;;  %v10640_v61 = vld [vmem:[%s22698_s5 + $0x590] sm:$0xff] }
 0x274   : > { %15458 = vmatprep.subr.bf16.mxu1 %v23119_v55  ;;  %23164 = vst [vmem:[#allocation93_spill] sm:$0xff] %v19771_v42  ;;  %23166 = vst [vmem:[#allocation95_spill] sm:$0xff] %v19795_v4  ;;  %v10672_v59 = vld [vmem:[%s22698_s5 + $0x690] sm:$0xff]  ;;  %v10673_v6 = vld [vmem:[%s22698_s5 + $0x698] sm:$0xff] }
 0x275   : > { %23162 = vst [vmem:[#allocation91_spill] sm:$0xff] %v19765_v20  ;;  %23163 = vst [vmem:[#allocation92_spill] sm:$0xff] %v19769_v3  ;;  %v10625_v7 = vld [vmem:[%s22698_s5 + $0x518] sm:$0xff] }
 0x276   : > { %15435 = vmatpush3.bf16.msra.mxu0 %v19731_v44  ;;  %23165 = vst [vmem:[#allocation94_spill] sm:$0xff] %v19780_v14  ;;  %v10626_v44 = vld [vmem:[%s22698_s5 + $0x520] sm:$0xff] }
 0x277   : > { %15460 = vmatpush3.bf16.msra.mxu1 %v19735_v15  ;;  %15437 = vmatprep.subr.bf16.mxu0 %v19737_v13  ;;  %v19805_v13 = vpack.c.bf16 %v10655_v29, %v10654_v52  ;;  %v19817_v15 = vpack.c.bf16 %v10641_v36, %v10640_v61  ;;  %v10657_v52 = vld [vmem:[%s22698_s5 + $0x618] sm:$0xff]  ;;  %v10642_v29 = vld [vmem:[%s22698_s5 + $0x5a0] sm:$0xff]  ;;  %v10675_v36 = vld [vmem:[%s22698_s5 + $0x6a8] sm:$0xff] }
 0x278   : > { %15461 = vmatprep.subr.bf16.mxu1 %v23119_v55  ;;  %v10674_v61 = vld [vmem:[%s22698_s5 + $0x6a0] sm:$0xff] }
 0x279   : > { %23167 = vst [vmem:[#allocation96_spill] sm:$0xff] %v19805_v13  ;;  %23168 = vst [vmem:[#allocation97_spill] sm:$0xff] %v19817_v15 }
 0x27a   : > { %15439 = vmatpush3.bf16.msra.mxu0 %v19765_v20  ;;  %v10624_v20 = vld [vmem:[%s22698_s5 + $0x510] sm:$0xff] }
 0x27b   : > { %15463 = vmatpush3.bf16.msra.mxu1 %v19769_v3  ;;  %15465 = vmatprep.subr.bf16.mxu0 %v19771_v42  ;;  %v10643_v42 = vld [vmem:[%s22698_s5 + $0x5a8] sm:$0xff]  ;;  %v19829_v3 = vpack.c.bf16 %v10673_v6, %v10672_v59  ;;  %v19843_v59 = vpack.c.bf16 %v10657_v52, %v10656_v18  ;;  %v10644_v18 = vld [vmem:[%s22698_s5 + $0x5b0] sm:$0xff]  ;;  %v10645_v52 = vld [vmem:[%s22698_s5 + $0x5b8] sm:$0xff] }
 0x27c   : > { %15497 = vmatprep.subr.bf16.mxu1 %v19780_v14  ;;  %v19839_v14 = vpack.c.bf16 %v10625_v7, %v10624_v20  ;;  %v19845_v6 = vpack.c.bf16 %v10643_v42, %v10642_v29  ;;  %v10658_v20 = vld [vmem:[%s22698_s5 + $0x620] sm:$0xff]  ;;  %v19858_v7 = vpack.c.bf16 %v10675_v36, %v10674_v61  ;;  %v10659_v42 = vld [vmem:[%s22698_s5 + $0x628] sm:$0xff]  ;;  %v10676_v29 = vld [vmem:[%s22698_s5 + $0x6b0] sm:$0xff]  ;;  %v19877_v36 = vpack.c.bf16 %v10627_v60, %v10626_v44 }
 0x27d   : > { %1475 = vmatmul.mubr.f32.vlgmr.msra.gmra.mrb[8].mxu0 %v19328_v43  ;;  %23169 = vst [vmem:[#allocation98_spill] sm:$0xff] %v19829_v3  ;;  %23171 = vst [vmem:[#allocation100_spill] sm:$0xff] %v19843_v59  ;;  %v10677_v61 = vld [vmem:[%s22698_s5 + $0x6b8] sm:$0xff]  ;;  %v10660_v60 = vld [vmem:[%s22698_s5 + $0x630] sm:$0xff] }
 0x27e   : > { %13909 = vmatmul.mubr.f32.vlgmr.msra.gmra.mrb[8].mxu1 %v19559_v8  ;;  %15467 = vmatpush3.bf16.msra.mxu0 %v19795_v4  ;;  %23170 = vst [vmem:[#allocation99_spill] sm:$0xff] %v19839_v14  ;;  %23172 = vst [vmem:[#allocation101_spill] sm:$0xff] %v19845_v6  ;;  %v10629_v4 = vld [vmem:[%s22698_s5 + $0x538] sm:$0xff]  ;;  %v19895_v44 = vpack.c.bf16 %v10677_v61, %v10676_v29  ;;  %v10679_v29 = vld [vmem:[%s22698_s5 + $0x6c8] sm:$0xff] }
 0x27f   : > { %1626 = vmatprep.mubr.f32.mxu0 %v19315_v32  ;;  %15499 = vmatpush3.bf16.msra.mxu1 %v19805_v13  ;;  %23173 = vst [vmem:[#allocation102_spill] sm:$0xff] %v19858_v7  ;;  %23174 = vst [vmem:[#allocation103_spill] sm:$0xff] %v19877_v36  ;;  %v19883_v13 = vpack.c.bf16 %v10645_v52, %v10644_v18  ;;  %v10647_v18 = vld [vmem:[%s22698_s5 + $0x5c8] sm:$0xff]  ;;  %v10678_v52 = vld [vmem:[%s22698_s5 + $0x6c0] sm:$0xff] }
 0x280   : > { %1696 = vmatprep.mubr.f32.mxu1 %v19317_v30  ;;  %15469 = vmatprep.subr.bf16.mxu0 %v19817_v15  ;;  %v19881_v15 = vpack.c.bf16 %v10659_v42, %v10658_v20  ;;  %23177 = vst [vmem:[#allocation106_spill] sm:$0xff] %v19895_v44  ;;  %v10661_v20 = vld [vmem:[%s22698_s5 + $0x638] sm:$0xff]  ;;  %v10646_v42 = vld [vmem:[%s22698_s5 + $0x5c0] sm:$0xff] }
 0x281   : > { %15501 = vmatprep.subr.bf16.mxu1 %v19829_v3  ;;  %23176 = vst [vmem:[#allocation105_spill] sm:$0xff] %v19883_v13  ;;  %v10628_v3 = vld [vmem:[%s22698_s5 + $0x530] sm:$0xff] }
 0x282   : > { %15471 = vmatpush3.bf16.msra.mxu0 %v19839_v14  ;;  %23175 = vst [vmem:[#allocation104_spill] sm:$0xff] %v19881_v15  ;;  %v19913_v61 = vpack.c.bf16 %v10629_v4, %v10628_v3  ;;  %v10631_v14 = vld [vmem:[%s22698_s5 + $0x548] sm:$0xff]  ;;  %v10662_v3 = vld [vmem:[%s22698_s5 + $0x640] sm:$0xff]  ;;  %v19931_v4 = vpack.c.bf16 %v10679_v29, %v10678_v52  ;;  %v10681_v52 = vld [vmem:[%s22698_s5 + $0x6d8] sm:$0xff] }
 0x283   : > { %15503 = vmatpush3.bf16.msra.mxu1 %v19843_v59  ;;  %15473 = vmatprep.subr.bf16.mxu0 %v19845_v6  ;;  %v19919_v6 = vpack.c.bf16 %v10647_v18, %v10646_v42  ;;  %v10630_v59 = vld [vmem:[%s22698_s5 + $0x540] sm:$0xff]  ;;  %v10649_v42 = vld [vmem:[%s22698_s5 + $0x5d8] sm:$0xff]  ;;  %v10680_v18 = vld [vmem:[%s22698_s5 + $0x6d0] sm:$0xff] }
 0x284   : > { %15505 = vmatprep.subr.bf16.mxu1 %v19858_v7  ;;  %23178 = vst [vmem:[#allocation107_spill] sm:$0xff] %v19913_v61  ;;  %v19917_v7 = vpack.c.bf16 %v10661_v20, %v10660_v60  ;;  %23181 = vst [vmem:[#allocation110_spill] sm:$0xff] %v19931_v4  ;;  %v10663_v60 = vld [vmem:[%s22698_s5 + $0x648] sm:$0xff]  ;;  %v10648_v20 = vld [vmem:[%s22698_s5 + $0x5d0] sm:$0xff]  ;;  %v19949_v29 = vpack.c.bf16 %v10631_v14, %v10630_v59  ;;  %v19967_v59 = vpack.c.bf16 %v10681_v52, %v10680_v18 }
 0x285   : > { %23180 = vst [vmem:[#allocation109_spill] sm:$0xff] %v19919_v6  ;;  %v10664_v14 = vld [vmem:[%s22698_s5 + $0x650] sm:$0xff]  ;;  %v10683_v18 = vld [vmem:[%s22698_s5 + $0x6e8] sm:$0xff] }
 0x286   : > { %15475 = vmatpush3.bf16.msra.mxu0 %v19877_v36  ;;  %23179 = vst [vmem:[#allocation108_spill] sm:$0xff] %v19917_v7  ;;  %23182 = vst [vmem:[#allocation111_spill] sm:$0xff] %v19949_v29  ;;  %v10633_v36 = vld [vmem:[%s22698_s5 + $0x558] sm:$0xff] }
 0x287   : > { %15507 = vmatpush3.bf16.msra.mxu1 %v19881_v15  ;;  %15477 = vmatprep.subr.bf16.mxu0 %v19883_v13  ;;  %v19955_v13 = vpack.c.bf16 %v10649_v42, %v10648_v20  ;;  %v10632_v15 = vld [vmem:[%s22698_s5 + $0x550] sm:$0xff]  ;;  %23185 = vst [vmem:[#allocation114_spill] sm:$0xff] %v19967_v59  ;;  %v10651_v20 = vld [vmem:[%s22698_s5 + $0x5e8] sm:$0xff]  ;;  %v10682_v42 = vld [vmem:[%s22698_s5 + $0x6e0] sm:$0xff] }
 0x288   : > { %15509 = vmatprep.subr.bf16.mxu1 %v19895_v44  ;;  %v19953_v44 = vpack.c.bf16 %v10663_v60, %v10662_v3  ;;  %v10665_v3 = vld [vmem:[%s22698_s5 + $0x658] sm:$0xff]  ;;  %v10650_v60 = vld [vmem:[%s22698_s5 + $0x5e0] sm:$0xff]  ;;  %v19985_v52 = vpack.c.bf16 %v10633_v36, %v10632_v15  ;;  %v20003_v36 = vpack.c.bf16 %v10683_v18, %v10682_v42 }
 0x289   : > { %23184 = vst [vmem:[#allocation113_spill] sm:$0xff] %v19955_v13  ;;  %v10666_v15 = vld [vmem:[%s22698_s5 + $0x660] sm:$0xff]  ;;  %v10685_v42 = vld [vmem:[%s22698_s5 + $0x6f8] sm:$0xff] }
 0x28a   : > { %15479 = vmatpush3.bf16.msra.mxu0 %v19913_v61  ;;  %23183 = vst [vmem:[#allocation112_spill] sm:$0xff] %v19953_v44  ;;  %23186 = vst [vmem:[#allocation115_spill] sm:$0xff] %v19985_v52  ;;  %v10635_v61 = vld [vmem:[%s22698_s5 + $0x568] sm:$0xff] }
 0x28b   : > { %15511 = vmatpush3.bf16.msra.mxu1 %v19917_v7  ;;  %15481 = vmatprep.subr.bf16.mxu0 %v19919_v6  ;;  %v19991_v6 = vpack.c.bf16 %v10651_v20, %v10650_v60  ;;  %v10634_v7 = vld [vmem:[%s22698_s5 + $0x560] sm:$0xff]  ;;  %23189 = vst [vmem:[#allocation118_spill] sm:$0xff] %v20003_v36  ;;  %v10653_v60 = vld [vmem:[%s22698_s5 + $0x5f8] sm:$0xff]  ;;  %v10684_v20 = vld [vmem:[%s22698_s5 + $0x6f0] sm:$0xff] }
 0x28c   : > { %15513 = vmatprep.subr.bf16.mxu1 %v19931_v4  ;;  %v19989_v4 = vpack.c.bf16 %v10665_v3, %v10664_v14  ;;  %v10667_v14 = vld [vmem:[%s22698_s5 + $0x668] sm:$0xff]  ;;  %v10652_v3 = vld [vmem:[%s22698_s5 + $0x5f0] sm:$0xff]  ;;  %v20021_v18 = vpack.c.bf16 %v10635_v61, %v10634_v7  ;;  %v20036_v7 = vpack.c.bf16 %v10685_v42, %v10684_v20  ;;  %v10686_v42 = vld [vmem:[%s22698_s5 + $0x700] sm:$0xff] }
 0x28d   : > { %23188 = vst [vmem:[#allocation117_spill] sm:$0xff] %v19991_v6  ;;  %v10668_v61 = vld [vmem:[%s22698_s5 + $0x670] sm:$0xff] }
 0x28e   : > { %15483 = vmatpush3.bf16.msra.mxu0 %v19949_v29  ;;  %23187 = vst [vmem:[#allocation116_spill] sm:$0xff] %v19989_v4  ;;  %23190 = vst [vmem:[#allocation119_spill] sm:$0xff] %v20021_v18  ;;  %v10637_v29 = vld [vmem:[%s22698_s5 + $0x578] sm:$0xff] }
 0x28f   : > { %15515 = vmatpush3.bf16.msra.mxu1 %v19953_v44  ;;  %15485 = vmatprep.subr.bf16.mxu0 %v19955_v13  ;;  %v20027_v13 = vpack.c.bf16 %v10653_v60, %v10652_v3  ;;  %v10636_v44 = vld [vmem:[%s22698_s5 + $0x570] sm:$0xff]  ;;  %23193 = vst [vmem:[#allocation122_spill] sm:$0xff] %v20036_v7  ;;  %v10719_v3 = vld [vmem:[%s22698_s5 + $0x808] sm:$0xff] }
 0x290   : > { %15517 = vmatprep.subr.bf16.mxu1 %v19967_v59  ;;  %v20025_v59 = vpack.c.bf16 %v10667_v14, %v10666_v15  ;;  %v10669_v15 = vld [vmem:[%s22698_s5 + $0x678] sm:$0xff]  ;;  %v10718_v14 = vld [vmem:[%s22698_s5 + $0x800] sm:$0xff]  ;;  %v20051_v60 = vpack.c.bf16 %v10637_v29, %v10636_v44  ;;  %v10703_v29 = vld [vmem:[%s22698_s5 + $0x788] sm:$0xff] }
 0x291   : > { %23192 = vst [vmem:[#allocation121_spill] sm:$0xff] %v20027_v13  ;;  %v20055_v20 = vpack.c.bf16 %v10669_v15, %v10668_v61  ;;  %v10702_v44 = vld [vmem:[%s22698_s5 + $0x780] sm:$0xff]  ;;  %v10720_v61 = vld [vmem:[%s22698_s5 + $0x810] sm:$0xff]  ;;  %v10721_v15 = vld [vmem:[%s22698_s5 + $0x818] sm:$0xff] }
 0x292   : > { %15487 = vmatpush3.bf16.msra.mxu0 %v19985_v52  ;;  %23191 = vst [vmem:[#allocation120_spill] sm:$0xff] %v20025_v59  ;;  %23194 = vst [vmem:[#allocation123_spill] sm:$0xff] %v20051_v60 }
 0x293   : > { %15519 = vmatpush3.bf16.msra.mxu1 %v19989_v4  ;;  %15489 = vmatprep.subr.bf16.mxu0 %v19991_v6  ;;  %23195 = vst [vmem:[#allocation124_spill] sm:$0xff] %v20055_v20  ;;  %v20064_v6 = vpack.c.bf16 %v10719_v3, %v10718_v14  ;;  %v20083_v3 = vpack.c.bf16 %v10703_v29, %v10702_v44  ;;  %v10722_v44 = vld [vmem:[%s22698_s5 + $0x820] sm:$0xff]  ;;  %v10723_v29 = vld [vmem:[%s22698_s5 + $0x828] sm:$0xff] }
 0x294   : > { %15521 = vmatprep.subr.bf16.mxu1 %v20003_v36  ;;  %v10687_v36 = vld [vmem:[%s22698_s5 + $0x708] sm:$0xff] }
 0x295   : > { %23196 = vst [vmem:[#allocation125_spill] sm:$0xff] %v20064_v6  ;;  %v20079_v14 = vpack.c.bf16 %v10687_v36, %v10686_v42  ;;  %23198 = vst [vmem:[#allocation127_spill] sm:$0xff] %v20083_v3  ;;  %v10704_v36 = vld [vmem:[%s22698_s5 + $0x790] sm:$0xff]  ;;  %v10705_v42 = vld [vmem:[%s22698_s5 + $0x798] sm:$0xff] }
 0x296   : > { %15491 = vmatpush3.bf16.msra.mxu0 %v20021_v18 }
 0x297   : > { %15523 = vmatpush3.bf16.msra.mxu1 %v20025_v59  ;;  %15493 = vmatprep.subr.bf16.mxu0 %v20027_v13  ;;  %23197 = vst [vmem:[#allocation126_spill] sm:$0xff] %v20079_v14  ;;  %v10689_v13 = vld [vmem:[%s22698_s5 + $0x718] sm:$0xff]  ;;  %v20092_v59 = vpack.c.bf16 %v10721_v15, %v10720_v61  ;;  %v20113_v15 = vpack.c.bf16 %v10705_v42, %v10704_v36  ;;  %v10724_v36 = vld [vmem:[%s22698_s5 + $0x830] sm:$0xff] }
 0x298   : > { %15525 = vmatprep.subr.bf16.mxu1 %v20036_v7  ;;  %v10688_v7 = vld [vmem:[%s22698_s5 + $0x710] sm:$0xff]  ;;  %v10725_v42 = vld [vmem:[%s22698_s5 + $0x838] sm:$0xff] }
 0x299   : > { %23199 = vst [vmem:[#allocation128_spill] sm:$0xff] %v20092_v59  ;;  %v20109_v61 = vpack.c.bf16 %v10689_v13, %v10688_v7  ;;  %23201 = vst [vmem:[#allocation130_spill] sm:$0xff] %v20113_v15  ;;  %v20123_v13 = vpack.c.bf16 %v10723_v29, %v10722_v44  ;;  %v10707_v7 = vld [vmem:[%s22698_s5 + $0x7a8] sm:$0xff] }
 0x29a   : > { %15495 = vmatpush3.bf16.msra.mxu0 %v20051_v60 }
 0x29b   : > { %15527 = vmatpush3.bf16.msra.mxu1 %v20055_v20  ;;  %15528 = vmatprep.subr.bf16.mxu0 %v23119_v55  ;;  %23200 = vst [vmem:[#allocation129_spill] sm:$0xff] %v20109_v61  ;;  %v10691_v20 = vld [vmem:[%s22698_s5 + $0x728] sm:$0xff]  ;;  %23202 = vst [vmem:[#allocation131_spill] sm:$0xff] %v20123_v13 }
 0x29c   : > { %15553 = vmatprep.subr.bf16.mxu1 %v20064_v6  ;;  %v10690_v6 = vld [vmem:[%s22698_s5 + $0x720] sm:$0xff] }
 0x29d   : > { %1627 = vmatmul.mubr.f32.vlgmr.msra.gmra.mrb[10].mxu0 %v19326_v45  ;;  %v20140_v44 = vpack.c.bf16 %v10691_v20, %v10690_v6  ;;  %v10708_v6 = vld [vmem:[%s22698_s5 + $0x7b0] sm:$0xff]  ;;  %v10709_v20 = vld [vmem:[%s22698_s5 + $0x7b8] sm:$0xff] }
 0x29e   : > { %1697 = vmatmul.mubr.f32.vlgmr.msra.gmra.mrb[10].mxu1 %v19328_v43  ;;  %15530 = vmatpush3.bf16.msra.mxu0 %v20079_v14  ;;  %v20153_v14 = vpack.c.bf16 %v10725_v42, %v10724_v36  ;;  %v20172_v42 = vpack.c.bf16 %v10709_v20, %v10708_v6  ;;  %v10728_v6 = vld [vmem:[%s22698_s5 + $0x850] sm:$0xff]  ;;  %v10729_v20 = vld [vmem:[%s22698_s5 + $0x858] sm:$0xff] }
 0x29f   : > { %15555 = vmatpush3.bf16.msra.mxu1 %v20083_v3  ;;  %1843 = vmatprep.mubr.f32.mxu1 %v19315_v32  ;;  %v10706_v32 = vld [vmem:[%s22698_s5 + $0x7a0] sm:$0xff]  ;;  %23203 = vst [vmem:[#allocation132_spill] sm:$0xff] %v20140_v44  ;;  %v10693_v3 = vld [vmem:[%s22698_s5 + $0x738] sm:$0xff] }
 0x2a0   : > { %15531 = vmatprep.subr.bf16.mxu0 %v23119_v55  ;;  %15557 = vmatprep.subr.bf16.mxu1 %v20092_v59  ;;  %v20144_v29 = vpack.c.bf16 %v10707_v7, %v10706_v32  ;;  %v10692_v59 = vld [vmem:[%s22698_s5 + $0x730] sm:$0xff]  ;;  %23205 = vst [vmem:[#allocation134_spill] sm:$0xff] %v20153_v14  ;;  %v10726_v32 = vld [vmem:[%s22698_s5 + $0x840] sm:$0xff]  ;;  %v10727_v7 = vld [vmem:[%s22698_s5 + $0x848] sm:$0xff] }
 0x2a1   : > { %13943 = vmatprep.mubr.msk.f32.mxu0 %vm18657_vm1, %v23121_v11  ;;  %v20168_v36 = vpack.c.bf16 %v10693_v3, %v10692_v59  ;;  %23207 = vst [vmem:[#allocation136_spill] sm:$0xff] %v20172_v42  ;;  %v10710_v59 = vld [vmem:[%s22698_s5 + $0x7c0] sm:$0xff]  ;;  %v10711_v3 = vld [vmem:[%s22698_s5 + $0x7c8] sm:$0xff] }
 0x2a2   : > { %15533 = vmatpush3.bf16.msra.mxu0 %v20109_v61  ;;  %23204 = vst [vmem:[#allocation133_spill] sm:$0xff] %v20144_v29  ;;  %v20181_v61 = vpack.c.bf16 %v10727_v7, %v10726_v32  ;;  %v20200_v7 = vpack.c.bf16 %v10711_v3, %v10710_v59  ;;  %v10730_v59 = vld [vmem:[%s22698_s5 + $0x860] sm:$0xff]  ;;  %v10731_v3 = vld [vmem:[%s22698_s5 + $0x868] sm:$0xff] }
 0x2a3   : > { %15559 = vmatpush3.bf16.msra.mxu1 %v20113_v15  ;;  %15534 = vmatprep.subr.bf16.mxu0 %v23119_v55  ;;  %23206 = vst [vmem:[#allocation135_spill] sm:$0xff] %v20168_v36  ;;  %v10695_v15 = vld [vmem:[%s22698_s5 + $0x748] sm:$0xff] }
 0x2a4   : > { %15561 = vmatprep.subr.bf16.mxu1 %v20123_v13  ;;  %v10694_v13 = vld [vmem:[%s22698_s5 + $0x740] sm:$0xff]  ;;  %23208 = vst [vmem:[#allocation137_spill] sm:$0xff] %v20181_v61  ;;  %23210 = vst [vmem:[#allocation139_spill] sm:$0xff] %v20200_v7 }
 0x2a5   : > { %v20196_v32 = vpack.c.bf16 %v10695_v15, %v10694_v13  ;;  %v10712_v15 = vld [vmem:[%s22698_s5 + $0x7d0] sm:$0xff]  ;;  %v10713_v13 = vld [vmem:[%s22698_s5 + $0x7d8] sm:$0xff] }
 0x2a6   : > { %15536 = vmatpush3.bf16.msra.mxu0 %v20140_v44  ;;  %v20209_v44 = vpack.c.bf16 %v10729_v20, %v10728_v6  ;;  %v20228_v20 = vpack.c.bf16 %v10713_v13, %v10712_v15  ;;  %v10732_v15 = vld [vmem:[%s22698_s5 + $0x870] sm:$0xff]  ;;  %v10733_v13 = vld [vmem:[%s22698_s5 + $0x878] sm:$0xff] }
 0x2a7   : > { %15563 = vmatpush3.bf16.msra.mxu1 %v20144_v29  ;;  %15537 = vmatprep.subr.bf16.mxu0 %v23119_v55  ;;  %23209 = vst [vmem:[#allocation138_spill] sm:$0xff] %v20196_v32  ;;  %v10697_v29 = vld [vmem:[%s22698_s5 + $0x758] sm:$0xff] }
 0x2a8   : > { %15565 = vmatprep.subr.bf16.mxu1 %v20153_v14  ;;  %v10696_v14 = vld [vmem:[%s22698_s5 + $0x750] sm:$0xff]  ;;  %23211 = vst [vmem:[#allocation140_spill] sm:$0xff] %v20209_v44  ;;  %23213 = vst [vmem:[#allocation142_spill] sm:$0xff] %v20228_v20 }
 0x2a9   : > { %v20224_v6 = vpack.c.bf16 %v10697_v29, %v10696_v14  ;;  %v10714_v14 = vld [vmem:[%s22698_s5 + $0x7e0] sm:$0xff]  ;;  %v10715_v29 = vld [vmem:[%s22698_s5 + $0x7e8] sm:$0xff] }
 0x2aa   : > { %15539 = vmatpush3.bf16.msra.mxu0 %v20168_v36  ;;  %v20237_v36 = vpack.c.bf16 %v10731_v3, %v10730_v59  ;;  %v20256_v3 = vpack.c.bf16 %v10715_v29, %v10714_v14  ;;  %v10750_v14 = vld [vmem:[%s22698_s5 + $0x900] sm:$0xff]  ;;  %v10751_v29 = vld [vmem:[%s22698_s5 + $0x908] sm:$0xff] }
 0x2ab   : > { %15567 = vmatpush3.bf16.msra.mxu1 %v20172_v42  ;;  %15540 = vmatprep.subr.bf16.mxu0 %v23119_v55  ;;  %23212 = vst [vmem:[#allocation141_spill] sm:$0xff] %v20224_v6  ;;  %v10699_v42 = vld [vmem:[%s22698_s5 + $0x768] sm:$0xff] }
 0x2ac   : > { %15569 = vmatprep.subr.bf16.mxu1 %v20181_v61  ;;  %v10698_v61 = vld [vmem:[%s22698_s5 + $0x760] sm:$0xff]  ;;  %23214 = vst [vmem:[#allocation143_spill] sm:$0xff] %v20237_v36  ;;  %23216 = vst [vmem:[#allocation145_spill] sm:$0xff] %v20256_v3 }
 0x2ad   : > { %v20252_v59 = vpack.c.bf16 %v10699_v42, %v10698_v61  ;;  %v20268_v61 = vpack.c.bf16 %v10733_v13, %v10732_v15  ;;  %v10717_v42 = vld [vmem:[%s22698_s5 + $0x7f8] sm:$0xff]  ;;  %v20286_v13 = vpack.c.bf16 %v10751_v29, %v10750_v14 }
 0x2ae   : > { %15542 = vmatpush3.bf16.msra.mxu0 %v20196_v32  ;;  %v10735_v32 = vld [vmem:[%s22698_s5 + $0x888] sm:$0xff] }
 0x2af   : > { %15571 = vmatpush3.bf16.msra.mxu1 %v20200_v7  ;;  %15543 = vmatprep.subr.bf16.mxu0 %v23119_v55  ;;  %23215 = vst [vmem:[#allocation144_spill] sm:$0xff] %v20252_v59  ;;  %v10701_v7 = vld [vmem:[%s22698_s5 + $0x778] sm:$0xff]  ;;  %23217 = vst [vmem:[#allocation146_spill] sm:$0xff] %v20268_v61 }
 0x2b0   : > { %15573 = vmatprep.subr.bf16.mxu1 %v20209_v44  ;;  %v10700_v44 = vld [vmem:[%s22698_s5 + $0x770] sm:$0xff]  ;;  %23220 = vst [vmem:[#allocation149_spill] sm:$0xff] %v20286_v13 }
 0x2b2   : > { %15545 = vmatpush3.bf16.msra.mxu0 %v20224_v6  ;;  %v10716_v6 = vld [vmem:[%s22698_s5 + $0x7f0] sm:$0xff] }
 0x2b3   : > { %15575 = vmatpush3.bf16.msra.mxu1 %v20228_v20  ;;  %15546 = vmatprep.subr.bf16.mxu0 %v23119_v55  ;;  %v20280_v20 = vpack.c.bf16 %v10701_v7, %v10700_v44  ;;  %v20284_v15 = vpack.c.bf16 %v10717_v42, %v10716_v6  ;;  %v10766_v44 = vld [vmem:[%s22698_s5 + $0x980] sm:$0xff]  ;;  %v10767_v7 = vld [vmem:[%s22698_s5 + $0x988] sm:$0xff]  ;;  %v10752_v6 = vld [vmem:[%s22698_s5 + $0x910] sm:$0xff] }
 0x2b4   : > { %15577 = vmatprep.subr.bf16.mxu1 %v20237_v36  ;;  %v10734_v36 = vld [vmem:[%s22698_s5 + $0x880] sm:$0xff]  ;;  %v10753_v42 = vld [vmem:[%s22698_s5 + $0x918] sm:$0xff]  ;;  %v20312_v29 = vpack.c.bf16 %v10767_v7, %v10766_v44  ;;  %v10755_v7 = vld [vmem:[%s22698_s5 + $0x928] sm:$0xff] }
 0x2b5   : > { %23218 = vst [vmem:[#allocation147_spill] sm:$0xff] %v20280_v20  ;;  %23219 = vst [vmem:[#allocation148_spill] sm:$0xff] %v20284_v15  ;;  %v20308_v14 = vpack.c.bf16 %v10735_v32, %v10734_v36  ;;  %v20324_v36 = vpack.c.bf16 %v10753_v42, %v10752_v6  ;;  %v10769_v32 = vld [vmem:[%s22698_s5 + $0x998] sm:$0xff]  ;;  %v10754_v44 = vld [vmem:[%s22698_s5 + $0x920] sm:$0xff] }
 0x2b6   : > { %15548 = vmatpush3.bf16.msra.mxu0 %v20252_v59  ;;  %23222 = vst [vmem:[#allocation151_spill] sm:$0xff] %v20312_v29 }
 0x2b7   : > { %15579 = vmatpush3.bf16.msra.mxu1 %v20256_v3  ;;  %15549 = vmatprep.subr.bf16.mxu0 %v23119_v55  ;;  %23221 = vst [vmem:[#allocation150_spill] sm:$0xff] %v20308_v14  ;;  %v10737_v3 = vld [vmem:[%s22698_s5 + $0x898] sm:$0xff]  ;;  %23223 = vst [vmem:[#allocation152_spill] sm:$0xff] %v20324_v36 }
 0x2b8   : > { %15581 = vmatprep.subr.bf16.mxu1 %v20268_v61  ;;  %v10736_v61 = vld [vmem:[%s22698_s5 + $0x890] sm:$0xff] }
 0x2b9   : > { %v20338_v6 = vpack.c.bf16 %v10737_v3, %v10736_v61  ;;  %v10770_v3 = vld [vmem:[%s22698_s5 + $0x9a0] sm:$0xff]  ;;  %v10757_v61 = vld [vmem:[%s22698_s5 + $0x938] sm:$0xff] }
 0x2ba   : > { %15551 = vmatpush3.bf16.msra.mxu0 %v20280_v20  ;;  %v10768_v20 = vld [vmem:[%s22698_s5 + $0x990] sm:$0xff] }
 0x2bb   : > { %15583 = vmatpush3.bf16.msra.mxu1 %v20284_v15  ;;  %15585 = vmatprep.subr.bf16.mxu0 %v20286_v13  ;;  %23224 = vst [vmem:[#allocation153_spill] sm:$0xff] %v20338_v6  ;;  %v20342_v42 = vpack.c.bf16 %v10769_v32, %v10768_v20  ;;  %v20344_v13 = vpack.c.bf16 %v10755_v7, %v10754_v44  ;;  %v10738_v15 = vld [vmem:[%s22698_s5 + $0x8a0] sm:$0xff]  ;;  %v10756_v20 = vld [vmem:[%s22698_s5 + $0x930] sm:$0xff] }
 0x2bc   : > { %15616 = vmatprep.subr.bf16.mxu1 %v23119_v55  ;;  %v20375_v7 = vpack.c.bf16 %v10757_v61, %v10756_v20 }
 0x2bd   : > { %13944 = vmatmul.mubr.f32.vlgmr.msra.gmra.mrb[12].mxu0 %v19559_v8  ;;  %23225 = vst [vmem:[#allocation154_spill] sm:$0xff] %v20342_v42  ;;  %23226 = vst [vmem:[#allocation155_spill] sm:$0xff] %v20344_v13 }
 0x2be   : > { %1844 = vmatmul.mubr.f32.vlgmr.msra.gmra.mrb[12].mxu1 %v19326_v45  ;;  %15587 = vmatpush3.bf16.msra.mxu0 %v20308_v14  ;;  %v10739_v45 = vld [vmem:[%s22698_s5 + $0x8a8] sm:$0xff]  ;;  %23229 = vst [vmem:[#allocation158_spill] sm:$0xff] %v20375_v7 }
 0x2bf   : > { %1913 = vmatprep.mubr.f32.mxu0 %v19317_v30  ;;  %15618 = vmatpush3.bf16.msra.mxu1 %v20312_v29  ;;  %v10771_v30 = vld [vmem:[%s22698_s5 + $0x9a8] sm:$0xff]  ;;  %v20369_v32 = vpack.c.bf16 %v10739_v45, %v10738_v15  ;;  %v10741_v29 = vld [vmem:[%s22698_s5 + $0x8b8] sm:$0xff]  ;;  %v10772_v15 = vld [vmem:[%s22698_s5 + $0x9b0] sm:$0xff] }
 0x2c0   : > { %15589 = vmatprep.subr.bf16.mxu0 %v20324_v36  ;;  %15619 = vmatprep.subr.bf16.mxu1 %v23119_v55  ;;  %v20373_v44 = vpack.c.bf16 %v10771_v30, %v10770_v3  ;;  %v10740_v36 = vld [vmem:[%s22698_s5 + $0x8b0] sm:$0xff]  ;;  %v10773_v45 = vld [vmem:[%s22698_s5 + $0x9b8] sm:$0xff]  ;;  %v10758_v3 = vld [vmem:[%s22698_s5 + $0x940] sm:$0xff] }
 0x2c1   : > { %13978 = vmatprep.mubr.msk.f32.mxu1 %vm18657_vm1, %v23121_v11  ;;  %23227 = vst [vmem:[#allocation156_spill] sm:$0xff] %v20369_v32  ;;  %v10759_v30 = vld [vmem:[%s22698_s5 + $0x948] sm:$0xff]  ;;  %v20397_v20 = vpack.c.bf16 %v10741_v29, %v10740_v36  ;;  %v20401_v61 = vpack.c.bf16 %v10773_v45, %v10772_v15  ;;  %v10774_v29 = vld [vmem:[%s22698_s5 + $0x9c0] sm:$0xff]  ;;  %v10760_v15 = vld [vmem:[%s22698_s5 + $0x950] sm:$0xff] }
 0x2c2   : > { %15591 = vmatpush3.bf16.msra.mxu0 %v20338_v6  ;;  %23228 = vst [vmem:[#allocation157_spill] sm:$0xff] %v20373_v44  ;;  %v10743_v6 = vld [vmem:[%s22698_s5 + $0x8c8] sm:$0xff]  ;;  %v10761_v45 = vld [vmem:[%s22698_s5 + $0x958] sm:$0xff] }
 0x2c3   : > { %15621 = vmatpush3.bf16.msra.mxu1 %v20342_v42  ;;  %15593 = vmatprep.subr.bf16.mxu0 %v20344_v13  ;;  %23230 = vst [vmem:[#allocation159_spill] sm:$0xff] %v20397_v20  ;;  %23231 = vst [vmem:[#allocation160_spill] sm:$0xff] %v20401_v61  ;;  %v20403_v13 = vpack.c.bf16 %v10759_v30, %v10758_v3  ;;  %v10742_v42 = vld [vmem:[%s22698_s5 + $0x8c0] sm:$0xff]  ;;  %v10775_v36 = vld [vmem:[%s22698_s5 + $0x9c8] sm:$0xff] }
 0x2c4   : > { %15622 = vmatprep.subr.bf16.mxu1 %v23119_v55  ;;  %v20425_v3 = vpack.c.bf16 %v10743_v6, %v10742_v42  ;;  %v20429_v30 = vpack.c.bf16 %v10775_v36, %v10774_v29  ;;  %v10776_v6 = vld [vmem:[%s22698_s5 + $0x9d0] sm:$0xff]  ;;  %v10777_v42 = vld [vmem:[%s22698_s5 + $0x9d8] sm:$0xff]  ;;  %v10762_v29 = vld [vmem:[%s22698_s5 + $0x960] sm:$0xff] }
 0x2c5   : > { %23232 = vst [vmem:[#allocation161_spill] sm:$0xff] %v20403_v13  ;;  %v10763_v36 = vld [vmem:[%s22698_s5 + $0x968] sm:$0xff] }
 0x2c6   : > { %15595 = vmatpush3.bf16.msra.mxu0 %v20369_v32  ;;  %23233 = vst [vmem:[#allocation162_spill] sm:$0xff] %v20425_v3  ;;  %23234 = vst [vmem:[#allocation163_spill] sm:$0xff] %v20429_v30  ;;  %v10745_v32 = vld [vmem:[%s22698_s5 + $0x8d8] sm:$0xff] }
 0x2c7   : > { %15624 = vmatpush3.bf16.msra.mxu1 %v20373_v44  ;;  %15597 = vmatprep.subr.bf16.mxu0 %v20375_v7  ;;  %v20431_v7 = vpack.c.bf16 %v10761_v45, %v10760_v15  ;;  %v10744_v44 = vld [vmem:[%s22698_s5 + $0x8d0] sm:$0xff]  ;;  %v20457_v45 = vpack.c.bf16 %v10777_v42, %v10776_v6  ;;  %v10765_v42 = vld [vmem:[%s22698_s5 + $0x978] sm:$0xff] }
 0x2c8   : > { %15625 = vmatprep.subr.bf16.mxu1 %v23119_v55  ;;  %v20453_v15 = vpack.c.bf16 %v10745_v32, %v10744_v44  ;;  %v10778_v32 = vld [vmem:[%s22698_s5 + $0x9e0] sm:$0xff]  ;;  %v10779_v44 = vld [vmem:[%s22698_s5 + $0x9e8] sm:$0xff]  ;;  %v10764_v6 = vld [vmem:[%s22698_s5 + $0x970] sm:$0xff] }
 0x2c9   : > { %23235 = vst [vmem:[#allocation164_spill] sm:$0xff] %v20431_v7  ;;  %23237 = vst [vmem:[#allocation166_spill] sm:$0xff] %v20457_v45 }
 0x2ca   : > { %15599 = vmatpush3.bf16.msra.mxu0 %v20397_v20  ;;  %23236 = vst [vmem:[#allocation165_spill] sm:$0xff] %v20453_v15  ;;  %v10747_v20 = vld [vmem:[%s22698_s5 + $0x8e8] sm:$0xff] }
 0x2cb   : > { %15627 = vmatpush3.bf16.msra.mxu1 %v20401_v61  ;;  %15601 = vmatprep.subr.bf16.mxu0 %v20403_v13  ;;  %v20459_v13 = vpack.c.bf16 %v10763_v36, %v10762_v29  ;;  %v10746_v61 = vld [vmem:[%s22698_s5 + $0x8e0] sm:$0xff]  ;;  %v20485_v36 = vpack.c.bf16 %v10779_v44, %v10778_v32 }
 0x2cc   : > { %15628 = vmatprep.subr.bf16.mxu1 %v23119_v55  ;;  %v20481_v29 = vpack.c.bf16 %v10747_v20, %v10746_v61  ;;  %v10780_v20 = vld [vmem:[%s22698_s5 + $0x9f0] sm:$0xff]  ;;  %v10781_v61 = vld [vmem:[%s22698_s5 + $0x9f8] sm:$0xff] }
 0x2cd   : > { %23238 = vst [vmem:[#allocation167_spill] sm:$0xff] %v20459_v13  ;;  %23240 = vst [vmem:[#allocation169_spill] sm:$0xff] %v20485_v36  ;;  %v20507_v44 = vpack.c.bf16 %v10781_v61, %v10780_v20 }
 0x2ce   : > { %15603 = vmatpush3.bf16.msra.mxu0 %v20425_v3  ;;  %23239 = vst [vmem:[#allocation168_spill] sm:$0xff] %v20481_v29  ;;  %v10749_v3 = vld [vmem:[%s22698_s5 + $0x8f8] sm:$0xff] }
 0x2cf   : > { %15630 = vmatpush3.bf16.msra.mxu1 %v20429_v30  ;;  %15605 = vmatprep.subr.bf16.mxu0 %v20431_v7  ;;  %v20487_v7 = vpack.c.bf16 %v10765_v42, %v10764_v6  ;;  %v10748_v30 = vld [vmem:[%s22698_s5 + $0x8f0] sm:$0xff]  ;;  %23243 = vst [vmem:[#allocation172_spill] sm:$0xff] %v20507_v44 }
 0x2d0   : > { %15631 = vmatprep.subr.bf16.mxu1 %v23119_v55  ;;  %v20503_v32 = vpack.c.bf16 %v10749_v3, %v10748_v30  ;;  %v10797_v3 = vld [vmem:[%s18730_s23 + $0x8] sm:$0xff]  ;;  %v20538_v30 = vld [vmem:[%s22699_s6] ss:$0 sm:$0xff] }
 0x2d1   : > { %23241 = vst [vmem:[#allocation170_spill] sm:$0xff] %v20487_v7  ;;  %2004 = vrot.lane.b32.xlu0 %v10797_v3, %s18655_s12  ;;  %23244 = vst [vmem:[#allocation173_spill] sm:$0xff] %v20538_v30 }
 0x2d2   : > { %15607 = vmatpush3.bf16.msra.mxu0 %v20453_v15  ;;  %23242 = vst [vmem:[#allocation171_spill] sm:$0xff] %v20503_v32 }
 0x2d3   : > { %15633 = vmatpush3.bf16.msra.mxu1 %v20457_v45  ;;  %15609 = vmatprep.subr.bf16.mxu0 %v20459_v13 }
 0x2d4   : > { %15634 = vmatprep.subr.bf16.mxu1 %v23119_v55 }
 0x2d6   : > { %15611 = vmatpush3.bf16.msra.mxu0 %v20481_v29 }
 0x2d7   : > { %15636 = vmatpush3.bf16.msra.mxu1 %v20485_v36  ;;  %15613 = vmatprep.subr.bf16.mxu0 %v20487_v7 }
 0x2d8   : > { %15637 = vmatprep.subr.bf16.mxu1 %v23119_v55 }
 0x2da   : > { %15615 = vmatpush3.bf16.msra.mxu0 %v20503_v32 }
 0x2db   : > { %15639 = vmatpush3.bf16.msra.mxu1 %v20507_v44  ;;  %15640 = vmatprep.subr.bf16.mxu0 %v23119_v55 }
 0x2dc   : > { %15650 = vmatprep.subr.bf16.mxu1 %v18779_v16 }
 0x2dd   : > { %1914 = vmatmul.mubr.f32.vlgmr.msra.gmra.mrb[14].mxu0 %v19328_v43 }
 0x2de   : > { %13979 = vmatmul.mubr.f32.vlgmr.msra.gmra.mrb[14].mxu1 %v19559_v8  ;;  %15642 = vmatpush3.bf16.msra.mxu0 %v18746_v5 }
 0x2df   : > { %15643 = vmatprep.subr.bf16.mxu0 %v23119_v55  ;;  %13993 = vmatprep.mubr.msk.f32.mxu0 %vm18657_vm1, %v23121_v11 }
 0x2e0   : > { %15652 = vmatpush1.bf16.msra.mxu1 %v18781_v17  ;;  %2149 = vmatprep.mubr.f32.mxu1 %v23121_v11 }
 0x2e1   : > { %15654 = vmatprep.subr.bf16.mxu1 %v18796_v22 }
 0x2e2   : > { %15645 = vmatpush3.bf16.msra.mxu0 %v18761_v10  ;;  %v20544_v10 = vld [vmem:[%s22699_s6 + $0x1] ss:$0 sm:$0xff] }
 0x2e3   : > { %15646 = vmatprep.subr.bf16.mxu0 %v23119_v55  ;;  %23245 = vst [vmem:[#allocation174_spill] sm:$0xff] %v20544_v10 }
 0x2e4   : > { %15656 = vmatpush1.bf16.msra.mxu1 %v18808_v26 }
 0x2e5   : > { %15658 = vmatprep.subr.bf16.mxu1 %v18823_v31 }
 0x2e6   : > { %15648 = vmatpush3.bf16.msra.mxu0 %v18805_v25 }
 0x2e7   : > { %15666 = vmatprep.subr.bf16.mxu0 %v18811_v27 }
 0x2e8   : > { %15660 = vmatpush1.bf16.msra.mxu1 %v18830_v33 }
 0x2e9   : > { %15662 = vmatprep.subr.bf16.mxu1 %v18889_v54 }
 0x2ec   : > { %15664 = vmatpush1.bf16.msra.mxu1 %v18900_v58 }
 0x2ed   : > { %15681 = vmatprep.subr.bf16.mxu1 %v23119_v55 }
 0x310   : > { %v10921_v43 = vpop.f32.mrb[4].mxu0  ;;  %v10956_v8 = vpop.f32.mrb[4].mxu1 }
 0x311   : > { %v10922_v6 = vpop.f32.mrb[5].mxu0  ;;  %v10957_v42 = vpop.f32.mrb[5].mxu1 }
 0x312   : > { %v10923_v20 = vadd.f32 %v10922_v6, %v10921_v43  ;;  %v10958_v61 = vadd.f32 %v10957_v42, %v10956_v8 }
 0x314   : > { %v1185_v3 = vadd.f32 %v10923_v20, %v20538_v30 }
 0x316   : > { %v1255_v33 = vadd.f32 %v10958_v61, %v1185_v3 }
 0x330   : > { %v1324_v27 = vpop.f32.mrb[6].mxu0  ;;  %v11008_v54 = vpop.f32.mrb[6].mxu1 }
 0x331   : > { %v1325_v25 = vadd.f32 %v1324_v27, %v1255_v33  ;;  %v13875_v58 = vpop.f32.mrb[7].mxu0  ;;  %v11009_v31 = vpop.f32.mrb[7].mxu1  ;;  %v20550_v27 = vld [vmem:[%s22699_s6 + $0x2] ss:$0 sm:$0xff] }
 0x332   : > { %v11010_v26 = vadd.f32 %v11009_v31, %v11008_v54 }
 0x334   : > { %v1407_v43 = vadd.f32 %v11010_v26, %v20544_v10  ;;  %v10791_v26 = vmul.f32 -1.442695, %v1325_v25 }
 0x350   : > { %v11043_v22 = vpop.f32.mrb[8].mxu0 }
 0x351   : > { %v1546_v17 = vpop.f32.mrb[8].mxu1  ;;  %v11044_v5 = vpop.f32.mrb[9].mxu0 }
 0x352   : > { %v11045_v8 = vadd.f32 %v11044_v5, %v11043_v22  ;;  %v13910_v6 = vpop.f32.mrb[9].mxu1 }
 0x354   : > { %v1477_v42 = vadd.f32 %v11045_v8, %v1407_v43 }
 0x356   : > { %v1547_v20 = vadd.f32 %v1546_v17, %v1477_v42 }
 0x358   : > { %v10793_v44 = vmul.f32 -1.442695, %v1547_v20 }
 0x35a   : > { %18502 = vpow2.f32 %v10793_v44 }
 0x35b   : > { %18504 = vpow2.f32 %v10791_v26 }
 0x364   : > { %v18503_v5 = vpop.eup %18502 }
 0x365   : > { %v18505_v17 = vpop.eup %18504  ;;  %v1553_v22 = vadd.f32 1.0, %v18503_v5 }
 0x366   : > { %v1331_v43 = vadd.f32 1.0, %v18505_v17 }
 0x367   : > { %18506 = vrcp.f32 %v1553_v22 }
 0x368   : > { %18508 = vrcp.f32 %v1331_v43 }
 0x370   : > { %v11095_v61 = vpop.f32.mrb[10].mxu0 }
 0x371   : > { %v11130_v3 = vpop.f32.mrb[10].mxu1  ;;  %v11096_v31 = vpop.f32.mrb[11].mxu0 }
 0x372   : > { %v11097_v33 = vadd.f32 %v11096_v31, %v11095_v61  ;;  %v11131_v54 = vpop.f32.mrb[11].mxu1  ;;  %v18507_v31 = vpop.eup %18506 }
 0x373   : > { %v11132_v58 = vadd.f32 %v11131_v54, %v11130_v3 }
 0x374   : > { %v1629_v30 = vadd.f32 %v11097_v33, %v20550_v27  ;;  %v776_v33 = vld [vmem:[#allocation3] sm:$0xff] }
 0x375   : > { %v1995_v25 = vmul.f32 %v18507_v31, %v776_v33 }
 0x376   : > { %v1699_v16 = vadd.f32 %v11132_v58, %v1629_v30  ;;  %v18509_v30 = vpop.eup %18508  ;;  %v20558_v58 = vld [vmem:[%s22699_s6 + $0x3] ss:$0 sm:$0xff] }
 0x390   : > { %v1768_v8 = vpop.f32.mrb[12].mxu0 }
 0x391   : > { %v1769_v6 = vadd.f32 %v1768_v8, %v1699_v16  ;;  %v11182_v42 = vpop.f32.mrb[12].mxu1  ;;  %v13945_v10 = vpop.f32.mrb[13].mxu0 }
 0x392   : > { %v11183_v61 = vpop.f32.mrb[13].mxu1 }
 0x393   : > { %18510 = vtanh.f32 %v1769_v6  ;;  %v11184_v3 = vadd.f32 %v11183_v61, %v11182_v42 }
 0x395   : > { %v1846_v5 = vadd.f32 %v11184_v3, %v20558_v58 }
 0x39d   : > { %v18511_v20 = vpop.eup %18510 }
 0x39e   : > { %v1996_v44 = vmul.f32 %v18511_v20, %v18509_v30  ;;  %v2005_v30 = vpop.permute.xlu0 %2004 }
 0x3a0   : > { %v20553_v54 = vadd.f32 %v1996_v44, %v1995_v25  ;;  %v20577_v44 = vld [vmem:[%s22695_s2] ss:$0 sm:$0xff] }
 0x3b0   : > { %v11217_v16 = vpop.f32.mrb[14].mxu0 }
 0x3b1   : > { %v1985_v26 = vpop.f32.mrb[14].mxu1  ;;  %v11218_v10 = vpop.f32.mrb[15].mxu0 }
 0x3b2   : > { %v11219_v17 = vadd.f32 %v11218_v10, %v11217_v16  ;;  %v13980_v22 = vpop.f32.mrb[15].mxu1 }
 0x3b3   : > { %v23248_v22 = vld [vmem:[#allocation27_spill] sm:$0xff] }
 0x3b4   : > { %v1916_v43 = vadd.f32 %v11219_v17, %v1846_v5  ;;  %v23246_v5 = vld [vmem:[#allocation25_spill] sm:$0xff]  ;;  %v23247_v17 = vld [vmem:[#allocation26_spill] sm:$0xff] }
 0x3b6   : > { %v1986_v8 = vadd.f32 %v1985_v26, %v1916_v43  ;;  %v23249_v43 = vld [vmem:[#allocation28_spill] sm:$0xff] }
 0x3b8   : > { %v10796_v6 = vmul.f32 -1.442695, %v1986_v8  ;;  %v23250_v8 = vld [vmem:[#allocation36_spill] sm:$0xff] }
 0x3ba   : > { %18512 = vpow2.f32 %v10796_v6  ;;  %v23251_v6 = vld [vmem:[#allocation29_spill] sm:$0xff] }
 0x3bb   : > { %18514 = vtanh.f32 %v20553_v54 }
 0x3c4   : > { %v18513_v42 = vpop.eup %18512 }
 0x3c5   : > { %v1992_v61 = vadd.f32 1.0, %v18513_v42  ;;  %v18515_v31 = vpop.eup %18514  ;;  %v23252_v42 = vld [vmem:[#allocation30_spill] sm:$0xff] }
 0x3c7   : > { %18516 = vrcp.f32 %v1992_v61  ;;  %v23253_v61 = vld [vmem:[#allocation38_spill] sm:$0xff] }
 0x3d1   : > { %v18517_v33 = vpop.eup %18516 }
 0x3d2   : > { %v1999_v20 = vmul.f32 %v18517_v33, %v18515_v31  ;;  %v23254_v31 = vld [vmem:[#allocation31_spill] sm:$0xff]  ;;  %v23255_v33 = vld [vmem:[#allocation32_spill] sm:$0xff] }
 0x3d4   : > { %2000 = vst.msk [vmem:[#allocation4] sm:$0xff] %vm782_vm2, %v1999_v20  ;;  %v2007_v25 = vsel %vm782_vm2, %v1999_v20, %v2005_v30  ;;  %v23256_v30 = vld [vmem:[#allocation33_spill] sm:$0xff]  ;;  %v23257_v20 = vld [vmem:[#allocation34_spill] sm:$0xff] }
 0x3d5   : > { %13994 = vmatmul.mubr.msk.f32.vlgmr.msra.gmra.mrb[16].mxu0 %vm790_vm3, %v2007_v25  ;;  %v23258_v25 = vld [vmem:[#allocation35_spill] sm:$0xff] }
 0x3d6   : > { %15668 = vmatpush1.bf16.msra.mxu0 %v18847_v39  ;;  %2220 = vmatprep.mubr.f32.mxu0 %v23121_v11 }
 0x3d7   : > { %15670 = vmatprep.subr.bf16.mxu0 %v18849_v41 }
 0x3da   : > { %15672 = vmatpush1.bf16.msra.mxu0 %v18866_v47 }
 0x3db   : > { %15674 = vmatprep.subr.bf16.mxu0 %v18870_v48 }
 0x3de   : > { %15676 = vmatpush1.bf16.msra.mxu0 %v18879_v51 }
 0x3df   : > { %15678 = vmatprep.subr.bf16.mxu0 %v18912_v62 }
 0x3e2   : > { %15680 = vmatpush1.bf16.msra.mxu0 %v18914_v63 }
 0x3e3   : > { %15694 = vmatprep.subr.bf16.mxu0 %v18926_v2 }
 0x4a8   : > { %v2077_v3 = vpop.f32.mrb[16].mxu0 }
 0x4a9   : > { %v2078_v16 = vadd.f32 %v20577_v44, %v2077_v3  ;;  %v13995_v26 = vpop.f32.mrb[17].mxu0  ;;  %v23259_v3 = vld [vmem:[#allocation37_spill] sm:$0xff] }
 0x4aa   : > { %v23261_v26 = vld [vmem:[#allocation40_spill] sm:$0xff] }
 0x4ab   : > { %v2081_v10 = vmax.f32 %v2078_v16, 0.0  ;;  %v23260_v16 = vld [vmem:[#allocation39_spill] sm:$0xff] }
 0x4ad   : > { %10799 = vmatmul.mubr.msk.f32.vlgmr.msra.gmra.mrb[16].mxu1 %vm891_vm4, %v2081_v10  ;;  %10800 = vmatmul.mubr.msk.f32.vlgmr.msra.gmra.mrb[18].mxu0 %vm891_vm4, %v2081_v10 }
 0x4ae   : > { %15683 = vmatpush3.bf16.msra.mxu1 %v18950_v19  ;;  %14012 = vmatprep.mubr.msk.f32.mxu1 %vm18657_vm1, %v23121_v11 }
 0x4af   : > { %15684 = vmatprep.subr.bf16.mxu1 %v23119_v55  ;;  %15696 = vmatpush3.bf16.msra.mxu0 %v18960_v24 }
 0x4b0   : > { %15698 = vmatprep.subr.bf16.mxu0 %v18962_v28 }
 0x4b2   : > { %15686 = vmatpush3.bf16.msra.mxu1 %v18981_v35 }
 0x4b3   : > { %15687 = vmatprep.subr.bf16.mxu1 %v23119_v55  ;;  %15700 = vmatpush3.bf16.msra.mxu0 %v18993_v38 }
 0x4b4   : > { %15702 = vmatprep.subr.bf16.mxu0 %v18996_v40 }
 0x4b6   : > { %15689 = vmatpush3.bf16.msra.mxu1 %v19011_v46 }
 0x4b7   : > { %15690 = vmatprep.subr.bf16.mxu1 %v23119_v55  ;;  %15704 = vmatpush3.bf16.msra.mxu0 %v19024_v53 }
 0x4b8   : > { %15706 = vmatprep.subr.bf16.mxu0 %v19030_v56 }
 0x4ba   : > { %15692 = vmatpush3.bf16.msra.mxu1 %v19045_v0 }
 0x4bb   : > { %15726 = vmatprep.subr.bf16.mxu1 %v19048_v1  ;;  %15708 = vmatpush3.bf16.msra.mxu0 %v19060_v9 }
 0x4bc   : > { %15710 = vmatprep.subr.bf16.mxu0 %v19066_v12 }
 0x4bd   : > { %14013 = vmatmul.mubr.msk.f32.vlgmr.msra.gmra.mrb[18].mxu1 %vm891_vm4, %v2081_v10 }
 0x4be   : > { %15728 = vmatpush3.bf16.msra.mxu1 %v19081_v21 }
 0x4bf   : > { %15730 = vmatprep.subr.bf16.mxu1 %v19084_v23  ;;  %15712 = vmatpush3.bf16.msra.mxu0 %v19096_v34 }
 0x4c0   : > { %15714 = vmatprep.subr.bf16.mxu0 %v19102_v37 }
 0x4c2   : > { %15732 = vmatpush3.bf16.msra.mxu1 %v19119_v49 }
 0x4c3   : > { %15734 = vmatprep.subr.bf16.mxu1 %v19122_v50  ;;  %15716 = vmatpush3.bf16.msra.mxu0 %v19134_v57 }
 0x4c4   : > { %15718 = vmatprep.subr.bf16.mxu0 %v23246_v5 }
 0x4c6   : > { %15736 = vmatpush3.bf16.msra.mxu1 %v23247_v17  ;;  %v23265_v17 = vld [vmem:[#allocation44_spill] sm:$0xff] }
 0x4c7   : > { %15738 = vmatprep.subr.bf16.mxu1 %v23248_v22  ;;  %15720 = vmatpush3.bf16.msra.mxu0 %v23249_v43  ;;  %v23264_v22 = vld [vmem:[#allocation43_spill] sm:$0xff] }
 0x4c8   : > { %15722 = vmatprep.subr.bf16.mxu0 %v23250_v8  ;;  %v23263_v8 = vld [vmem:[#allocation42_spill] sm:$0xff] }
 0x4ca   : > { %15740 = vmatpush3.bf16.msra.mxu1 %v23251_v6 }
 0x4cb   : > { %15742 = vmatprep.subr.bf16.mxu1 %v23252_v42  ;;  %15724 = vmatpush3.bf16.msra.mxu0 %v23253_v61  ;;  %v23262_v42 = vld [vmem:[#allocation41_spill] sm:$0xff] }
 0x4cc   : > { %15757 = vmatprep.subr.bf16.mxu0 %v23119_v55 }
 0x4ce   : > { %15744 = vmatpush3.bf16.msra.mxu1 %v23254_v31 }
 0x4cf   : > { %15746 = vmatprep.subr.bf16.mxu1 %v23255_v33 }
 0x4d2   : > { %15748 = vmatpush3.bf16.msra.mxu1 %v23256_v30 }
 0x4d3   : > { %15750 = vmatprep.subr.bf16.mxu1 %v23257_v20 }
 0x4d6   : > { %15752 = vmatpush3.bf16.msra.mxu1 %v23258_v25 }
 0x4d7   : > { %15754 = vmatprep.subr.bf16.mxu1 %v23259_v3 }
 0x4da   : > { %15756 = vmatpush3.bf16.msra.mxu1 %v23260_v16 }
 0x4db   : > { %15782 = vmatprep.subr.bf16.mxu1 %v23261_v26 }
 0x580   : > { %v2151_v10 = vpop.f32.mrb[16].mxu1  ;;  %v2222_v61 = vpop.f32.mrb[18].mxu0 }
 0x581   : > { %v2152_v6 = vadd.f32 %v2151_v10, %v23262_v42  ;;  %v2223_v31 = vadd.f32 %v2222_v61, %v23263_v8  ;;  %v2153_v43 = vpop.f32.mrb[17].mxu1  ;;  %v2224_v33 = vpop.f32.mrb[19].mxu0  ;;  %v23266_v61 = vld [vmem:[#allocation45_spill] sm:$0xff]  ;;  %v23272_v10 = vld [vmem:[#allocation51_spill] sm:$0xff] }
 0x582   : > { %v2154_v30 = vadd.f32 %v2153_v43, %v23264_v22  ;;  %v2225_v20 = vadd.f32 %v2224_v33, %v23265_v17  ;;  %v23267_v43 = vld [vmem:[#allocation46_spill] sm:$0xff]  ;;  %v23270_v33 = vld [vmem:[#allocation49_spill] sm:$0xff]  ;;  %v23276_v22 = vld [vmem:[#allocation55_spill] sm:$0xff] }
 0x583   : > { %v20633_v3 = vmax.f32 %v2152_v6, 0.0  ;;  %v20635_v16 = vmax.f32 %v2223_v31, 0.0  ;;  %v23268_v6 = vld [vmem:[#allocation47_spill] sm:$0xff]  ;;  %v23269_v31 = vld [vmem:[#allocation48_spill] sm:$0xff]  ;;  %v23275_v17 = vld [vmem:[#allocation54_spill] sm:$0xff] }
 0x584   : > { %v20629_v5 = vmax.f32 %v2154_v30, 0.0  ;;  %v20631_v25 = vmax.f32 %v2225_v20, 0.0  ;;  %v23271_v30 = vld [vmem:[#allocation50_spill] sm:$0xff]  ;;  %v23288_v8 = vld [vmem:[#allocation67_spill] sm:$0xff] }
 0x585   : > { %v23328_v42 = vld [vmem:[#allocation107_spill] sm:$0xff] }
 0x586   : > { %2366 = vmatprep.mubr.f32.mxu0 %v20629_v5  ;;  %2436 = vmatprep.mubr.f32.mxu1 %v20631_v25 }
 0x587   : > { %2367 = vmatmul.mubr.f32.vlgmr.msra.gmra.mrb[20].mxu0 %v20633_v3  ;;  %2437 = vmatmul.mubr.f32.vlgmr.msra.gmra.mrb[20].mxu1 %v20635_v16 }
 0x588   : > { %15759 = vmatpush3.bf16.msra.mxu0 %v23266_v61  ;;  %15784 = vmatpush3.bf16.msra.mxu1 %v23267_v43  ;;  %v23273_v43 = vld [vmem:[#allocation52_spill] sm:$0xff] }
 0x589   : > { %2582 = vmatprep.mubr.f32.mxu1 %v20629_v5  ;;  %15760 = vmatprep.subr.bf16.mxu0 %v23119_v55 }
 0x58a   : > { %15786 = vmatprep.subr.bf16.mxu1 %v23268_v6  ;;  %14047 = vmatprep.mubr.msk.f32.mxu0 %vm18657_vm1, %v23121_v11  ;;  %v23274_v6 = vld [vmem:[#allocation53_spill] sm:$0xff] }
 0x58c   : > { %15762 = vmatpush3.bf16.msra.mxu0 %v23269_v31  ;;  %15788 = vmatpush3.bf16.msra.mxu1 %v23270_v33  ;;  %v23277_v33 = vld [vmem:[#allocation56_spill] sm:$0xff]  ;;  %v23278_v31 = vld [vmem:[#allocation57_spill] sm:$0xff] }
 0x58d   : > { %15763 = vmatprep.subr.bf16.mxu0 %v23119_v55  ;;  %15790 = vmatprep.subr.bf16.mxu1 %v23271_v30  ;;  %v23279_v30 = vld [vmem:[#allocation58_spill] sm:$0xff] }
 0x590   : > { %v2293_v20 = vpop.f32.mrb[18].mxu1  ;;  %15765 = vmatpush3.bf16.msra.mxu0 %v23272_v10  ;;  %15792 = vmatpush3.bf16.msra.mxu1 %v23273_v43  ;;  %v23280_v43 = vld [vmem:[#allocation59_spill] sm:$0xff]  ;;  %v23282_v10 = vld [vmem:[#allocation61_spill] sm:$0xff] }
 0x591   : > { %v14014_v61 = vpop.f32.mrb[19].mxu1  ;;  %15766 = vmatprep.subr.bf16.mxu0 %v23119_v55  ;;  %15794 = vmatprep.subr.bf16.mxu1 %v23274_v6  ;;  %v23285_v6 = vld [vmem:[#allocation64_spill] sm:$0xff] }
 0x592   : > { %v23281_v61 = vld [vmem:[#allocation60_spill] sm:$0xff] }
 0x594   : > { %15768 = vmatpush3.bf16.msra.mxu0 %v23275_v17  ;;  %15796 = vmatpush3.bf16.msra.mxu1 %v23276_v22  ;;  %v23283_v17 = vld [vmem:[#allocation62_spill] sm:$0xff]  ;;  %v23284_v22 = vld [vmem:[#allocation63_spill] sm:$0xff] }
 0x595   : > { %15769 = vmatprep.subr.bf16.mxu0 %v23119_v55  ;;  %15798 = vmatprep.subr.bf16.mxu1 %v23277_v33  ;;  %v23286_v33 = vld [vmem:[#allocation65_spill] sm:$0xff] }
 0x598   : > { %15771 = vmatpush3.bf16.msra.mxu0 %v23278_v31  ;;  %15800 = vmatpush3.bf16.msra.mxu1 %v23279_v30  ;;  %v2294_v31 = vadd.f32 %v2293_v20, %v23286_v33  ;;  %v23287_v30 = vld [vmem:[#allocation66_spill] sm:$0xff]  ;;  %v23292_v20 = vld [vmem:[#allocation71_spill] sm:$0xff]  ;;  %v23301_v33 = vld [vmem:[#allocation80_spill] sm:$0xff] }
 0x599   : > { %15772 = vmatprep.subr.bf16.mxu0 %v23119_v55  ;;  %15802 = vmatprep.subr.bf16.mxu1 %v23280_v43  ;;  %v23289_v43 = vld [vmem:[#allocation68_spill] sm:$0xff] }
 0x59c   : > { %15774 = vmatpush3.bf16.msra.mxu0 %v23281_v61  ;;  %15804 = vmatpush3.bf16.msra.mxu1 %v23282_v10  ;;  %v20675_v61 = vmax.f32 %v2294_v31, 0.0  ;;  %v23290_v10 = vld [vmem:[#allocation69_spill] sm:$0xff] }
 0x59d   : > { %15775 = vmatprep.subr.bf16.mxu0 %v23119_v55  ;;  %15806 = vmatprep.subr.bf16.mxu1 %v23283_v17  ;;  %v23294_v31 = vld [vmem:[#allocation73_spill] sm:$0xff] }
 0x59e   : > { %v23326_v17 = vld [vmem:[#allocation105_spill] sm:$0xff] }
 0x5a0   : > { %15777 = vmatpush3.bf16.msra.mxu0 %v23284_v22  ;;  %15808 = vmatpush3.bf16.msra.mxu1 %v23285_v6  ;;  %v23291_v6 = vld [vmem:[#allocation70_spill] sm:$0xff]  ;;  %v23302_v22 = vld [vmem:[#allocation81_spill] sm:$0xff] }
 0x5a1   : > { %15778 = vmatprep.subr.bf16.mxu0 %v23119_v55  ;;  %15810 = vmatprep.subr.bf16.mxu1 %v23287_v30  ;;  %v23293_v30 = vld [vmem:[#allocation72_spill] sm:$0xff] }
 0x5a4   : > { %15780 = vmatpush3.bf16.msra.mxu0 %v23288_v8  ;;  %15812 = vmatpush3.bf16.msra.mxu1 %v23289_v43  ;;  %v23296_v43 = vld [vmem:[#allocation75_spill] sm:$0xff]  ;;  %v23298_v8 = vld [vmem:[#allocation77_spill] sm:$0xff] }
 0x5a5   : > { %15814 = vmatprep.subr.bf16.mxu0 %v23290_v10  ;;  %15845 = vmatprep.subr.bf16.mxu1 %v23119_v55  ;;  %v23295_v10 = vld [vmem:[#allocation74_spill] sm:$0xff] }
 0x5a7   : > { %14048 = vmatmul.mubr.f32.vlgmr.msra.gmra.mrb[22].mxu0 %v20675_v61  ;;  %2583 = vmatmul.mubr.f32.vlgmr.msra.gmra.mrb[22].mxu1 %v20633_v3 }
 0x5a8   : > { %15816 = vmatpush3.bf16.msra.mxu0 %v23291_v6  ;;  %2652 = vmatprep.mubr.f32.mxu0 %v20631_v25  ;;  %v23297_v6 = vld [vmem:[#allocation76_spill] sm:$0xff] }
 0x5a9   : > { %15847 = vmatpush3.bf16.msra.mxu1 %v23292_v20  ;;  %15818 = vmatprep.subr.bf16.mxu0 %v23293_v30  ;;  %v23299_v20 = vld [vmem:[#allocation78_spill] sm:$0xff]  ;;  %v23300_v30 = vld [vmem:[#allocation79_spill] sm:$0xff] }
 0x5aa   : > { %15848 = vmatprep.subr.bf16.mxu1 %v23119_v55  ;;  %14082 = vmatprep.mubr.msk.f32.mxu1 %vm18657_vm1, %v23121_v11 }
 0x5ac   : > { %15820 = vmatpush3.bf16.msra.mxu0 %v23294_v31  ;;  %v23305_v31 = vld [vmem:[#allocation84_spill] sm:$0xff] }
 0x5ad   : > { %15850 = vmatpush3.bf16.msra.mxu1 %v23295_v10  ;;  %15822 = vmatprep.subr.bf16.mxu0 %v23296_v43  ;;  %v23303_v10 = vld [vmem:[#allocation82_spill] sm:$0xff]  ;;  %v23304_v43 = vld [vmem:[#allocation83_spill] sm:$0xff] }
 0x5ae   : > { %15851 = vmatprep.subr.bf16.mxu1 %v23119_v55 }
 0x5b0   : > { %15824 = vmatpush3.bf16.msra.mxu0 %v23297_v6  ;;  %v23308_v6 = vld [vmem:[#allocation87_spill] sm:$0xff] }
 0x5b1   : > { %15853 = vmatpush3.bf16.msra.mxu1 %v23298_v8  ;;  %15826 = vmatprep.subr.bf16.mxu0 %v23299_v20  ;;  %v23306_v8 = vld [vmem:[#allocation85_spill] sm:$0xff]  ;;  %v23307_v20 = vld [vmem:[#allocation86_spill] sm:$0xff] }
 0x5b2   : > { %15854 = vmatprep.subr.bf16.mxu1 %v23119_v55 }
 0x5b4   : > { %15828 = vmatpush3.bf16.msra.mxu0 %v23300_v30  ;;  %v23311_v30 = vld [vmem:[#allocation90_spill] sm:$0xff] }
 0x5b5   : > { %15856 = vmatpush3.bf16.msra.mxu1 %v23301_v33  ;;  %15830 = vmatprep.subr.bf16.mxu0 %v23302_v22  ;;  %v23309_v33 = vld [vmem:[#allocation88_spill] sm:$0xff]  ;;  %v23310_v22 = vld [vmem:[#allocation89_spill] sm:$0xff] }
 0x5b6   : > { %15857 = vmatprep.subr.bf16.mxu1 %v23119_v55 }
 0x5b8   : > { %15832 = vmatpush3.bf16.msra.mxu0 %v23303_v10  ;;  %v23314_v10 = vld [vmem:[#allocation93_spill] sm:$0xff] }
 0x5b9   : > { %15859 = vmatpush3.bf16.msra.mxu1 %v23304_v43  ;;  %15834 = vmatprep.subr.bf16.mxu0 %v23305_v31  ;;  %v23312_v43 = vld [vmem:[#allocation91_spill] sm:$0xff]  ;;  %v23313_v31 = vld [vmem:[#allocation92_spill] sm:$0xff] }
 0x5ba   : > { %15860 = vmatprep.subr.bf16.mxu1 %v23119_v55 }
 0x5bc   : > { %15836 = vmatpush3.bf16.msra.mxu0 %v23306_v8  ;;  %v23315_v8 = vld [vmem:[#allocation94_spill] sm:$0xff] }
 0x5bd   : > { %15862 = vmatpush3.bf16.msra.mxu1 %v23307_v20  ;;  %15838 = vmatprep.subr.bf16.mxu0 %v23308_v6  ;;  %v23316_v6 = vld [vmem:[#allocation95_spill] sm:$0xff] }
 0x5be   : > { %15863 = vmatprep.subr.bf16.mxu1 %v23119_v55  ;;  %v23324_v20 = vld [vmem:[#allocation103_spill] sm:$0xff] }
 0x5c0   : > { %15840 = vmatpush3.bf16.msra.mxu0 %v23309_v33  ;;  %v23323_v33 = vld [vmem:[#allocation102_spill] sm:$0xff] }
 0x5c1   : > { %15865 = vmatpush3.bf16.msra.mxu1 %v23310_v22  ;;  %15842 = vmatprep.subr.bf16.mxu0 %v23311_v30  ;;  %v23317_v22 = vld [vmem:[#allocation96_spill] sm:$0xff]  ;;  %v23318_v30 = vld [vmem:[#allocation97_spill] sm:$0xff] }
 0x5c2   : > { %15866 = vmatprep.subr.bf16.mxu1 %v23119_v55 }
 0x5c4   : > { %15844 = vmatpush3.bf16.msra.mxu0 %v23312_v43  ;;  %v23319_v43 = vld [vmem:[#allocation98_spill] sm:$0xff] }
 0x5c5   : > { %15868 = vmatpush3.bf16.msra.mxu1 %v23313_v31  ;;  %15870 = vmatprep.subr.bf16.mxu0 %v23314_v10  ;;  %v23320_v31 = vld [vmem:[#allocation99_spill] sm:$0xff]  ;;  %v23321_v10 = vld [vmem:[#allocation100_spill] sm:$0xff] }
 0x5c6   : > { %15902 = vmatprep.subr.bf16.mxu1 %v23315_v8  ;;  %v23322_v8 = vld [vmem:[#allocation101_spill] sm:$0xff] }
 0x5c7   : > { %2653 = vmatmul.mubr.f32.vlgmr.msra.gmra.mrb[24].mxu0 %v20635_v16 }
 0x5c8   : > { %14083 = vmatmul.mubr.f32.vlgmr.msra.gmra.mrb[24].mxu1 %v20675_v61  ;;  %15872 = vmatpush3.bf16.msra.mxu0 %v23316_v6  ;;  %v23325_v6 = vld [vmem:[#allocation104_spill] sm:$0xff] }
 0x5c9   : > { %2798 = vmatprep.mubr.f32.mxu0 %v20629_v5  ;;  %15904 = vmatpush3.bf16.msra.mxu1 %v23317_v22  ;;  %v23327_v22 = vld [vmem:[#allocation106_spill] sm:$0xff] }
 0x5ca   : > { %2868 = vmatprep.mubr.f32.mxu1 %v20631_v25  ;;  %15874 = vmatprep.subr.bf16.mxu0 %v23318_v30  ;;  %v23329_v30 = vld [vmem:[#allocation108_spill] sm:$0xff] }
 0x5cb   : > { %15906 = vmatprep.subr.bf16.mxu1 %v23319_v43  ;;  %v23330_v43 = vld [vmem:[#allocation109_spill] sm:$0xff] }
 0x5cc   : > { %15876 = vmatpush3.bf16.msra.mxu0 %v23320_v31  ;;  %v23331_v31 = vld [vmem:[#allocation110_spill] sm:$0xff] }
 0x5cd   : > { %15908 = vmatpush3.bf16.msra.mxu1 %v23321_v10  ;;  %15878 = vmatprep.subr.bf16.mxu0 %v23322_v8  ;;  %v23332_v10 = vld [vmem:[#allocation111_spill] sm:$0xff]  ;;  %v23333_v8 = vld [vmem:[#allocation112_spill] sm:$0xff] }
 0x5ce   : > { %15910 = vmatprep.subr.bf16.mxu1 %v23323_v33  ;;  %v23334_v33 = vld [vmem:[#allocation113_spill] sm:$0xff] }
 0x5d0   : > { %15880 = vmatpush3.bf16.msra.mxu0 %v23324_v20  ;;  %v23335_v20 = vld [vmem:[#allocation114_spill] sm:$0xff] }
 0x5d1   : > { %15912 = vmatpush3.bf16.msra.mxu1 %v23325_v6  ;;  %15882 = vmatprep.subr.bf16.mxu0 %v23326_v17 }
 0x5d2   : > { %15914 = vmatprep.subr.bf16.mxu1 %v23327_v22  ;;  %v23336_v22 = vld [vmem:[#allocation117_spill] sm:$0xff] }
 0x5d4   : > { %15884 = vmatpush3.bf16.msra.mxu0 %v23328_v42  ;;  %v23337_v42 = vld [vmem:[#allocation118_spill] sm:$0xff] }
 0x5d5   : > { %15916 = vmatpush3.bf16.msra.mxu1 %v23329_v30  ;;  %15886 = vmatprep.subr.bf16.mxu0 %v23330_v43  ;;  %v23338_v43 = vld [vmem:[#allocation120_spill] sm:$0xff] }
 0x5d6   : > { %15918 = vmatprep.subr.bf16.mxu1 %v23331_v31  ;;  %v23339_v31 = vld [vmem:[#allocation121_spill] sm:$0xff] }
 0x5d8   : > { %15888 = vmatpush3.bf16.msra.mxu0 %v23332_v10  ;;  %v23340_v10 = vld [vmem:[#allocation122_spill] sm:$0xff] }
 0x5d9   : > { %15920 = vmatpush3.bf16.msra.mxu1 %v23333_v8  ;;  %15890 = vmatprep.subr.bf16.mxu0 %v23334_v33  ;;  %v23341_v33 = vld [vmem:[#allocation124_spill] sm:$0xff] }
 0x5da   : > { %15922 = vmatprep.subr.bf16.mxu1 %v23335_v20 }
 0x5dc   : > { %15892 = vmatpush3.bf16.msra.mxu0 %v19985_v52  ;;  %v23342_v52 = vld [vmem:[#allocation125_spill] sm:$0xff] }
 0x5dd   : > { %15924 = vmatpush3.bf16.msra.mxu1 %v19989_v4  ;;  %15894 = vmatprep.subr.bf16.mxu0 %v23336_v22 }
 0x5de   : > { %15926 = vmatprep.subr.bf16.mxu1 %v23337_v42  ;;  %v23343_v42 = vld [vmem:[#allocation126_spill] sm:$0xff] }
 0x5e0   : > { %15896 = vmatpush3.bf16.msra.mxu0 %v20021_v18  ;;  %v23344_v18 = vld [vmem:[#allocation127_spill] sm:$0xff] }
 0x5e1   : > { %15928 = vmatpush3.bf16.msra.mxu1 %v23338_v43  ;;  %15898 = vmatprep.subr.bf16.mxu0 %v23339_v31  ;;  %v23353_v31 = vld [vmem:[#allocation136_spill] sm:$0xff]  ;;  %v23356_v43 = vld [vmem:[#allocation139_spill] sm:$0xff] }
 0x5e2   : > { %15930 = vmatprep.subr.bf16.mxu1 %v23340_v10  ;;  %v23345_v10 = vld [vmem:[#allocation128_spill] sm:$0xff] }
 0x5e4   : > { %15900 = vmatpush3.bf16.msra.mxu0 %v20051_v60  ;;  %v23348_v60 = vld [vmem:[#allocation131_spill] sm:$0xff] }
 0x5e5   : > { %15932 = vmatpush3.bf16.msra.mxu1 %v23341_v33  ;;  %15933 = vmatprep.subr.bf16.mxu0 %v23119_v55  ;;  %v23346_v33 = vld [vmem:[#allocation129_spill] sm:$0xff] }
 0x5e6   : > { %15958 = vmatprep.subr.bf16.mxu1 %v23342_v52  ;;  %v23347_v52 = vld [vmem:[#allocation130_spill] sm:$0xff] }
 0x5e7   : > { %2799 = vmatmul.mubr.f32.vlgmr.msra.gmra.mrb[26].mxu0 %v20633_v3 }
 0x5e8   : > { %2869 = vmatmul.mubr.f32.vlgmr.msra.gmra.mrb[26].mxu1 %v20635_v16  ;;  %15935 = vmatpush3.bf16.msra.mxu0 %v23343_v42  ;;  %v23349_v42 = vld [vmem:[#allocation132_spill] sm:$0xff] }
 0x5e9   : > { %15960 = vmatpush3.bf16.msra.mxu1 %v23344_v18  ;;  %3009 = vmatprep.mubr.f32.mxu1 %v20629_v5  ;;  %v23350_v18 = vld [vmem:[#allocation133_spill] sm:$0xff]  ;;  %v23351_v5 = vld [vmem:[#allocation134_spill] sm:$0xff] }
 0x5ea   : > { %15936 = vmatprep.subr.bf16.mxu0 %v23119_v55  ;;  %15962 = vmatprep.subr.bf16.mxu1 %v23345_v10  ;;  %v23352_v10 = vld [vmem:[#allocation135_spill] sm:$0xff] }
 0x5eb   : > { %14117 = vmatprep.mubr.msk.f32.mxu0 %vm18657_vm1, %v23121_v11 }
 0x5ec   : > { %15938 = vmatpush3.bf16.msra.mxu0 %v23346_v33  ;;  %v23354_v33 = vld [vmem:[#allocation137_spill] sm:$0xff] }
 0x5ed   : > { %15964 = vmatpush3.bf16.msra.mxu1 %v23347_v52  ;;  %15939 = vmatprep.subr.bf16.mxu0 %v23119_v55  ;;  %v23355_v52 = vld [vmem:[#allocation138_spill] sm:$0xff] }
 0x5ee   : > { %15966 = vmatprep.subr.bf16.mxu1 %v23348_v60  ;;  %v23359_v60 = vld [vmem:[#allocation142_spill] sm:$0xff] }
 0x5f0   : > { %15941 = vmatpush3.bf16.msra.mxu0 %v23349_v42  ;;  %v23357_v42 = vld [vmem:[#allocation140_spill] sm:$0xff] }
 0x5f1   : > { %15968 = vmatpush3.bf16.msra.mxu1 %v23350_v18  ;;  %15942 = vmatprep.subr.bf16.mxu0 %v23119_v55  ;;  %v23358_v18 = vld [vmem:[#allocation141_spill] sm:$0xff] }
 0x5f2   : > { %15970 = vmatprep.subr.bf16.mxu1 %v23351_v5 }
 0x5f4   : > { %15944 = vmatpush3.bf16.msra.mxu0 %v23352_v10  ;;  %v23360_v10 = vld [vmem:[#allocation143_spill] sm:$0xff] }
 0x5f5   : > { %15972 = vmatpush3.bf16.msra.mxu1 %v23353_v31  ;;  %15945 = vmatprep.subr.bf16.mxu0 %v23119_v55  ;;  %v23361_v31 = vld [vmem:[#allocation145_spill] sm:$0xff] }
 0x5f6   : > { %15974 = vmatprep.subr.bf16.mxu1 %v23354_v33  ;;  %v23364_v33 = vld [vmem:[#allocation148_spill] sm:$0xff] }
 0x5f8   : > { %15947 = vmatpush3.bf16.msra.mxu0 %v23355_v52  ;;  %v23362_v52 = vld [vmem:[#allocation146_spill] sm:$0xff] }
 0x5f9   : > { %15976 = vmatpush3.bf16.msra.mxu1 %v23356_v43  ;;  %15948 = vmatprep.subr.bf16.mxu0 %v23119_v55  ;;  %v23363_v43 = vld [vmem:[#allocation147_spill] sm:$0xff] }
 0x5fa   : > { %15978 = vmatprep.subr.bf16.mxu1 %v23357_v42  ;;  %v23365_v42 = vld [vmem:[#allocation149_spill] sm:$0xff] }
 0x5fc   : > { %15950 = vmatpush3.bf16.msra.mxu0 %v23358_v18 }
 0x5fd   : > { %15980 = vmatpush3.bf16.msra.mxu1 %v23359_v60  ;;  %15951 = vmatprep.subr.bf16.mxu0 %v23119_v55 }
 0x5fe   : > { %15982 = vmatprep.subr.bf16.mxu1 %v23360_v10  ;;  %v23394_v10 = vld [vmem:[#allocation174_spill] sm:$0xff] }
 0x600   : > { %15953 = vmatpush3.bf16.msra.mxu0 %v20252_v59  ;;  %v23367_v59 = vld [vmem:[#allocation152_spill] sm:$0xff] }
 0x601   : > { %15984 = vmatpush3.bf16.msra.mxu1 %v23361_v31  ;;  %15954 = vmatprep.subr.bf16.mxu0 %v23119_v55  ;;  %v23366_v31 = vld [vmem:[#allocation151_spill] sm:$0xff] }
 0x602   : > { %15986 = vmatprep.subr.bf16.mxu1 %v23362_v52  ;;  %v23376_v52 = vld [vmem:[#allocation161_spill] sm:$0xff] }
 0x604   : > { %15956 = vmatpush3.bf16.msra.mxu0 %v23363_v43  ;;  %v23370_v43 = vld [vmem:[#allocation155_spill] sm:$0xff] }
 0x605   : > { %15988 = vmatpush3.bf16.msra.mxu1 %v23364_v33  ;;  %15990 = vmatprep.subr.bf16.mxu0 %v23365_v42  ;;  %v23368_v42 = vld [vmem:[#allocation153_spill] sm:$0xff]  ;;  %v23369_v33 = vld [vmem:[#allocation154_spill] sm:$0xff] }
 0x606   : > { %16021 = vmatprep.subr.bf16.mxu1 %v23119_v55 }
 0x607   : > { %14118 = vmatmul.mubr.f32.vlgmr.msra.gmra.mrb[28].mxu0 %v20675_v61 }
 0x608   : > { %3010 = vmatmul.mubr.f32.vlgmr.msra.gmra.mrb[28].mxu1 %v20633_v3  ;;  %15992 = vmatpush3.bf16.msra.mxu0 %v20308_v14  ;;  %v23371_v3 = vld [vmem:[#allocation156_spill] sm:$0xff] }
 0x609   : > { %3079 = vmatprep.mubr.f32.mxu0 %v20631_v25  ;;  %16023 = vmatpush3.bf16.msra.mxu1 %v23366_v31  ;;  %v23372_v25 = vld [vmem:[#allocation157_spill] sm:$0xff]  ;;  %v23373_v31 = vld [vmem:[#allocation158_spill] sm:$0xff]  ;;  %v23375_v14 = vld [vmem:[#allocation160_spill] sm:$0xff] }
 0x60a   : > { %15994 = vmatprep.subr.bf16.mxu0 %v23367_v59  ;;  %16024 = vmatprep.subr.bf16.mxu1 %v23119_v55  ;;  %v23374_v59 = vld [vmem:[#allocation159_spill] sm:$0xff] }
 0x60b   : > { %14152 = vmatprep.mubr.msk.f32.mxu1 %vm18657_vm1, %v23121_v11 }
 0x60c   : > { %15996 = vmatpush3.bf16.msra.mxu0 %v23368_v42  ;;  %v23379_v42 = vld [vmem:[#allocation164_spill] sm:$0xff] }
 0x60d   : > { %16026 = vmatpush3.bf16.msra.mxu1 %v23369_v33  ;;  %15998 = vmatprep.subr.bf16.mxu0 %v23370_v43  ;;  %v23377_v33 = vld [vmem:[#allocation162_spill] sm:$0xff]  ;;  %v23378_v43 = vld [vmem:[#allocation163_spill] sm:$0xff] }
 0x60e   : > { %16027 = vmatprep.subr.bf16.mxu1 %v23119_v55 }
 0x610   : > { %16000 = vmatpush3.bf16.msra.mxu0 %v23371_v3 }
 0x611   : > { %16029 = vmatpush3.bf16.msra.mxu1 %v23372_v25  ;;  %16002 = vmatprep.subr.bf16.mxu0 %v23373_v31 }
 0x612   : > { %16030 = vmatprep.subr.bf16.mxu1 %v23119_v55 }
 0x614   : > { %16004 = vmatpush3.bf16.msra.mxu0 %v23374_v59 }
 0x615   : > { %16032 = vmatpush3.bf16.msra.mxu1 %v23375_v14  ;;  %16006 = vmatprep.subr.bf16.mxu0 %v23376_v52  ;;  %v23393_v52 = vld [vmem:[#allocation173_spill] sm:$0xff] }
 0x616   : > { %16033 = vmatprep.subr.bf16.mxu1 %v23119_v55 }
 0x618   : > { %16008 = vmatpush3.bf16.msra.mxu0 %v23377_v33 }
 0x619   : > { %16035 = vmatpush3.bf16.msra.mxu1 %v23378_v43  ;;  %16010 = vmatprep.subr.bf16.mxu0 %v23379_v42  ;;  %v23380_v42 = vld [vmem:[#allocation172_spill] sm:$0xff] }
 0x61a   : > { %16036 = vmatprep.subr.bf16.mxu1 %v23119_v55 }
 0x61c   : > { %16012 = vmatpush3.bf16.msra.mxu0 %v20453_v15 }
 0x61d   : > { %16038 = vmatpush3.bf16.msra.mxu1 %v20457_v45  ;;  %16014 = vmatprep.subr.bf16.mxu0 %v20459_v13  ;;  %v23381_v45 = vld [vmem:[#allocation7_spill] sm:$0xff]  ;;  %v23391_v13 = vld [vmem:[#allocation20_spill] sm:$0xff] }
 0x61e   : > { %16039 = vmatprep.subr.bf16.mxu1 %v23119_v55 }
 0x620   : > { %16016 = vmatpush3.bf16.msra.mxu0 %v20481_v29  ;;  %v23382_v29 = vld [vmem:[#allocation5_spill] sm:$0xff] }
 0x621   : > { %16041 = vmatpush3.bf16.msra.mxu1 %v20485_v36  ;;  %16018 = vmatprep.subr.bf16.mxu0 %v20487_v7  ;;  %v23383_v7 = vld [vmem:[#allocation8_spill] sm:$0xff]  ;;  %v23385_v36 = vld [vmem:[#allocation6_spill] sm:$0xff] }
 0x622   : > { %16042 = vmatprep.subr.bf16.mxu1 %v23119_v55 }
 0x624   : > { %16020 = vmatpush3.bf16.msra.mxu0 %v20503_v32  ;;  %v10805_v32 = vld [vmem:[%s18730_s23 + $0x10] sm:$0xff] }
 0x625   : > { %16044 = vmatpush3.bf16.msra.mxu1 %v23380_v42  ;;  %16045 = vmatprep.subr.bf16.mxu0 %v23119_v55  ;;  %v23384_v42 = vld [vmem:[#allocation9_spill] sm:$0xff] }
 0x626   : > { %16055 = vmatprep.subr.bf16.mxu1 %v23381_v45  ;;  %3171 = vrot.lane.b32.xlu1 %v10805_v32, %s18655_s12  ;;  %v23388_v45 = vld [vmem:[#allocation10_spill] sm:$0xff] }
 0x627   : > { %3080 = vmatmul.mubr.f32.vlgmr.msra.gmra.mrb[30].mxu0 %v20635_v16  ;;  %v23386_v16 = vld [vmem:[#allocation11_spill] sm:$0xff] }
 0x628   : > { %14153 = vmatmul.mubr.f32.vlgmr.msra.gmra.mrb[30].mxu1 %v20675_v61  ;;  %16047 = vmatpush3.bf16.msra.mxu0 %v23382_v29  ;;  %v23387_v61 = vld [vmem:[#allocation13_spill] sm:$0xff]  ;;  %v23389_v29 = vld [vmem:[#allocation12_spill] sm:$0xff] }
 0x629   : > { %16048 = vmatprep.subr.bf16.mxu0 %v23119_v55  ;;  %14167 = vmatprep.mubr.msk.f32.mxu0 %vm18657_vm1, %v23121_v11 }
 0x62a   : > { %16057 = vmatpush1.bf16.msra.mxu1 %v23383_v7  ;;  %3316 = vmatprep.mubr.f32.mxu1 %v23121_v11  ;;  %v23390_v7 = vld [vmem:[#allocation14_spill] sm:$0xff] }
 0x62b   : > { %16059 = vmatprep.subr.bf16.mxu1 %v23384_v42  ;;  %v23392_v42 = vld [vmem:[#allocation21_spill] sm:$0xff] }
 0x62c   : > { %16050 = vmatpush3.bf16.msra.mxu0 %v23385_v36 }
 0x62d   : > { %16051 = vmatprep.subr.bf16.mxu0 %v23119_v55 }
 0x62e   : > { %16061 = vmatpush1.bf16.msra.mxu1 %v23386_v16 }
 0x62f   : > { %16063 = vmatprep.subr.bf16.mxu1 %v23387_v61 }
 0x630   : > { %16053 = vmatpush3.bf16.msra.mxu0 %v23388_v45 }
 0x631   : > { %16071 = vmatprep.subr.bf16.mxu0 %v23389_v29 }
 0x632   : > { %16065 = vmatpush1.bf16.msra.mxu1 %v23390_v7 }
 0x633   : > { %16067 = vmatprep.subr.bf16.mxu1 %v23391_v13 }
 0x636   : > { %16069 = vmatpush1.bf16.msra.mxu1 %v23392_v42 }
 0x637   : > { %16086 = vmatprep.subr.bf16.mxu1 %v23119_v55 }
 0x65a   : > { %v11285_v36 = vpop.f32.mrb[20].mxu0  ;;  %v11320_v32 = vpop.f32.mrb[20].mxu1 }
 0x65b   : > { %v11286_v15 = vpop.f32.mrb[21].mxu0  ;;  %v11321_v43 = vpop.f32.mrb[21].mxu1 }
 0x65c   : > { %v11287_v33 = vadd.f32 %v11286_v15, %v11285_v36  ;;  %v11322_v16 = vadd.f32 %v11321_v43, %v11320_v32 }
 0x65e   : > { %v2369_v61 = vadd.f32 %v11287_v33, %v23393_v52 }
 0x660   : > { %v2439_v14 = vadd.f32 %v11322_v16, %v2369_v61 }
 0x67a   : > { %v2508_v45 = vpop.f32.mrb[22].mxu0  ;;  %v11372_v59 = vpop.f32.mrb[22].mxu1 }
 0x67b   : > { %v2509_v29 = vadd.f32 %v2508_v45, %v2439_v14  ;;  %v14049_v31 = vpop.f32.mrb[23].mxu0  ;;  %v11373_v7 = vpop.f32.mrb[23].mxu1 }
 0x67c   : > { %v11374_v25 = vadd.f32 %v11373_v7, %v11372_v59 }
 0x67d   : > { %v10802_v59 = vmul.f32 -1.442695, %v2509_v29 }
 0x67e   : > { %v2585_v60 = vadd.f32 %v11374_v25, %v23394_v10 }
 0x69a   : > { %v11407_v13 = vpop.f32.mrb[24].mxu0 }
 0x69b   : > { %v2724_v3 = vpop.f32.mrb[24].mxu1  ;;  %v11408_v42 = vpop.f32.mrb[25].mxu0 }
 0x69c   : > { %v11409_v18 = vadd.f32 %v11408_v42, %v11407_v13  ;;  %v14084_v5 = vpop.f32.mrb[25].mxu1 }
 0x69e   : > { %v2655_v22 = vadd.f32 %v11409_v18, %v2585_v60 }
 0x6a0   : > { %v2725_v4 = vadd.f32 %v2724_v3, %v2655_v22 }
 0x6a2   : > { %v10803_v31 = vmul.f32 -1.442695, %v2725_v4 }
 0x6a4   : > { %18518 = vpow2.f32 %v10803_v31 }
 0x6a5   : > { %18520 = vpow2.f32 %v10802_v59 }
 0x6ae   : > { %v18519_v7 = vpop.eup %18518 }
 0x6af   : > { %v18521_v61 = vpop.eup %18520  ;;  %v2731_v10 = vadd.f32 1.0, %v18519_v7 }
 0x6b0   : > { %v2515_v13 = vadd.f32 1.0, %v18521_v61 }
 0x6b1   : > { %18522 = vrcp.f32 %v2731_v10 }
 0x6b2   : > { %18524 = vrcp.f32 %v2515_v13  ;;  %v3172_v13 = vpop.permute.xlu1 %3171 }
 0x6ba   : > { %v11459_v15 = vpop.f32.mrb[26].mxu0 }
 0x6bb   : > { %v11494_v36 = vpop.f32.mrb[26].mxu1  ;;  %v11460_v43 = vpop.f32.mrb[27].mxu0 }
 0x6bc   : > { %v11461_v52 = vadd.f32 %v11460_v43, %v11459_v15  ;;  %v11495_v33 = vpop.f32.mrb[27].mxu1  ;;  %v18523_v25 = vpop.eup %18522 }
 0x6bd   : > { %v11496_v16 = vadd.f32 %v11495_v33, %v11494_v36  ;;  %v3161_v4 = vmul.f32 %v18523_v25, %v20553_v54  ;;  %v23397_v25 = vld [vmem:[#allocation27_spill] sm:$0xff] }
 0x6be   : > { %v2801_v14 = vadd.f32 %v11461_v52, %v20550_v27  ;;  %v18525_v27 = vpop.eup %18524 }
 0x6c0   : > { %v2871_v45 = vadd.f32 %v11496_v16, %v2801_v14 }
 0x6da   : > { %v2940_v42 = vpop.f32.mrb[28].mxu0 }
 0x6db   : > { %v2941_v18 = vadd.f32 %v2940_v42, %v2871_v45  ;;  %v11546_v60 = vpop.f32.mrb[28].mxu1  ;;  %v14119_v22 = vpop.f32.mrb[29].mxu0 }
 0x6dc   : > { %v11547_v5 = vpop.f32.mrb[29].mxu1 }
 0x6dd   : > { %18526 = vtanh.f32 %v2941_v18  ;;  %v11548_v3 = vadd.f32 %v11547_v5, %v11546_v60 }
 0x6df   : > { %v3012_v33 = vadd.f32 %v11548_v3, %v20558_v58  ;;  %v23396_v3 = vld [vmem:[#allocation26_spill] sm:$0xff] }
 0x6e7   : > { %v18527_v32 = vpop.eup %18526 }
 0x6e8   : > { %v3162_v29 = vmul.f32 %v18527_v32, %v18525_v27  ;;  %v23398_v27 = vld [vmem:[#allocation28_spill] sm:$0xff] }
 0x6e9   : > { %v23399_v32 = vld [vmem:[#allocation36_spill] sm:$0xff] }
 0x6ea   : > { %v20851_v15 = vadd.f32 %v3162_v29, %v3161_v4  ;;  %v23400_v4 = vld [vmem:[#allocation29_spill] sm:$0xff]  ;;  %v23401_v29 = vld [vmem:[#allocation30_spill] sm:$0xff] }
 0x6fa   : > { %v11581_v36 = vpop.f32.mrb[30].mxu0 }
 0x6fb   : > { %v3151_v43 = vpop.f32.mrb[30].mxu1  ;;  %v11582_v52 = vpop.f32.mrb[31].mxu0 }
 0x6fc   : > { %v11583_v16 = vadd.f32 %v11582_v52, %v11581_v36  ;;  %v14154_v14 = vpop.f32.mrb[31].mxu1  ;;  %v23402_v36 = vld [vmem:[#allocation38_spill] sm:$0xff]  ;;  %v23404_v52 = vld [vmem:[#allocation32_spill] sm:$0xff] }
 0x6fd   : > { %v23407_v14 = vld [vmem:[#allocation35_spill] sm:$0xff] }
 0x6fe   : > { %v3082_v45 = vadd.f32 %v11583_v16, %v3012_v33  ;;  %v23405_v33 = vld [vmem:[#allocation33_spill] sm:$0xff]  ;;  %v23406_v16 = vld [vmem:[#allocation34_spill] sm:$0xff] }
 0x700   : > { %v3152_v31 = vadd.f32 %v3151_v43, %v3082_v45  ;;  %v23403_v43 = vld [vmem:[#allocation31_spill] sm:$0xff]  ;;  %v23408_v45 = vld [vmem:[#allocation37_spill] sm:$0xff] }
 0x702   : > { %v10804_v59 = vmul.f32 -1.442695, %v3152_v31  ;;  %v23409_v31 = vld [vmem:[#allocation39_spill] sm:$0xff] }
 0x704   : > { %18528 = vpow2.f32 %v10804_v59 }
 0x705   : > { %18530 = vtanh.f32 %v20851_v15 }
 0x70e   : > { %v18529_v7 = vpop.eup %18528 }
 0x70f   : > { %v3158_v61 = vadd.f32 1.0, %v18529_v7  ;;  %v18531_v54 = vpop.eup %18530 }
 0x711   : > { %18532 = vrcp.f32 %v3158_v61  ;;  %v23410_v61 = vld [vmem:[#allocation41_spill] sm:$0xff] }
 0x71b   : > { %v18533_v10 = vpop.eup %18532 }
 0x71c   : > { %v3165_v42 = vmul.f32 %v18533_v10, %v18531_v54  ;;  %v23411_v10 = vld [vmem:[#allocation42_spill] sm:$0xff] }
 0x71e   : > { %3167 = vst.msk [vmem:[#allocation4 + $0x8] sm:$0xff] %vm782_vm2, %v3165_v42  ;;  %v3174_v18 = vsel %vm782_vm2, %v3165_v42, %v3172_v13 }
 0x71f   : > { %14168 = vmatmul.mubr.msk.f32.vlgmr.msra.gmra.mrb[32].mxu0 %vm790_vm3, %v3174_v18 }
 0x720   : > { %16073 = vmatpush1.bf16.msra.mxu0 %v18847_v39  ;;  %3387 = vmatprep.mubr.f32.mxu0 %v23121_v11 }
 0x721   : > { %16075 = vmatprep.subr.bf16.mxu0 %v18849_v41 }
 0x724   : > { %16077 = vmatpush1.bf16.msra.mxu0 %v18866_v47 }
 0x725   : > { %16079 = vmatprep.subr.bf16.mxu0 %v18870_v48 }
 0x728   : > { %16081 = vmatpush1.bf16.msra.mxu0 %v18879_v51 }
 0x729   : > { %16083 = vmatprep.subr.bf16.mxu0 %v18912_v62 }
 0x72c   : > { %16085 = vmatpush1.bf16.msra.mxu0 %v18914_v63 }
 0x72d   : > { %16099 = vmatprep.subr.bf16.mxu0 %v18926_v2 }
 0x7f2   : > { %v3244_v58 = vpop.f32.mrb[32].mxu0 }
 0x7f3   : > { %v3245_v60 = vadd.f32 %v20577_v44, %v3244_v58  ;;  %v14169_v22 = vpop.f32.mrb[33].mxu0  ;;  %v23395_v44 = vld [vmem:[#allocation25_spill] sm:$0xff]  ;;  %v23412_v58 = vld [vmem:[#allocation43_spill] sm:$0xff] }
 0x7f4   : > { %v23413_v22 = vld [vmem:[#allocation44_spill] sm:$0xff] }
 0x7f5   : > { %v3248_v5 = vmax.f32 %v3245_v60, 0.0 }
 0x7f7   : > { %10807 = vmatmul.mubr.msk.f32.vlgmr.msra.gmra.mrb[32].mxu1 %vm891_vm4, %v3248_v5  ;;  %10808 = vmatmul.mubr.msk.f32.vlgmr.msra.gmra.mrb[34].mxu0 %vm891_vm4, %v3248_v5 }
 0x7f8   : > { %16088 = vmatpush3.bf16.msra.mxu1 %v18950_v19  ;;  %14186 = vmatprep.mubr.msk.f32.mxu1 %vm18657_vm1, %v23121_v11 }
 0x7f9   : > { %16089 = vmatprep.subr.bf16.mxu1 %v23119_v55  ;;  %16101 = vmatpush3.bf16.msra.mxu0 %v18960_v24 }
 0x7fa   : > { %16103 = vmatprep.subr.bf16.mxu0 %v18962_v28 }
 0x7fc   : > { %16091 = vmatpush3.bf16.msra.mxu1 %v18981_v35 }
 0x7fd   : > { %16092 = vmatprep.subr.bf16.mxu1 %v23119_v55  ;;  %16105 = vmatpush3.bf16.msra.mxu0 %v18993_v38 }
 0x7fe   : > { %16107 = vmatprep.subr.bf16.mxu0 %v18996_v40 }
 0x800   : > { %16094 = vmatpush3.bf16.msra.mxu1 %v19011_v46 }
 0x801   : > { %16095 = vmatprep.subr.bf16.mxu1 %v23119_v55  ;;  %16109 = vmatpush3.bf16.msra.mxu0 %v19024_v53 }
 0x802   : > { %16111 = vmatprep.subr.bf16.mxu0 %v19030_v56 }
 0x804   : > { %16097 = vmatpush3.bf16.msra.mxu1 %v19045_v0 }
 0x805   : > { %16131 = vmatprep.subr.bf16.mxu1 %v19048_v1  ;;  %16113 = vmatpush3.bf16.msra.mxu0 %v19060_v9 }
 0x806   : > { %16115 = vmatprep.subr.bf16.mxu0 %v19066_v12 }
 0x807   : > { %14187 = vmatmul.mubr.msk.f32.vlgmr.msra.gmra.mrb[34].mxu1 %vm891_vm4, %v3248_v5 }
 0x808   : > { %16133 = vmatpush3.bf16.msra.mxu1 %v19081_v21 }
 0x809   : > { %16135 = vmatprep.subr.bf16.mxu1 %v19084_v23  ;;  %16117 = vmatpush3.bf16.msra.mxu0 %v19096_v34 }
 0x80a   : > { %16119 = vmatprep.subr.bf16.mxu0 %v19102_v37 }
 0x80c   : > { %16137 = vmatpush3.bf16.msra.mxu1 %v19119_v49 }
 0x80d   : > { %16139 = vmatprep.subr.bf16.mxu1 %v19122_v50  ;;  %16121 = vmatpush3.bf16.msra.mxu0 %v19134_v57 }
 0x80e   : > { %16123 = vmatprep.subr.bf16.mxu0 %v23395_v44 }
 0x810   : > { %16141 = vmatpush3.bf16.msra.mxu1 %v23396_v3 }
 0x811   : > { %16143 = vmatprep.subr.bf16.mxu1 %v23397_v25  ;;  %16125 = vmatpush3.bf16.msra.mxu0 %v23398_v27 }
 0x812   : > { %16127 = vmatprep.subr.bf16.mxu0 %v23399_v32 }
 0x814   : > { %16145 = vmatpush3.bf16.msra.mxu1 %v23400_v4 }
 0x815   : > { %16147 = vmatprep.subr.bf16.mxu1 %v23401_v29  ;;  %16129 = vmatpush3.bf16.msra.mxu0 %v23402_v36 }
 0x816   : > { %16162 = vmatprep.subr.bf16.mxu0 %v23119_v55 }
 0x818   : > { %16149 = vmatpush3.bf16.msra.mxu1 %v23403_v43 }
 0x819   : > { %16151 = vmatprep.subr.bf16.mxu1 %v23404_v52 }
 0x81c   : > { %16153 = vmatpush3.bf16.msra.mxu1 %v23405_v33 }
 0x81d   : > { %16155 = vmatprep.subr.bf16.mxu1 %v23406_v16 }
 0x820   : > { %16157 = vmatpush3.bf16.msra.mxu1 %v23407_v14 }
 0x821   : > { %16159 = vmatprep.subr.bf16.mxu1 %v23408_v45 }
 0x824   : > { %16161 = vmatpush3.bf16.msra.mxu1 %v23409_v31 }
 0x825   : > { %16187 = vmatprep.subr.bf16.mxu1 %v23261_v26 }
 0x8ca   : > { %v3318_v59 = vpop.f32.mrb[32].mxu1  ;;  %v3389_v7 = vpop.f32.mrb[34].mxu0 }
 0x8cb   : > { %v3319_v54 = vadd.f32 %v3318_v59, %v23410_v61  ;;  %v3390_v13 = vadd.f32 %v3389_v7, %v23411_v10  ;;  %v3320_v42 = vpop.f32.mrb[33].mxu1  ;;  %v3391_v18 = vpop.f32.mrb[35].mxu0  ;;  %v23414_v59 = vld [vmem:[#allocation45_spill] sm:$0xff]  ;;  %v23415_v7 = vld [vmem:[#allocation46_spill] sm:$0xff]  ;;  %v23436_v10 = vld [vmem:[#allocation67_spill] sm:$0xff] }
 0x8cc   : > { %v3321_v60 = vadd.f32 %v3320_v42, %v23412_v58  ;;  %v3392_v5 = vadd.f32 %v3391_v18, %v23413_v22  ;;  %v23418_v42 = vld [vmem:[#allocation49_spill] sm:$0xff]  ;;  %v23419_v18 = vld [vmem:[#allocation50_spill] sm:$0xff]  ;;  %v23424_v58 = vld [vmem:[#allocation55_spill] sm:$0xff] }
 0x8cd   : > { %v20921_v45 = vmax.f32 %v3319_v54, 0.0  ;;  %v20923_v31 = vmax.f32 %v3390_v13, 0.0  ;;  %v23416_v54 = vld [vmem:[#allocation47_spill] sm:$0xff]  ;;  %v23417_v13 = vld [vmem:[#allocation48_spill] sm:$0xff]  ;;  %v23423_v22 = vld [vmem:[#allocation54_spill] sm:$0xff] }
 0x8ce   : > { %v20917_v16 = vmax.f32 %v3321_v60, 0.0  ;;  %v20919_v14 = vmax.f32 %v3392_v5, 0.0  ;;  %v23420_v5 = vld [vmem:[#allocation51_spill] sm:$0xff] }
 0x8d0   : > { %3533 = vmatprep.mubr.f32.mxu0 %v20917_v16  ;;  %3603 = vmatprep.mubr.f32.mxu1 %v20919_v14 }
 0x8d1   : > { %3534 = vmatmul.mubr.f32.vlgmr.msra.gmra.mrb[36].mxu0 %v20921_v45  ;;  %3604 = vmatmul.mubr.f32.vlgmr.msra.gmra.mrb[36].mxu1 %v20923_v31 }
 0x8d2   : > { %16164 = vmatpush3.bf16.msra.mxu0 %v23414_v59  ;;  %16189 = vmatpush3.bf16.msra.mxu1 %v23415_v7  ;;  %v23421_v7 = vld [vmem:[#allocation52_spill] sm:$0xff] }
 0x8d3   : > { %3749 = vmatprep.mubr.f32.mxu1 %v20917_v16  ;;  %16165 = vmatprep.subr.bf16.mxu0 %v23119_v55 }
 0x8d4   : > { %16191 = vmatprep.subr.bf16.mxu1 %v23416_v54  ;;  %14221 = vmatprep.mubr.msk.f32.mxu0 %vm18657_vm1, %v23121_v11  ;;  %v23422_v54 = vld [vmem:[#allocation53_spill] sm:$0xff] }
 0x8d6   : > { %16167 = vmatpush3.bf16.msra.mxu0 %v23417_v13  ;;  %16193 = vmatpush3.bf16.msra.mxu1 %v23418_v42  ;;  %v23425_v42 = vld [vmem:[#allocation56_spill] sm:$0xff]  ;;  %v23426_v13 = vld [vmem:[#allocation57_spill] sm:$0xff] }
 0x8d7   : > { %16168 = vmatprep.subr.bf16.mxu0 %v23119_v55  ;;  %16195 = vmatprep.subr.bf16.mxu1 %v23419_v18  ;;  %v23427_v18 = vld [vmem:[#allocation58_spill] sm:$0xff] }
 0x8da   : > { %v3460_v60 = vpop.f32.mrb[34].mxu1  ;;  %16170 = vmatpush3.bf16.msra.mxu0 %v23420_v5  ;;  %16197 = vmatpush3.bf16.msra.mxu1 %v23421_v7  ;;  %v23428_v7 = vld [vmem:[#allocation59_spill] sm:$0xff]  ;;  %v23430_v5 = vld [vmem:[#allocation61_spill] sm:$0xff] }
 0x8db   : > { %v14188_v59 = vpop.f32.mrb[35].mxu1  ;;  %16171 = vmatprep.subr.bf16.mxu0 %v23119_v55  ;;  %16199 = vmatprep.subr.bf16.mxu1 %v23422_v54  ;;  %v23433_v54 = vld [vmem:[#allocation64_spill] sm:$0xff] }
 0x8dc   : > { %v23429_v59 = vld [vmem:[#allocation60_spill] sm:$0xff] }
 0x8de   : > { %16173 = vmatpush3.bf16.msra.mxu0 %v23423_v22  ;;  %16201 = vmatpush3.bf16.msra.mxu1 %v23424_v58  ;;  %v23431_v22 = vld [vmem:[#allocation62_spill] sm:$0xff]  ;;  %v23432_v58 = vld [vmem:[#allocation63_spill] sm:$0xff] }
 0x8df   : > { %16174 = vmatprep.subr.bf16.mxu0 %v23119_v55  ;;  %16203 = vmatprep.subr.bf16.mxu1 %v23425_v42  ;;  %v23434_v42 = vld [vmem:[#allocation65_spill] sm:$0xff] }
 0x8e2   : > { %16176 = vmatpush3.bf16.msra.mxu0 %v23426_v13  ;;  %16205 = vmatpush3.bf16.msra.mxu1 %v23427_v18  ;;  %v3461_v13 = vadd.f32 %v3460_v60, %v23434_v42  ;;  %v23435_v18 = vld [vmem:[#allocation66_spill] sm:$0xff]  ;;  %v23440_v60 = vld [vmem:[#allocation71_spill] sm:$0xff]  ;;  %v23449_v42 = vld [vmem:[#allocation80_spill] sm:$0xff] }
 0x8e3   : > { %16177 = vmatprep.subr.bf16.mxu0 %v23119_v55  ;;  %16207 = vmatprep.subr.bf16.mxu1 %v23428_v7  ;;  %v23437_v7 = vld [vmem:[#allocation68_spill] sm:$0xff] }
 0x8e6   : > { %16179 = vmatpush3.bf16.msra.mxu0 %v23429_v59  ;;  %16209 = vmatpush3.bf16.msra.mxu1 %v23430_v5  ;;  %v20963_v59 = vmax.f32 %v3461_v13, 0.0  ;;  %v23438_v5 = vld [vmem:[#allocation69_spill] sm:$0xff] }
 0x8e7   : > { %16180 = vmatprep.subr.bf16.mxu0 %v23119_v55  ;;  %16211 = vmatprep.subr.bf16.mxu1 %v23431_v22  ;;  %v23442_v13 = vld [vmem:[#allocation73_spill] sm:$0xff] }
 0x8ea   : > { %16182 = vmatpush3.bf16.msra.mxu0 %v23432_v58  ;;  %16213 = vmatpush3.bf16.msra.mxu1 %v23433_v54  ;;  %v23439_v54 = vld [vmem:[#allocation70_spill] sm:$0xff]  ;;  %v23450_v58 = vld [vmem:[#allocation81_spill] sm:$0xff] }
 0x8eb   : > { %16183 = vmatprep.subr.bf16.mxu0 %v23119_v55  ;;  %16215 = vmatprep.subr.bf16.mxu1 %v23435_v18  ;;  %v23441_v18 = vld [vmem:[#allocation72_spill] sm:$0xff] }
 0x8ee   : > { %16185 = vmatpush3.bf16.msra.mxu0 %v23436_v10  ;;  %16217 = vmatpush3.bf16.msra.mxu1 %v23437_v7  ;;  %v23444_v7 = vld [vmem:[#allocation75_spill] sm:$0xff]  ;;  %v23446_v10 = vld [vmem:[#allocation77_spill] sm:$0xff] }
 0x8ef   : > { %16219 = vmatprep.subr.bf16.mxu0 %v23438_v5  ;;  %16250 = vmatprep.subr.bf16.mxu1 %v23119_v55  ;;  %v23443_v5 = vld [vmem:[#allocation74_spill] sm:$0xff] }
 0x8f1   : > { %14222 = vmatmul.mubr.f32.vlgmr.msra.gmra.mrb[38].mxu0 %v20963_v59  ;;  %3750 = vmatmul.mubr.f32.vlgmr.msra.gmra.mrb[38].mxu1 %v20921_v45 }
 0x8f2   : > { %16221 = vmatpush3.bf16.msra.mxu0 %v23439_v54  ;;  %3819 = vmatprep.mubr.f32.mxu0 %v20919_v14  ;;  %v23445_v54 = vld [vmem:[#allocation76_spill] sm:$0xff] }
 0x8f3   : > { %16252 = vmatpush3.bf16.msra.mxu1 %v23440_v60  ;;  %16223 = vmatprep.subr.bf16.mxu0 %v23441_v18  ;;  %v23447_v60 = vld [vmem:[#allocation78_spill] sm:$0xff]  ;;  %v23448_v18 = vld [vmem:[#allocation79_spill] sm:$0xff] }
 0x8f4   : > { %16253 = vmatprep.subr.bf16.mxu1 %v23119_v55  ;;  %14256 = vmatprep.mubr.msk.f32.mxu1 %vm18657_vm1, %v23121_v11 }
 0x8f6   : > { %16225 = vmatpush3.bf16.msra.mxu0 %v23442_v13  ;;  %v23453_v13 = vld [vmem:[#allocation84_spill] sm:$0xff] }
 0x8f7   : > { %16255 = vmatpush3.bf16.msra.mxu1 %v23443_v5  ;;  %16227 = vmatprep.subr.bf16.mxu0 %v23444_v7  ;;  %v23451_v5 = vld [vmem:[#allocation82_spill] sm:$0xff]  ;;  %v23452_v7 = vld [vmem:[#allocation83_spill] sm:$0xff] }
 0x8f8   : > { %16256 = vmatprep.subr.bf16.mxu1 %v23119_v55 }
 0x8fa   : > { %16229 = vmatpush3.bf16.msra.mxu0 %v23445_v54  ;;  %v23456_v54 = vld [vmem:[#allocation87_spill] sm:$0xff] }
 0x8fb   : > { %16258 = vmatpush3.bf16.msra.mxu1 %v23446_v10  ;;  %16231 = vmatprep.subr.bf16.mxu0 %v23447_v60  ;;  %v23454_v10 = vld [vmem:[#allocation85_spill] sm:$0xff]  ;;  %v23455_v60 = vld [vmem:[#allocation86_spill] sm:$0xff] }
 0x8fc   : > { %16259 = vmatprep.subr.bf16.mxu1 %v23119_v55 }
 0x8fe   : > { %16233 = vmatpush3.bf16.msra.mxu0 %v23448_v18  ;;  %v23459_v18 = vld [vmem:[#allocation90_spill] sm:$0xff] }
 0x8ff   : > { %16261 = vmatpush3.bf16.msra.mxu1 %v23449_v42  ;;  %16235 = vmatprep.subr.bf16.mxu0 %v23450_v58  ;;  %v23457_v42 = vld [vmem:[#allocation88_spill] sm:$0xff]  ;;  %v23458_v58 = vld [vmem:[#allocation89_spill] sm:$0xff] }
 0x900   : > { %16262 = vmatprep.subr.bf16.mxu1 %v23119_v55 }
 0x902   : > { %16237 = vmatpush3.bf16.msra.mxu0 %v23451_v5  ;;  %v23462_v5 = vld [vmem:[#allocation93_spill] sm:$0xff] }
 0x903   : > { %16264 = vmatpush3.bf16.msra.mxu1 %v23452_v7  ;;  %16239 = vmatprep.subr.bf16.mxu0 %v23453_v13  ;;  %v23460_v7 = vld [vmem:[#allocation91_spill] sm:$0xff]  ;;  %v23461_v13 = vld [vmem:[#allocation92_spill] sm:$0xff] }
 0x904   : > { %16265 = vmatprep.subr.bf16.mxu1 %v23119_v55 }
 0x906   : > { %16241 = vmatpush3.bf16.msra.mxu0 %v23454_v10  ;;  %v23463_v10 = vld [vmem:[#allocation94_spill] sm:$0xff] }
 0x907   : > { %16267 = vmatpush3.bf16.msra.mxu1 %v23455_v60  ;;  %16243 = vmatprep.subr.bf16.mxu0 %v23456_v54  ;;  %v23464_v54 = vld [vmem:[#allocation95_spill] sm:$0xff] }
 0x908   : > { %16268 = vmatprep.subr.bf16.mxu1 %v23119_v55  ;;  %v23472_v60 = vld [vmem:[#allocation103_spill] sm:$0xff] }
 0x90a   : > { %16245 = vmatpush3.bf16.msra.mxu0 %v23457_v42  ;;  %v23471_v42 = vld [vmem:[#allocation102_spill] sm:$0xff] }
 0x90b   : > { %16270 = vmatpush3.bf16.msra.mxu1 %v23458_v58  ;;  %16247 = vmatprep.subr.bf16.mxu0 %v23459_v18  ;;  %v23465_v58 = vld [vmem:[#allocation96_spill] sm:$0xff]  ;;  %v23466_v18 = vld [vmem:[#allocation97_spill] sm:$0xff] }
 0x90c   : > { %16271 = vmatprep.subr.bf16.mxu1 %v23119_v55 }
 0x90e   : > { %16249 = vmatpush3.bf16.msra.mxu0 %v23460_v7  ;;  %v23467_v7 = vld [vmem:[#allocation98_spill] sm:$0xff] }
 0x90f   : > { %16273 = vmatpush3.bf16.msra.mxu1 %v23461_v13  ;;  %16275 = vmatprep.subr.bf16.mxu0 %v23462_v5  ;;  %v23468_v13 = vld [vmem:[#allocation99_spill] sm:$0xff]  ;;  %v23469_v5 = vld [vmem:[#allocation100_spill] sm:$0xff] }
 0x910   : > { %16307 = vmatprep.subr.bf16.mxu1 %v23463_v10  ;;  %v23470_v10 = vld [vmem:[#allocation101_spill] sm:$0xff] }
 0x911   : > { %3820 = vmatmul.mubr.f32.vlgmr.msra.gmra.mrb[40].mxu0 %v20923_v31 }
 0x912   : > { %14257 = vmatmul.mubr.f32.vlgmr.msra.gmra.mrb[40].mxu1 %v20963_v59  ;;  %16277 = vmatpush3.bf16.msra.mxu0 %v23464_v54  ;;  %v23474_v54 = vld [vmem:[#allocation107_spill] sm:$0xff] }
 0x913   : > { %3965 = vmatprep.mubr.f32.mxu0 %v20917_v16  ;;  %16309 = vmatpush3.bf16.msra.mxu1 %v23465_v58  ;;  %v23473_v58 = vld [vmem:[#allocation106_spill] sm:$0xff] }
 0x914   : > { %4035 = vmatprep.mubr.f32.mxu1 %v20919_v14  ;;  %16279 = vmatprep.subr.bf16.mxu0 %v23466_v18 }
 0x915   : > { %16311 = vmatprep.subr.bf16.mxu1 %v23467_v7  ;;  %v23475_v7 = vld [vmem:[#allocation109_spill] sm:$0xff] }
 0x916   : > { %16281 = vmatpush3.bf16.msra.mxu0 %v23468_v13  ;;  %v23476_v13 = vld [vmem:[#allocation110_spill] sm:$0xff] }
 0x917   : > { %16313 = vmatpush3.bf16.msra.mxu1 %v23469_v5  ;;  %16283 = vmatprep.subr.bf16.mxu0 %v23470_v10  ;;  %v23477_v5 = vld [vmem:[#allocation111_spill] sm:$0xff] }
 0x918   : > { %16315 = vmatprep.subr.bf16.mxu1 %v23471_v42  ;;  %v23478_v42 = vld [vmem:[#allocation113_spill] sm:$0xff] }
 0x91a   : > { %16285 = vmatpush3.bf16.msra.mxu0 %v23472_v60 }
 0x91b   : > { %16317 = vmatpush3.bf16.msra.mxu1 %v23325_v6  ;;  %16287 = vmatprep.subr.bf16.mxu0 %v23326_v17  ;;  %v23479_v6 = vld [vmem:[#allocation115_spill] sm:$0xff]  ;;  %v23480_v17 = vld [vmem:[#allocation116_spill] sm:$0xff] }
 0x91c   : > { %16319 = vmatprep.subr.bf16.mxu1 %v23473_v58  ;;  %v23481_v58 = vld [vmem:[#allocation117_spill] sm:$0xff] }
 0x91e   : > { %16289 = vmatpush3.bf16.msra.mxu0 %v23474_v54  ;;  %v23482_v54 = vld [vmem:[#allocation118_spill] sm:$0xff] }
 0x91f   : > { %16321 = vmatpush3.bf16.msra.mxu1 %v23329_v30  ;;  %16291 = vmatprep.subr.bf16.mxu0 %v23475_v7  ;;  %v23483_v30 = vld [vmem:[#allocation119_spill] sm:$0xff]  ;;  %v23484_v7 = vld [vmem:[#allocation120_spill] sm:$0xff] }
 0x920   : > { %16323 = vmatprep.subr.bf16.mxu1 %v23476_v13  ;;  %v23485_v13 = vld [vmem:[#allocation121_spill] sm:$0xff] }
 0x922   : > { %16293 = vmatpush3.bf16.msra.mxu0 %v23477_v5  ;;  %v23486_v5 = vld [vmem:[#allocation122_spill] sm:$0xff] }
 0x923   : > { %16325 = vmatpush3.bf16.msra.mxu1 %v23333_v8  ;;  %16295 = vmatprep.subr.bf16.mxu0 %v23478_v42  ;;  %v23487_v8 = vld [vmem:[#allocation123_spill] sm:$0xff]  ;;  %v23488_v42 = vld [vmem:[#allocation124_spill] sm:$0xff] }
 0x924   : > { %16327 = vmatprep.subr.bf16.mxu1 %v23335_v20 }
 0x926   : > { %16297 = vmatpush3.bf16.msra.mxu0 %v23479_v6  ;;  %v23489_v6 = vld [vmem:[#allocation125_spill] sm:$0xff] }
 0x927   : > { %16329 = vmatpush3.bf16.msra.mxu1 %v23480_v17  ;;  %16299 = vmatprep.subr.bf16.mxu0 %v23481_v58 }
 0x928   : > { %16331 = vmatprep.subr.bf16.mxu1 %v23482_v54  ;;  %v23490_v54 = vld [vmem:[#allocation126_spill] sm:$0xff] }
 0x92a   : > { %16301 = vmatpush3.bf16.msra.mxu0 %v23483_v30  ;;  %v23491_v30 = vld [vmem:[#allocation127_spill] sm:$0xff] }
 0x92b   : > { %16333 = vmatpush3.bf16.msra.mxu1 %v23484_v7  ;;  %16303 = vmatprep.subr.bf16.mxu0 %v23485_v13  ;;  %v23500_v13 = vld [vmem:[#allocation136_spill] sm:$0xff]  ;;  %v23503_v7 = vld [vmem:[#allocation139_spill] sm:$0xff] }
 0x92c   : > { %16335 = vmatprep.subr.bf16.mxu1 %v23486_v5  ;;  %v23492_v5 = vld [vmem:[#allocation128_spill] sm:$0xff] }
 0x92e   : > { %16305 = vmatpush3.bf16.msra.mxu0 %v23487_v8  ;;  %v23495_v8 = vld [vmem:[#allocation131_spill] sm:$0xff] }
 0x92f   : > { %16337 = vmatpush3.bf16.msra.mxu1 %v23488_v42  ;;  %16338 = vmatprep.subr.bf16.mxu0 %v23119_v55  ;;  %v23493_v42 = vld [vmem:[#allocation129_spill] sm:$0xff] }
 0x930   : > { %16363 = vmatprep.subr.bf16.mxu1 %v23489_v6  ;;  %v23494_v6 = vld [vmem:[#allocation130_spill] sm:$0xff] }
 0x931   : > { %3966 = vmatmul.mubr.f32.vlgmr.msra.gmra.mrb[42].mxu0 %v20921_v45 }
 0x932   : > { %4036 = vmatmul.mubr.f32.vlgmr.msra.gmra.mrb[42].mxu1 %v20923_v31  ;;  %16340 = vmatpush3.bf16.msra.mxu0 %v23490_v54  ;;  %v23496_v54 = vld [vmem:[#allocation132_spill] sm:$0xff] }
 0x933   : > { %16365 = vmatpush3.bf16.msra.mxu1 %v23491_v30  ;;  %4176 = vmatprep.mubr.f32.mxu1 %v20917_v16  ;;  %v23497_v30 = vld [vmem:[#allocation133_spill] sm:$0xff]  ;;  %v23498_v16 = vld [vmem:[#allocation134_spill] sm:$0xff] }
 0x934   : > { %16341 = vmatprep.subr.bf16.mxu0 %v23119_v55  ;;  %16367 = vmatprep.subr.bf16.mxu1 %v23492_v5  ;;  %v23499_v5 = vld [vmem:[#allocation135_spill] sm:$0xff] }
 0x935   : > { %14291 = vmatprep.mubr.msk.f32.mxu0 %vm18657_vm1, %v23121_v11 }
 0x936   : > { %16343 = vmatpush3.bf16.msra.mxu0 %v23493_v42  ;;  %v23501_v42 = vld [vmem:[#allocation137_spill] sm:$0xff] }
 0x937   : > { %16369 = vmatpush3.bf16.msra.mxu1 %v23494_v6  ;;  %16344 = vmatprep.subr.bf16.mxu0 %v23119_v55  ;;  %v23502_v6 = vld [vmem:[#allocation138_spill] sm:$0xff] }
 0x938   : > { %16371 = vmatprep.subr.bf16.mxu1 %v23495_v8  ;;  %v23506_v8 = vld [vmem:[#allocation142_spill] sm:$0xff] }
 0x93a   : > { %16346 = vmatpush3.bf16.msra.mxu0 %v23496_v54  ;;  %v23504_v54 = vld [vmem:[#allocation140_spill] sm:$0xff] }
 0x93b   : > { %16373 = vmatpush3.bf16.msra.mxu1 %v23497_v30  ;;  %16347 = vmatprep.subr.bf16.mxu0 %v23119_v55  ;;  %v23505_v30 = vld [vmem:[#allocation141_spill] sm:$0xff] }
 0x93c   : > { %16375 = vmatprep.subr.bf16.mxu1 %v23498_v16  ;;  %v23509_v16 = vld [vmem:[#allocation145_spill] sm:$0xff] }
 0x93e   : > { %16349 = vmatpush3.bf16.msra.mxu0 %v23499_v5  ;;  %v23507_v5 = vld [vmem:[#allocation143_spill] sm:$0xff] }
 0x93f   : > { %16377 = vmatpush3.bf16.msra.mxu1 %v23500_v13  ;;  %16350 = vmatprep.subr.bf16.mxu0 %v23119_v55  ;;  %v23508_v13 = vld [vmem:[#allocation144_spill] sm:$0xff] }
 0x940   : > { %16379 = vmatprep.subr.bf16.mxu1 %v23501_v42  ;;  %v23512_v42 = vld [vmem:[#allocation148_spill] sm:$0xff] }
 0x942   : > { %16352 = vmatpush3.bf16.msra.mxu0 %v23502_v6  ;;  %v23510_v6 = vld [vmem:[#allocation146_spill] sm:$0xff] }
 0x943   : > { %16381 = vmatpush3.bf16.msra.mxu1 %v23503_v7  ;;  %16353 = vmatprep.subr.bf16.mxu0 %v23119_v55  ;;  %v23511_v7 = vld [vmem:[#allocation147_spill] sm:$0xff] }
 0x944   : > { %16383 = vmatprep.subr.bf16.mxu1 %v23504_v54  ;;  %v23513_v54 = vld [vmem:[#allocation149_spill] sm:$0xff] }
 0x946   : > { %16355 = vmatpush3.bf16.msra.mxu0 %v23505_v30 }
 0x947   : > { %16385 = vmatpush3.bf16.msra.mxu1 %v23506_v8  ;;  %16356 = vmatprep.subr.bf16.mxu0 %v23119_v55 }
 0x948   : > { %16387 = vmatprep.subr.bf16.mxu1 %v23507_v5  ;;  %v23514_v5 = vld [vmem:[#allocation150_spill] sm:$0xff] }
 0x94a   : > { %16358 = vmatpush3.bf16.msra.mxu0 %v23508_v13  ;;  %v23516_v13 = vld [vmem:[#allocation152_spill] sm:$0xff] }
 0x94b   : > { %16389 = vmatpush3.bf16.msra.mxu1 %v23509_v16  ;;  %16359 = vmatprep.subr.bf16.mxu0 %v23119_v55  ;;  %v23515_v16 = vld [vmem:[#allocation151_spill] sm:$0xff] }
 0x94c   : > { %16391 = vmatprep.subr.bf16.mxu1 %v23510_v6  ;;  %v23525_v6 = vld [vmem:[#allocation161_spill] sm:$0xff] }
 0x94e   : > { %16361 = vmatpush3.bf16.msra.mxu0 %v23511_v7  ;;  %v23519_v7 = vld [vmem:[#allocation155_spill] sm:$0xff] }
 0x94f   : > { %16393 = vmatpush3.bf16.msra.mxu1 %v23512_v42  ;;  %16395 = vmatprep.subr.bf16.mxu0 %v23513_v54  ;;  %v23517_v54 = vld [vmem:[#allocation153_spill] sm:$0xff]  ;;  %v23518_v42 = vld [vmem:[#allocation154_spill] sm:$0xff] }
 0x950   : > { %16426 = vmatprep.subr.bf16.mxu1 %v23119_v55 }
 0x951   : > { %14292 = vmatmul.mubr.f32.vlgmr.msra.gmra.mrb[44].mxu0 %v20963_v59 }
 0x952   : > { %4177 = vmatmul.mubr.f32.vlgmr.msra.gmra.mrb[44].mxu1 %v20921_v45  ;;  %16397 = vmatpush3.bf16.msra.mxu0 %v23514_v5  ;;  %v23520_v45 = vld [vmem:[#allocation156_spill] sm:$0xff] }
 0x953   : > { %4246 = vmatprep.mubr.f32.mxu0 %v20919_v14  ;;  %16428 = vmatpush3.bf16.msra.mxu1 %v23515_v16  ;;  %v23521_v14 = vld [vmem:[#allocation157_spill] sm:$0xff]  ;;  %v23522_v16 = vld [vmem:[#allocation158_spill] sm:$0xff]  ;;  %v23524_v5 = vld [vmem:[#allocation160_spill] sm:$0xff] }
 0x954   : > { %16399 = vmatprep.subr.bf16.mxu0 %v23516_v13  ;;  %16429 = vmatprep.subr.bf16.mxu1 %v23119_v55  ;;  %v23523_v13 = vld [vmem:[#allocation159_spill] sm:$0xff] }
 0x955   : > { %14326 = vmatprep.mubr.msk.f32.mxu1 %vm18657_vm1, %v23121_v11 }
 0x956   : > { %16401 = vmatpush3.bf16.msra.mxu0 %v23517_v54  ;;  %v23528_v54 = vld [vmem:[#allocation164_spill] sm:$0xff] }
 0x957   : > { %16431 = vmatpush3.bf16.msra.mxu1 %v23518_v42  ;;  %16403 = vmatprep.subr.bf16.mxu0 %v23519_v7  ;;  %v23526_v42 = vld [vmem:[#allocation162_spill] sm:$0xff]  ;;  %v23527_v7 = vld [vmem:[#allocation163_spill] sm:$0xff] }
 0x958   : > { %16432 = vmatprep.subr.bf16.mxu1 %v23119_v55 }
 0x95a   : > { %16405 = vmatpush3.bf16.msra.mxu0 %v23520_v45  ;;  %v23531_v45 = vld [vmem:[#allocation167_spill] sm:$0xff] }
 0x95b   : > { %16434 = vmatpush3.bf16.msra.mxu1 %v23521_v14  ;;  %16407 = vmatprep.subr.bf16.mxu0 %v23522_v16  ;;  %v23529_v14 = vld [vmem:[#allocation165_spill] sm:$0xff]  ;;  %v23530_v16 = vld [vmem:[#allocation166_spill] sm:$0xff] }
 0x95c   : > { %16435 = vmatprep.subr.bf16.mxu1 %v23119_v55 }
 0x95e   : > { %16409 = vmatpush3.bf16.msra.mxu0 %v23523_v13 }
 0x95f   : > { %16437 = vmatpush3.bf16.msra.mxu1 %v23524_v5  ;;  %16411 = vmatprep.subr.bf16.mxu0 %v23525_v6  ;;  %v23532_v5 = vld [vmem:[#allocation168_spill] sm:$0xff]  ;;  %v23533_v6 = vld [vmem:[#allocation169_spill] sm:$0xff] }
 0x960   : > { %16438 = vmatprep.subr.bf16.mxu1 %v23119_v55 }
 0x962   : > { %16413 = vmatpush3.bf16.msra.mxu0 %v23526_v42  ;;  %v23534_v42 = vld [vmem:[#allocation170_spill] sm:$0xff] }
 0x963   : > { %16440 = vmatpush3.bf16.msra.mxu1 %v23527_v7  ;;  %16415 = vmatprep.subr.bf16.mxu0 %v23528_v54  ;;  %v23535_v54 = vld [vmem:[#allocation171_spill] sm:$0xff]  ;;  %v23536_v7 = vld [vmem:[#allocation172_spill] sm:$0xff] }
 0x964   : > { %16441 = vmatprep.subr.bf16.mxu1 %v23119_v55 }
 0x966   : > { %16417 = vmatpush3.bf16.msra.mxu0 %v23529_v14 }
 0x967   : > { %16443 = vmatpush3.bf16.msra.mxu1 %v23530_v16  ;;  %16419 = vmatprep.subr.bf16.mxu0 %v23531_v45  ;;  %v23537_v16 = vld [vmem:[#allocation12_spill] sm:$0xff] }
 0x968   : > { %16444 = vmatprep.subr.bf16.mxu1 %v23119_v55 }
 0x96a   : > { %16421 = vmatpush3.bf16.msra.mxu0 %v23532_v5  ;;  %v23538_v5 = vld [vmem:[#allocation5_spill] sm:$0xff] }
 0x96b   : > { %16446 = vmatpush3.bf16.msra.mxu1 %v23533_v6  ;;  %16423 = vmatprep.subr.bf16.mxu0 %v23534_v42 }
 0x96c   : > { %16447 = vmatprep.subr.bf16.mxu1 %v23119_v55 }
 0x96e   : > { %16425 = vmatpush3.bf16.msra.mxu0 %v23535_v54  ;;  %v23539_v54 = vld [vmem:[#allocation6_spill] sm:$0xff] }
 0x96f   : > { %16449 = vmatpush3.bf16.msra.mxu1 %v23536_v7  ;;  %16450 = vmatprep.subr.bf16.mxu0 %v23119_v55  ;;  %v10813_v7 = vld [vmem:[%s18730_s23 + $0x18] sm:$0xff] }
 0x970   : > { %16476 = vmatprep.subr.bf16.mxu1 %v23537_v16  ;;  %4338 = vrot.lane.b32.xlu1 %v10813_v7, %s18655_s12 }
 0x971   : > { %4247 = vmatmul.mubr.f32.vlgmr.msra.gmra.mrb[46].mxu0 %v20923_v31  ;;  %v23540_v31 = vld [vmem:[#allocation10_spill] sm:$0xff] }
 0x972   : > { %14327 = vmatmul.mubr.f32.vlgmr.msra.gmra.mrb[46].mxu1 %v20963_v59  ;;  %16452 = vmatpush3.bf16.msra.mxu0 %v23538_v5  ;;  %v23541_v59 = vld [vmem:[#allocation7_spill] sm:$0xff] }
 0x973   : > { %16453 = vmatprep.subr.bf16.mxu0 %v23119_v55  ;;  %14341 = vmatprep.mubr.msk.f32.mxu0 %vm18657_vm1, %v23121_v11 }
 0x974   : > { %16478 = vmatpush1.bf16.msra.mxu1 %v18847_v39  ;;  %4554 = vmatprep.mubr.f32.mxu1 %v23121_v11 }
 0x975   : > { %16480 = vmatprep.subr.bf16.mxu1 %v18849_v41 }
 0x976   : > { %16455 = vmatpush3.bf16.msra.mxu0 %v23539_v54 }
 0x977   : > { %16456 = vmatprep.subr.bf16.mxu0 %v23119_v55 }
 0x978   : > { %16482 = vmatpush1.bf16.msra.mxu1 %v18866_v47 }
 0x979   : > { %16484 = vmatprep.subr.bf16.mxu1 %v18870_v48 }
 0x97a   : > { %16458 = vmatpush3.bf16.msra.mxu0 %v23540_v31  ;;  %v21138_v31 = vld [vmem:[%s22699_s6] ss:$0 sm:$0xff] }
 0x97b   : > { %16460 = vmatprep.subr.bf16.mxu0 %v23541_v59  ;;  %23542 = vst [vmem:[#allocation173_spill] sm:$0xff] %v21138_v31 }
 0x97c   : > { %16486 = vmatpush1.bf16.msra.mxu1 %v18879_v51 }
 0x97d   : > { %16488 = vmatprep.subr.bf16.mxu1 %v18912_v62 }
 0x980   : > { %16490 = vmatpush1.bf16.msra.mxu1 %v18914_v63 }
 0x981   : > { %16504 = vmatprep.subr.bf16.mxu1 %v18926_v2 }
 0x9a4   : > { %v11649_v54 = vpop.f32.mrb[36].mxu0  ;;  %v11684_v7 = vpop.f32.mrb[36].mxu1 }
 0x9a5   : > { %v11650_v41 = vpop.f32.mrb[37].mxu0  ;;  %v11685_v39 = vpop.f32.mrb[37].mxu1 }
 0x9a6   : > { %v11651_v5 = vadd.f32 %v11650_v41, %v11649_v54  ;;  %v11686_v47 = vadd.f32 %v11685_v39, %v11684_v7  ;;  %v21144_v39 = vld [vmem:[%s22699_s6 + $0x1] ss:$0 sm:$0xff] }
 0x9a8   : > { %v3536_v59 = vadd.f32 %v21138_v31, %v11651_v5 }
 0x9aa   : > { %v3606_v51 = vadd.f32 %v11686_v47, %v3536_v59 }
 0x9c4   : > { %v3675_v48 = vpop.f32.mrb[38].mxu0  ;;  %v11736_v62 = vpop.f32.mrb[38].mxu1 }
 0x9c5   : > { %v3676_v16 = vadd.f32 %v3675_v48, %v3606_v51  ;;  %v14223_v63 = vpop.f32.mrb[39].mxu0  ;;  %v11737_v42 = vpop.f32.mrb[39].mxu1 }
 0x9c6   : > { %v11738_v2 = vadd.f32 %v11737_v42, %v11736_v62  ;;  %v21150_v42 = vld [vmem:[%s22699_s6 + $0x2] ss:$0 sm:$0xff] }
 0x9c8   : > { %v3752_v41 = vadd.f32 %v21144_v39, %v11738_v2  ;;  %v10810_v2 = vmul.f32 -1.442695, %v3676_v16 }
 0x9e4   : > { %v11771_v6 = vpop.f32.mrb[40].mxu0 }
 0x9e5   : > { %v3891_v45 = vpop.f32.mrb[40].mxu1  ;;  %v11772_v14 = vpop.f32.mrb[41].mxu0 }
 0x9e6   : > { %v11773_v54 = vadd.f32 %v11772_v14, %v11771_v6  ;;  %v14258_v7 = vpop.f32.mrb[41].mxu1 }
 0x9e8   : > { %v3822_v5 = vadd.f32 %v11773_v54, %v3752_v41 }
 0x9ea   : > { %v3892_v47 = vadd.f32 %v3891_v45, %v3822_v5 }
 0x9ec   : > { %v10811_v30 = vmul.f32 -1.442695, %v3892_v47 }
 0x9ee   : > { %18534 = vpow2.f32 %v10811_v30 }
 0x9ef   : > { %18536 = vpow2.f32 %v10810_v2 }
 0x9f8   : > { %v18535_v6 = vpop.eup %18534 }
 0x9f9   : > { %v18537_v45 = vpop.eup %18536  ;;  %v3898_v14 = vadd.f32 1.0, %v18535_v6 }
 0x9fa   : > { %v3682_v41 = vadd.f32 1.0, %v18537_v45 }
 0x9fb   : > { %18538 = vrcp.f32 %v3898_v14 }
 0x9fc   : > { %18540 = vrcp.f32 %v3682_v41 }
 0xa04   : > { %v11823_v59 = vpop.f32.mrb[42].mxu0 }
 0xa05   : > { %v11858_v31 = vpop.f32.mrb[42].mxu1  ;;  %v11824_v48 = vpop.f32.mrb[43].mxu0 }
 0xa06   : > { %v11825_v51 = vadd.f32 %v11824_v48, %v11823_v59  ;;  %v11859_v63 = vpop.f32.mrb[43].mxu1 }
 0xa07   : > { %v11860_v62 = vadd.f32 %v11859_v63, %v11858_v31  ;;  %v18539_v63 = vpop.eup %18538 }
 0xa08   : > { %v3968_v13 = vadd.f32 %v21150_v42, %v11825_v51  ;;  %v18541_v51 = vpop.eup %18540  ;;  %v4328_v16 = vmul.f32 %v18539_v63, %v20851_v15 }
 0xa0a   : > { %v4038_v8 = vadd.f32 %v11860_v62, %v3968_v13 }
 0xa24   : > { %v4107_v54 = vpop.f32.mrb[44].mxu0 }
 0xa25   : > { %v4108_v7 = vadd.f32 %v4107_v54, %v4038_v8  ;;  %v11910_v31 = vpop.f32.mrb[44].mxu1  ;;  %v14293_v5 = vpop.f32.mrb[45].mxu0  ;;  %v21159_v8 = vld [vmem:[%s22699_s6 + $0x3] ss:$0 sm:$0xff] }
 0xa26   : > { %v11911_v59 = vpop.f32.mrb[45].mxu1 }
 0xa27   : > { %18542 = vtanh.f32 %v4108_v7  ;;  %v11912_v48 = vadd.f32 %v11911_v59, %v11910_v31 }
 0xa29   : > { %v4179_v45 = vadd.f32 %v21159_v8, %v11912_v48  ;;  %v23543_v48 = vld [vmem:[#allocation8_spill] sm:$0xff] }
 0xa31   : > { %v18543_v13 = vpop.eup %18542 }
 0xa32   : > { %v4329_v30 = vmul.f32 %v18543_v13, %v18541_v51  ;;  %v4339_v51 = vpop.permute.xlu1 %4338 }
 0xa34   : > { %v21154_v47 = vadd.f32 %v4329_v30, %v4328_v16  ;;  %v23544_v30 = vld [vmem:[#allocation9_spill] sm:$0xff] }
 0xa44   : > { %v11945_v62 = vpop.f32.mrb[46].mxu0 }
 0xa45   : > { %v4318_v2 = vpop.f32.mrb[46].mxu1  ;;  %v11946_v6 = vpop.f32.mrb[47].mxu0 }
 0xa46   : > { %v11947_v14 = vadd.f32 %v11946_v6, %v11945_v62  ;;  %v14328_v41 = vpop.f32.mrb[47].mxu1  ;;  %v23545_v62 = vld [vmem:[#allocation11_spill] sm:$0xff]  ;;  %v23547_v6 = vld [vmem:[#allocation14_spill] sm:$0xff] }
 0xa48   : > { %v4249_v54 = vadd.f32 %v11947_v14, %v4179_v45  ;;  %v23548_v45 = vld [vmem:[#allocation20_spill] sm:$0xff]  ;;  %v23549_v14 = vld [vmem:[#allocation21_spill] sm:$0xff] }
 0xa4a   : > { %v4319_v7 = vadd.f32 %v4318_v2, %v4249_v54  ;;  %v23546_v2 = vld [vmem:[#allocation13_spill] sm:$0xff]  ;;  %v21178_v54 = vld [vmem:[%s22695_s2] ss:$0 sm:$0xff] }
 0xa4c   : > { %v10812_v31 = vmul.f32 -1.442695, %v4319_v7 }
 0xa4e   : > { %18544 = vpow2.f32 %v10812_v31 }
 0xa4f   : > { %18546 = vtanh.f32 %v21154_v47 }
 0xa58   : > { %v18545_v15 = vpop.eup %18544 }
 0xa59   : > { %v4325_v5 = vadd.f32 1.0, %v18545_v15  ;;  %v18547_v59 = vpop.eup %18546 }
 0xa5b   : > { %18548 = vrcp.f32 %v4325_v5  ;;  %v23550_v5 = vld [vmem:[#allocation34_spill] sm:$0xff] }
 0xa65   : > { %v18549_v63 = vpop.eup %18548 }
 0xa66   : > { %v4332_v13 = vmul.f32 %v18549_v63, %v18547_v59  ;;  %v23551_v59 = vld [vmem:[#allocation35_spill] sm:$0xff]  ;;  %v23552_v63 = vld [vmem:[#allocation37_spill] sm:$0xff] }
 0xa68   : > { %4334 = vst.msk [vmem:[#allocation4 + $0x10] sm:$0xff] %vm782_vm2, %v4332_v13  ;;  %v4341_v16 = vsel %vm782_vm2, %v4332_v13, %v4339_v51  ;;  %v23553_v51 = vld [vmem:[#allocation39_spill] sm:$0xff] }
 0xa69   : > { %14342 = vmatmul.mubr.msk.f32.vlgmr.msra.gmra.mrb[48].mxu0 %vm790_vm3, %v4341_v16 }
 0xa6a   : > { %16462 = vmatpush1.bf16.msra.mxu0 %v23543_v48  ;;  %4483 = vmatprep.mubr.f32.mxu0 %v23121_v11 }
 0xa6b   : > { %16464 = vmatprep.subr.bf16.mxu0 %v23544_v30 }
 0xa6e   : > { %16466 = vmatpush1.bf16.msra.mxu0 %v23545_v62 }
 0xa6f   : > { %16468 = vmatprep.subr.bf16.mxu0 %v23546_v2 }
 0xa72   : > { %16470 = vmatpush1.bf16.msra.mxu0 %v23547_v6 }
 0xa73   : > { %16472 = vmatprep.subr.bf16.mxu0 %v23548_v45 }
 0xa76   : > { %16474 = vmatpush1.bf16.msra.mxu0 %v23549_v14 }
 0xa77   : > { %16491 = vmatprep.subr.bf16.mxu0 %v23119_v55 }
 0xb3c   : > { %v4411_v41 = vpop.f32.mrb[48].mxu0 }
 0xb3d   : > { %v4412_v7 = vadd.f32 %v21178_v54, %v4411_v41  ;;  %v14343_v31 = vpop.f32.mrb[49].mxu0 }
 0xb3f   : > { %v4415_v15 = vmax.f32 %v4412_v7, 0.0  ;;  %v23554_v7 = vld [vmem:[#allocation42_spill] sm:$0xff] }
 0xb41   : > { %10815 = vmatmul.mubr.msk.f32.vlgmr.msra.gmra.mrb[50].mxu0 %vm891_vm4, %v4415_v15  ;;  %10816 = vmatmul.mubr.msk.f32.vlgmr.msra.gmra.mrb[48].mxu1 %vm891_vm4, %v4415_v15 }
 0xb42   : > { %16493 = vmatpush3.bf16.msra.mxu0 %v18950_v19  ;;  %14360 = vmatprep.mubr.msk.f32.mxu0 %vm18657_vm1, %v23121_v11 }
 0xb43   : > { %16494 = vmatprep.subr.bf16.mxu0 %v23119_v55  ;;  %16506 = vmatpush3.bf16.msra.mxu1 %v18960_v24 }
 0xb44   : > { %16508 = vmatprep.subr.bf16.mxu1 %v18962_v28 }
 0xb46   : > { %16496 = vmatpush3.bf16.msra.mxu0 %v18981_v35 }
 0xb47   : > { %16497 = vmatprep.subr.bf16.mxu0 %v23119_v55  ;;  %16510 = vmatpush3.bf16.msra.mxu1 %v18993_v38 }
 0xb48   : > { %16512 = vmatprep.subr.bf16.mxu1 %v18996_v40 }
 0xb4a   : > { %16499 = vmatpush3.bf16.msra.mxu0 %v19011_v46 }
 0xb4b   : > { %16500 = vmatprep.subr.bf16.mxu0 %v23119_v55  ;;  %16514 = vmatpush3.bf16.msra.mxu1 %v19024_v53 }
 0xb4c   : > { %16516 = vmatprep.subr.bf16.mxu1 %v19030_v56 }
 0xb4e   : > { %16502 = vmatpush3.bf16.msra.mxu0 %v19045_v0 }
 0xb4f   : > { %16536 = vmatprep.subr.bf16.mxu0 %v19048_v1  ;;  %16518 = vmatpush3.bf16.msra.mxu1 %v19060_v9 }
 0xb50   : > { %16520 = vmatprep.subr.bf16.mxu1 %v19066_v12 }
 0xb51   : > { %14361 = vmatmul.mubr.msk.f32.vlgmr.msra.gmra.mrb[52].mxu0 %vm891_vm4, %v4415_v15 }
 0xb52   : > { %16538 = vmatpush3.bf16.msra.mxu0 %v19081_v21 }
 0xb53   : > { %16540 = vmatprep.subr.bf16.mxu0 %v19084_v23  ;;  %16522 = vmatpush3.bf16.msra.mxu1 %v19096_v34 }
 0xb54   : > { %16524 = vmatprep.subr.bf16.mxu1 %v19102_v37 }
 0xb56   : > { %16542 = vmatpush3.bf16.msra.mxu0 %v19119_v49 }
 0xb57   : > { %16544 = vmatprep.subr.bf16.mxu0 %v19122_v50  ;;  %16526 = vmatpush3.bf16.msra.mxu1 %v19134_v57 }
 0xb58   : > { %16528 = vmatprep.subr.bf16.mxu1 %v23395_v44 }
 0xb5a   : > { %16546 = vmatpush3.bf16.msra.mxu0 %v23396_v3 }
 0xb5b   : > { %16548 = vmatprep.subr.bf16.mxu0 %v23397_v25  ;;  %16530 = vmatpush3.bf16.msra.mxu1 %v23398_v27 }
 0xb5c   : > { %16532 = vmatprep.subr.bf16.mxu1 %v23399_v32 }
 0xb5e   : > { %16550 = vmatpush3.bf16.msra.mxu0 %v23400_v4 }
 0xb5f   : > { %16552 = vmatprep.subr.bf16.mxu0 %v23401_v29  ;;  %16534 = vmatpush3.bf16.msra.mxu1 %v23402_v36  ;;  %v23556_v36 = vld [vmem:[#allocation44_spill] sm:$0xff] }
 0xb60   : > { %16567 = vmatprep.subr.bf16.mxu1 %v23119_v55 }
 0xb62   : > { %16554 = vmatpush3.bf16.msra.mxu0 %v23403_v43  ;;  %v23555_v43 = vld [vmem:[#allocation43_spill] sm:$0xff] }
 0xb63   : > { %16556 = vmatprep.subr.bf16.mxu0 %v23404_v52 }
 0xb66   : > { %16558 = vmatpush3.bf16.msra.mxu0 %v23405_v33 }
 0xb67   : > { %16560 = vmatprep.subr.bf16.mxu0 %v23550_v5 }
 0xb6a   : > { %16562 = vmatpush3.bf16.msra.mxu0 %v23551_v59 }
 0xb6b   : > { %16564 = vmatprep.subr.bf16.mxu0 %v23552_v63 }
 0xb6e   : > { %16566 = vmatpush3.bf16.msra.mxu0 %v23553_v51 }
 0xb6f   : > { %16592 = vmatprep.subr.bf16.mxu0 %v23261_v26 }
 0xc14   : > { %v4485_v13 = vpop.f32.mrb[50].mxu0  ;;  %v4556_v16 = vpop.f32.mrb[48].mxu1 }
 0xc15   : > { %v4486_v41 = vadd.f32 %v4485_v13, %v23410_v61  ;;  %v4557_v31 = vadd.f32 %v4556_v16, %v23554_v7  ;;  %v4487_v15 = vpop.f32.mrb[51].mxu0  ;;  %v4558_v52 = vpop.f32.mrb[49].mxu1  ;;  %v23557_v13 = vld [vmem:[#allocation45_spill] sm:$0xff]  ;;  %v23558_v16 = vld [vmem:[#allocation46_spill] sm:$0xff] }
 0xc16   : > { %v4488_v33 = vadd.f32 %v4487_v15, %v23555_v43  ;;  %v4559_v5 = vadd.f32 %v4558_v52, %v23556_v36  ;;  %v23559_v52 = vld [vmem:[#allocation47_spill] sm:$0xff]  ;;  %v23566_v36 = vld [vmem:[#allocation54_spill] sm:$0xff] }
 0xc17   : > { %v21234_v63 = vmax.f32 %v4486_v41, 0.0  ;;  %v21236_v51 = vmax.f32 %v4557_v31, 0.0  ;;  %v23562_v41 = vld [vmem:[#allocation50_spill] sm:$0xff]  ;;  %v23563_v15 = vld [vmem:[#allocation51_spill] sm:$0xff] }
 0xc18   : > { %v21230_v29 = vmax.f32 %v4488_v33, 0.0  ;;  %v21232_v59 = vmax.f32 %v4559_v5, 0.0  ;;  %v23560_v33 = vld [vmem:[#allocation48_spill] sm:$0xff]  ;;  %v23561_v5 = vld [vmem:[#allocation49_spill] sm:$0xff]  ;;  %v23567_v43 = vld [vmem:[#allocation55_spill] sm:$0xff] }
 0xc1a   : > { %4700 = vmatprep.mubr.f32.mxu1 %v21230_v29  ;;  %4770 = vmatprep.mubr.f32.mxu0 %v21232_v59 }
 0xc1b   : > { %4701 = vmatmul.mubr.f32.vlgmr.msra.gmra.mrb[50].mxu1 %v21234_v63  ;;  %4771 = vmatmul.mubr.f32.vlgmr.msra.gmra.mrb[54].mxu0 %v21236_v51 }
 0xc1c   : > { %16569 = vmatpush3.bf16.msra.mxu1 %v23557_v13  ;;  %16594 = vmatpush3.bf16.msra.mxu0 %v23558_v16  ;;  %v23564_v16 = vld [vmem:[#allocation52_spill] sm:$0xff] }
 0xc1d   : > { %4916 = vmatprep.mubr.f32.mxu0 %v21230_v29  ;;  %16570 = vmatprep.subr.bf16.mxu1 %v23119_v55 }
 0xc1e   : > { %16596 = vmatprep.subr.bf16.mxu0 %v23559_v52  ;;  %14395 = vmatprep.mubr.msk.f32.mxu1 %vm18657_vm1, %v23121_v11  ;;  %v23565_v52 = vld [vmem:[#allocation53_spill] sm:$0xff] }
 0xc20   : > { %16572 = vmatpush3.bf16.msra.mxu1 %v23560_v33  ;;  %16598 = vmatpush3.bf16.msra.mxu0 %v23561_v5  ;;  %v23568_v5 = vld [vmem:[#allocation56_spill] sm:$0xff]  ;;  %v23569_v33 = vld [vmem:[#allocation57_spill] sm:$0xff] }
 0xc21   : > { %16573 = vmatprep.subr.bf16.mxu1 %v23119_v55  ;;  %16600 = vmatprep.subr.bf16.mxu0 %v23562_v41  ;;  %v23570_v41 = vld [vmem:[#allocation58_spill] sm:$0xff] }
 0xc24   : > { %v4627_v31 = vpop.f32.mrb[52].mxu0  ;;  %16575 = vmatpush3.bf16.msra.mxu1 %v23563_v15  ;;  %16602 = vmatpush3.bf16.msra.mxu0 %v23564_v16  ;;  %v23571_v16 = vld [vmem:[#allocation59_spill] sm:$0xff]  ;;  %v23573_v15 = vld [vmem:[#allocation61_spill] sm:$0xff] }
 0xc25   : > { %v14362_v13 = vpop.f32.mrb[53].mxu0  ;;  %16576 = vmatprep.subr.bf16.mxu1 %v23119_v55  ;;  %16604 = vmatprep.subr.bf16.mxu0 %v23565_v52  ;;  %v23578_v52 = vld [vmem:[#allocation67_spill] sm:$0xff] }
 0xc26   : > { %v23572_v13 = vld [vmem:[#allocation60_spill] sm:$0xff] }
 0xc28   : > { %16578 = vmatpush3.bf16.msra.mxu1 %v23566_v36  ;;  %16606 = vmatpush3.bf16.msra.mxu0 %v23567_v43  ;;  %v23574_v43 = vld [vmem:[#allocation63_spill] sm:$0xff]  ;;  %v23575_v36 = vld [vmem:[#allocation64_spill] sm:$0xff] }
 0xc29   : > { %16579 = vmatprep.subr.bf16.mxu1 %v23119_v55  ;;  %16608 = vmatprep.subr.bf16.mxu0 %v23568_v5  ;;  %v23576_v5 = vld [vmem:[#allocation65_spill] sm:$0xff] }
 0xc2c   : > { %16581 = vmatpush3.bf16.msra.mxu1 %v23569_v33  ;;  %16610 = vmatpush3.bf16.msra.mxu0 %v23570_v41  ;;  %v4628_v33 = vadd.f32 %v4627_v31, %v23576_v5  ;;  %v23577_v41 = vld [vmem:[#allocation66_spill] sm:$0xff]  ;;  %v23582_v31 = vld [vmem:[#allocation71_spill] sm:$0xff]  ;;  %v23591_v5 = vld [vmem:[#allocation80_spill] sm:$0xff] }
 0xc2d   : > { %16582 = vmatprep.subr.bf16.mxu1 %v23119_v55  ;;  %16612 = vmatprep.subr.bf16.mxu0 %v23571_v16  ;;  %v23579_v16 = vld [vmem:[#allocation68_spill] sm:$0xff] }
 0xc30   : > { %16584 = vmatpush3.bf16.msra.mxu1 %v23572_v13  ;;  %16614 = vmatpush3.bf16.msra.mxu0 %v23573_v15  ;;  %v21276_v13 = vmax.f32 %v4628_v33, 0.0  ;;  %v23580_v15 = vld [vmem:[#allocation69_spill] sm:$0xff] }
 0xc31   : > { %16585 = vmatprep.subr.bf16.mxu1 %v23119_v55  ;;  %16616 = vmatprep.subr.bf16.mxu0 %v23431_v22  ;;  %v23584_v33 = vld [vmem:[#allocation73_spill] sm:$0xff] }
 0xc34   : > { %16587 = vmatpush3.bf16.msra.mxu1 %v23574_v43  ;;  %16618 = vmatpush3.bf16.msra.mxu0 %v23575_v36  ;;  %v23581_v36 = vld [vmem:[#allocation70_spill] sm:$0xff]  ;;  %v23592_v43 = vld [vmem:[#allocation81_spill] sm:$0xff] }
 0xc35   : > { %16588 = vmatprep.subr.bf16.mxu1 %v23119_v55  ;;  %16620 = vmatprep.subr.bf16.mxu0 %v23577_v41  ;;  %v23583_v41 = vld [vmem:[#allocation72_spill] sm:$0xff] }
 0xc38   : > { %16590 = vmatpush3.bf16.msra.mxu1 %v23578_v52  ;;  %16622 = vmatpush3.bf16.msra.mxu0 %v23579_v16  ;;  %v23586_v16 = vld [vmem:[#allocation75_spill] sm:$0xff]  ;;  %v23588_v52 = vld [vmem:[#allocation77_spill] sm:$0xff] }
 0xc39   : > { %16624 = vmatprep.subr.bf16.mxu1 %v23580_v15  ;;  %16655 = vmatprep.subr.bf16.mxu0 %v23119_v55  ;;  %v23585_v15 = vld [vmem:[#allocation74_spill] sm:$0xff] }
 0xc3b   : > { %14396 = vmatmul.mubr.f32.vlgmr.msra.gmra.mrb[52].mxu1 %v21276_v13  ;;  %4917 = vmatmul.mubr.f32.vlgmr.msra.gmra.mrb[56].mxu0 %v21234_v63 }
 0xc3c   : > { %16626 = vmatpush3.bf16.msra.mxu1 %v23581_v36  ;;  %4986 = vmatprep.mubr.f32.mxu1 %v21232_v59  ;;  %v23587_v36 = vld [vmem:[#allocation76_spill] sm:$0xff] }
 0xc3d   : > { %16657 = vmatpush3.bf16.msra.mxu0 %v23582_v31  ;;  %16628 = vmatprep.subr.bf16.mxu1 %v23583_v41  ;;  %v23589_v31 = vld [vmem:[#allocation78_spill] sm:$0xff]  ;;  %v23590_v41 = vld [vmem:[#allocation79_spill] sm:$0xff] }
 0xc3e   : > { %16658 = vmatprep.subr.bf16.mxu0 %v23119_v55  ;;  %14430 = vmatprep.mubr.msk.f32.mxu0 %vm18657_vm1, %v23121_v11 }
 0xc40   : > { %16630 = vmatpush3.bf16.msra.mxu1 %v23584_v33  ;;  %v23595_v33 = vld [vmem:[#allocation84_spill] sm:$0xff] }
 0xc41   : > { %16660 = vmatpush3.bf16.msra.mxu0 %v23585_v15  ;;  %16632 = vmatprep.subr.bf16.mxu1 %v23586_v16  ;;  %v23593_v15 = vld [vmem:[#allocation82_spill] sm:$0xff]  ;;  %v23594_v16 = vld [vmem:[#allocation83_spill] sm:$0xff] }
 0xc42   : > { %16661 = vmatprep.subr.bf16.mxu0 %v23119_v55 }
 0xc44   : > { %16634 = vmatpush3.bf16.msra.mxu1 %v23587_v36  ;;  %v23598_v36 = vld [vmem:[#allocation87_spill] sm:$0xff] }
 0xc45   : > { %16663 = vmatpush3.bf16.msra.mxu0 %v23588_v52  ;;  %16636 = vmatprep.subr.bf16.mxu1 %v23589_v31  ;;  %v23596_v52 = vld [vmem:[#allocation85_spill] sm:$0xff]  ;;  %v23597_v31 = vld [vmem:[#allocation86_spill] sm:$0xff] }
 0xc46   : > { %16664 = vmatprep.subr.bf16.mxu0 %v23119_v55 }
 0xc48   : > { %16638 = vmatpush3.bf16.msra.mxu1 %v23590_v41  ;;  %v23601_v41 = vld [vmem:[#allocation90_spill] sm:$0xff] }
 0xc49   : > { %16666 = vmatpush3.bf16.msra.mxu0 %v23591_v5  ;;  %16640 = vmatprep.subr.bf16.mxu1 %v23592_v43  ;;  %v23599_v5 = vld [vmem:[#allocation88_spill] sm:$0xff]  ;;  %v23600_v43 = vld [vmem:[#allocation89_spill] sm:$0xff] }
 0xc4a   : > { %16667 = vmatprep.subr.bf16.mxu0 %v23119_v55 }
 0xc4c   : > { %16642 = vmatpush3.bf16.msra.mxu1 %v23593_v15  ;;  %v23604_v15 = vld [vmem:[#allocation93_spill] sm:$0xff] }
 0xc4d   : > { %16669 = vmatpush3.bf16.msra.mxu0 %v23594_v16  ;;  %16644 = vmatprep.subr.bf16.mxu1 %v23595_v33  ;;  %v23602_v16 = vld [vmem:[#allocation91_spill] sm:$0xff]  ;;  %v23603_v33 = vld [vmem:[#allocation92_spill] sm:$0xff] }
 0xc4e   : > { %16670 = vmatprep.subr.bf16.mxu0 %v23119_v55 }
 0xc50   : > { %16646 = vmatpush3.bf16.msra.mxu1 %v23596_v52  ;;  %v23605_v52 = vld [vmem:[#allocation94_spill] sm:$0xff] }
 0xc51   : > { %16672 = vmatpush3.bf16.msra.mxu0 %v23597_v31  ;;  %16648 = vmatprep.subr.bf16.mxu1 %v23598_v36  ;;  %v23606_v36 = vld [vmem:[#allocation95_spill] sm:$0xff] }
 0xc52   : > { %16673 = vmatprep.subr.bf16.mxu0 %v23119_v55 }
 0xc54   : > { %16650 = vmatpush3.bf16.msra.mxu1 %v23599_v5  ;;  %v23615_v5 = vld [vmem:[#allocation107_spill] sm:$0xff] }
 0xc55   : > { %16675 = vmatpush3.bf16.msra.mxu0 %v23600_v43  ;;  %16652 = vmatprep.subr.bf16.mxu1 %v23601_v41  ;;  %v23607_v43 = vld [vmem:[#allocation96_spill] sm:$0xff]  ;;  %v23613_v41 = vld [vmem:[#allocation105_spill] sm:$0xff] }
 0xc56   : > { %16676 = vmatprep.subr.bf16.mxu0 %v23119_v55 }
 0xc58   : > { %16654 = vmatpush3.bf16.msra.mxu1 %v23602_v16  ;;  %v23608_v16 = vld [vmem:[#allocation98_spill] sm:$0xff] }
 0xc59   : > { %16678 = vmatpush3.bf16.msra.mxu0 %v23603_v33  ;;  %16680 = vmatprep.subr.bf16.mxu1 %v23604_v15  ;;  %v23609_v33 = vld [vmem:[#allocation99_spill] sm:$0xff]  ;;  %v23610_v15 = vld [vmem:[#allocation100_spill] sm:$0xff] }
 0xc5a   : > { %16712 = vmatprep.subr.bf16.mxu0 %v23605_v52  ;;  %v23611_v52 = vld [vmem:[#allocation102_spill] sm:$0xff] }
 0xc5b   : > { %4987 = vmatmul.mubr.f32.vlgmr.msra.gmra.mrb[54].mxu1 %v21236_v51 }
 0xc5c   : > { %14431 = vmatmul.mubr.f32.vlgmr.msra.gmra.mrb[58].mxu0 %v21276_v13  ;;  %16682 = vmatpush3.bf16.msra.mxu1 %v23606_v36  ;;  %v23612_v36 = vld [vmem:[#allocation104_spill] sm:$0xff] }
 0xc5d   : > { %5132 = vmatprep.mubr.f32.mxu1 %v21230_v29  ;;  %16714 = vmatpush3.bf16.msra.mxu0 %v23607_v43  ;;  %v23614_v43 = vld [vmem:[#allocation106_spill] sm:$0xff] }
 0xc5e   : > { %5202 = vmatprep.mubr.f32.mxu0 %v21232_v59  ;;  %16684 = vmatprep.subr.bf16.mxu1 %v23466_v18  ;;  %v23616_v18 = vld [vmem:[#allocation108_spill] sm:$0xff] }
 0xc5f   : > { %16716 = vmatprep.subr.bf16.mxu0 %v23608_v16  ;;  %v23617_v16 = vld [vmem:[#allocation109_spill] sm:$0xff] }
 0xc60   : > { %16686 = vmatpush3.bf16.msra.mxu1 %v23609_v33  ;;  %v23618_v33 = vld [vmem:[#allocation110_spill] sm:$0xff] }
 0xc61   : > { %16718 = vmatpush3.bf16.msra.mxu0 %v23610_v15  ;;  %16688 = vmatprep.subr.bf16.mxu1 %v23470_v10  ;;  %v23619_v15 = vld [vmem:[#allocation111_spill] sm:$0xff]  ;;  %v23620_v10 = vld [vmem:[#allocation112_spill] sm:$0xff] }
 0xc62   : > { %16720 = vmatprep.subr.bf16.mxu0 %v23611_v52  ;;  %v23621_v52 = vld [vmem:[#allocation113_spill] sm:$0xff] }
 0xc64   : > { %16690 = vmatpush3.bf16.msra.mxu1 %v23472_v60 }
 0xc65   : > { %16722 = vmatpush3.bf16.msra.mxu0 %v23612_v36  ;;  %16692 = vmatprep.subr.bf16.mxu1 %v23613_v41  ;;  %v23622_v36 = vld [vmem:[#allocation115_spill] sm:$0xff] }
 0xc66   : > { %16724 = vmatprep.subr.bf16.mxu0 %v23614_v43 }
 0xc68   : > { %16694 = vmatpush3.bf16.msra.mxu1 %v23615_v5  ;;  %v23623_v5 = vld [vmem:[#allocation118_spill] sm:$0xff] }
 0xc69   : > { %16726 = vmatpush3.bf16.msra.mxu0 %v23616_v18  ;;  %16696 = vmatprep.subr.bf16.mxu1 %v23617_v16  ;;  %v23624_v18 = vld [vmem:[#allocation119_spill] sm:$0xff]  ;;  %v23625_v16 = vld [vmem:[#allocation120_spill] sm:$0xff] }
 0xc6a   : > { %16728 = vmatprep.subr.bf16.mxu0 %v23618_v33  ;;  %v23626_v33 = vld [vmem:[#allocation121_spill] sm:$0xff] }
 0xc6c   : > { %16698 = vmatpush3.bf16.msra.mxu1 %v23619_v15  ;;  %v23627_v15 = vld [vmem:[#allocation122_spill] sm:$0xff] }
 0xc6d   : > { %16730 = vmatpush3.bf16.msra.mxu0 %v23620_v10  ;;  %16700 = vmatprep.subr.bf16.mxu1 %v23621_v52  ;;  %v23628_v10 = vld [vmem:[#allocation123_spill] sm:$0xff]  ;;  %v23629_v52 = vld [vmem:[#allocation124_spill] sm:$0xff] }
 0xc6e   : > { %16732 = vmatprep.subr.bf16.mxu0 %v23335_v20 }
 0xc70   : > { %16702 = vmatpush3.bf16.msra.mxu1 %v23622_v36  ;;  %v23630_v36 = vld [vmem:[#allocation125_spill] sm:$0xff] }
 0xc71   : > { %16734 = vmatpush3.bf16.msra.mxu0 %v23480_v17  ;;  %16704 = vmatprep.subr.bf16.mxu1 %v23481_v58  ;;  %v23691_v58 = vld [vmem:[#allocation173_spill] sm:$0xff] }
 0xc72   : > { %16736 = vmatprep.subr.bf16.mxu0 %v23623_v5  ;;  %v23631_v5 = vld [vmem:[#allocation126_spill] sm:$0xff] }
 0xc74   : > { %16706 = vmatpush3.bf16.msra.mxu1 %v23624_v18  ;;  %v23632_v18 = vld [vmem:[#allocation127_spill] sm:$0xff] }
 0xc75   : > { %16738 = vmatpush3.bf16.msra.mxu0 %v23625_v16  ;;  %16708 = vmatprep.subr.bf16.mxu1 %v23626_v33  ;;  %v23641_v33 = vld [vmem:[#allocation136_spill] sm:$0xff]  ;;  %v23644_v16 = vld [vmem:[#allocation139_spill] sm:$0xff] }
 0xc76   : > { %16740 = vmatprep.subr.bf16.mxu0 %v23627_v15  ;;  %v23633_v15 = vld [vmem:[#allocation128_spill] sm:$0xff] }
 0xc78   : > { %16710 = vmatpush3.bf16.msra.mxu1 %v23628_v10  ;;  %v23636_v10 = vld [vmem:[#allocation131_spill] sm:$0xff] }
 0xc79   : > { %16742 = vmatpush3.bf16.msra.mxu0 %v23629_v52  ;;  %16743 = vmatprep.subr.bf16.mxu1 %v23119_v55  ;;  %v23634_v52 = vld [vmem:[#allocation129_spill] sm:$0xff] }
 0xc7a   : > { %16768 = vmatprep.subr.bf16.mxu0 %v23630_v36  ;;  %v23635_v36 = vld [vmem:[#allocation130_spill] sm:$0xff] }
 0xc7b   : > { %5133 = vmatmul.mubr.f32.vlgmr.msra.gmra.mrb[56].mxu1 %v21234_v63 }
 0xc7c   : > { %5203 = vmatmul.mubr.f32.vlgmr.msra.gmra.mrb[60].mxu0 %v21236_v51  ;;  %16745 = vmatpush3.bf16.msra.mxu1 %v23631_v5  ;;  %v23637_v5 = vld [vmem:[#allocation132_spill] sm:$0xff] }
 0xc7d   : > { %16770 = vmatpush3.bf16.msra.mxu0 %v23632_v18  ;;  %5343 = vmatprep.mubr.f32.mxu0 %v21230_v29  ;;  %v23638_v18 = vld [vmem:[#allocation133_spill] sm:$0xff]  ;;  %v23639_v29 = vld [vmem:[#allocation134_spill] sm:$0xff] }
 0xc7e   : > { %16746 = vmatprep.subr.bf16.mxu1 %v23119_v55  ;;  %16772 = vmatprep.subr.bf16.mxu0 %v23633_v15  ;;  %v23640_v15 = vld [vmem:[#allocation135_spill] sm:$0xff] }
 0xc7f   : > { %14465 = vmatprep.mubr.msk.f32.mxu1 %vm18657_vm1, %v23121_v11 }
 0xc80   : > { %16748 = vmatpush3.bf16.msra.mxu1 %v23634_v52  ;;  %v23642_v52 = vld [vmem:[#allocation137_spill] sm:$0xff] }
 0xc81   : > { %16774 = vmatpush3.bf16.msra.mxu0 %v23635_v36  ;;  %16749 = vmatprep.subr.bf16.mxu1 %v23119_v55  ;;  %v23643_v36 = vld [vmem:[#allocation138_spill] sm:$0xff] }
 0xc82   : > { %16776 = vmatprep.subr.bf16.mxu0 %v23636_v10  ;;  %v23647_v10 = vld [vmem:[#allocation142_spill] sm:$0xff] }
 0xc84   : > { %16751 = vmatpush3.bf16.msra.mxu1 %v23637_v5  ;;  %v23645_v5 = vld [vmem:[#allocation140_spill] sm:$0xff] }
 0xc85   : > { %16778 = vmatpush3.bf16.msra.mxu0 %v23638_v18  ;;  %16752 = vmatprep.subr.bf16.mxu1 %v23119_v55  ;;  %v23646_v18 = vld [vmem:[#allocation141_spill] sm:$0xff] }
 0xc86   : > { %16780 = vmatprep.subr.bf16.mxu0 %v23639_v29  ;;  %v23650_v29 = vld [vmem:[#allocation145_spill] sm:$0xff] }
 0xc88   : > { %16754 = vmatpush3.bf16.msra.mxu1 %v23640_v15  ;;  %v23648_v15 = vld [vmem:[#allocation143_spill] sm:$0xff] }
 0xc89   : > { %16782 = vmatpush3.bf16.msra.mxu0 %v23641_v33  ;;  %16755 = vmatprep.subr.bf16.mxu1 %v23119_v55  ;;  %v23649_v33 = vld [vmem:[#allocation144_spill] sm:$0xff] }
 0xc8a   : > { %16784 = vmatprep.subr.bf16.mxu0 %v23642_v52  ;;  %v23653_v52 = vld [vmem:[#allocation148_spill] sm:$0xff] }
 0xc8c   : > { %16757 = vmatpush3.bf16.msra.mxu1 %v23643_v36  ;;  %v23651_v36 = vld [vmem:[#allocation146_spill] sm:$0xff] }
 0xc8d   : > { %16786 = vmatpush3.bf16.msra.mxu0 %v23644_v16  ;;  %16758 = vmatprep.subr.bf16.mxu1 %v23119_v55  ;;  %v23652_v16 = vld [vmem:[#allocation147_spill] sm:$0xff] }
 0xc8e   : > { %16788 = vmatprep.subr.bf16.mxu0 %v23645_v5  ;;  %v23654_v5 = vld [vmem:[#allocation149_spill] sm:$0xff] }
 0xc90   : > { %16760 = vmatpush3.bf16.msra.mxu1 %v23646_v18 }
 0xc91   : > { %16790 = vmatpush3.bf16.msra.mxu0 %v23647_v10  ;;  %16761 = vmatprep.subr.bf16.mxu1 %v23119_v55 }
 0xc92   : > { %16792 = vmatprep.subr.bf16.mxu0 %v23648_v15  ;;  %v23655_v15 = vld [vmem:[#allocation150_spill] sm:$0xff] }
 0xc94   : > { %16763 = vmatpush3.bf16.msra.mxu1 %v23649_v33  ;;  %v23657_v33 = vld [vmem:[#allocation152_spill] sm:$0xff] }
 0xc95   : > { %16794 = vmatpush3.bf16.msra.mxu0 %v23650_v29  ;;  %16764 = vmatprep.subr.bf16.mxu1 %v23119_v55  ;;  %v23656_v29 = vld [vmem:[#allocation151_spill] sm:$0xff] }
 0xc96   : > { %16796 = vmatprep.subr.bf16.mxu0 %v23651_v36  ;;  %v23666_v36 = vld [vmem:[#allocation161_spill] sm:$0xff] }
 0xc98   : > { %16766 = vmatpush3.bf16.msra.mxu1 %v23652_v16  ;;  %v23660_v16 = vld [vmem:[#allocation155_spill] sm:$0xff] }
 0xc99   : > { %16798 = vmatpush3.bf16.msra.mxu0 %v23653_v52  ;;  %16800 = vmatprep.subr.bf16.mxu1 %v23654_v5  ;;  %v23658_v5 = vld [vmem:[#allocation153_spill] sm:$0xff]  ;;  %v23659_v52 = vld [vmem:[#allocation154_spill] sm:$0xff] }
 0xc9a   : > { %16831 = vmatprep.subr.bf16.mxu0 %v23119_v55 }
 0xc9b   : > { %14466 = vmatmul.mubr.f32.vlgmr.msra.gmra.mrb[58].mxu1 %v21276_v13 }
 0xc9c   : > { %5344 = vmatmul.mubr.f32.vlgmr.msra.gmra.mrb[62].mxu0 %v21234_v63  ;;  %16802 = vmatpush3.bf16.msra.mxu1 %v23655_v15  ;;  %v23661_v63 = vld [vmem:[#allocation156_spill] sm:$0xff] }
 0xc9d   : > { %5413 = vmatprep.mubr.f32.mxu1 %v21232_v59  ;;  %16833 = vmatpush3.bf16.msra.mxu0 %v23656_v29  ;;  %v23662_v59 = vld [vmem:[#allocation157_spill] sm:$0xff]  ;;  %v23663_v29 = vld [vmem:[#allocation158_spill] sm:$0xff]  ;;  %v23665_v15 = vld [vmem:[#allocation160_spill] sm:$0xff] }
 0xc9e   : > { %16804 = vmatprep.subr.bf16.mxu1 %v23657_v33  ;;  %16834 = vmatprep.subr.bf16.mxu0 %v23119_v55  ;;  %v23664_v33 = vld [vmem:[#allocation159_spill] sm:$0xff] }
 0xc9f   : > { %14500 = vmatprep.mubr.msk.f32.mxu0 %vm18657_vm1, %v23121_v11 }
 0xca0   : > { %16806 = vmatpush3.bf16.msra.mxu1 %v23658_v5  ;;  %v23669_v5 = vld [vmem:[#allocation164_spill] sm:$0xff] }
 0xca1   : > { %16836 = vmatpush3.bf16.msra.mxu0 %v23659_v52  ;;  %16808 = vmatprep.subr.bf16.mxu1 %v23660_v16  ;;  %v23667_v52 = vld [vmem:[#allocation162_spill] sm:$0xff]  ;;  %v23668_v16 = vld [vmem:[#allocation163_spill] sm:$0xff] }
 0xca2   : > { %16837 = vmatprep.subr.bf16.mxu0 %v23119_v55 }
 0xca4   : > { %16810 = vmatpush3.bf16.msra.mxu1 %v23661_v63  ;;  %v23672_v63 = vld [vmem:[#allocation167_spill] sm:$0xff] }
 0xca5   : > { %16839 = vmatpush3.bf16.msra.mxu0 %v23662_v59  ;;  %16812 = vmatprep.subr.bf16.mxu1 %v23663_v29  ;;  %v23670_v59 = vld [vmem:[#allocation165_spill] sm:$0xff]  ;;  %v23671_v29 = vld [vmem:[#allocation166_spill] sm:$0xff] }
 0xca6   : > { %16840 = vmatprep.subr.bf16.mxu0 %v23119_v55 }
 0xca8   : > { %16814 = vmatpush3.bf16.msra.mxu1 %v23664_v33 }
 0xca9   : > { %16842 = vmatpush3.bf16.msra.mxu0 %v23665_v15  ;;  %16816 = vmatprep.subr.bf16.mxu1 %v23666_v36  ;;  %v23673_v15 = vld [vmem:[#allocation168_spill] sm:$0xff]  ;;  %v23674_v36 = vld [vmem:[#allocation169_spill] sm:$0xff] }
 0xcaa   : > { %16843 = vmatprep.subr.bf16.mxu0 %v23119_v55 }
 0xcac   : > { %16818 = vmatpush3.bf16.msra.mxu1 %v23667_v52  ;;  %v23675_v52 = vld [vmem:[#allocation170_spill] sm:$0xff] }
 0xcad   : > { %16845 = vmatpush3.bf16.msra.mxu0 %v23668_v16  ;;  %16820 = vmatprep.subr.bf16.mxu1 %v23669_v5  ;;  %v23676_v5 = vld [vmem:[#allocation171_spill] sm:$0xff]  ;;  %v23677_v16 = vld [vmem:[#allocation172_spill] sm:$0xff] }
 0xcae   : > { %16846 = vmatprep.subr.bf16.mxu0 %v23119_v55 }
 0xcb0   : > { %16822 = vmatpush3.bf16.msra.mxu1 %v23670_v59  ;;  %v23690_v59 = vld [vmem:[#allocation24_spill] sm:$0xff] }
 0xcb1   : > { %16848 = vmatpush3.bf16.msra.mxu0 %v23671_v29  ;;  %16824 = vmatprep.subr.bf16.mxu1 %v23672_v63  ;;  %v23678_v29 = vld [vmem:[#allocation12_spill] sm:$0xff]  ;;  %v23688_v63 = vld [vmem:[#allocation22_spill] sm:$0xff] }
 0xcb2   : > { %16849 = vmatprep.subr.bf16.mxu0 %v23119_v55 }
 0xcb4   : > { %16826 = vmatpush3.bf16.msra.mxu1 %v23673_v15  ;;  %v23679_v15 = vld [vmem:[#allocation5_spill] sm:$0xff] }
 0xcb5   : > { %16851 = vmatpush3.bf16.msra.mxu0 %v23674_v36  ;;  %16828 = vmatprep.subr.bf16.mxu1 %v23675_v52  ;;  %v23680_v52 = vld [vmem:[#allocation15_spill] sm:$0xff]  ;;  %v23682_v36 = vld [vmem:[#allocation6_spill] sm:$0xff] }
 0xcb6   : > { %16852 = vmatprep.subr.bf16.mxu0 %v23119_v55 }
 0xcb8   : > { %16830 = vmatpush3.bf16.msra.mxu1 %v23676_v5  ;;  %v10821_v5 = vld [vmem:[%s18730_s23 + $0x20] sm:$0xff] }
 0xcb9   : > { %16854 = vmatpush3.bf16.msra.mxu0 %v23677_v16  ;;  %16855 = vmatprep.subr.bf16.mxu1 %v23119_v55  ;;  %v23681_v16 = vld [vmem:[#allocation16_spill] sm:$0xff] }
 0xcba   : > { %16881 = vmatprep.subr.bf16.mxu0 %v23678_v29  ;;  %5505 = vrot.lane.b32.xlu0 %v10821_v5, %s18655_s12  ;;  %v23686_v29 = vld [vmem:[#allocation7_spill] sm:$0xff] }
 0xcbb   : > { %5414 = vmatmul.mubr.f32.vlgmr.msra.gmra.mrb[60].mxu1 %v21236_v51  ;;  %v23683_v51 = vld [vmem:[#allocation17_spill] sm:$0xff] }
 0xcbc   : > { %14501 = vmatmul.mubr.f32.vlgmr.msra.gmra.mrb[64].mxu0 %v21276_v13  ;;  %16857 = vmatpush3.bf16.msra.mxu1 %v23679_v15  ;;  %v23684_v13 = vld [vmem:[#allocation18_spill] sm:$0xff] }
 0xcbd   : > { %16858 = vmatprep.subr.bf16.mxu1 %v23119_v55  ;;  %14515 = vmatprep.mubr.msk.f32.mxu1 %vm18657_vm1, %v23121_v11  ;;  %v23685_v15 = vld [vmem:[#allocation10_spill] sm:$0xff] }
 0xcbe   : > { %16883 = vmatpush1.bf16.msra.mxu0 %v23680_v52  ;;  %5721 = vmatprep.mubr.f32.mxu0 %v23121_v11  ;;  %v23687_v52 = vld [vmem:[#allocation19_spill] sm:$0xff] }
 0xcbf   : > { %16885 = vmatprep.subr.bf16.mxu0 %v23681_v16  ;;  %v23689_v16 = vld [vmem:[#allocation23_spill] sm:$0xff] }
 0xcc0   : > { %16860 = vmatpush3.bf16.msra.mxu1 %v23682_v36 }
 0xcc1   : > { %16861 = vmatprep.subr.bf16.mxu1 %v23119_v55 }
 0xcc2   : > { %16887 = vmatpush1.bf16.msra.mxu0 %v23683_v51 }
 0xcc3   : > { %16889 = vmatprep.subr.bf16.mxu0 %v23684_v13 }
 0xcc4   : > { %16863 = vmatpush3.bf16.msra.mxu1 %v23685_v15 }
 0xcc5   : > { %16865 = vmatprep.subr.bf16.mxu1 %v23686_v29 }
 0xcc6   : > { %16891 = vmatpush1.bf16.msra.mxu0 %v23687_v52 }
 0xcc7   : > { %16893 = vmatprep.subr.bf16.mxu0 %v23688_v63 }
 0xcca   : > { %16895 = vmatpush1.bf16.msra.mxu0 %v23689_v16 }
 0xccb   : > { %16909 = vmatprep.subr.bf16.mxu0 %v23690_v59 }
 0xcee   : > { %v12013_v36 = vpop.f32.mrb[50].mxu1  ;;  %v12048_v5 = vpop.f32.mrb[54].mxu0 }
 0xcef   : > { %v12014_v33 = vpop.f32.mrb[51].mxu1  ;;  %v12049_v10 = vpop.f32.mrb[55].mxu0 }
 0xcf0   : > { %v12015_v18 = vadd.f32 %v12014_v33, %v12013_v36  ;;  %v12050_v51 = vadd.f32 %v12049_v10, %v12048_v5 }
 0xcf2   : > { %v4703_v13 = vadd.f32 %v23691_v58, %v12015_v18 }
 0xcf4   : > { %v4773_v17 = vadd.f32 %v12050_v51, %v4703_v13 }
 0xd0e   : > { %v4842_v15 = vpop.f32.mrb[52].mxu1  ;;  %v12100_v20 = vpop.f32.mrb[56].mxu0 }
 0xd0f   : > { %v4843_v29 = vadd.f32 %v4842_v15, %v4773_v17  ;;  %v14397_v43 = vpop.f32.mrb[53].mxu1  ;;  %v12101_v52 = vpop.f32.mrb[57].mxu0 }
 0xd10   : > { %v12102_v41 = vadd.f32 %v12101_v52, %v12100_v20 }
 0xd11   : > { %v10818_v20 = vmul.f32 -1.442695, %v4843_v29 }
 0xd12   : > { %v4919_v59 = vadd.f32 %v21144_v39, %v12102_v41 }
 0xd2e   : > { %v12135_v63 = vpop.f32.mrb[54].mxu1 }
 0xd2f   : > { %v5058_v60 = vpop.f32.mrb[58].mxu0  ;;  %v12136_v16 = vpop.f32.mrb[55].mxu1 }
 0xd30   : > { %v12137_v31 = vadd.f32 %v12136_v16, %v12135_v63  ;;  %v14432_v22 = vpop.f32.mrb[59].mxu0 }
 0xd32   : > { %v4989_v7 = vadd.f32 %v12137_v31, %v4919_v59 }
 0xd34   : > { %v5059_v61 = vadd.f32 %v5058_v60, %v4989_v7 }
 0xd36   : > { %v10819_v15 = vmul.f32 -1.442695, %v5059_v61 }
 0xd38   : > { %18550 = vpow2.f32 %v10819_v15 }
 0xd39   : > { %18552 = vpow2.f32 %v10818_v20 }
 0xd42   : > { %v18551_v52 = vpop.eup %18550 }
 0xd43   : > { %v18553_v13 = vpop.eup %18552  ;;  %v5065_v39 = vadd.f32 1.0, %v18551_v52 }
 0xd44   : > { %v4849_v16 = vadd.f32 1.0, %v18553_v13 }
 0xd45   : > { %18554 = vrcp.f32 %v5065_v39 }
 0xd46   : > { %18556 = vrcp.f32 %v4849_v16  ;;  %v5506_v16 = vpop.permute.xlu0 %5505 }
 0xd4e   : > { %v12187_v36 = vpop.f32.mrb[56].mxu1 }
 0xd4f   : > { %v12222_v10 = vpop.f32.mrb[60].mxu0  ;;  %v12188_v33 = vpop.f32.mrb[57].mxu1 }
 0xd50   : > { %v12189_v58 = vadd.f32 %v12188_v33, %v12187_v36  ;;  %v12223_v18 = vpop.f32.mrb[61].mxu0  ;;  %v18555_v59 = vpop.eup %18554 }
 0xd51   : > { %v12224_v51 = vadd.f32 %v12223_v18, %v12222_v10  ;;  %v5495_v61 = vmul.f32 %v18555_v59, %v21154_v47  ;;  %v23694_v59 = vld [vmem:[#allocation31_spill] sm:$0xff] }
 0xd52   : > { %v5135_v17 = vadd.f32 %v21150_v42, %v12189_v58  ;;  %v18557_v42 = vpop.eup %18556 }
 0xd54   : > { %v5205_v43 = vadd.f32 %v12224_v51, %v5135_v17 }
 0xd6e   : > { %v5274_v22 = vpop.f32.mrb[58].mxu1 }
 0xd6f   : > { %v5275_v60 = vadd.f32 %v5274_v22, %v5205_v43  ;;  %v12274_v7 = vpop.f32.mrb[62].mxu0  ;;  %v14467_v41 = vpop.f32.mrb[59].mxu1 }
 0xd70   : > { %v12275_v31 = vpop.f32.mrb[63].mxu0 }
 0xd71   : > { %18558 = vtanh.f32 %v5275_v60  ;;  %v12276_v63 = vadd.f32 %v12275_v31, %v12274_v7 }
 0xd73   : > { %v5346_v18 = vadd.f32 %v21159_v8, %v12276_v63  ;;  %v23693_v63 = vld [vmem:[#allocation38_spill] sm:$0xff] }
 0xd7b   : > { %v18559_v5 = vpop.eup %18558 }
 0xd7c   : > { %v5496_v29 = vmul.f32 %v18559_v5, %v18557_v42  ;;  %v23695_v42 = vld [vmem:[#allocation32_spill] sm:$0xff]  ;;  %v23696_v5 = vld [vmem:[#allocation33_spill] sm:$0xff] }
 0xd7e   : > { %v21452_v36 = vadd.f32 %v5496_v29, %v5495_v61  ;;  %v23697_v61 = vld [vmem:[#allocation34_spill] sm:$0xff]  ;;  %v23698_v29 = vld [vmem:[#allocation35_spill] sm:$0xff] }
 0xd8e   : > { %v12309_v10 = vpop.f32.mrb[60].mxu1 }
 0xd8f   : > { %v5485_v33 = vpop.f32.mrb[64].mxu0  ;;  %v12310_v58 = vpop.f32.mrb[61].mxu1 }
 0xd90   : > { %v12311_v51 = vadd.f32 %v12310_v58, %v12309_v10  ;;  %v14502_v17 = vpop.f32.mrb[65].mxu0  ;;  %v23699_v10 = vld [vmem:[#allocation37_spill] sm:$0xff] }
 0xd92   : > { %v5416_v43 = vadd.f32 %v12311_v51, %v5346_v18  ;;  %v23701_v51 = vld [vmem:[#allocation41_spill] sm:$0xff] }
 0xd94   : > { %v5486_v15 = vadd.f32 %v5485_v33, %v5416_v43  ;;  %v23700_v33 = vld [vmem:[#allocation39_spill] sm:$0xff]  ;;  %v23702_v43 = vld [vmem:[#allocation42_spill] sm:$0xff] }
 0xd96   : > { %v10820_v20 = vmul.f32 -1.442695, %v5486_v15 }
 0xd98   : > { %18560 = vpow2.f32 %v10820_v20 }
 0xd99   : > { %18562 = vtanh.f32 %v21452_v36 }
 0xda2   : > { %v18561_v52 = vpop.eup %18560 }
 0xda3   : > { %v5492_v13 = vadd.f32 1.0, %v18561_v52  ;;  %v18563_v47 = vpop.eup %18562 }
 0xda5   : > { %18564 = vrcp.f32 %v5492_v13  ;;  %v23703_v13 = vld [vmem:[#allocation43_spill] sm:$0xff] }
 0xdaf   : > { %v18565_v39 = vpop.eup %18564 }
 0xdb0   : > { %v5499_v22 = vmul.f32 %v18565_v39, %v18563_v47  ;;  %v23704_v39 = vld [vmem:[#allocation44_spill] sm:$0xff] }
 0xdb2   : > { %5501 = vst.msk [vmem:[#allocation4 + $0x18] sm:$0xff] %vm782_vm2, %v5499_v22  ;;  %v5508_v60 = vsel %vm782_vm2, %v5499_v22, %v5506_v16 }
 0xdb3   : > { %14516 = vmatmul.mubr.msk.f32.vlgmr.msra.gmra.mrb[62].mxu1 %vm790_vm3, %v5508_v60 }
 0xdb4   : > { %16867 = vmatpush1.bf16.msra.mxu1 %v23543_v48  ;;  %5650 = vmatprep.mubr.f32.mxu1 %v23121_v11 }
 0xdb5   : > { %16869 = vmatprep.subr.bf16.mxu1 %v23544_v30 }
 0xdb8   : > { %16871 = vmatpush1.bf16.msra.mxu1 %v23545_v62 }
 0xdb9   : > { %16873 = vmatprep.subr.bf16.mxu1 %v23546_v2 }
 0xdbc   : > { %16875 = vmatpush1.bf16.msra.mxu1 %v23547_v6 }
 0xdbd   : > { %16877 = vmatprep.subr.bf16.mxu1 %v23548_v45 }
 0xdc0   : > { %16879 = vmatpush1.bf16.msra.mxu1 %v23549_v14 }
 0xdc1   : > { %16896 = vmatprep.subr.bf16.mxu1 %v23119_v55 }
 0xe86   : > { %v5578_v8 = vpop.f32.mrb[62].mxu1 }
 0xe87   : > { %v5579_v7 = vadd.f32 %v21178_v54, %v5578_v8  ;;  %v14517_v41 = vpop.f32.mrb[63].mxu1  ;;  %v23692_v54 = vld [vmem:[#allocation30_spill] sm:$0xff] }
 0xe88   : > { %v23705_v41 = vld [vmem:[#allocation45_spill] sm:$0xff] }
 0xe89   : > { %v5582_v31 = vmax.f32 %v5579_v7, 0.0 }
 0xe8b   : > { %10823 = vmatmul.mubr.msk.f32.vlgmr.msra.gmra.mrb[64].mxu1 %vm891_vm4, %v5582_v31  ;;  %10824 = vmatmul.mubr.msk.f32.vlgmr.msra.gmra.mrb[66].mxu0 %vm891_vm4, %v5582_v31 }
 0xe8c   : > { %16898 = vmatpush3.bf16.msra.mxu1 %v18950_v19  ;;  %14534 = vmatprep.mubr.msk.f32.mxu1 %vm18657_vm1, %v23121_v11 }
 0xe8d   : > { %16899 = vmatprep.subr.bf16.mxu1 %v23119_v55  ;;  %16911 = vmatpush3.bf16.msra.mxu0 %v18960_v24 }
 0xe8e   : > { %16913 = vmatprep.subr.bf16.mxu0 %v18962_v28 }
 0xe90   : > { %16901 = vmatpush3.bf16.msra.mxu1 %v18981_v35 }
 0xe91   : > { %16902 = vmatprep.subr.bf16.mxu1 %v23119_v55  ;;  %16915 = vmatpush3.bf16.msra.mxu0 %v18993_v38 }
 0xe92   : > { %16917 = vmatprep.subr.bf16.mxu0 %v18996_v40 }
 0xe94   : > { %16904 = vmatpush3.bf16.msra.mxu1 %v19011_v46 }
 0xe95   : > { %16905 = vmatprep.subr.bf16.mxu1 %v23119_v55  ;;  %16919 = vmatpush3.bf16.msra.mxu0 %v19024_v53 }
 0xe96   : > { %16921 = vmatprep.subr.bf16.mxu0 %v19030_v56 }
 0xe98   : > { %16907 = vmatpush3.bf16.msra.mxu1 %v19045_v0 }
 0xe99   : > { %16941 = vmatprep.subr.bf16.mxu1 %v19048_v1  ;;  %16923 = vmatpush3.bf16.msra.mxu0 %v19060_v9 }
 0xe9a   : > { %16925 = vmatprep.subr.bf16.mxu0 %v19066_v12 }
 0xe9b   : > { %14535 = vmatmul.mubr.msk.f32.vlgmr.msra.gmra.mrb[66].mxu1 %vm891_vm4, %v5582_v31  ;;  %v23706_v31 = vld [vmem:[#allocation46_spill] sm:$0xff] }
 0xe9c   : > { %16943 = vmatpush3.bf16.msra.mxu1 %v19081_v21 }
 0xe9d   : > { %16945 = vmatprep.subr.bf16.mxu1 %v19084_v23  ;;  %16927 = vmatpush3.bf16.msra.mxu0 %v19096_v34 }
 0xe9e   : > { %16929 = vmatprep.subr.bf16.mxu0 %v19102_v37 }
 0xea0   : > { %16947 = vmatpush3.bf16.msra.mxu1 %v19119_v49 }
 0xea1   : > { %16949 = vmatprep.subr.bf16.mxu1 %v19122_v50  ;;  %16931 = vmatpush3.bf16.msra.mxu0 %v19134_v57 }
 0xea2   : > { %16933 = vmatprep.subr.bf16.mxu0 %v23395_v44 }
 0xea4   : > { %16951 = vmatpush3.bf16.msra.mxu1 %v23396_v3 }
 0xea5   : > { %16953 = vmatprep.subr.bf16.mxu1 %v23397_v25  ;;  %16935 = vmatpush3.bf16.msra.mxu0 %v23398_v27 }
 0xea6   : > { %16937 = vmatprep.subr.bf16.mxu0 %v23399_v32 }
 0xea8   : > { %16955 = vmatpush3.bf16.msra.mxu1 %v23400_v4 }
 0xea9   : > { %16957 = vmatprep.subr.bf16.mxu1 %v23692_v54  ;;  %16939 = vmatpush3.bf16.msra.mxu0 %v23693_v63 }
 0xeaa   : > { %16972 = vmatprep.subr.bf16.mxu0 %v23119_v55 }
 0xeac   : > { %16959 = vmatpush3.bf16.msra.mxu1 %v23694_v59 }
 0xead   : > { %16961 = vmatprep.subr.bf16.mxu1 %v23695_v42 }
 0xeb0   : > { %16963 = vmatpush3.bf16.msra.mxu1 %v23696_v5 }
 0xeb1   : > { %16965 = vmatprep.subr.bf16.mxu1 %v23697_v61 }
 0xeb4   : > { %16967 = vmatpush3.bf16.msra.mxu1 %v23698_v29 }
 0xeb5   : > { %16969 = vmatprep.subr.bf16.mxu1 %v23699_v10 }
 0xeb8   : > { %16971 = vmatpush3.bf16.msra.mxu1 %v23700_v33 }
 0xeb9   : > { %16997 = vmatprep.subr.bf16.mxu1 %v23261_v26 }
 0xf5e   : > { %v5652_v58 = vpop.f32.mrb[64].mxu1  ;;  %v5723_v18 = vpop.f32.mrb[66].mxu0 }
 0xf5f   : > { %v5653_v17 = vadd.f32 %v5652_v58, %v23701_v51  ;;  %v5724_v15 = vadd.f32 %v5723_v18, %v23702_v43  ;;  %v5654_v20 = vpop.f32.mrb[65].mxu1  ;;  %v5725_v52 = vpop.f32.mrb[67].mxu0  ;;  %v23707_v58 = vld [vmem:[#allocation47_spill] sm:$0xff]  ;;  %v23708_v18 = vld [vmem:[#allocation48_spill] sm:$0xff] }
 0xf60   : > { %v5655_v47 = vadd.f32 %v5654_v20, %v23703_v13  ;;  %v5726_v16 = vadd.f32 %v5725_v52, %v23704_v39  ;;  %v23711_v52 = vld [vmem:[#allocation51_spill] sm:$0xff] }
 0xf61   : > { %v21522_v8 = vmax.f32 %v5653_v17, 0.0  ;;  %v21524_v7 = vmax.f32 %v5724_v15, 0.0  ;;  %v23709_v17 = vld [vmem:[#allocation49_spill] sm:$0xff]  ;;  %v23710_v15 = vld [vmem:[#allocation50_spill] sm:$0xff]  ;;  %v23727_v39 = vld [vmem:[#allocation67_spill] sm:$0xff] }
 0xf62   : > { %v21518_v22 = vmax.f32 %v5655_v47, 0.0  ;;  %v21520_v60 = vmax.f32 %v5726_v16, 0.0  ;;  %v23712_v47 = vld [vmem:[#allocation52_spill] sm:$0xff]  ;;  %v23767_v13 = vld [vmem:[#allocation107_spill] sm:$0xff] }
 0xf64   : > { %5867 = vmatprep.mubr.f32.mxu0 %v21518_v22  ;;  %5937 = vmatprep.mubr.f32.mxu1 %v21520_v60 }
 0xf65   : > { %5868 = vmatmul.mubr.f32.vlgmr.msra.gmra.mrb[68].mxu0 %v21522_v8  ;;  %5938 = vmatmul.mubr.f32.vlgmr.msra.gmra.mrb[68].mxu1 %v21524_v7 }
 0xf66   : > { %16974 = vmatpush3.bf16.msra.mxu0 %v23705_v41  ;;  %16999 = vmatpush3.bf16.msra.mxu1 %v23706_v31  ;;  %v23714_v31 = vld [vmem:[#allocation54_spill] sm:$0xff]  ;;  %v23715_v41 = vld [vmem:[#allocation55_spill] sm:$0xff] }
 0xf67   : > { %6083 = vmatprep.mubr.f32.mxu1 %v21518_v22  ;;  %16975 = vmatprep.subr.bf16.mxu0 %v23119_v55 }
 0xf68   : > { %17001 = vmatprep.subr.bf16.mxu1 %v23707_v58  ;;  %14569 = vmatprep.mubr.msk.f32.mxu0 %vm18657_vm1, %v23121_v11  ;;  %v23713_v58 = vld [vmem:[#allocation53_spill] sm:$0xff] }
 0xf6a   : > { %16977 = vmatpush3.bf16.msra.mxu0 %v23708_v18  ;;  %17003 = vmatpush3.bf16.msra.mxu1 %v23709_v17  ;;  %v23716_v17 = vld [vmem:[#allocation56_spill] sm:$0xff]  ;;  %v23717_v18 = vld [vmem:[#allocation57_spill] sm:$0xff] }
 0xf6b   : > { %16978 = vmatprep.subr.bf16.mxu0 %v23119_v55  ;;  %17005 = vmatprep.subr.bf16.mxu1 %v23710_v15  ;;  %v23718_v15 = vld [vmem:[#allocation58_spill] sm:$0xff] }
 0xf6e   : > { %v5794_v20 = vpop.f32.mrb[66].mxu1  ;;  %16980 = vmatpush3.bf16.msra.mxu0 %v23711_v52  ;;  %17007 = vmatpush3.bf16.msra.mxu1 %v23712_v47  ;;  %v23719_v47 = vld [vmem:[#allocation59_spill] sm:$0xff]  ;;  %v23721_v52 = vld [vmem:[#allocation61_spill] sm:$0xff] }
 0xf6f   : > { %v14536_v16 = vpop.f32.mrb[67].mxu1  ;;  %16981 = vmatprep.subr.bf16.mxu0 %v23119_v55  ;;  %17009 = vmatprep.subr.bf16.mxu1 %v23713_v58  ;;  %v23724_v58 = vld [vmem:[#allocation64_spill] sm:$0xff] }
 0xf70   : > { %v23720_v16 = vld [vmem:[#allocation60_spill] sm:$0xff] }
 0xf72   : > { %16983 = vmatpush3.bf16.msra.mxu0 %v23714_v31  ;;  %17011 = vmatpush3.bf16.msra.mxu1 %v23715_v41  ;;  %v23722_v31 = vld [vmem:[#allocation62_spill] sm:$0xff]  ;;  %v23723_v41 = vld [vmem:[#allocation63_spill] sm:$0xff] }
 0xf73   : > { %16984 = vmatprep.subr.bf16.mxu0 %v23119_v55  ;;  %17013 = vmatprep.subr.bf16.mxu1 %v23716_v17  ;;  %v23725_v17 = vld [vmem:[#allocation65_spill] sm:$0xff] }
 0xf76   : > { %16986 = vmatpush3.bf16.msra.mxu0 %v23717_v18  ;;  %17015 = vmatpush3.bf16.msra.mxu1 %v23718_v15  ;;  %v5795_v18 = vadd.f32 %v5794_v20, %v23725_v17  ;;  %v23726_v15 = vld [vmem:[#allocation66_spill] sm:$0xff]  ;;  %v23731_v20 = vld [vmem:[#allocation71_spill] sm:$0xff]  ;;  %v23740_v17 = vld [vmem:[#allocation80_spill] sm:$0xff] }
 0xf77   : > { %16987 = vmatprep.subr.bf16.mxu0 %v23119_v55  ;;  %17017 = vmatprep.subr.bf16.mxu1 %v23719_v47  ;;  %v23728_v47 = vld [vmem:[#allocation68_spill] sm:$0xff] }
 0xf7a   : > { %16989 = vmatpush3.bf16.msra.mxu0 %v23720_v16  ;;  %17019 = vmatpush3.bf16.msra.mxu1 %v23721_v52  ;;  %v21564_v16 = vmax.f32 %v5795_v18, 0.0  ;;  %v23729_v52 = vld [vmem:[#allocation69_spill] sm:$0xff] }
 0xf7b   : > { %16990 = vmatprep.subr.bf16.mxu0 %v23119_v55  ;;  %17021 = vmatprep.subr.bf16.mxu1 %v23722_v31  ;;  %v23733_v18 = vld [vmem:[#allocation73_spill] sm:$0xff] }
 0xf7c   : > { %v23765_v31 = vld [vmem:[#allocation105_spill] sm:$0xff] }
 0xf7e   : > { %16992 = vmatpush3.bf16.msra.mxu0 %v23723_v41  ;;  %17023 = vmatpush3.bf16.msra.mxu1 %v23724_v58  ;;  %v23730_v58 = vld [vmem:[#allocation70_spill] sm:$0xff]  ;;  %v23741_v41 = vld [vmem:[#allocation81_spill] sm:$0xff] }
 0xf7f   : > { %16993 = vmatprep.subr.bf16.mxu0 %v23119_v55  ;;  %17025 = vmatprep.subr.bf16.mxu1 %v23726_v15  ;;  %v23732_v15 = vld [vmem:[#allocation72_spill] sm:$0xff] }
 0xf82   : > { %16995 = vmatpush3.bf16.msra.mxu0 %v23727_v39  ;;  %17027 = vmatpush3.bf16.msra.mxu1 %v23728_v47  ;;  %v23735_v47 = vld [vmem:[#allocation75_spill] sm:$0xff]  ;;  %v23737_v39 = vld [vmem:[#allocation77_spill] sm:$0xff] }
 0xf83   : > { %17029 = vmatprep.subr.bf16.mxu0 %v23729_v52  ;;  %17060 = vmatprep.subr.bf16.mxu1 %v23119_v55  ;;  %v23734_v52 = vld [vmem:[#allocation74_spill] sm:$0xff] }
 0xf85   : > { %14570 = vmatmul.mubr.f32.vlgmr.msra.gmra.mrb[70].mxu0 %v21564_v16  ;;  %6084 = vmatmul.mubr.f32.vlgmr.msra.gmra.mrb[70].mxu1 %v21522_v8 }
 0xf86   : > { %17031 = vmatpush3.bf16.msra.mxu0 %v23730_v58  ;;  %6153 = vmatprep.mubr.f32.mxu0 %v21520_v60  ;;  %v23736_v58 = vld [vmem:[#allocation76_spill] sm:$0xff] }
 0xf87   : > { %17062 = vmatpush3.bf16.msra.mxu1 %v23731_v20  ;;  %17033 = vmatprep.subr.bf16.mxu0 %v23732_v15  ;;  %v23738_v20 = vld [vmem:[#allocation78_spill] sm:$0xff]  ;;  %v23739_v15 = vld [vmem:[#allocation79_spill] sm:$0xff] }
 0xf88   : > { %17063 = vmatprep.subr.bf16.mxu1 %v23119_v55  ;;  %14604 = vmatprep.mubr.msk.f32.mxu1 %vm18657_vm1, %v23121_v11 }
 0xf8a   : > { %17035 = vmatpush3.bf16.msra.mxu0 %v23733_v18  ;;  %v23744_v18 = vld [vmem:[#allocation84_spill] sm:$0xff] }
 0xf8b   : > { %17065 = vmatpush3.bf16.msra.mxu1 %v23734_v52  ;;  %17037 = vmatprep.subr.bf16.mxu0 %v23735_v47  ;;  %v23742_v52 = vld [vmem:[#allocation82_spill] sm:$0xff]  ;;  %v23743_v47 = vld [vmem:[#allocation83_spill] sm:$0xff] }
 0xf8c   : > { %17066 = vmatprep.subr.bf16.mxu1 %v23119_v55 }
 0xf8e   : > { %17039 = vmatpush3.bf16.msra.mxu0 %v23736_v58  ;;  %v23747_v58 = vld [vmem:[#allocation87_spill] sm:$0xff] }
 0xf8f   : > { %17068 = vmatpush3.bf16.msra.mxu1 %v23737_v39  ;;  %17041 = vmatprep.subr.bf16.mxu0 %v23738_v20  ;;  %v23745_v39 = vld [vmem:[#allocation85_spill] sm:$0xff]  ;;  %v23746_v20 = vld [vmem:[#allocation86_spill] sm:$0xff] }
 0xf90   : > { %17069 = vmatprep.subr.bf16.mxu1 %v23119_v55 }
 0xf92   : > { %17043 = vmatpush3.bf16.msra.mxu0 %v23739_v15  ;;  %v23750_v15 = vld [vmem:[#allocation90_spill] sm:$0xff] }
 0xf93   : > { %17071 = vmatpush3.bf16.msra.mxu1 %v23740_v17  ;;  %17045 = vmatprep.subr.bf16.mxu0 %v23741_v41  ;;  %v23748_v17 = vld [vmem:[#allocation88_spill] sm:$0xff]  ;;  %v23749_v41 = vld [vmem:[#allocation89_spill] sm:$0xff] }
 0xf94   : > { %17072 = vmatprep.subr.bf16.mxu1 %v23119_v55 }
 0xf96   : > { %17047 = vmatpush3.bf16.msra.mxu0 %v23742_v52  ;;  %v23753_v52 = vld [vmem:[#allocation93_spill] sm:$0xff] }
 0xf97   : > { %17074 = vmatpush3.bf16.msra.mxu1 %v23743_v47  ;;  %17049 = vmatprep.subr.bf16.mxu0 %v23744_v18  ;;  %v23751_v47 = vld [vmem:[#allocation91_spill] sm:$0xff]  ;;  %v23752_v18 = vld [vmem:[#allocation92_spill] sm:$0xff] }
 0xf98   : > { %17075 = vmatprep.subr.bf16.mxu1 %v23119_v55 }
 0xf9a   : > { %17051 = vmatpush3.bf16.msra.mxu0 %v23745_v39  ;;  %v23754_v39 = vld [vmem:[#allocation94_spill] sm:$0xff] }
 0xf9b   : > { %17077 = vmatpush3.bf16.msra.mxu1 %v23746_v20  ;;  %17053 = vmatprep.subr.bf16.mxu0 %v23747_v58  ;;  %v23755_v58 = vld [vmem:[#allocation95_spill] sm:$0xff] }
 0xf9c   : > { %17078 = vmatprep.subr.bf16.mxu1 %v23119_v55  ;;  %v23763_v20 = vld [vmem:[#allocation103_spill] sm:$0xff] }
 0xf9e   : > { %17055 = vmatpush3.bf16.msra.mxu0 %v23748_v17  ;;  %v23762_v17 = vld [vmem:[#allocation102_spill] sm:$0xff] }
 0xf9f   : > { %17080 = vmatpush3.bf16.msra.mxu1 %v23749_v41  ;;  %17057 = vmatprep.subr.bf16.mxu0 %v23750_v15  ;;  %v23756_v41 = vld [vmem:[#allocation96_spill] sm:$0xff]  ;;  %v23757_v15 = vld [vmem:[#allocation97_spill] sm:$0xff] }
 0xfa0   : > { %17081 = vmatprep.subr.bf16.mxu1 %v23119_v55 }
 0xfa2   : > { %17059 = vmatpush3.bf16.msra.mxu0 %v23751_v47  ;;  %v23758_v47 = vld [vmem:[#allocation98_spill] sm:$0xff] }
 0xfa3   : > { %17083 = vmatpush3.bf16.msra.mxu1 %v23752_v18  ;;  %17085 = vmatprep.subr.bf16.mxu0 %v23753_v52  ;;  %v23759_v18 = vld [vmem:[#allocation99_spill] sm:$0xff]  ;;  %v23760_v52 = vld [vmem:[#allocation100_spill] sm:$0xff] }
 0xfa4   : > { %17117 = vmatprep.subr.bf16.mxu1 %v23754_v39  ;;  %v23761_v39 = vld [vmem:[#allocation101_spill] sm:$0xff] }
 0xfa5   : > { %6154 = vmatmul.mubr.f32.vlgmr.msra.gmra.mrb[72].mxu0 %v21524_v7 }
 0xfa6   : > { %14605 = vmatmul.mubr.f32.vlgmr.msra.gmra.mrb[72].mxu1 %v21564_v16  ;;  %17087 = vmatpush3.bf16.msra.mxu0 %v23755_v58  ;;  %v23764_v58 = vld [vmem:[#allocation104_spill] sm:$0xff] }
 0xfa7   : > { %6299 = vmatprep.mubr.f32.mxu0 %v21518_v22  ;;  %17119 = vmatpush3.bf16.msra.mxu1 %v23756_v41  ;;  %v23766_v41 = vld [vmem:[#allocation106_spill] sm:$0xff] }
 0xfa8   : > { %6369 = vmatprep.mubr.f32.mxu1 %v21520_v60  ;;  %17089 = vmatprep.subr.bf16.mxu0 %v23757_v15  ;;  %v23768_v15 = vld [vmem:[#allocation108_spill] sm:$0xff] }
 0xfa9   : > { %17121 = vmatprep.subr.bf16.mxu1 %v23758_v47  ;;  %v23769_v47 = vld [vmem:[#allocation109_spill] sm:$0xff] }
 0xfaa   : > { %17091 = vmatpush3.bf16.msra.mxu0 %v23759_v18  ;;  %v23770_v18 = vld [vmem:[#allocation110_spill] sm:$0xff] }
 0xfab   : > { %17123 = vmatpush3.bf16.msra.mxu1 %v23760_v52  ;;  %17093 = vmatprep.subr.bf16.mxu0 %v23761_v39  ;;  %v23771_v52 = vld [vmem:[#allocation111_spill] sm:$0xff]  ;;  %v23772_v39 = vld [vmem:[#allocation112_spill] sm:$0xff] }
 0xfac   : > { %17125 = vmatprep.subr.bf16.mxu1 %v23762_v17  ;;  %v23773_v17 = vld [vmem:[#allocation113_spill] sm:$0xff] }
 0xfae   : > { %17095 = vmatpush3.bf16.msra.mxu0 %v23763_v20  ;;  %v23774_v20 = vld [vmem:[#allocation114_spill] sm:$0xff] }
 0xfaf   : > { %17127 = vmatpush3.bf16.msra.mxu1 %v23764_v58  ;;  %17097 = vmatprep.subr.bf16.mxu0 %v23765_v31  ;;  %v23775_v58 = vld [vmem:[#allocation115_spill] sm:$0xff]  ;;  %v23776_v31 = vld [vmem:[#allocation116_spill] sm:$0xff] }
 0xfb0   : > { %17129 = vmatprep.subr.bf16.mxu1 %v23766_v41  ;;  %v23777_v41 = vld [vmem:[#allocation117_spill] sm:$0xff] }
 0xfb2   : > { %17099 = vmatpush3.bf16.msra.mxu0 %v23767_v13  ;;  %v23778_v13 = vld [vmem:[#allocation118_spill] sm:$0xff] }
 0xfb3   : > { %17131 = vmatpush3.bf16.msra.mxu1 %v23768_v15  ;;  %17101 = vmatprep.subr.bf16.mxu0 %v23769_v47  ;;  %v23779_v15 = vld [vmem:[#allocation119_spill] sm:$0xff]  ;;  %v23780_v47 = vld [vmem:[#allocation120_spill] sm:$0xff] }
 0xfb4   : > { %17133 = vmatprep.subr.bf16.mxu1 %v23770_v18  ;;  %v23781_v18 = vld [vmem:[#allocation121_spill] sm:$0xff] }
 0xfb6   : > { %17103 = vmatpush3.bf16.msra.mxu0 %v23771_v52  ;;  %v23782_v52 = vld [vmem:[#allocation122_spill] sm:$0xff] }
 0xfb7   : > { %17135 = vmatpush3.bf16.msra.mxu1 %v23772_v39  ;;  %17105 = vmatprep.subr.bf16.mxu0 %v23773_v17  ;;  %v23783_v39 = vld [vmem:[#allocation123_spill] sm:$0xff]  ;;  %v23784_v17 = vld [vmem:[#allocation124_spill] sm:$0xff] }
 0xfb8   : > { %17137 = vmatprep.subr.bf16.mxu1 %v23774_v20 }
 0xfba   : > { %17107 = vmatpush3.bf16.msra.mxu0 %v23775_v58  ;;  %v23785_v58 = vld [vmem:[#allocation125_spill] sm:$0xff] }
 0xfbb   : > { %17139 = vmatpush3.bf16.msra.mxu1 %v23776_v31  ;;  %17109 = vmatprep.subr.bf16.mxu0 %v23777_v41 }
 0xfbc   : > { %17141 = vmatprep.subr.bf16.mxu1 %v23778_v13  ;;  %v23786_v13 = vld [vmem:[#allocation126_spill] sm:$0xff] }
 0xfbe   : > { %17111 = vmatpush3.bf16.msra.mxu0 %v23779_v15  ;;  %v23787_v15 = vld [vmem:[#allocation127_spill] sm:$0xff] }
 0xfbf   : > { %17143 = vmatpush3.bf16.msra.mxu1 %v23780_v47  ;;  %17113 = vmatprep.subr.bf16.mxu0 %v23781_v18  ;;  %v23796_v18 = vld [vmem:[#allocation136_spill] sm:$0xff]  ;;  %v23799_v47 = vld [vmem:[#allocation139_spill] sm:$0xff] }
 0xfc0   : > { %17145 = vmatprep.subr.bf16.mxu1 %v23782_v52  ;;  %v23788_v52 = vld [vmem:[#allocation128_spill] sm:$0xff] }
 0xfc2   : > { %17115 = vmatpush3.bf16.msra.mxu0 %v23783_v39  ;;  %v23791_v39 = vld [vmem:[#allocation131_spill] sm:$0xff] }
 0xfc3   : > { %17147 = vmatpush3.bf16.msra.mxu1 %v23784_v17  ;;  %17148 = vmatprep.subr.bf16.mxu0 %v23119_v55  ;;  %v23789_v17 = vld [vmem:[#allocation129_spill] sm:$0xff] }
 0xfc4   : > { %17173 = vmatprep.subr.bf16.mxu1 %v23785_v58  ;;  %v23790_v58 = vld [vmem:[#allocation130_spill] sm:$0xff] }
 0xfc5   : > { %6300 = vmatmul.mubr.f32.vlgmr.msra.gmra.mrb[74].mxu0 %v21522_v8 }
 0xfc6   : > { %6370 = vmatmul.mubr.f32.vlgmr.msra.gmra.mrb[74].mxu1 %v21524_v7  ;;  %17150 = vmatpush3.bf16.msra.mxu0 %v23786_v13  ;;  %v23792_v13 = vld [vmem:[#allocation132_spill] sm:$0xff] }
 0xfc7   : > { %17175 = vmatpush3.bf16.msra.mxu1 %v23787_v15  ;;  %6510 = vmatprep.mubr.f32.mxu1 %v21518_v22  ;;  %v23793_v15 = vld [vmem:[#allocation133_spill] sm:$0xff]  ;;  %v23794_v22 = vld [vmem:[#allocation134_spill] sm:$0xff] }
 0xfc8   : > { %17151 = vmatprep.subr.bf16.mxu0 %v23119_v55  ;;  %17177 = vmatprep.subr.bf16.mxu1 %v23788_v52  ;;  %v23795_v52 = vld [vmem:[#allocation135_spill] sm:$0xff] }
 0xfc9   : > { %14639 = vmatprep.mubr.msk.f32.mxu0 %vm18657_vm1, %v23121_v11 }
 0xfca   : > { %17153 = vmatpush3.bf16.msra.mxu0 %v23789_v17  ;;  %v23797_v17 = vld [vmem:[#allocation137_spill] sm:$0xff] }
 0xfcb   : > { %17179 = vmatpush3.bf16.msra.mxu1 %v23790_v58  ;;  %17154 = vmatprep.subr.bf16.mxu0 %v23119_v55  ;;  %v23798_v58 = vld [vmem:[#allocation138_spill] sm:$0xff] }
 0xfcc   : > { %17181 = vmatprep.subr.bf16.mxu1 %v23791_v39  ;;  %v23802_v39 = vld [vmem:[#allocation142_spill] sm:$0xff] }
 0xfce   : > { %17156 = vmatpush3.bf16.msra.mxu0 %v23792_v13  ;;  %v23800_v13 = vld [vmem:[#allocation140_spill] sm:$0xff] }
 0xfcf   : > { %17183 = vmatpush3.bf16.msra.mxu1 %v23793_v15  ;;  %17157 = vmatprep.subr.bf16.mxu0 %v23119_v55  ;;  %v23801_v15 = vld [vmem:[#allocation141_spill] sm:$0xff] }
 0xfd0   : > { %17185 = vmatprep.subr.bf16.mxu1 %v23794_v22  ;;  %v23805_v22 = vld [vmem:[#allocation145_spill] sm:$0xff] }
 0xfd2   : > { %17159 = vmatpush3.bf16.msra.mxu0 %v23795_v52  ;;  %v23803_v52 = vld [vmem:[#allocation143_spill] sm:$0xff] }
 0xfd3   : > { %17187 = vmatpush3.bf16.msra.mxu1 %v23796_v18  ;;  %17160 = vmatprep.subr.bf16.mxu0 %v23119_v55  ;;  %v23804_v18 = vld [vmem:[#allocation144_spill] sm:$0xff] }
 0xfd4   : > { %17189 = vmatprep.subr.bf16.mxu1 %v23797_v17  ;;  %v23808_v17 = vld [vmem:[#allocation148_spill] sm:$0xff] }
 0xfd6   : > { %17162 = vmatpush3.bf16.msra.mxu0 %v23798_v58  ;;  %v23806_v58 = vld [vmem:[#allocation146_spill] sm:$0xff] }
 0xfd7   : > { %17191 = vmatpush3.bf16.msra.mxu1 %v23799_v47  ;;  %17163 = vmatprep.subr.bf16.mxu0 %v23119_v55  ;;  %v23807_v47 = vld [vmem:[#allocation147_spill] sm:$0xff] }
 0xfd8   : > { %17193 = vmatprep.subr.bf16.mxu1 %v23800_v13  ;;  %v23809_v13 = vld [vmem:[#allocation149_spill] sm:$0xff] }
 0xfda   : > { %17165 = vmatpush3.bf16.msra.mxu0 %v23801_v15 }
 0xfdb   : > { %17195 = vmatpush3.bf16.msra.mxu1 %v23802_v39  ;;  %17166 = vmatprep.subr.bf16.mxu0 %v23119_v55 }
 0xfdc   : > { %17197 = vmatprep.subr.bf16.mxu1 %v23803_v52  ;;  %v23810_v52 = vld [vmem:[#allocation150_spill] sm:$0xff] }
 0xfde   : > { %17168 = vmatpush3.bf16.msra.mxu0 %v23804_v18  ;;  %v23812_v18 = vld [vmem:[#allocation152_spill] sm:$0xff] }
 0xfdf   : > { %17199 = vmatpush3.bf16.msra.mxu1 %v23805_v22  ;;  %17169 = vmatprep.subr.bf16.mxu0 %v23119_v55  ;;  %v23811_v22 = vld [vmem:[#allocation151_spill] sm:$0xff] }
 0xfe0   : > { %17201 = vmatprep.subr.bf16.mxu1 %v23806_v58  ;;  %v23821_v58 = vld [vmem:[#allocation161_spill] sm:$0xff] }
 0xfe2   : > { %17171 = vmatpush3.bf16.msra.mxu0 %v23807_v47  ;;  %v23815_v47 = vld [vmem:[#allocation155_spill] sm:$0xff] }
 0xfe3   : > { %17203 = vmatpush3.bf16.msra.mxu1 %v23808_v17  ;;  %17205 = vmatprep.subr.bf16.mxu0 %v23809_v13  ;;  %v23813_v13 = vld [vmem:[#allocation153_spill] sm:$0xff]  ;;  %v23814_v17 = vld [vmem:[#allocation154_spill] sm:$0xff] }
 0xfe4   : > { %17236 = vmatprep.subr.bf16.mxu1 %v23119_v55 }
 0xfe5   : > { %14640 = vmatmul.mubr.f32.vlgmr.msra.gmra.mrb[76].mxu0 %v21564_v16 }
 0xfe6   : > { %6511 = vmatmul.mubr.f32.vlgmr.msra.gmra.mrb[76].mxu1 %v21522_v8  ;;  %17207 = vmatpush3.bf16.msra.mxu0 %v23810_v52  ;;  %v23816_v8 = vld [vmem:[#allocation156_spill] sm:$0xff] }
 0xfe7   : > { %6580 = vmatprep.mubr.f32.mxu0 %v21520_v60  ;;  %17238 = vmatpush3.bf16.msra.mxu1 %v23811_v22  ;;  %v23817_v60 = vld [vmem:[#allocation157_spill] sm:$0xff]  ;;  %v23818_v22 = vld [vmem:[#allocation158_spill] sm:$0xff]  ;;  %v23820_v52 = vld [vmem:[#allocation160_spill] sm:$0xff] }
 0xfe8   : > { %17209 = vmatprep.subr.bf16.mxu0 %v23812_v18  ;;  %17239 = vmatprep.subr.bf16.mxu1 %v23119_v55  ;;  %v23819_v18 = vld [vmem:[#allocation159_spill] sm:$0xff] }
 0xfe9   : > { %14674 = vmatprep.mubr.msk.f32.mxu1 %vm18657_vm1, %v23121_v11 }
 0xfea   : > { %17211 = vmatpush3.bf16.msra.mxu0 %v23813_v13  ;;  %v23824_v13 = vld [vmem:[#allocation164_spill] sm:$0xff] }
 0xfeb   : > { %17241 = vmatpush3.bf16.msra.mxu1 %v23814_v17  ;;  %17213 = vmatprep.subr.bf16.mxu0 %v23815_v47  ;;  %v23822_v17 = vld [vmem:[#allocation162_spill] sm:$0xff]  ;;  %v23823_v47 = vld [vmem:[#allocation163_spill] sm:$0xff] }
 0xfec   : > { %17242 = vmatprep.subr.bf16.mxu1 %v23119_v55 }
 0xfee   : > { %17215 = vmatpush3.bf16.msra.mxu0 %v23816_v8  ;;  %v23827_v8 = vld [vmem:[#allocation167_spill] sm:$0xff] }
 0xfef   : > { %17244 = vmatpush3.bf16.msra.mxu1 %v23817_v60  ;;  %17217 = vmatprep.subr.bf16.mxu0 %v23818_v22  ;;  %v23825_v60 = vld [vmem:[#allocation165_spill] sm:$0xff]  ;;  %v23826_v22 = vld [vmem:[#allocation166_spill] sm:$0xff] }
 0xff0   : > { %17245 = vmatprep.subr.bf16.mxu1 %v23119_v55 }
 0xff2   : > { %17219 = vmatpush3.bf16.msra.mxu0 %v23819_v18 }
 0xff3   : > { %17247 = vmatpush3.bf16.msra.mxu1 %v23820_v52  ;;  %17221 = vmatprep.subr.bf16.mxu0 %v23821_v58  ;;  %v23828_v52 = vld [vmem:[#allocation168_spill] sm:$0xff]  ;;  %v23829_v58 = vld [vmem:[#allocation169_spill] sm:$0xff] }
 0xff4   : > { %17248 = vmatprep.subr.bf16.mxu1 %v23119_v55 }
 0xff6   : > { %17223 = vmatpush3.bf16.msra.mxu0 %v23822_v17  ;;  %v23830_v17 = vld [vmem:[#allocation170_spill] sm:$0xff] }
 0xff7   : > { %17250 = vmatpush3.bf16.msra.mxu1 %v23823_v47  ;;  %17225 = vmatprep.subr.bf16.mxu0 %v23824_v13  ;;  %v23831_v13 = vld [vmem:[#allocation171_spill] sm:$0xff]  ;;  %v23832_v47 = vld [vmem:[#allocation172_spill] sm:$0xff] }
 0xff8   : > { %17251 = vmatprep.subr.bf16.mxu1 %v23119_v55 }
 0xffa   : > { %17227 = vmatpush3.bf16.msra.mxu0 %v23825_v60  ;;  %v23845_v60 = vld [vmem:[#allocation24_spill] sm:$0xff] }
 0xffb   : > { %17253 = vmatpush3.bf16.msra.mxu1 %v23826_v22  ;;  %17229 = vmatprep.subr.bf16.mxu0 %v23827_v8  ;;  %v23833_v22 = vld [vmem:[#allocation12_spill] sm:$0xff]  ;;  %v23843_v8 = vld [vmem:[#allocation22_spill] sm:$0xff] }
 0xffc   : > { %17254 = vmatprep.subr.bf16.mxu1 %v23119_v55 }
 0xffe   : > { %17231 = vmatpush3.bf16.msra.mxu0 %v23828_v52  ;;  %v23834_v52 = vld [vmem:[#allocation5_spill] sm:$0xff] }
 0xfff   : > { %17256 = vmatpush3.bf16.msra.mxu1 %v23829_v58  ;;  %17233 = vmatprep.subr.bf16.mxu0 %v23830_v17  ;;  %v23835_v17 = vld [vmem:[#allocation15_spill] sm:$0xff]  ;;  %v23837_v58 = vld [vmem:[#allocation6_spill] sm:$0xff] }
0x1000   : > { %17257 = vmatprep.subr.bf16.mxu1 %v23119_v55 }
0x1002   : > { %17235 = vmatpush3.bf16.msra.mxu0 %v23831_v13  ;;  %v10829_v13 = vld [vmem:[%s18730_s23 + $0x28] sm:$0xff] }
0x1003   : > { %17259 = vmatpush3.bf16.msra.mxu1 %v23832_v47  ;;  %17260 = vmatprep.subr.bf16.mxu0 %v23119_v55  ;;  %v23836_v47 = vld [vmem:[#allocation16_spill] sm:$0xff] }
0x1004   : > { %17286 = vmatprep.subr.bf16.mxu1 %v23833_v22  ;;  %6672 = vrot.lane.b32.xlu1 %v10829_v13, %s18655_s12  ;;  %v23841_v22 = vld [vmem:[#allocation7_spill] sm:$0xff] }
0x1005   : > { %6581 = vmatmul.mubr.f32.vlgmr.msra.gmra.mrb[78].mxu0 %v21524_v7  ;;  %v23838_v7 = vld [vmem:[#allocation17_spill] sm:$0xff] }
0x1006   : > { %14675 = vmatmul.mubr.f32.vlgmr.msra.gmra.mrb[78].mxu1 %v21564_v16  ;;  %17262 = vmatpush3.bf16.msra.mxu0 %v23834_v52  ;;  %v23839_v16 = vld [vmem:[#allocation18_spill] sm:$0xff] }
0x1007   : > { %17263 = vmatprep.subr.bf16.mxu0 %v23119_v55  ;;  %14689 = vmatprep.mubr.msk.f32.mxu0 %vm18657_vm1, %v23121_v11  ;;  %v23840_v52 = vld [vmem:[#allocation10_spill] sm:$0xff] }
0x1008   : > { %17288 = vmatpush1.bf16.msra.mxu1 %v23835_v17  ;;  %6888 = vmatprep.mubr.f32.mxu1 %v23121_v11  ;;  %v23842_v17 = vld [vmem:[#allocation19_spill] sm:$0xff] }
0x1009   : > { %17290 = vmatprep.subr.bf16.mxu1 %v23836_v47  ;;  %v23844_v47 = vld [vmem:[#allocation23_spill] sm:$0xff] }
0x100a   : > { %17265 = vmatpush3.bf16.msra.mxu0 %v23837_v58 }
0x100b   : > { %17266 = vmatprep.subr.bf16.mxu0 %v23119_v55 }
0x100c   : > { %17292 = vmatpush1.bf16.msra.mxu1 %v23838_v7 }
0x100d   : > { %17294 = vmatprep.subr.bf16.mxu1 %v23839_v16 }
0x100e   : > { %17268 = vmatpush3.bf16.msra.mxu0 %v23840_v52  ;;  %v21739_v52 = vld [vmem:[%s22699_s6] ss:$0 sm:$0xff] }
0x100f   : > { %17270 = vmatprep.subr.bf16.mxu0 %v23841_v22  ;;  %23846 = vst [vmem:[#allocation174_spill] sm:$0xff] %v21739_v52 }
0x1010   : > { %17296 = vmatpush1.bf16.msra.mxu1 %v23842_v17 }
0x1011   : > { %17298 = vmatprep.subr.bf16.mxu1 %v23843_v8 }
0x1014   : > { %17300 = vmatpush1.bf16.msra.mxu1 %v23844_v47 }
0x1015   : > { %17314 = vmatprep.subr.bf16.mxu1 %v23845_v60 }
0x1038   : > { %v12377_v58 = vpop.f32.mrb[68].mxu0  ;;  %v12412_v13 = vpop.f32.mrb[68].mxu1 }
0x1039   : > { %v12378_v18 = vpop.f32.mrb[69].mxu0  ;;  %v12413_v39 = vpop.f32.mrb[69].mxu1 }
0x103a   : > { %v12379_v15 = vadd.f32 %v12378_v18, %v12377_v58  ;;  %v12414_v7 = vadd.f32 %v12413_v39, %v12412_v13  ;;  %v21745_v39 = vld [vmem:[%s22699_s6 + $0x1] ss:$0 sm:$0xff] }
0x103c   : > { %v5870_v22 = vadd.f32 %v21739_v52, %v12379_v15 }
0x103e   : > { %v5940_v17 = vadd.f32 %v12414_v7, %v5870_v22 }
0x1058   : > { %v6009_v16 = vpop.f32.mrb[70].mxu0  ;;  %v12464_v8 = vpop.f32.mrb[70].mxu1 }
0x1059   : > { %v6010_v41 = vadd.f32 %v6009_v16, %v5940_v17  ;;  %v14571_v47 = vpop.f32.mrb[71].mxu0  ;;  %v12465_v31 = vpop.f32.mrb[71].mxu1 }
0x105a   : > { %v12466_v60 = vadd.f32 %v12465_v31, %v12464_v8  ;;  %v21751_v8 = vld [vmem:[%s22699_s6 + $0x2] ss:$0 sm:$0xff] }
0x105c   : > { %v6086_v58 = vadd.f32 %v21745_v39, %v12466_v60  ;;  %v10826_v60 = vmul.f32 -1.442695, %v6010_v41 }
0x1078   : > { %v12499_v20 = vpop.f32.mrb[72].mxu0 }
0x1079   : > { %v6225_v43 = vpop.f32.mrb[72].mxu1  ;;  %v12500_v51 = vpop.f32.mrb[73].mxu0 }
0x107a   : > { %v12501_v18 = vadd.f32 %v12500_v51, %v12499_v20  ;;  %v14606_v13 = vpop.f32.mrb[73].mxu1 }
0x107c   : > { %v6156_v15 = vadd.f32 %v12501_v18, %v6086_v58 }
0x107e   : > { %v6226_v22 = vadd.f32 %v6225_v43, %v6156_v15 }
0x1080   : > { %v10827_v10 = vmul.f32 -1.442695, %v6226_v22 }
0x1082   : > { %18566 = vpow2.f32 %v10827_v10 }
0x1083   : > { %18568 = vpow2.f32 %v10826_v60 }
0x108c   : > { %v18567_v51 = vpop.eup %18566 }
0x108d   : > { %v18569_v43 = vpop.eup %18568  ;;  %v6232_v20 = vadd.f32 1.0, %v18567_v51 }
0x108e   : > { %v6016_v58 = vadd.f32 1.0, %v18569_v43 }
0x108f   : > { %18570 = vrcp.f32 %v6232_v20 }
0x1090   : > { %18572 = vrcp.f32 %v6016_v58 }
0x1098   : > { %v12551_v7 = vpop.f32.mrb[74].mxu0 }
0x1099   : > { %v12586_v52 = vpop.f32.mrb[74].mxu1  ;;  %v12552_v17 = vpop.f32.mrb[75].mxu0 }
0x109a   : > { %v12553_v47 = vadd.f32 %v12552_v17, %v12551_v7  ;;  %v12587_v16 = vpop.f32.mrb[75].mxu1 }
0x109b   : > { %v12588_v31 = vadd.f32 %v12587_v16, %v12586_v52  ;;  %v18571_v16 = vpop.eup %18570 }
0x109c   : > { %v6302_v26 = vadd.f32 %v21751_v8, %v12553_v47  ;;  %v18573_v47 = vpop.eup %18572  ;;  %v6662_v41 = vmul.f32 %v18571_v16, %v21452_v36 }
0x109e   : > { %v6372_v33 = vadd.f32 %v12588_v31, %v6302_v26 }
0x10b8   : > { %v6441_v18 = vpop.f32.mrb[76].mxu0 }
0x10b9   : > { %v6442_v13 = vadd.f32 %v6441_v18, %v6372_v33  ;;  %v12638_v52 = vpop.f32.mrb[76].mxu1  ;;  %v14641_v15 = vpop.f32.mrb[77].mxu0  ;;  %v21760_v33 = vld [vmem:[%s22699_s6 + $0x3] ss:$0 sm:$0xff] }
0x10ba   : > { %v12639_v7 = vpop.f32.mrb[77].mxu1 }
0x10bb   : > { %18574 = vtanh.f32 %v6442_v13  ;;  %v12640_v17 = vadd.f32 %v12639_v7, %v12638_v52 }
0x10bd   : > { %v6513_v43 = vadd.f32 %v21760_v33, %v12640_v17 }
0x10c5   : > { %v18575_v26 = vpop.eup %18574 }
0x10c6   : > { %v6663_v10 = vmul.f32 %v18575_v26, %v18573_v47  ;;  %v6673_v47 = vpop.permute.xlu1 %6672 }
0x10c8   : > { %v21755_v22 = vadd.f32 %v6663_v10, %v6662_v41  ;;  %v21779_v10 = vld [vmem:[%s22695_s2] ss:$0 sm:$0xff] }
0x10d8   : > { %v12673_v31 = vpop.f32.mrb[78].mxu0 }
0x10d9   : > { %v6652_v60 = vpop.f32.mrb[78].mxu1  ;;  %v12674_v51 = vpop.f32.mrb[79].mxu0 }
0x10da   : > { %v12675_v20 = vadd.f32 %v12674_v51, %v12673_v31  ;;  %v14676_v58 = vpop.f32.mrb[79].mxu1 }
0x10db   : > { %v23849_v58 = vld [vmem:[#allocation40_spill] sm:$0xff] }
0x10dc   : > { %v6583_v18 = vadd.f32 %v12675_v20, %v6513_v43  ;;  %v23847_v43 = vld [vmem:[#allocation37_spill] sm:$0xff]  ;;  %v23848_v20 = vld [vmem:[#allocation39_spill] sm:$0xff] }
0x10de   : > { %v6653_v13 = vadd.f32 %v6652_v60, %v6583_v18 }
0x10e0   : > { %v10828_v52 = vmul.f32 -1.442695, %v6653_v13 }
0x10e2   : > { %18576 = vpow2.f32 %v10828_v52  ;;  %v23850_v52 = vld [vmem:[#allocation41_spill] sm:$0xff] }
0x10e3   : > { %18578 = vtanh.f32 %v21755_v22 }
0x10ec   : > { %v18577_v36 = vpop.eup %18576 }
0x10ed   : > { %v6659_v15 = vadd.f32 1.0, %v18577_v36  ;;  %v18579_v7 = vpop.eup %18578 }
0x10ef   : > { %18580 = vrcp.f32 %v6659_v15  ;;  %v23851_v15 = vld [vmem:[#allocation42_spill] sm:$0xff] }
0x10f9   : > { %v18581_v16 = vpop.eup %18580 }
0x10fa   : > { %v6666_v26 = vmul.f32 %v18581_v16, %v18579_v7 }
0x10fc   : > { %6668 = vst.msk [vmem:[#allocation4 + $0x20] sm:$0xff] %vm782_vm2, %v6666_v26  ;;  %v6675_v41 = vsel %vm782_vm2, %v6666_v26, %v6673_v47  ;;  %v23852_v26 = vld [vmem:[#allocation43_spill] sm:$0xff] }
0x10fd   : > { %14690 = vmatmul.mubr.msk.f32.vlgmr.msra.gmra.mrb[80].mxu0 %vm790_vm3, %v6675_v41 }
0x10fe   : > { %17272 = vmatpush1.bf16.msra.mxu0 %v23543_v48  ;;  %6817 = vmatprep.mubr.f32.mxu0 %v23121_v11 }
0x10ff   : > { %17274 = vmatprep.subr.bf16.mxu0 %v23544_v30 }
0x1102   : > { %17276 = vmatpush1.bf16.msra.mxu0 %v23545_v62 }
0x1103   : > { %17278 = vmatprep.subr.bf16.mxu0 %v23546_v2 }
0x1106   : > { %17280 = vmatpush1.bf16.msra.mxu0 %v23547_v6 }
0x1107   : > { %17282 = vmatprep.subr.bf16.mxu0 %v23548_v45 }
0x110a   : > { %17284 = vmatpush1.bf16.msra.mxu0 %v23549_v14 }
0x110b   : > { %17301 = vmatprep.subr.bf16.mxu0 %v23119_v55 }
0x11d0   : > { %v6745_v17 = vpop.f32.mrb[80].mxu0 }
0x11d1   : > { %v6746_v31 = vadd.f32 %v21779_v10, %v6745_v17  ;;  %v14691_v60 = vpop.f32.mrb[81].mxu0  ;;  %v23853_v17 = vld [vmem:[#allocation44_spill] sm:$0xff] }
0x11d3   : > { %v6749_v51 = vmax.f32 %v6746_v31, 0.0 }
0x11d5   : > { %10831 = vmatmul.mubr.msk.f32.vlgmr.msra.gmra.mrb[82].mxu0 %vm891_vm4, %v6749_v51  ;;  %10832 = vmatmul.mubr.msk.f32.vlgmr.msra.gmra.mrb[80].mxu1 %vm891_vm4, %v6749_v51 }
0x11d6   : > { %17303 = vmatpush3.bf16.msra.mxu0 %v18950_v19  ;;  %14708 = vmatprep.mubr.msk.f32.mxu0 %vm18657_vm1, %v23121_v11 }
0x11d7   : > { %17304 = vmatprep.subr.bf16.mxu0 %v23119_v55  ;;  %17316 = vmatpush3.bf16.msra.mxu1 %v18960_v24 }
0x11d8   : > { %17318 = vmatprep.subr.bf16.mxu1 %v18962_v28 }
0x11da   : > { %17306 = vmatpush3.bf16.msra.mxu0 %v18981_v35 }
0x11db   : > { %17307 = vmatprep.subr.bf16.mxu0 %v23119_v55  ;;  %17320 = vmatpush3.bf16.msra.mxu1 %v18993_v38 }
0x11dc   : > { %17322 = vmatprep.subr.bf16.mxu1 %v18996_v40 }
0x11de   : > { %17309 = vmatpush3.bf16.msra.mxu0 %v19011_v46 }
0x11df   : > { %17310 = vmatprep.subr.bf16.mxu0 %v23119_v55  ;;  %17324 = vmatpush3.bf16.msra.mxu1 %v19024_v53 }
0x11e0   : > { %17326 = vmatprep.subr.bf16.mxu1 %v19030_v56 }
0x11e2   : > { %17312 = vmatpush3.bf16.msra.mxu0 %v19045_v0 }
0x11e3   : > { %17346 = vmatprep.subr.bf16.mxu0 %v19048_v1  ;;  %17328 = vmatpush3.bf16.msra.mxu1 %v19060_v9 }
0x11e4   : > { %17330 = vmatprep.subr.bf16.mxu1 %v19066_v12 }
0x11e5   : > { %14709 = vmatmul.mubr.msk.f32.vlgmr.msra.gmra.mrb[84].mxu0 %vm891_vm4, %v6749_v51 }
0x11e6   : > { %17348 = vmatpush3.bf16.msra.mxu0 %v19081_v21 }
0x11e7   : > { %17350 = vmatprep.subr.bf16.mxu0 %v19084_v23  ;;  %17332 = vmatpush3.bf16.msra.mxu1 %v19096_v34 }
0x11e8   : > { %17334 = vmatprep.subr.bf16.mxu1 %v19102_v37 }
0x11ea   : > { %17352 = vmatpush3.bf16.msra.mxu0 %v19119_v49 }
0x11eb   : > { %17354 = vmatprep.subr.bf16.mxu0 %v19122_v50  ;;  %17336 = vmatpush3.bf16.msra.mxu1 %v19134_v57 }
0x11ec   : > { %17338 = vmatprep.subr.bf16.mxu1 %v23395_v44 }
0x11ee   : > { %17356 = vmatpush3.bf16.msra.mxu0 %v23396_v3 }
0x11ef   : > { %17358 = vmatprep.subr.bf16.mxu0 %v23397_v25  ;;  %17340 = vmatpush3.bf16.msra.mxu1 %v23398_v27 }
0x11f0   : > { %17342 = vmatprep.subr.bf16.mxu1 %v23399_v32 }
0x11f2   : > { %17360 = vmatpush3.bf16.msra.mxu0 %v23400_v4 }
0x11f3   : > { %17362 = vmatprep.subr.bf16.mxu0 %v23692_v54  ;;  %17344 = vmatpush3.bf16.msra.mxu1 %v23693_v63 }
0x11f4   : > { %17377 = vmatprep.subr.bf16.mxu1 %v23119_v55 }
0x11f6   : > { %17364 = vmatpush3.bf16.msra.mxu0 %v23694_v59 }
0x11f7   : > { %17366 = vmatprep.subr.bf16.mxu0 %v23695_v42 }
0x11fa   : > { %17368 = vmatpush3.bf16.msra.mxu0 %v23696_v5 }
0x11fb   : > { %17370 = vmatprep.subr.bf16.mxu0 %v23697_v61 }
0x11fe   : > { %17372 = vmatpush3.bf16.msra.mxu0 %v23698_v29 }
0x11ff   : > { %17374 = vmatprep.subr.bf16.mxu0 %v23847_v43 }
0x1202   : > { %17376 = vmatpush3.bf16.msra.mxu0 %v23848_v20 }
0x1203   : > { %17402 = vmatprep.subr.bf16.mxu0 %v23849_v58 }
0x12a8   : > { %v6819_v18 = vpop.f32.mrb[82].mxu0  ;;  %v6890_v13 = vpop.f32.mrb[80].mxu1 }
0x12a9   : > { %v6820_v36 = vadd.f32 %v6819_v18, %v23850_v52  ;;  %v6891_v7 = vadd.f32 %v6890_v13, %v23851_v15  ;;  %v6821_v16 = vpop.f32.mrb[83].mxu0  ;;  %v6892_v47 = vpop.f32.mrb[81].mxu1  ;;  %v23854_v18 = vld [vmem:[#allocation45_spill] sm:$0xff]  ;;  %v23855_v13 = vld [vmem:[#allocation46_spill] sm:$0xff]  ;;  %v23876_v15 = vld [vmem:[#allocation67_spill] sm:$0xff] }
0x12aa   : > { %v6822_v41 = vadd.f32 %v6821_v16, %v23852_v26  ;;  %v6893_v31 = vadd.f32 %v6892_v47, %v23853_v17  ;;  %v23858_v16 = vld [vmem:[#allocation49_spill] sm:$0xff]  ;;  %v23859_v47 = vld [vmem:[#allocation50_spill] sm:$0xff]  ;;  %v23864_v26 = vld [vmem:[#allocation55_spill] sm:$0xff] }
0x12ab   : > { %v21835_v43 = vmax.f32 %v6820_v36, 0.0  ;;  %v21837_v20 = vmax.f32 %v6891_v7, 0.0  ;;  %v23856_v36 = vld [vmem:[#allocation47_spill] sm:$0xff]  ;;  %v23857_v7 = vld [vmem:[#allocation48_spill] sm:$0xff]  ;;  %v23863_v17 = vld [vmem:[#allocation54_spill] sm:$0xff] }
0x12ac   : > { %v21831_v60 = vmax.f32 %v6822_v41, 0.0  ;;  %v21833_v51 = vmax.f32 %v6893_v31, 0.0  ;;  %v23860_v31 = vld [vmem:[#allocation51_spill] sm:$0xff] }
0x12ad   : > { %v23916_v52 = vld [vmem:[#allocation107_spill] sm:$0xff] }
0x12ae   : > { %7034 = vmatprep.mubr.f32.mxu1 %v21831_v60  ;;  %7104 = vmatprep.mubr.f32.mxu0 %v21833_v51 }
0x12af   : > { %7035 = vmatmul.mubr.f32.vlgmr.msra.gmra.mrb[82].mxu1 %v21835_v43  ;;  %7105 = vmatmul.mubr.f32.vlgmr.msra.gmra.mrb[86].mxu0 %v21837_v20 }
0x12b0   : > { %17379 = vmatpush3.bf16.msra.mxu1 %v23854_v18  ;;  %17404 = vmatpush3.bf16.msra.mxu0 %v23855_v13  ;;  %v23861_v13 = vld [vmem:[#allocation52_spill] sm:$0xff] }
0x12b1   : > { %7250 = vmatprep.mubr.f32.mxu0 %v21831_v60  ;;  %17380 = vmatprep.subr.bf16.mxu1 %v23119_v55 }
0x12b2   : > { %17406 = vmatprep.subr.bf16.mxu0 %v23856_v36  ;;  %14743 = vmatprep.mubr.msk.f32.mxu1 %vm18657_vm1, %v23121_v11  ;;  %v23862_v36 = vld [vmem:[#allocation53_spill] sm:$0xff] }
0x12b4   : > { %17382 = vmatpush3.bf16.msra.mxu1 %v23857_v7  ;;  %17408 = vmatpush3.bf16.msra.mxu0 %v23858_v16  ;;  %v23865_v16 = vld [vmem:[#allocation56_spill] sm:$0xff]  ;;  %v23866_v7 = vld [vmem:[#allocation57_spill] sm:$0xff] }
0x12b5   : > { %17383 = vmatprep.subr.bf16.mxu1 %v23119_v55  ;;  %17410 = vmatprep.subr.bf16.mxu0 %v23859_v47  ;;  %v23867_v47 = vld [vmem:[#allocation58_spill] sm:$0xff] }
0x12b8   : > { %v6961_v41 = vpop.f32.mrb[84].mxu0  ;;  %17385 = vmatpush3.bf16.msra.mxu1 %v23860_v31  ;;  %17412 = vmatpush3.bf16.msra.mxu0 %v23861_v13  ;;  %v23868_v13 = vld [vmem:[#allocation59_spill] sm:$0xff]  ;;  %v23870_v31 = vld [vmem:[#allocation61_spill] sm:$0xff] }
0x12b9   : > { %v14710_v18 = vpop.f32.mrb[85].mxu0  ;;  %17386 = vmatprep.subr.bf16.mxu1 %v23119_v55  ;;  %17414 = vmatprep.subr.bf16.mxu0 %v23862_v36  ;;  %v23873_v36 = vld [vmem:[#allocation64_spill] sm:$0xff] }
0x12ba   : > { %v23869_v18 = vld [vmem:[#allocation60_spill] sm:$0xff] }
0x12bc   : > { %17388 = vmatpush3.bf16.msra.mxu1 %v23863_v17  ;;  %17416 = vmatpush3.bf16.msra.mxu0 %v23864_v26  ;;  %v23871_v17 = vld [vmem:[#allocation62_spill] sm:$0xff]  ;;  %v23872_v26 = vld [vmem:[#allocation63_spill] sm:$0xff] }
0x12bd   : > { %17389 = vmatprep.subr.bf16.mxu1 %v23119_v55  ;;  %17418 = vmatprep.subr.bf16.mxu0 %v23865_v16  ;;  %v23874_v16 = vld [vmem:[#allocation65_spill] sm:$0xff] }
0x12c0   : > { %17391 = vmatpush3.bf16.msra.mxu1 %v23866_v7  ;;  %17420 = vmatpush3.bf16.msra.mxu0 %v23867_v47  ;;  %v6962_v7 = vadd.f32 %v6961_v41, %v23874_v16  ;;  %v23875_v47 = vld [vmem:[#allocation66_spill] sm:$0xff]  ;;  %v23880_v41 = vld [vmem:[#allocation71_spill] sm:$0xff]  ;;  %v23889_v16 = vld [vmem:[#allocation80_spill] sm:$0xff] }
0x12c1   : > { %17392 = vmatprep.subr.bf16.mxu1 %v23119_v55  ;;  %17422 = vmatprep.subr.bf16.mxu0 %v23868_v13  ;;  %v23877_v13 = vld [vmem:[#allocation68_spill] sm:$0xff] }
0x12c4   : > { %17394 = vmatpush3.bf16.msra.mxu1 %v23869_v18  ;;  %17424 = vmatpush3.bf16.msra.mxu0 %v23870_v31  ;;  %v21877_v18 = vmax.f32 %v6962_v7, 0.0  ;;  %v23878_v31 = vld [vmem:[#allocation69_spill] sm:$0xff] }
0x12c5   : > { %17395 = vmatprep.subr.bf16.mxu1 %v23119_v55  ;;  %17426 = vmatprep.subr.bf16.mxu0 %v23871_v17  ;;  %v23882_v7 = vld [vmem:[#allocation73_spill] sm:$0xff] }
0x12c6   : > { %v23914_v17 = vld [vmem:[#allocation105_spill] sm:$0xff] }
0x12c8   : > { %17397 = vmatpush3.bf16.msra.mxu1 %v23872_v26  ;;  %17428 = vmatpush3.bf16.msra.mxu0 %v23873_v36  ;;  %v23879_v36 = vld [vmem:[#allocation70_spill] sm:$0xff]  ;;  %v23890_v26 = vld [vmem:[#allocation81_spill] sm:$0xff] }
0x12c9   : > { %17398 = vmatprep.subr.bf16.mxu1 %v23119_v55  ;;  %17430 = vmatprep.subr.bf16.mxu0 %v23875_v47  ;;  %v23881_v47 = vld [vmem:[#allocation72_spill] sm:$0xff] }
0x12cc   : > { %17400 = vmatpush3.bf16.msra.mxu1 %v23876_v15  ;;  %17432 = vmatpush3.bf16.msra.mxu0 %v23877_v13  ;;  %v23884_v13 = vld [vmem:[#allocation75_spill] sm:$0xff]  ;;  %v23886_v15 = vld [vmem:[#allocation77_spill] sm:$0xff] }
0x12cd   : > { %17434 = vmatprep.subr.bf16.mxu1 %v23878_v31  ;;  %17465 = vmatprep.subr.bf16.mxu0 %v23119_v55  ;;  %v23883_v31 = vld [vmem:[#allocation74_spill] sm:$0xff] }
0x12cf   : > { %14744 = vmatmul.mubr.f32.vlgmr.msra.gmra.mrb[84].mxu1 %v21877_v18  ;;  %7251 = vmatmul.mubr.f32.vlgmr.msra.gmra.mrb[88].mxu0 %v21835_v43 }
0x12d0   : > { %17436 = vmatpush3.bf16.msra.mxu1 %v23879_v36  ;;  %7320 = vmatprep.mubr.f32.mxu1 %v21833_v51  ;;  %v23885_v36 = vld [vmem:[#allocation76_spill] sm:$0xff] }
0x12d1   : > { %17467 = vmatpush3.bf16.msra.mxu0 %v23880_v41  ;;  %17438 = vmatprep.subr.bf16.mxu1 %v23881_v47  ;;  %v23887_v41 = vld [vmem:[#allocation78_spill] sm:$0xff]  ;;  %v23888_v47 = vld [vmem:[#allocation79_spill] sm:$0xff] }
0x12d2   : > { %17468 = vmatprep.subr.bf16.mxu0 %v23119_v55  ;;  %14778 = vmatprep.mubr.msk.f32.mxu0 %vm18657_vm1, %v23121_v11 }
0x12d4   : > { %17440 = vmatpush3.bf16.msra.mxu1 %v23882_v7  ;;  %v23893_v7 = vld [vmem:[#allocation84_spill] sm:$0xff] }
0x12d5   : > { %17470 = vmatpush3.bf16.msra.mxu0 %v23883_v31  ;;  %17442 = vmatprep.subr.bf16.mxu1 %v23884_v13  ;;  %v23891_v31 = vld [vmem:[#allocation82_spill] sm:$0xff]  ;;  %v23892_v13 = vld [vmem:[#allocation83_spill] sm:$0xff] }
0x12d6   : > { %17471 = vmatprep.subr.bf16.mxu0 %v23119_v55 }
0x12d8   : > { %17444 = vmatpush3.bf16.msra.mxu1 %v23885_v36  ;;  %v23896_v36 = vld [vmem:[#allocation87_spill] sm:$0xff] }
0x12d9   : > { %17473 = vmatpush3.bf16.msra.mxu0 %v23886_v15  ;;  %17446 = vmatprep.subr.bf16.mxu1 %v23887_v41  ;;  %v23894_v15 = vld [vmem:[#allocation85_spill] sm:$0xff]  ;;  %v23895_v41 = vld [vmem:[#allocation86_spill] sm:$0xff] }
0x12da   : > { %17474 = vmatprep.subr.bf16.mxu0 %v23119_v55 }
0x12dc   : > { %17448 = vmatpush3.bf16.msra.mxu1 %v23888_v47  ;;  %v23899_v47 = vld [vmem:[#allocation90_spill] sm:$0xff] }
0x12dd   : > { %17476 = vmatpush3.bf16.msra.mxu0 %v23889_v16  ;;  %17450 = vmatprep.subr.bf16.mxu1 %v23890_v26  ;;  %v23897_v16 = vld [vmem:[#allocation88_spill] sm:$0xff]  ;;  %v23898_v26 = vld [vmem:[#allocation89_spill] sm:$0xff] }
0x12de   : > { %17477 = vmatprep.subr.bf16.mxu0 %v23119_v55 }
0x12e0   : > { %17452 = vmatpush3.bf16.msra.mxu1 %v23891_v31  ;;  %v23902_v31 = vld [vmem:[#allocation93_spill] sm:$0xff] }
0x12e1   : > { %17479 = vmatpush3.bf16.msra.mxu0 %v23892_v13  ;;  %17454 = vmatprep.subr.bf16.mxu1 %v23893_v7  ;;  %v23900_v13 = vld [vmem:[#allocation91_spill] sm:$0xff]  ;;  %v23901_v7 = vld [vmem:[#allocation92_spill] sm:$0xff] }
0x12e2   : > { %17480 = vmatprep.subr.bf16.mxu0 %v23119_v55 }
0x12e4   : > { %17456 = vmatpush3.bf16.msra.mxu1 %v23894_v15  ;;  %v23903_v15 = vld [vmem:[#allocation94_spill] sm:$0xff] }
0x12e5   : > { %17482 = vmatpush3.bf16.msra.mxu0 %v23895_v41  ;;  %17458 = vmatprep.subr.bf16.mxu1 %v23896_v36  ;;  %v23904_v36 = vld [vmem:[#allocation95_spill] sm:$0xff] }
0x12e6   : > { %17483 = vmatprep.subr.bf16.mxu0 %v23119_v55  ;;  %v23912_v41 = vld [vmem:[#allocation103_spill] sm:$0xff] }
0x12e8   : > { %17460 = vmatpush3.bf16.msra.mxu1 %v23897_v16  ;;  %v23911_v16 = vld [vmem:[#allocation102_spill] sm:$0xff] }
0x12e9   : > { %17485 = vmatpush3.bf16.msra.mxu0 %v23898_v26  ;;  %17462 = vmatprep.subr.bf16.mxu1 %v23899_v47  ;;  %v23905_v26 = vld [vmem:[#allocation96_spill] sm:$0xff]  ;;  %v23906_v47 = vld [vmem:[#allocation97_spill] sm:$0xff] }
0x12ea   : > { %17486 = vmatprep.subr.bf16.mxu0 %v23119_v55 }
0x12ec   : > { %17464 = vmatpush3.bf16.msra.mxu1 %v23900_v13  ;;  %v23907_v13 = vld [vmem:[#allocation98_spill] sm:$0xff] }
0x12ed   : > { %17488 = vmatpush3.bf16.msra.mxu0 %v23901_v7  ;;  %17490 = vmatprep.subr.bf16.mxu1 %v23902_v31  ;;  %v23908_v7 = vld [vmem:[#allocation99_spill] sm:$0xff]  ;;  %v23909_v31 = vld [vmem:[#allocation100_spill] sm:$0xff] }
0x12ee   : > { %17522 = vmatprep.subr.bf16.mxu0 %v23903_v15  ;;  %v23910_v15 = vld [vmem:[#allocation101_spill] sm:$0xff] }
0x12ef   : > { %7321 = vmatmul.mubr.f32.vlgmr.msra.gmra.mrb[86].mxu1 %v21837_v20 }
0x12f0   : > { %14779 = vmatmul.mubr.f32.vlgmr.msra.gmra.mrb[90].mxu0 %v21877_v18  ;;  %17492 = vmatpush3.bf16.msra.mxu1 %v23904_v36  ;;  %v23913_v36 = vld [vmem:[#allocation104_spill] sm:$0xff] }
0x12f1   : > { %7466 = vmatprep.mubr.f32.mxu1 %v21831_v60  ;;  %17524 = vmatpush3.bf16.msra.mxu0 %v23905_v26  ;;  %v23915_v26 = vld [vmem:[#allocation106_spill] sm:$0xff] }
0x12f2   : > { %7536 = vmatprep.mubr.f32.mxu0 %v21833_v51  ;;  %17494 = vmatprep.subr.bf16.mxu1 %v23906_v47  ;;  %v23917_v47 = vld [vmem:[#allocation108_spill] sm:$0xff] }
0x12f3   : > { %17526 = vmatprep.subr.bf16.mxu0 %v23907_v13  ;;  %v23918_v13 = vld [vmem:[#allocation109_spill] sm:$0xff] }
0x12f4   : > { %17496 = vmatpush3.bf16.msra.mxu1 %v23908_v7  ;;  %v23919_v7 = vld [vmem:[#allocation110_spill] sm:$0xff] }
0x12f5   : > { %17528 = vmatpush3.bf16.msra.mxu0 %v23909_v31  ;;  %17498 = vmatprep.subr.bf16.mxu1 %v23910_v15  ;;  %v23920_v31 = vld [vmem:[#allocation111_spill] sm:$0xff]  ;;  %v23921_v15 = vld [vmem:[#allocation112_spill] sm:$0xff] }
0x12f6   : > { %17530 = vmatprep.subr.bf16.mxu0 %v23911_v16  ;;  %v23922_v16 = vld [vmem:[#allocation113_spill] sm:$0xff] }
0x12f8   : > { %17500 = vmatpush3.bf16.msra.mxu1 %v23912_v41  ;;  %v23923_v41 = vld [vmem:[#allocation114_spill] sm:$0xff] }
0x12f9   : > { %17532 = vmatpush3.bf16.msra.mxu0 %v23913_v36  ;;  %17502 = vmatprep.subr.bf16.mxu1 %v23914_v17  ;;  %v23924_v36 = vld [vmem:[#allocation115_spill] sm:$0xff]  ;;  %v23925_v17 = vld [vmem:[#allocation116_spill] sm:$0xff] }
0x12fa   : > { %17534 = vmatprep.subr.bf16.mxu0 %v23915_v26  ;;  %v23926_v26 = vld [vmem:[#allocation117_spill] sm:$0xff] }
0x12fc   : > { %17504 = vmatpush3.bf16.msra.mxu1 %v23916_v52  ;;  %v23927_v52 = vld [vmem:[#allocation118_spill] sm:$0xff] }
0x12fd   : > { %17536 = vmatpush3.bf16.msra.mxu0 %v23917_v47  ;;  %17506 = vmatprep.subr.bf16.mxu1 %v23918_v13  ;;  %v23928_v47 = vld [vmem:[#allocation119_spill] sm:$0xff]  ;;  %v23929_v13 = vld [vmem:[#allocation120_spill] sm:$0xff] }
0x12fe   : > { %17538 = vmatprep.subr.bf16.mxu0 %v23919_v7  ;;  %v23930_v7 = vld [vmem:[#allocation121_spill] sm:$0xff] }
0x1300   : > { %17508 = vmatpush3.bf16.msra.mxu1 %v23920_v31  ;;  %v23931_v31 = vld [vmem:[#allocation122_spill] sm:$0xff] }
0x1301   : > { %17540 = vmatpush3.bf16.msra.mxu0 %v23921_v15  ;;  %17510 = vmatprep.subr.bf16.mxu1 %v23922_v16  ;;  %v23932_v15 = vld [vmem:[#allocation123_spill] sm:$0xff]  ;;  %v23933_v16 = vld [vmem:[#allocation124_spill] sm:$0xff] }
0x1302   : > { %17542 = vmatprep.subr.bf16.mxu0 %v23923_v41 }
0x1304   : > { %17512 = vmatpush3.bf16.msra.mxu1 %v23924_v36  ;;  %v23934_v36 = vld [vmem:[#allocation125_spill] sm:$0xff] }
0x1305   : > { %17544 = vmatpush3.bf16.msra.mxu0 %v23925_v17  ;;  %17514 = vmatprep.subr.bf16.mxu1 %v23926_v26  ;;  %v23995_v26 = vld [vmem:[#allocation174_spill] sm:$0xff] }
0x1306   : > { %17546 = vmatprep.subr.bf16.mxu0 %v23927_v52  ;;  %v23935_v52 = vld [vmem:[#allocation126_spill] sm:$0xff] }
0x1308   : > { %17516 = vmatpush3.bf16.msra.mxu1 %v23928_v47  ;;  %v23936_v47 = vld [vmem:[#allocation127_spill] sm:$0xff] }
0x1309   : > { %17548 = vmatpush3.bf16.msra.mxu0 %v23929_v13  ;;  %17518 = vmatprep.subr.bf16.mxu1 %v23930_v7  ;;  %v23945_v7 = vld [vmem:[#allocation136_spill] sm:$0xff]  ;;  %v23948_v13 = vld [vmem:[#allocation139_spill] sm:$0xff] }
0x130a   : > { %17550 = vmatprep.subr.bf16.mxu0 %v23931_v31  ;;  %v23937_v31 = vld [vmem:[#allocation128_spill] sm:$0xff] }
0x130c   : > { %17520 = vmatpush3.bf16.msra.mxu1 %v23932_v15  ;;  %v23940_v15 = vld [vmem:[#allocation131_spill] sm:$0xff] }
0x130d   : > { %17552 = vmatpush3.bf16.msra.mxu0 %v23933_v16  ;;  %17553 = vmatprep.subr.bf16.mxu1 %v23119_v55  ;;  %v23938_v16 = vld [vmem:[#allocation129_spill] sm:$0xff] }
0x130e   : > { %17578 = vmatprep.subr.bf16.mxu0 %v23934_v36  ;;  %v23939_v36 = vld [vmem:[#allocation130_spill] sm:$0xff] }
0x130f   : > { %7467 = vmatmul.mubr.f32.vlgmr.msra.gmra.mrb[88].mxu1 %v21835_v43 }
0x1310   : > { %7537 = vmatmul.mubr.f32.vlgmr.msra.gmra.mrb[92].mxu0 %v21837_v20  ;;  %17555 = vmatpush3.bf16.msra.mxu1 %v23935_v52  ;;  %v23941_v52 = vld [vmem:[#allocation132_spill] sm:$0xff] }
0x1311   : > { %17580 = vmatpush3.bf16.msra.mxu0 %v23936_v47  ;;  %7677 = vmatprep.mubr.f32.mxu0 %v21831_v60  ;;  %v23942_v47 = vld [vmem:[#allocation133_spill] sm:$0xff]  ;;  %v23943_v60 = vld [vmem:[#allocation134_spill] sm:$0xff] }
0x1312   : > { %17556 = vmatprep.subr.bf16.mxu1 %v23119_v55  ;;  %17582 = vmatprep.subr.bf16.mxu0 %v23937_v31  ;;  %v23944_v31 = vld [vmem:[#allocation135_spill] sm:$0xff] }
0x1313   : > { %14813 = vmatprep.mubr.msk.f32.mxu1 %vm18657_vm1, %v23121_v11 }
0x1314   : > { %17558 = vmatpush3.bf16.msra.mxu1 %v23938_v16  ;;  %v23946_v16 = vld [vmem:[#allocation137_spill] sm:$0xff] }
0x1315   : > { %17584 = vmatpush3.bf16.msra.mxu0 %v23939_v36  ;;  %17559 = vmatprep.subr.bf16.mxu1 %v23119_v55  ;;  %v23947_v36 = vld [vmem:[#allocation138_spill] sm:$0xff] }
0x1316   : > { %17586 = vmatprep.subr.bf16.mxu0 %v23940_v15  ;;  %v23951_v15 = vld [vmem:[#allocation142_spill] sm:$0xff] }
0x1318   : > { %17561 = vmatpush3.bf16.msra.mxu1 %v23941_v52  ;;  %v23949_v52 = vld [vmem:[#allocation140_spill] sm:$0xff] }
0x1319   : > { %17588 = vmatpush3.bf16.msra.mxu0 %v23942_v47  ;;  %17562 = vmatprep.subr.bf16.mxu1 %v23119_v55  ;;  %v23950_v47 = vld [vmem:[#allocation141_spill] sm:$0xff] }
0x131a   : > { %17590 = vmatprep.subr.bf16.mxu0 %v23943_v60  ;;  %v23954_v60 = vld [vmem:[#allocation145_spill] sm:$0xff] }
0x131c   : > { %17564 = vmatpush3.bf16.msra.mxu1 %v23944_v31  ;;  %v23952_v31 = vld [vmem:[#allocation143_spill] sm:$0xff] }
0x131d   : > { %17592 = vmatpush3.bf16.msra.mxu0 %v23945_v7  ;;  %17565 = vmatprep.subr.bf16.mxu1 %v23119_v55  ;;  %v23953_v7 = vld [vmem:[#allocation144_spill] sm:$0xff] }
0x131e   : > { %17594 = vmatprep.subr.bf16.mxu0 %v23946_v16  ;;  %v23957_v16 = vld [vmem:[#allocation148_spill] sm:$0xff] }
0x1320   : > { %17567 = vmatpush3.bf16.msra.mxu1 %v23947_v36  ;;  %v23955_v36 = vld [vmem:[#allocation146_spill] sm:$0xff] }
0x1321   : > { %17596 = vmatpush3.bf16.msra.mxu0 %v23948_v13  ;;  %17568 = vmatprep.subr.bf16.mxu1 %v23119_v55  ;;  %v23956_v13 = vld [vmem:[#allocation147_spill] sm:$0xff] }
0x1322   : > { %17598 = vmatprep.subr.bf16.mxu0 %v23949_v52  ;;  %v23958_v52 = vld [vmem:[#allocation149_spill] sm:$0xff] }
0x1324   : > { %17570 = vmatpush3.bf16.msra.mxu1 %v23950_v47 }
0x1325   : > { %17600 = vmatpush3.bf16.msra.mxu0 %v23951_v15  ;;  %17571 = vmatprep.subr.bf16.mxu1 %v23119_v55 }
0x1326   : > { %17602 = vmatprep.subr.bf16.mxu0 %v23952_v31  ;;  %v23959_v31 = vld [vmem:[#allocation150_spill] sm:$0xff] }
0x1328   : > { %17573 = vmatpush3.bf16.msra.mxu1 %v23953_v7  ;;  %v23961_v7 = vld [vmem:[#allocation152_spill] sm:$0xff] }
0x1329   : > { %17604 = vmatpush3.bf16.msra.mxu0 %v23954_v60  ;;  %17574 = vmatprep.subr.bf16.mxu1 %v23119_v55  ;;  %v23960_v60 = vld [vmem:[#allocation151_spill] sm:$0xff] }
0x132a   : > { %17606 = vmatprep.subr.bf16.mxu0 %v23955_v36  ;;  %v23970_v36 = vld [vmem:[#allocation161_spill] sm:$0xff] }
0x132c   : > { %17576 = vmatpush3.bf16.msra.mxu1 %v23956_v13  ;;  %v23964_v13 = vld [vmem:[#allocation155_spill] sm:$0xff] }
0x132d   : > { %17608 = vmatpush3.bf16.msra.mxu0 %v23957_v16  ;;  %17610 = vmatprep.subr.bf16.mxu1 %v23958_v52  ;;  %v23962_v52 = vld [vmem:[#allocation153_spill] sm:$0xff]  ;;  %v23963_v16 = vld [vmem:[#allocation154_spill] sm:$0xff] }
0x132e   : > { %17641 = vmatprep.subr.bf16.mxu0 %v23119_v55 }
0x132f   : > { %14814 = vmatmul.mubr.f32.vlgmr.msra.gmra.mrb[90].mxu1 %v21877_v18 }
0x1330   : > { %7678 = vmatmul.mubr.f32.vlgmr.msra.gmra.mrb[94].mxu0 %v21835_v43  ;;  %17612 = vmatpush3.bf16.msra.mxu1 %v23959_v31  ;;  %v23965_v43 = vld [vmem:[#allocation156_spill] sm:$0xff] }
0x1331   : > { %7747 = vmatprep.mubr.f32.mxu1 %v21833_v51  ;;  %17643 = vmatpush3.bf16.msra.mxu0 %v23960_v60  ;;  %v23966_v51 = vld [vmem:[#allocation157_spill] sm:$0xff]  ;;  %v23967_v60 = vld [vmem:[#allocation158_spill] sm:$0xff]  ;;  %v23969_v31 = vld [vmem:[#allocation160_spill] sm:$0xff] }
0x1332   : > { %17614 = vmatprep.subr.bf16.mxu1 %v23961_v7  ;;  %17644 = vmatprep.subr.bf16.mxu0 %v23119_v55  ;;  %v23968_v7 = vld [vmem:[#allocation159_spill] sm:$0xff] }
0x1333   : > { %14848 = vmatprep.mubr.msk.f32.mxu0 %vm18657_vm1, %v23121_v11 }
0x1334   : > { %17616 = vmatpush3.bf16.msra.mxu1 %v23962_v52  ;;  %v23973_v52 = vld [vmem:[#allocation164_spill] sm:$0xff] }
0x1335   : > { %17646 = vmatpush3.bf16.msra.mxu0 %v23963_v16  ;;  %17618 = vmatprep.subr.bf16.mxu1 %v23964_v13  ;;  %v23971_v16 = vld [vmem:[#allocation162_spill] sm:$0xff]  ;;  %v23972_v13 = vld [vmem:[#allocation163_spill] sm:$0xff] }
0x1336   : > { %17647 = vmatprep.subr.bf16.mxu0 %v23119_v55 }
0x1338   : > { %17620 = vmatpush3.bf16.msra.mxu1 %v23965_v43  ;;  %v23976_v43 = vld [vmem:[#allocation167_spill] sm:$0xff] }
0x1339   : > { %17649 = vmatpush3.bf16.msra.mxu0 %v23966_v51  ;;  %17622 = vmatprep.subr.bf16.mxu1 %v23967_v60  ;;  %v23974_v51 = vld [vmem:[#allocation165_spill] sm:$0xff]  ;;  %v23975_v60 = vld [vmem:[#allocation166_spill] sm:$0xff] }
0x133a   : > { %17650 = vmatprep.subr.bf16.mxu0 %v23119_v55 }
0x133c   : > { %17624 = vmatpush3.bf16.msra.mxu1 %v23968_v7 }
0x133d   : > { %17652 = vmatpush3.bf16.msra.mxu0 %v23969_v31  ;;  %17626 = vmatprep.subr.bf16.mxu1 %v23970_v36  ;;  %v23977_v31 = vld [vmem:[#allocation168_spill] sm:$0xff]  ;;  %v23978_v36 = vld [vmem:[#allocation169_spill] sm:$0xff] }
0x133e   : > { %17653 = vmatprep.subr.bf16.mxu0 %v23119_v55 }
0x1340   : > { %17628 = vmatpush3.bf16.msra.mxu1 %v23971_v16  ;;  %v23979_v16 = vld [vmem:[#allocation170_spill] sm:$0xff] }
0x1341   : > { %17655 = vmatpush3.bf16.msra.mxu0 %v23972_v13  ;;  %17630 = vmatprep.subr.bf16.mxu1 %v23973_v52  ;;  %v23980_v52 = vld [vmem:[#allocation171_spill] sm:$0xff]  ;;  %v23981_v13 = vld [vmem:[#allocation172_spill] sm:$0xff] }
0x1342   : > { %17656 = vmatprep.subr.bf16.mxu0 %v23119_v55 }
0x1344   : > { %17632 = vmatpush3.bf16.msra.mxu1 %v23974_v51  ;;  %v23994_v51 = vld [vmem:[#allocation24_spill] sm:$0xff] }
0x1345   : > { %17658 = vmatpush3.bf16.msra.mxu0 %v23975_v60  ;;  %17634 = vmatprep.subr.bf16.mxu1 %v23976_v43  ;;  %v23982_v60 = vld [vmem:[#allocation12_spill] sm:$0xff]  ;;  %v23992_v43 = vld [vmem:[#allocation22_spill] sm:$0xff] }
0x1346   : > { %17659 = vmatprep.subr.bf16.mxu0 %v23119_v55 }
0x1348   : > { %17636 = vmatpush3.bf16.msra.mxu1 %v23977_v31  ;;  %v23983_v31 = vld [vmem:[#allocation5_spill] sm:$0xff] }
0x1349   : > { %17661 = vmatpush3.bf16.msra.mxu0 %v23978_v36  ;;  %17638 = vmatprep.subr.bf16.mxu1 %v23979_v16  ;;  %v23984_v16 = vld [vmem:[#allocation15_spill] sm:$0xff]  ;;  %v23986_v36 = vld [vmem:[#allocation6_spill] sm:$0xff] }
0x134a   : > { %17662 = vmatprep.subr.bf16.mxu0 %v23119_v55 }
0x134c   : > { %17640 = vmatpush3.bf16.msra.mxu1 %v23980_v52  ;;  %v10837_v52 = vld [vmem:[%s18730_s23 + $0x30] sm:$0xff] }
0x134d   : > { %17664 = vmatpush3.bf16.msra.mxu0 %v23981_v13  ;;  %17665 = vmatprep.subr.bf16.mxu1 %v23119_v55  ;;  %v23985_v13 = vld [vmem:[#allocation16_spill] sm:$0xff] }
0x134e   : > { %17691 = vmatprep.subr.bf16.mxu0 %v23982_v60  ;;  %7839 = vrot.lane.b32.xlu0 %v10837_v52, %s18655_s12  ;;  %v23990_v60 = vld [vmem:[#allocation7_spill] sm:$0xff] }
0x134f   : > { %7748 = vmatmul.mubr.f32.vlgmr.msra.gmra.mrb[92].mxu1 %v21837_v20  ;;  %v23987_v20 = vld [vmem:[#allocation17_spill] sm:$0xff] }
0x1350   : > { %14849 = vmatmul.mubr.f32.vlgmr.msra.gmra.mrb[96].mxu0 %v21877_v18  ;;  %17667 = vmatpush3.bf16.msra.mxu1 %v23983_v31  ;;  %v23988_v18 = vld [vmem:[#allocation18_spill] sm:$0xff] }
0x1351   : > { %17668 = vmatprep.subr.bf16.mxu1 %v23119_v55  ;;  %14863 = vmatprep.mubr.msk.f32.mxu1 %vm18657_vm1, %v23121_v11  ;;  %v23989_v31 = vld [vmem:[#allocation10_spill] sm:$0xff] }
0x1352   : > { %17693 = vmatpush1.bf16.msra.mxu0 %v23984_v16  ;;  %8055 = vmatprep.mubr.f32.mxu0 %v23121_v11  ;;  %v23991_v16 = vld [vmem:[#allocation19_spill] sm:$0xff] }
0x1353   : > { %17695 = vmatprep.subr.bf16.mxu0 %v23985_v13  ;;  %v23993_v13 = vld [vmem:[#allocation23_spill] sm:$0xff] }
0x1354   : > { %17670 = vmatpush3.bf16.msra.mxu1 %v23986_v36 }
0x1355   : > { %17671 = vmatprep.subr.bf16.mxu1 %v23119_v55 }
0x1356   : > { %17697 = vmatpush1.bf16.msra.mxu0 %v23987_v20 }
0x1357   : > { %17699 = vmatprep.subr.bf16.mxu0 %v23988_v18 }
0x1358   : > { %17673 = vmatpush3.bf16.msra.mxu1 %v23989_v31 }
0x1359   : > { %17675 = vmatprep.subr.bf16.mxu1 %v23990_v60 }
0x135a   : > { %17701 = vmatpush1.bf16.msra.mxu0 %v23991_v16 }
0x135b   : > { %17703 = vmatprep.subr.bf16.mxu0 %v23992_v43 }
0x135e   : > { %17705 = vmatpush1.bf16.msra.mxu0 %v23993_v13 }
0x135f   : > { %17719 = vmatprep.subr.bf16.mxu0 %v23994_v51 }
0x1382   : > { %v12741_v36 = vpop.f32.mrb[82].mxu1  ;;  %v12776_v52 = vpop.f32.mrb[86].mxu0 }
0x1383   : > { %v12742_v7 = vpop.f32.mrb[83].mxu1  ;;  %v12777_v15 = vpop.f32.mrb[87].mxu0 }
0x1384   : > { %v12743_v47 = vadd.f32 %v12742_v7, %v12741_v36  ;;  %v12778_v20 = vadd.f32 %v12777_v15, %v12776_v52 }
0x1386   : > { %v7037_v18 = vadd.f32 %v23995_v26, %v12743_v47 }
0x1388   : > { %v7107_v17 = vadd.f32 %v12778_v20, %v7037_v18 }
0x13a2   : > { %v7176_v31 = vpop.f32.mrb[84].mxu1  ;;  %v12828_v41 = vpop.f32.mrb[88].mxu0 }
0x13a3   : > { %v7177_v60 = vadd.f32 %v7176_v31, %v7107_v17  ;;  %v14745_v58 = vpop.f32.mrb[85].mxu1  ;;  %v12829_v16 = vpop.f32.mrb[89].mxu0 }
0x13a4   : > { %v12830_v29 = vadd.f32 %v12829_v16, %v12828_v41 }
0x13a5   : > { %v10834_v16 = vmul.f32 -1.442695, %v7177_v60 }
0x13a6   : > { %v7253_v51 = vadd.f32 %v21745_v39, %v12830_v29 }
0x13c2   : > { %v12863_v43 = vpop.f32.mrb[86].mxu1 }
0x13c3   : > { %v7392_v61 = vpop.f32.mrb[90].mxu0  ;;  %v12864_v13 = vpop.f32.mrb[87].mxu1 }
0x13c4   : > { %v12865_v5 = vadd.f32 %v12864_v13, %v12863_v43  ;;  %v14780_v42 = vpop.f32.mrb[91].mxu0 }
0x13c6   : > { %v7323_v59 = vadd.f32 %v12865_v5, %v7253_v51 }
0x13c8   : > { %v7393_v63 = vadd.f32 %v7392_v61, %v7323_v59 }
0x13ca   : > { %v10835_v31 = vmul.f32 -1.442695, %v7393_v63 }
0x13cc   : > { %18582 = vpow2.f32 %v10835_v31 }
0x13cd   : > { %18584 = vpow2.f32 %v10834_v16 }
0x13d6   : > { %v18583_v41 = vpop.eup %18582 }
0x13d7   : > { %v18585_v18 = vpop.eup %18584  ;;  %v7399_v29 = vadd.f32 1.0, %v18583_v41 }
0x13d8   : > { %v7183_v39 = vadd.f32 1.0, %v18585_v18 }
0x13d9   : > { %18586 = vrcp.f32 %v7399_v29 }
0x13da   : > { %18588 = vrcp.f32 %v7183_v39  ;;  %v7840_v39 = vpop.permute.xlu0 %7839 }
0x13e2   : > { %v12915_v36 = vpop.f32.mrb[88].mxu1 }
0x13e3   : > { %v12950_v15 = vpop.f32.mrb[92].mxu0  ;;  %v12916_v7 = vpop.f32.mrb[89].mxu1 }
0x13e4   : > { %v12917_v26 = vadd.f32 %v12916_v7, %v12915_v36  ;;  %v12951_v47 = vpop.f32.mrb[93].mxu0  ;;  %v18587_v51 = vpop.eup %18586 }
0x13e5   : > { %v12952_v20 = vadd.f32 %v12951_v47, %v12950_v15  ;;  %v7829_v63 = vmul.f32 %v18587_v51, %v21755_v22  ;;  %v23998_v51 = vld [vmem:[#allocation32_spill] sm:$0xff] }
0x13e6   : > { %v7469_v17 = vadd.f32 %v21751_v8, %v12917_v26  ;;  %v18589_v8 = vpop.eup %18588 }
0x13e8   : > { %v7539_v58 = vadd.f32 %v12952_v20, %v7469_v17 }
0x1402   : > { %v7608_v42 = vpop.f32.mrb[90].mxu1 }
0x1403   : > { %v7609_v59 = vadd.f32 %v7608_v42, %v7539_v58  ;;  %v13002_v5 = vpop.f32.mrb[94].mxu0  ;;  %v14815_v61 = vpop.f32.mrb[91].mxu1 }
0x1404   : > { %v13003_v13 = vpop.f32.mrb[95].mxu0 }
0x1405   : > { %18590 = vtanh.f32 %v7609_v59  ;;  %v13004_v43 = vadd.f32 %v13003_v13, %v13002_v5 }
0x1407   : > { %v7680_v47 = vadd.f32 %v21760_v33, %v13004_v43  ;;  %v23997_v43 = vld [vmem:[#allocation31_spill] sm:$0xff] }
0x140f   : > { %v18591_v52 = vpop.eup %18590 }
0x1410   : > { %v7830_v60 = vmul.f32 %v18591_v52, %v18589_v8  ;;  %v23999_v8 = vld [vmem:[#allocation33_spill] sm:$0xff]  ;;  %v24000_v52 = vld [vmem:[#allocation34_spill] sm:$0xff] }
0x1412   : > { %v22053_v36 = vadd.f32 %v7830_v60, %v7829_v63  ;;  %v24001_v63 = vld [vmem:[#allocation35_spill] sm:$0xff]  ;;  %v24002_v60 = vld [vmem:[#allocation37_spill] sm:$0xff] }
0x1422   : > { %v13037_v15 = vpop.f32.mrb[92].mxu1 }
0x1423   : > { %v7819_v7 = vpop.f32.mrb[96].mxu0  ;;  %v13038_v26 = vpop.f32.mrb[93].mxu1 }
0x1424   : > { %v13039_v20 = vadd.f32 %v13038_v26, %v13037_v15  ;;  %v14850_v17 = vpop.f32.mrb[97].mxu0  ;;  %v24003_v15 = vld [vmem:[#allocation39_spill] sm:$0xff] }
0x1426   : > { %v7750_v58 = vadd.f32 %v13039_v20, %v7680_v47  ;;  %v24005_v20 = vld [vmem:[#allocation41_spill] sm:$0xff] }
0x1428   : > { %v7820_v31 = vadd.f32 %v7819_v7, %v7750_v58  ;;  %v24004_v7 = vld [vmem:[#allocation40_spill] sm:$0xff]  ;;  %v24006_v58 = vld [vmem:[#allocation42_spill] sm:$0xff] }
0x142a   : > { %v10836_v16 = vmul.f32 -1.442695, %v7820_v31 }
0x142c   : > { %18592 = vpow2.f32 %v10836_v16 }
0x142d   : > { %18594 = vtanh.f32 %v22053_v36 }
0x1436   : > { %v18593_v41 = vpop.eup %18592 }
0x1437   : > { %v7826_v18 = vadd.f32 1.0, %v18593_v41  ;;  %v18595_v22 = vpop.eup %18594 }
0x1439   : > { %18596 = vrcp.f32 %v7826_v18  ;;  %v24007_v18 = vld [vmem:[#allocation43_spill] sm:$0xff] }
0x1443   : > { %v18597_v29 = vpop.eup %18596 }
0x1444   : > { %v7833_v42 = vmul.f32 %v18597_v29, %v18595_v22  ;;  %v24008_v29 = vld [vmem:[#allocation44_spill] sm:$0xff] }
0x1446   : > { %7835 = vst.msk [vmem:[#allocation4 + $0x28] sm:$0xff] %vm782_vm2, %v7833_v42  ;;  %v7842_v59 = vsel %vm782_vm2, %v7833_v42, %v7840_v39 }
0x1447   : > { %14864 = vmatmul.mubr.msk.f32.vlgmr.msra.gmra.mrb[94].mxu1 %vm790_vm3, %v7842_v59 }
0x1448   : > { %17677 = vmatpush1.bf16.msra.mxu1 %v23543_v48  ;;  %7984 = vmatprep.mubr.f32.mxu1 %v23121_v11 }
0x1449   : > { %17679 = vmatprep.subr.bf16.mxu1 %v23544_v30 }
0x144c   : > { %17681 = vmatpush1.bf16.msra.mxu1 %v23545_v62 }
0x144d   : > { %17683 = vmatprep.subr.bf16.mxu1 %v23546_v2 }
0x1450   : > { %17685 = vmatpush1.bf16.msra.mxu1 %v23547_v6 }
0x1451   : > { %17687 = vmatprep.subr.bf16.mxu1 %v23548_v45 }
0x1454   : > { %17689 = vmatpush1.bf16.msra.mxu1 %v23549_v14 }
0x1455   : > { %17706 = vmatprep.subr.bf16.mxu1 %v23119_v55 }
0x151a   : > { %v7912_v33 = vpop.f32.mrb[94].mxu1 }
0x151b   : > { %v7913_v5 = vadd.f32 %v21779_v10, %v7912_v33  ;;  %v14865_v61 = vpop.f32.mrb[95].mxu1  ;;  %v23996_v10 = vld [vmem:[#allocation38_spill] sm:$0xff] }
0x151c   : > { %v24009_v61 = vld [vmem:[#allocation45_spill] sm:$0xff] }
0x151d   : > { %v7916_v13 = vmax.f32 %v7913_v5, 0.0 }
0x151f   : > { %10839 = vmatmul.mubr.msk.f32.vlgmr.msra.gmra.mrb[96].mxu1 %vm891_vm4, %v7916_v13  ;;  %10840 = vmatmul.mubr.msk.f32.vlgmr.msra.gmra.mrb[98].mxu0 %vm891_vm4, %v7916_v13 }
0x1520   : > { %17708 = vmatpush3.bf16.msra.mxu1 %v18950_v19  ;;  %14882 = vmatprep.mubr.msk.f32.mxu1 %vm18657_vm1, %v23121_v11 }
0x1521   : > { %17709 = vmatprep.subr.bf16.mxu1 %v23119_v55  ;;  %17721 = vmatpush3.bf16.msra.mxu0 %v18960_v24 }
0x1522   : > { %17723 = vmatprep.subr.bf16.mxu0 %v18962_v28 }
0x1524   : > { %17711 = vmatpush3.bf16.msra.mxu1 %v18981_v35 }
0x1525   : > { %17712 = vmatprep.subr.bf16.mxu1 %v23119_v55  ;;  %17725 = vmatpush3.bf16.msra.mxu0 %v18993_v38 }
0x1526   : > { %17727 = vmatprep.subr.bf16.mxu0 %v18996_v40 }
0x1528   : > { %17714 = vmatpush3.bf16.msra.mxu1 %v19011_v46 }
0x1529   : > { %17715 = vmatprep.subr.bf16.mxu1 %v23119_v55  ;;  %17729 = vmatpush3.bf16.msra.mxu0 %v19024_v53 }
0x152a   : > { %17731 = vmatprep.subr.bf16.mxu0 %v19030_v56 }
0x152c   : > { %17717 = vmatpush3.bf16.msra.mxu1 %v19045_v0 }
0x152d   : > { %17751 = vmatprep.subr.bf16.mxu1 %v19048_v1  ;;  %17733 = vmatpush3.bf16.msra.mxu0 %v19060_v9 }
0x152e   : > { %17735 = vmatprep.subr.bf16.mxu0 %v19066_v12 }
0x152f   : > { %14883 = vmatmul.mubr.msk.f32.vlgmr.msra.gmra.mrb[98].mxu1 %vm891_vm4, %v7916_v13  ;;  %v24010_v13 = vld [vmem:[#allocation46_spill] sm:$0xff] }
0x1530   : > { %17753 = vmatpush3.bf16.msra.mxu1 %v19081_v21 }
0x1531   : > { %17755 = vmatprep.subr.bf16.mxu1 %v19084_v23  ;;  %17737 = vmatpush3.bf16.msra.mxu0 %v19096_v34 }
0x1532   : > { %17739 = vmatprep.subr.bf16.mxu0 %v19102_v37 }
0x1534   : > { %17757 = vmatpush3.bf16.msra.mxu1 %v19119_v49 }
0x1535   : > { %17759 = vmatprep.subr.bf16.mxu1 %v19122_v50  ;;  %17741 = vmatpush3.bf16.msra.mxu0 %v19134_v57 }
0x1536   : > { %17743 = vmatprep.subr.bf16.mxu0 %v23395_v44 }
0x1538   : > { %17761 = vmatpush3.bf16.msra.mxu1 %v23396_v3 }
0x1539   : > { %17763 = vmatprep.subr.bf16.mxu1 %v23397_v25  ;;  %17745 = vmatpush3.bf16.msra.mxu0 %v23398_v27 }
0x153a   : > { %17747 = vmatprep.subr.bf16.mxu0 %v23399_v32 }
0x153c   : > { %17765 = vmatpush3.bf16.msra.mxu1 %v23400_v4 }
0x153d   : > { %17767 = vmatprep.subr.bf16.mxu1 %v23692_v54  ;;  %17749 = vmatpush3.bf16.msra.mxu0 %v23996_v10 }
0x153e   : > { %17782 = vmatprep.subr.bf16.mxu0 %v23119_v55 }
0x1540   : > { %17769 = vmatpush3.bf16.msra.mxu1 %v23997_v43 }
0x1541   : > { %17771 = vmatprep.subr.bf16.mxu1 %v23998_v51 }
0x1544   : > { %17773 = vmatpush3.bf16.msra.mxu1 %v23999_v8 }
0x1545   : > { %17775 = vmatprep.subr.bf16.mxu1 %v24000_v52 }
0x1548   : > { %17777 = vmatpush3.bf16.msra.mxu1 %v24001_v63 }
0x1549   : > { %17779 = vmatprep.subr.bf16.mxu1 %v24002_v60 }
0x154c   : > { %17781 = vmatpush3.bf16.msra.mxu1 %v24003_v15 }
0x154d   : > { %17807 = vmatprep.subr.bf16.mxu1 %v24004_v7 }
0x15f2   : > { %v7986_v26 = vpop.f32.mrb[96].mxu1  ;;  %v8057_v47 = vpop.f32.mrb[98].mxu0 }
0x15f3   : > { %v7987_v17 = vadd.f32 %v7986_v26, %v24005_v20  ;;  %v8058_v31 = vadd.f32 %v8057_v47, %v24006_v58  ;;  %v7988_v16 = vpop.f32.mrb[97].mxu1  ;;  %v8059_v41 = vpop.f32.mrb[99].mxu0  ;;  %v24011_v26 = vld [vmem:[#allocation47_spill] sm:$0xff]  ;;  %v24012_v47 = vld [vmem:[#allocation48_spill] sm:$0xff] }
0x15f4   : > { %v7989_v22 = vadd.f32 %v7988_v16, %v24007_v18  ;;  %v8060_v39 = vadd.f32 %v8059_v41, %v24008_v29  ;;  %v24015_v41 = vld [vmem:[#allocation51_spill] sm:$0xff] }
0x15f5   : > { %v22123_v33 = vmax.f32 %v7987_v17, 0.0  ;;  %v22125_v5 = vmax.f32 %v8058_v31, 0.0  ;;  %v24013_v17 = vld [vmem:[#allocation49_spill] sm:$0xff]  ;;  %v24014_v31 = vld [vmem:[#allocation50_spill] sm:$0xff]  ;;  %v24031_v29 = vld [vmem:[#allocation67_spill] sm:$0xff] }
0x15f6   : > { %v22119_v42 = vmax.f32 %v7989_v22, 0.0  ;;  %v22121_v59 = vmax.f32 %v8060_v39, 0.0  ;;  %v24016_v22 = vld [vmem:[#allocation52_spill] sm:$0xff]  ;;  %v24071_v18 = vld [vmem:[#allocation107_spill] sm:$0xff] }
0x15f8   : > { %8201 = vmatprep.mubr.f32.mxu0 %v22119_v42  ;;  %8271 = vmatprep.mubr.f32.mxu1 %v22121_v59 }
0x15f9   : > { %8202 = vmatmul.mubr.f32.vlgmr.msra.gmra.mrb[100].mxu0 %v22123_v33  ;;  %8272 = vmatmul.mubr.f32.vlgmr.msra.gmra.mrb[100].mxu1 %v22125_v5 }
0x15fa   : > { %17784 = vmatpush3.bf16.msra.mxu0 %v24009_v61  ;;  %17809 = vmatpush3.bf16.msra.mxu1 %v24010_v13  ;;  %v24018_v13 = vld [vmem:[#allocation54_spill] sm:$0xff]  ;;  %v24019_v61 = vld [vmem:[#allocation55_spill] sm:$0xff] }
0x15fb   : > { %8417 = vmatprep.mubr.f32.mxu1 %v22119_v42  ;;  %17785 = vmatprep.subr.bf16.mxu0 %v23119_v55 }
0x15fc   : > { %17811 = vmatprep.subr.bf16.mxu1 %v24011_v26  ;;  %14917 = vmatprep.mubr.msk.f32.mxu0 %vm18657_vm1, %v23121_v11  ;;  %v24017_v26 = vld [vmem:[#allocation53_spill] sm:$0xff] }
0x15fe   : > { %17787 = vmatpush3.bf16.msra.mxu0 %v24012_v47  ;;  %17813 = vmatpush3.bf16.msra.mxu1 %v24013_v17  ;;  %v24020_v17 = vld [vmem:[#allocation56_spill] sm:$0xff]  ;;  %v24021_v47 = vld [vmem:[#allocation57_spill] sm:$0xff] }
0x15ff   : > { %17788 = vmatprep.subr.bf16.mxu0 %v23119_v55  ;;  %17815 = vmatprep.subr.bf16.mxu1 %v24014_v31  ;;  %v24022_v31 = vld [vmem:[#allocation58_spill] sm:$0xff] }
0x1602   : > { %v8128_v16 = vpop.f32.mrb[98].mxu1  ;;  %17790 = vmatpush3.bf16.msra.mxu0 %v24015_v41  ;;  %17817 = vmatpush3.bf16.msra.mxu1 %v24016_v22  ;;  %v24023_v22 = vld [vmem:[#allocation59_spill] sm:$0xff]  ;;  %v24025_v41 = vld [vmem:[#allocation61_spill] sm:$0xff] }
0x1603   : > { %v14884_v39 = vpop.f32.mrb[99].mxu1  ;;  %17791 = vmatprep.subr.bf16.mxu0 %v23119_v55  ;;  %17819 = vmatprep.subr.bf16.mxu1 %v24017_v26  ;;  %v24028_v26 = vld [vmem:[#allocation64_spill] sm:$0xff] }
0x1604   : > { %v24024_v39 = vld [vmem:[#allocation60_spill] sm:$0xff] }
0x1606   : > { %17793 = vmatpush3.bf16.msra.mxu0 %v24018_v13  ;;  %17821 = vmatpush3.bf16.msra.mxu1 %v24019_v61  ;;  %v24026_v13 = vld [vmem:[#allocation62_spill] sm:$0xff]  ;;  %v24027_v61 = vld [vmem:[#allocation63_spill] sm:$0xff] }
0x1607   : > { %17794 = vmatprep.subr.bf16.mxu0 %v23119_v55  ;;  %17823 = vmatprep.subr.bf16.mxu1 %v24020_v17  ;;  %v24029_v17 = vld [vmem:[#allocation65_spill] sm:$0xff] }
0x160a   : > { %17796 = vmatpush3.bf16.msra.mxu0 %v24021_v47  ;;  %17825 = vmatpush3.bf16.msra.mxu1 %v24022_v31  ;;  %v8129_v47 = vadd.f32 %v8128_v16, %v24029_v17  ;;  %v24030_v31 = vld [vmem:[#allocation66_spill] sm:$0xff]  ;;  %v24035_v16 = vld [vmem:[#allocation71_spill] sm:$0xff]  ;;  %v24044_v17 = vld [vmem:[#allocation80_spill] sm:$0xff] }
0x160b   : > { %17797 = vmatprep.subr.bf16.mxu0 %v23119_v55  ;;  %17827 = vmatprep.subr.bf16.mxu1 %v24023_v22  ;;  %v24032_v22 = vld [vmem:[#allocation68_spill] sm:$0xff] }
0x160e   : > { %17799 = vmatpush3.bf16.msra.mxu0 %v24024_v39  ;;  %17829 = vmatpush3.bf16.msra.mxu1 %v24025_v41  ;;  %v22165_v39 = vmax.f32 %v8129_v47, 0.0  ;;  %v24033_v41 = vld [vmem:[#allocation69_spill] sm:$0xff] }
0x160f   : > { %17800 = vmatprep.subr.bf16.mxu0 %v23119_v55  ;;  %17831 = vmatprep.subr.bf16.mxu1 %v24026_v13  ;;  %v24037_v47 = vld [vmem:[#allocation73_spill] sm:$0xff] }
0x1610   : > { %v24069_v13 = vld [vmem:[#allocation105_spill] sm:$0xff] }
0x1612   : > { %17802 = vmatpush3.bf16.msra.mxu0 %v24027_v61  ;;  %17833 = vmatpush3.bf16.msra.mxu1 %v24028_v26  ;;  %v24034_v26 = vld [vmem:[#allocation70_spill] sm:$0xff]  ;;  %v24045_v61 = vld [vmem:[#allocation81_spill] sm:$0xff] }
0x1613   : > { %17803 = vmatprep.subr.bf16.mxu0 %v23119_v55  ;;  %17835 = vmatprep.subr.bf16.mxu1 %v24030_v31  ;;  %v24036_v31 = vld [vmem:[#allocation72_spill] sm:$0xff] }
0x1616   : > { %17805 = vmatpush3.bf16.msra.mxu0 %v24031_v29  ;;  %17837 = vmatpush3.bf16.msra.mxu1 %v24032_v22  ;;  %v24039_v22 = vld [vmem:[#allocation75_spill] sm:$0xff]  ;;  %v24041_v29 = vld [vmem:[#allocation77_spill] sm:$0xff] }
0x1617   : > { %17839 = vmatprep.subr.bf16.mxu0 %v24033_v41  ;;  %17870 = vmatprep.subr.bf16.mxu1 %v23119_v55  ;;  %v24038_v41 = vld [vmem:[#allocation74_spill] sm:$0xff] }
0x1619   : > { %14918 = vmatmul.mubr.f32.vlgmr.msra.gmra.mrb[102].mxu0 %v22165_v39  ;;  %8418 = vmatmul.mubr.f32.vlgmr.msra.gmra.mrb[102].mxu1 %v22123_v33 }
0x161a   : > { %17841 = vmatpush3.bf16.msra.mxu0 %v24034_v26  ;;  %8487 = vmatprep.mubr.f32.mxu0 %v22121_v59  ;;  %v24040_v26 = vld [vmem:[#allocation76_spill] sm:$0xff] }
0x161b   : > { %17872 = vmatpush3.bf16.msra.mxu1 %v24035_v16  ;;  %17843 = vmatprep.subr.bf16.mxu0 %v24036_v31  ;;  %v24042_v16 = vld [vmem:[#allocation78_spill] sm:$0xff]  ;;  %v24043_v31 = vld [vmem:[#allocation79_spill] sm:$0xff] }
0x161c   : > { %17873 = vmatprep.subr.bf16.mxu1 %v23119_v55  ;;  %14952 = vmatprep.mubr.msk.f32.mxu1 %vm18657_vm1, %v23121_v11 }
0x161e   : > { %17845 = vmatpush3.bf16.msra.mxu0 %v24037_v47  ;;  %v24048_v47 = vld [vmem:[#allocation84_spill] sm:$0xff] }
0x161f   : > { %17875 = vmatpush3.bf16.msra.mxu1 %v24038_v41  ;;  %17847 = vmatprep.subr.bf16.mxu0 %v24039_v22  ;;  %v24046_v41 = vld [vmem:[#allocation82_spill] sm:$0xff]  ;;  %v24047_v22 = vld [vmem:[#allocation83_spill] sm:$0xff] }
0x1620   : > { %17876 = vmatprep.subr.bf16.mxu1 %v23119_v55 }
0x1622   : > { %17849 = vmatpush3.bf16.msra.mxu0 %v24040_v26  ;;  %v24051_v26 = vld [vmem:[#allocation87_spill] sm:$0xff] }
0x1623   : > { %17878 = vmatpush3.bf16.msra.mxu1 %v24041_v29  ;;  %17851 = vmatprep.subr.bf16.mxu0 %v24042_v16  ;;  %v24049_v29 = vld [vmem:[#allocation85_spill] sm:$0xff]  ;;  %v24050_v16 = vld [vmem:[#allocation86_spill] sm:$0xff] }
0x1624   : > { %17879 = vmatprep.subr.bf16.mxu1 %v23119_v55 }
0x1626   : > { %17853 = vmatpush3.bf16.msra.mxu0 %v24043_v31  ;;  %v24054_v31 = vld [vmem:[#allocation90_spill] sm:$0xff] }
0x1627   : > { %17881 = vmatpush3.bf16.msra.mxu1 %v24044_v17  ;;  %17855 = vmatprep.subr.bf16.mxu0 %v24045_v61  ;;  %v24052_v17 = vld [vmem:[#allocation88_spill] sm:$0xff]  ;;  %v24053_v61 = vld [vmem:[#allocation89_spill] sm:$0xff] }
0x1628   : > { %17882 = vmatprep.subr.bf16.mxu1 %v23119_v55 }
0x162a   : > { %17857 = vmatpush3.bf16.msra.mxu0 %v24046_v41  ;;  %v24057_v41 = vld [vmem:[#allocation93_spill] sm:$0xff] }
0x162b   : > { %17884 = vmatpush3.bf16.msra.mxu1 %v24047_v22  ;;  %17859 = vmatprep.subr.bf16.mxu0 %v24048_v47  ;;  %v24055_v22 = vld [vmem:[#allocation91_spill] sm:$0xff]  ;;  %v24056_v47 = vld [vmem:[#allocation92_spill] sm:$0xff] }
0x162c   : > { %17885 = vmatprep.subr.bf16.mxu1 %v23119_v55 }
0x162e   : > { %17861 = vmatpush3.bf16.msra.mxu0 %v24049_v29  ;;  %v24058_v29 = vld [vmem:[#allocation94_spill] sm:$0xff] }
0x162f   : > { %17887 = vmatpush3.bf16.msra.mxu1 %v24050_v16  ;;  %17863 = vmatprep.subr.bf16.mxu0 %v24051_v26  ;;  %v24059_v26 = vld [vmem:[#allocation95_spill] sm:$0xff] }
0x1630   : > { %17888 = vmatprep.subr.bf16.mxu1 %v23119_v55  ;;  %v24067_v16 = vld [vmem:[#allocation103_spill] sm:$0xff] }
0x1632   : > { %17865 = vmatpush3.bf16.msra.mxu0 %v24052_v17  ;;  %v24066_v17 = vld [vmem:[#allocation102_spill] sm:$0xff] }
0x1633   : > { %17890 = vmatpush3.bf16.msra.mxu1 %v24053_v61  ;;  %17867 = vmatprep.subr.bf16.mxu0 %v24054_v31  ;;  %v24060_v61 = vld [vmem:[#allocation96_spill] sm:$0xff]  ;;  %v24061_v31 = vld [vmem:[#allocation97_spill] sm:$0xff] }
0x1634   : > { %17891 = vmatprep.subr.bf16.mxu1 %v23119_v55 }
0x1636   : > { %17869 = vmatpush3.bf16.msra.mxu0 %v24055_v22  ;;  %v24062_v22 = vld [vmem:[#allocation98_spill] sm:$0xff] }
0x1637   : > { %17893 = vmatpush3.bf16.msra.mxu1 %v24056_v47  ;;  %17895 = vmatprep.subr.bf16.mxu0 %v24057_v41  ;;  %v24063_v47 = vld [vmem:[#allocation99_spill] sm:$0xff]  ;;  %v24064_v41 = vld [vmem:[#allocation100_spill] sm:$0xff] }
0x1638   : > { %17927 = vmatprep.subr.bf16.mxu1 %v24058_v29  ;;  %v24065_v29 = vld [vmem:[#allocation101_spill] sm:$0xff] }
0x1639   : > { %8488 = vmatmul.mubr.f32.vlgmr.msra.gmra.mrb[104].mxu0 %v22125_v5 }
0x163a   : > { %14953 = vmatmul.mubr.f32.vlgmr.msra.gmra.mrb[104].mxu1 %v22165_v39  ;;  %17897 = vmatpush3.bf16.msra.mxu0 %v24059_v26  ;;  %v24068_v26 = vld [vmem:[#allocation104_spill] sm:$0xff] }
0x163b   : > { %8633 = vmatprep.mubr.f32.mxu0 %v22119_v42  ;;  %17929 = vmatpush3.bf16.msra.mxu1 %v24060_v61  ;;  %v24070_v61 = vld [vmem:[#allocation106_spill] sm:$0xff] }
0x163c   : > { %8703 = vmatprep.mubr.f32.mxu1 %v22121_v59  ;;  %17899 = vmatprep.subr.bf16.mxu0 %v24061_v31  ;;  %v24072_v31 = vld [vmem:[#allocation108_spill] sm:$0xff] }
0x163d   : > { %17931 = vmatprep.subr.bf16.mxu1 %v24062_v22  ;;  %v24073_v22 = vld [vmem:[#allocation109_spill] sm:$0xff] }
0x163e   : > { %17901 = vmatpush3.bf16.msra.mxu0 %v24063_v47  ;;  %v24074_v47 = vld [vmem:[#allocation110_spill] sm:$0xff] }
0x163f   : > { %17933 = vmatpush3.bf16.msra.mxu1 %v24064_v41  ;;  %17903 = vmatprep.subr.bf16.mxu0 %v24065_v29  ;;  %v24075_v41 = vld [vmem:[#allocation111_spill] sm:$0xff]  ;;  %v24076_v29 = vld [vmem:[#allocation112_spill] sm:$0xff] }
0x1640   : > { %17935 = vmatprep.subr.bf16.mxu1 %v24066_v17  ;;  %v24077_v17 = vld [vmem:[#allocation113_spill] sm:$0xff] }
0x1642   : > { %17905 = vmatpush3.bf16.msra.mxu0 %v24067_v16  ;;  %v24078_v16 = vld [vmem:[#allocation114_spill] sm:$0xff] }
0x1643   : > { %17937 = vmatpush3.bf16.msra.mxu1 %v24068_v26  ;;  %17907 = vmatprep.subr.bf16.mxu0 %v24069_v13  ;;  %v24079_v26 = vld [vmem:[#allocation115_spill] sm:$0xff]  ;;  %v24080_v13 = vld [vmem:[#allocation116_spill] sm:$0xff] }
0x1644   : > { %17939 = vmatprep.subr.bf16.mxu1 %v24070_v61  ;;  %v24081_v61 = vld [vmem:[#allocation117_spill] sm:$0xff] }
0x1646   : > { %17909 = vmatpush3.bf16.msra.mxu0 %v24071_v18  ;;  %v24082_v18 = vld [vmem:[#allocation118_spill] sm:$0xff] }
0x1647   : > { %17941 = vmatpush3.bf16.msra.mxu1 %v24072_v31  ;;  %17911 = vmatprep.subr.bf16.mxu0 %v24073_v22  ;;  %v24083_v31 = vld [vmem:[#allocation119_spill] sm:$0xff]  ;;  %v24084_v22 = vld [vmem:[#allocation120_spill] sm:$0xff] }
0x1648   : > { %17943 = vmatprep.subr.bf16.mxu1 %v24074_v47  ;;  %v24085_v47 = vld [vmem:[#allocation121_spill] sm:$0xff] }
0x164a   : > { %17913 = vmatpush3.bf16.msra.mxu0 %v24075_v41  ;;  %v24086_v41 = vld [vmem:[#allocation122_spill] sm:$0xff] }
0x164b   : > { %17945 = vmatpush3.bf16.msra.mxu1 %v24076_v29  ;;  %17915 = vmatprep.subr.bf16.mxu0 %v24077_v17  ;;  %v24087_v29 = vld [vmem:[#allocation123_spill] sm:$0xff]  ;;  %v24088_v17 = vld [vmem:[#allocation124_spill] sm:$0xff] }
0x164c   : > { %17947 = vmatprep.subr.bf16.mxu1 %v24078_v16 }
0x164e   : > { %17917 = vmatpush3.bf16.msra.mxu0 %v24079_v26  ;;  %v24089_v26 = vld [vmem:[#allocation125_spill] sm:$0xff] }
0x164f   : > { %17949 = vmatpush3.bf16.msra.mxu1 %v24080_v13  ;;  %17919 = vmatprep.subr.bf16.mxu0 %v24081_v61 }
0x1650   : > { %17951 = vmatprep.subr.bf16.mxu1 %v24082_v18  ;;  %v24090_v18 = vld [vmem:[#allocation126_spill] sm:$0xff] }
0x1652   : > { %17921 = vmatpush3.bf16.msra.mxu0 %v24083_v31  ;;  %v24091_v31 = vld [vmem:[#allocation127_spill] sm:$0xff] }
0x1653   : > { %17953 = vmatpush3.bf16.msra.mxu1 %v24084_v22  ;;  %17923 = vmatprep.subr.bf16.mxu0 %v24085_v47  ;;  %v24100_v47 = vld [vmem:[#allocation136_spill] sm:$0xff]  ;;  %v24103_v22 = vld [vmem:[#allocation139_spill] sm:$0xff] }
0x1654   : > { %17955 = vmatprep.subr.bf16.mxu1 %v24086_v41  ;;  %v24092_v41 = vld [vmem:[#allocation128_spill] sm:$0xff] }
0x1656   : > { %17925 = vmatpush3.bf16.msra.mxu0 %v24087_v29  ;;  %v24095_v29 = vld [vmem:[#allocation131_spill] sm:$0xff] }
0x1657   : > { %17957 = vmatpush3.bf16.msra.mxu1 %v24088_v17  ;;  %17958 = vmatprep.subr.bf16.mxu0 %v23119_v55  ;;  %v24093_v17 = vld [vmem:[#allocation129_spill] sm:$0xff] }
0x1658   : > { %17983 = vmatprep.subr.bf16.mxu1 %v24089_v26  ;;  %v24094_v26 = vld [vmem:[#allocation130_spill] sm:$0xff] }
0x1659   : > { %8634 = vmatmul.mubr.f32.vlgmr.msra.gmra.mrb[106].mxu0 %v22123_v33 }
0x165a   : > { %8704 = vmatmul.mubr.f32.vlgmr.msra.gmra.mrb[106].mxu1 %v22125_v5  ;;  %17960 = vmatpush3.bf16.msra.mxu0 %v24090_v18  ;;  %v24096_v18 = vld [vmem:[#allocation132_spill] sm:$0xff] }
0x165b   : > { %17985 = vmatpush3.bf16.msra.mxu1 %v24091_v31  ;;  %8844 = vmatprep.mubr.f32.mxu1 %v22119_v42  ;;  %v24097_v31 = vld [vmem:[#allocation133_spill] sm:$0xff]  ;;  %v24098_v42 = vld [vmem:[#allocation134_spill] sm:$0xff] }
0x165c   : > { %17961 = vmatprep.subr.bf16.mxu0 %v23119_v55  ;;  %17987 = vmatprep.subr.bf16.mxu1 %v24092_v41  ;;  %v24099_v41 = vld [vmem:[#allocation135_spill] sm:$0xff] }
0x165d   : > { %14987 = vmatprep.mubr.msk.f32.mxu0 %vm18657_vm1, %v23121_v11 }
0x165e   : > { %17963 = vmatpush3.bf16.msra.mxu0 %v24093_v17  ;;  %v24101_v17 = vld [vmem:[#allocation137_spill] sm:$0xff] }
0x165f   : > { %17989 = vmatpush3.bf16.msra.mxu1 %v24094_v26  ;;  %17964 = vmatprep.subr.bf16.mxu0 %v23119_v55  ;;  %v24102_v26 = vld [vmem:[#allocation138_spill] sm:$0xff] }
0x1660   : > { %17991 = vmatprep.subr.bf16.mxu1 %v24095_v29  ;;  %v24106_v29 = vld [vmem:[#allocation142_spill] sm:$0xff] }
0x1662   : > { %17966 = vmatpush3.bf16.msra.mxu0 %v24096_v18  ;;  %v24104_v18 = vld [vmem:[#allocation140_spill] sm:$0xff] }
0x1663   : > { %17993 = vmatpush3.bf16.msra.mxu1 %v24097_v31  ;;  %17967 = vmatprep.subr.bf16.mxu0 %v23119_v55  ;;  %v24105_v31 = vld [vmem:[#allocation141_spill] sm:$0xff] }
0x1664   : > { %17995 = vmatprep.subr.bf16.mxu1 %v24098_v42  ;;  %v24109_v42 = vld [vmem:[#allocation145_spill] sm:$0xff] }
0x1666   : > { %17969 = vmatpush3.bf16.msra.mxu0 %v24099_v41  ;;  %v24107_v41 = vld [vmem:[#allocation143_spill] sm:$0xff] }
0x1667   : > { %17997 = vmatpush3.bf16.msra.mxu1 %v24100_v47  ;;  %17970 = vmatprep.subr.bf16.mxu0 %v23119_v55  ;;  %v24108_v47 = vld [vmem:[#allocation144_spill] sm:$0xff] }
0x1668   : > { %17999 = vmatprep.subr.bf16.mxu1 %v24101_v17  ;;  %v24112_v17 = vld [vmem:[#allocation148_spill] sm:$0xff] }
0x166a   : > { %17972 = vmatpush3.bf16.msra.mxu0 %v24102_v26  ;;  %v24110_v26 = vld [vmem:[#allocation146_spill] sm:$0xff] }
0x166b   : > { %18001 = vmatpush3.bf16.msra.mxu1 %v24103_v22  ;;  %17973 = vmatprep.subr.bf16.mxu0 %v23119_v55  ;;  %v24111_v22 = vld [vmem:[#allocation147_spill] sm:$0xff] }
0x166c   : > { %18003 = vmatprep.subr.bf16.mxu1 %v24104_v18  ;;  %v24113_v18 = vld [vmem:[#allocation149_spill] sm:$0xff] }
0x166e   : > { %17975 = vmatpush3.bf16.msra.mxu0 %v24105_v31 }
0x166f   : > { %18005 = vmatpush3.bf16.msra.mxu1 %v24106_v29  ;;  %17976 = vmatprep.subr.bf16.mxu0 %v23119_v55 }
0x1670   : > { %18007 = vmatprep.subr.bf16.mxu1 %v24107_v41  ;;  %v24114_v41 = vld [vmem:[#allocation150_spill] sm:$0xff] }
0x1672   : > { %17978 = vmatpush3.bf16.msra.mxu0 %v24108_v47  ;;  %v24116_v47 = vld [vmem:[#allocation152_spill] sm:$0xff] }
0x1673   : > { %18009 = vmatpush3.bf16.msra.mxu1 %v24109_v42  ;;  %17979 = vmatprep.subr.bf16.mxu0 %v23119_v55  ;;  %v24115_v42 = vld [vmem:[#allocation151_spill] sm:$0xff] }
0x1674   : > { %18011 = vmatprep.subr.bf16.mxu1 %v24110_v26  ;;  %v24125_v26 = vld [vmem:[#allocation161_spill] sm:$0xff] }
0x1676   : > { %17981 = vmatpush3.bf16.msra.mxu0 %v24111_v22  ;;  %v24119_v22 = vld [vmem:[#allocation155_spill] sm:$0xff] }
0x1677   : > { %18013 = vmatpush3.bf16.msra.mxu1 %v24112_v17  ;;  %18015 = vmatprep.subr.bf16.mxu0 %v24113_v18  ;;  %v24117_v18 = vld [vmem:[#allocation153_spill] sm:$0xff]  ;;  %v24118_v17 = vld [vmem:[#allocation154_spill] sm:$0xff] }
0x1678   : > { %18046 = vmatprep.subr.bf16.mxu1 %v23119_v55 }
0x1679   : > { %14988 = vmatmul.mubr.f32.vlgmr.msra.gmra.mrb[108].mxu0 %v22165_v39 }
0x167a   : > { %8845 = vmatmul.mubr.f32.vlgmr.msra.gmra.mrb[108].mxu1 %v22123_v33  ;;  %18017 = vmatpush3.bf16.msra.mxu0 %v24114_v41  ;;  %v24120_v33 = vld [vmem:[#allocation156_spill] sm:$0xff] }
0x167b   : > { %8914 = vmatprep.mubr.f32.mxu0 %v22121_v59  ;;  %18048 = vmatpush3.bf16.msra.mxu1 %v24115_v42  ;;  %v24121_v59 = vld [vmem:[#allocation157_spill] sm:$0xff]  ;;  %v24122_v42 = vld [vmem:[#allocation158_spill] sm:$0xff]  ;;  %v24124_v41 = vld [vmem:[#allocation160_spill] sm:$0xff] }
0x167c   : > { %18019 = vmatprep.subr.bf16.mxu0 %v24116_v47  ;;  %18049 = vmatprep.subr.bf16.mxu1 %v23119_v55  ;;  %v24123_v47 = vld [vmem:[#allocation159_spill] sm:$0xff] }
0x167d   : > { %15022 = vmatprep.mubr.msk.f32.mxu1 %vm18657_vm1, %v23121_v11 }
0x167e   : > { %18021 = vmatpush3.bf16.msra.mxu0 %v24117_v18  ;;  %v24128_v18 = vld [vmem:[#allocation164_spill] sm:$0xff] }
0x167f   : > { %18051 = vmatpush3.bf16.msra.mxu1 %v24118_v17  ;;  %18023 = vmatprep.subr.bf16.mxu0 %v24119_v22  ;;  %v24126_v17 = vld [vmem:[#allocation162_spill] sm:$0xff]  ;;  %v24127_v22 = vld [vmem:[#allocation163_spill] sm:$0xff] }
0x1680   : > { %18052 = vmatprep.subr.bf16.mxu1 %v23119_v55 }
0x1682   : > { %18025 = vmatpush3.bf16.msra.mxu0 %v24120_v33  ;;  %v24131_v33 = vld [vmem:[#allocation167_spill] sm:$0xff] }
0x1683   : > { %18054 = vmatpush3.bf16.msra.mxu1 %v24121_v59  ;;  %18027 = vmatprep.subr.bf16.mxu0 %v24122_v42  ;;  %v24129_v59 = vld [vmem:[#allocation165_spill] sm:$0xff]  ;;  %v24130_v42 = vld [vmem:[#allocation166_spill] sm:$0xff] }
0x1684   : > { %18055 = vmatprep.subr.bf16.mxu1 %v23119_v55 }
0x1686   : > { %18029 = vmatpush3.bf16.msra.mxu0 %v24123_v47 }
0x1687   : > { %18057 = vmatpush3.bf16.msra.mxu1 %v24124_v41  ;;  %18031 = vmatprep.subr.bf16.mxu0 %v24125_v26  ;;  %v24132_v41 = vld [vmem:[#allocation168_spill] sm:$0xff]  ;;  %v24133_v26 = vld [vmem:[#allocation169_spill] sm:$0xff] }
0x1688   : > { %18058 = vmatprep.subr.bf16.mxu1 %v23119_v55 }
0x168a   : > { %18033 = vmatpush3.bf16.msra.mxu0 %v24126_v17  ;;  %v24134_v17 = vld [vmem:[#allocation170_spill] sm:$0xff] }
0x168b   : > { %18060 = vmatpush3.bf16.msra.mxu1 %v24127_v22  ;;  %18035 = vmatprep.subr.bf16.mxu0 %v24128_v18  ;;  %v24135_v18 = vld [vmem:[#allocation171_spill] sm:$0xff]  ;;  %v24136_v22 = vld [vmem:[#allocation172_spill] sm:$0xff] }
0x168c   : > { %18061 = vmatprep.subr.bf16.mxu1 %v23119_v55 }
0x168e   : > { %18037 = vmatpush3.bf16.msra.mxu0 %v24129_v59  ;;  %v24149_v59 = vld [vmem:[#allocation24_spill] sm:$0xff] }
0x168f   : > { %18063 = vmatpush3.bf16.msra.mxu1 %v24130_v42  ;;  %18039 = vmatprep.subr.bf16.mxu0 %v24131_v33  ;;  %v24137_v42 = vld [vmem:[#allocation12_spill] sm:$0xff]  ;;  %v24147_v33 = vld [vmem:[#allocation22_spill] sm:$0xff] }
0x1690   : > { %18064 = vmatprep.subr.bf16.mxu1 %v23119_v55 }
0x1692   : > { %18041 = vmatpush3.bf16.msra.mxu0 %v24132_v41  ;;  %v24138_v41 = vld [vmem:[#allocation5_spill] sm:$0xff] }
0x1693   : > { %18066 = vmatpush3.bf16.msra.mxu1 %v24133_v26  ;;  %18043 = vmatprep.subr.bf16.mxu0 %v24134_v17  ;;  %v24139_v17 = vld [vmem:[#allocation15_spill] sm:$0xff]  ;;  %v24141_v26 = vld [vmem:[#allocation6_spill] sm:$0xff] }
0x1694   : > { %18067 = vmatprep.subr.bf16.mxu1 %v23119_v55 }
0x1696   : > { %18045 = vmatpush3.bf16.msra.mxu0 %v24135_v18  ;;  %v10845_v18 = vld [vmem:[%s18730_s23 + $0x38] sm:$0xff] }
0x1697   : > { %18069 = vmatpush3.bf16.msra.mxu1 %v24136_v22  ;;  %18070 = vmatprep.subr.bf16.mxu0 %v23119_v55  ;;  %v24140_v22 = vld [vmem:[#allocation16_spill] sm:$0xff] }
0x1698   : > { %18096 = vmatprep.subr.bf16.mxu1 %v24137_v42  ;;  %9006 = vrot.lane.b32.xlu1 %v10845_v18, %s18655_s12  ;;  %v24145_v42 = vld [vmem:[#allocation7_spill] sm:$0xff] }
0x1699   : > { %8915 = vmatmul.mubr.f32.vlgmr.msra.gmra.mrb[110].mxu0 %v22125_v5  ;;  %v24142_v5 = vld [vmem:[#allocation17_spill] sm:$0xff] }
0x169a   : > { %15023 = vmatmul.mubr.f32.vlgmr.msra.gmra.mrb[110].mxu1 %v22165_v39  ;;  %18072 = vmatpush3.bf16.msra.mxu0 %v24138_v41  ;;  %v24143_v41 = vld [vmem:[#allocation18_spill] sm:$0xff] }
0x169b   : > { %18073 = vmatprep.subr.bf16.mxu0 %v23119_v55  ;;  %15037 = vmatprep.mubr.msk.f32.mxu0 %vm18657_vm1, %v23121_v11  ;;  %v24144_v39 = vld [vmem:[#allocation10_spill] sm:$0xff] }
0x169c   : > { %18098 = vmatpush1.bf16.msra.mxu1 %v24139_v17  ;;  %9222 = vmatprep.mubr.f32.mxu1 %v23121_v11  ;;  %v24146_v17 = vld [vmem:[#allocation19_spill] sm:$0xff] }
0x169d   : > { %18100 = vmatprep.subr.bf16.mxu1 %v24140_v22  ;;  %v24148_v22 = vld [vmem:[#allocation23_spill] sm:$0xff] }
0x169e   : > { %18075 = vmatpush3.bf16.msra.mxu0 %v24141_v26 }
0x169f   : > { %18076 = vmatprep.subr.bf16.mxu0 %v23119_v55 }
0x16a0   : > { %18102 = vmatpush1.bf16.msra.mxu1 %v24142_v5 }
0x16a1   : > { %18104 = vmatprep.subr.bf16.mxu1 %v24143_v41  ;;  %v22340_v41 = vld [vmem:[%s22699_s6] ss:$0 sm:$0xff] }
0x16a2   : > { %18078 = vmatpush3.bf16.msra.mxu0 %v24144_v39  ;;  %24150 = vst [vmem:[#allocation25_spill] sm:$0xff] %v22340_v41 }
0x16a3   : > { %18080 = vmatprep.subr.bf16.mxu0 %v24145_v42 }
0x16a4   : > { %18106 = vmatpush1.bf16.msra.mxu1 %v24146_v17 }
0x16a5   : > { %18108 = vmatprep.subr.bf16.mxu1 %v24147_v33 }
0x16a8   : > { %18110 = vmatpush1.bf16.msra.mxu1 %v24148_v22 }
0x16a9   : > { %18124 = vmatprep.subr.bf16.mxu1 %v24149_v59 }
0x16cc   : > { %v13105_v26 = vpop.f32.mrb[100].mxu0  ;;  %v13140_v18 = vpop.f32.mrb[100].mxu1 }
0x16cd   : > { %v13106_v47 = vpop.f32.mrb[101].mxu0  ;;  %v13141_v29 = vpop.f32.mrb[101].mxu1 }
0x16ce   : > { %v13107_v31 = vadd.f32 %v13106_v47, %v13105_v26  ;;  %v13142_v5 = vadd.f32 %v13141_v29, %v13140_v18  ;;  %v22346_v29 = vld [vmem:[%s22699_s6 + $0x1] ss:$0 sm:$0xff] }
0x16d0   : > { %v8204_v39 = vadd.f32 %v22340_v41, %v13107_v31 }
0x16d2   : > { %v8274_v42 = vadd.f32 %v13142_v5, %v8204_v39 }
0x16ec   : > { %v8343_v17 = vpop.f32.mrb[102].mxu0  ;;  %v13192_v33 = vpop.f32.mrb[102].mxu1 }
0x16ed   : > { %v8344_v61 = vadd.f32 %v8343_v17, %v8274_v42  ;;  %v14919_v22 = vpop.f32.mrb[103].mxu0  ;;  %v13193_v13 = vpop.f32.mrb[103].mxu1 }
0x16ee   : > { %v13194_v59 = vadd.f32 %v13193_v13, %v13192_v33  ;;  %v22352_v33 = vld [vmem:[%s22699_s6 + $0x2] ss:$0 sm:$0xff] }
0x16f0   : > { %v8420_v47 = vadd.f32 %v22346_v29, %v13194_v59  ;;  %v10842_v59 = vmul.f32 -1.442695, %v8344_v61 }
0x170c   : > { %v13227_v16 = vpop.f32.mrb[104].mxu0 }
0x170d   : > { %v8559_v58 = vpop.f32.mrb[104].mxu1  ;;  %v13228_v20 = vpop.f32.mrb[105].mxu0 }
0x170e   : > { %v13229_v26 = vadd.f32 %v13228_v20, %v13227_v16  ;;  %v14954_v18 = vpop.f32.mrb[105].mxu1 }
0x1710   : > { %v8490_v31 = vadd.f32 %v13229_v26, %v8420_v47 }
0x1712   : > { %v8560_v5 = vadd.f32 %v8559_v58, %v8490_v31 }
0x1714   : > { %v10843_v60 = vmul.f32 -1.442695, %v8560_v5 }
0x1716   : > { %18598 = vpow2.f32 %v10843_v60 }
0x1717   : > { %18600 = vpow2.f32 %v10842_v59 }
0x1720   : > { %v18599_v20 = vpop.eup %18598 }
0x1721   : > { %v18601_v58 = vpop.eup %18600  ;;  %v8566_v16 = vadd.f32 1.0, %v18599_v20 }
0x1722   : > { %v8350_v47 = vadd.f32 1.0, %v18601_v58 }
0x1723   : > { %18602 = vrcp.f32 %v8566_v16 }
0x1724   : > { %18604 = vrcp.f32 %v8350_v47 }
0x172c   : > { %v13279_v39 = vpop.f32.mrb[106].mxu0 }
0x172d   : > { %v13314_v41 = vpop.f32.mrb[106].mxu1  ;;  %v13280_v42 = vpop.f32.mrb[107].mxu0 }
0x172e   : > { %v13281_v17 = vadd.f32 %v13280_v42, %v13279_v39  ;;  %v13315_v22 = vpop.f32.mrb[107].mxu1 }
0x172f   : > { %v13316_v13 = vadd.f32 %v13315_v22, %v13314_v41  ;;  %v18603_v22 = vpop.eup %18602 }
0x1730   : > { %v8636_v7 = vadd.f32 %v22352_v33, %v13281_v17  ;;  %v18605_v17 = vpop.eup %18604  ;;  %v8996_v61 = vmul.f32 %v18603_v22, %v22053_v36 }
0x1732   : > { %v8706_v15 = vadd.f32 %v13316_v13, %v8636_v7 }
0x174c   : > { %v8775_v26 = vpop.f32.mrb[108].mxu0 }
0x174d   : > { %v8776_v18 = vadd.f32 %v8775_v26, %v8706_v15  ;;  %v13366_v41 = vpop.f32.mrb[108].mxu1  ;;  %v14989_v31 = vpop.f32.mrb[109].mxu0  ;;  %v22361_v15 = vld [vmem:[%s22699_s6 + $0x3] ss:$0 sm:$0xff] }
0x174e   : > { %v13367_v39 = vpop.f32.mrb[109].mxu1 }
0x174f   : > { %18606 = vtanh.f32 %v8776_v18  ;;  %v13368_v42 = vadd.f32 %v13367_v39, %v13366_v41 }
0x1751   : > { %v8847_v58 = vadd.f32 %v22361_v15, %v13368_v42 }
0x1759   : > { %v18607_v7 = vpop.eup %18606 }
0x175a   : > { %v8997_v60 = vmul.f32 %v18607_v7, %v18605_v17  ;;  %v9007_v17 = vpop.permute.xlu1 %9006 }
0x175c   : > { %v22356_v5 = vadd.f32 %v8997_v60, %v8996_v61 }
0x176c   : > { %v13401_v13 = vpop.f32.mrb[110].mxu0 }
0x176d   : > { %v8986_v59 = vpop.f32.mrb[110].mxu1  ;;  %v13402_v20 = vpop.f32.mrb[111].mxu0 }
0x176e   : > { %v13403_v16 = vadd.f32 %v13402_v20, %v13401_v13  ;;  %v15024_v47 = vpop.f32.mrb[111].mxu1  ;;  %v24176_v20 = vld [vmem:[#allocation63_spill] sm:$0xff] }
0x1770   : > { %v8917_v26 = vadd.f32 %v13403_v16, %v8847_v58  ;;  %v24177_v58 = vld [vmem:[#allocation64_spill] sm:$0xff]  ;;  %v24178_v16 = vld [vmem:[#allocation65_spill] sm:$0xff] }
0x1772   : > { %v8987_v18 = vadd.f32 %v8986_v59, %v8917_v26  ;;  %v24175_v59 = vld [vmem:[#allocation62_spill] sm:$0xff] }
0x1773   : > { %v24179_v26 = vld [vmem:[#allocation66_spill] sm:$0xff] }
0x1774   : > { %v10844_v41 = vmul.f32 -1.442695, %v8987_v18  ;;  %v24180_v18 = vld [vmem:[#allocation67_spill] sm:$0xff] }
0x1776   : > { %18608 = vpow2.f32 %v10844_v41  ;;  %v24181_v41 = vld [vmem:[#allocation68_spill] sm:$0xff] }
0x1777   : > { %18610 = vtanh.f32 %v22356_v5 }
0x1780   : > { %v18609_v36 = vpop.eup %18608 }
0x1781   : > { %v8993_v31 = vadd.f32 1.0, %v18609_v36  ;;  %v18611_v39 = vpop.eup %18610 }
0x1783   : > { %18612 = vrcp.f32 %v8993_v31  ;;  %v24182_v31 = vld [vmem:[#allocation69_spill] sm:$0xff] }
0x178d   : > { %v18613_v22 = vpop.eup %18612 }
0x178e   : > { %v9000_v7 = vmul.f32 %v18613_v22, %v18611_v39  ;;  %v24183_v39 = vld [vmem:[#allocation70_spill] sm:$0xff]  ;;  %v24184_v22 = vld [vmem:[#allocation71_spill] sm:$0xff] }
0x1790   : > { %9002 = vst.msk [vmem:[#allocation4 + $0x30] sm:$0xff] %vm782_vm2, %v9000_v7  ;;  %v9009_v61 = vsel %vm782_vm2, %v9000_v7, %v9007_v17  ;;  %v24185_v17 = vld [vmem:[#allocation72_spill] sm:$0xff]  ;;  %v24186_v7 = vld [vmem:[#allocation73_spill] sm:$0xff] }
0x1791   : > { %15038 = vmatmul.mubr.msk.f32.vlgmr.msra.gmra.mrb[112].mxu0 %vm790_vm3, %v9009_v61  ;;  %v24187_v61 = vld [vmem:[#allocation74_spill] sm:$0xff] }
0x1792   : > { %18082 = vmatpush1.bf16.msra.mxu0 %v23543_v48  ;;  %9151 = vmatprep.mubr.f32.mxu0 %v23121_v11  ;;  %v18645_v48 = vld [vmem:[%s22695_s2] ss:$0 sm:$0xff] }
0x1793   : > { %18084 = vmatprep.subr.bf16.mxu0 %v23544_v30 }
0x1796   : > { %18086 = vmatpush1.bf16.msra.mxu0 %v23545_v62  ;;  %v24164_v62 = vld [vmem:[#allocation51_spill] sm:$0xff] }
0x1797   : > { %18088 = vmatprep.subr.bf16.mxu0 %v23546_v2  ;;  %v24165_v2 = vld [vmem:[#allocation52_spill] sm:$0xff] }
0x179a   : > { %18090 = vmatpush1.bf16.msra.mxu0 %v23547_v6 }
0x179b   : > { %18092 = vmatprep.subr.bf16.mxu0 %v23548_v45  ;;  %v24166_v45 = vld [vmem:[#allocation53_spill] sm:$0xff] }
0x179e   : > { %18094 = vmatpush1.bf16.msra.mxu0 %v23549_v14  ;;  %v24167_v14 = vld [vmem:[#allocation54_spill] sm:$0xff] }
0x179f   : > { %18111 = vmatprep.subr.bf16.mxu0 %v23119_v55 }
0x1864   : > { %v9079_v42 = vpop.f32.mrb[112].mxu0 }
0x1865   : > { %v9080_v60 = vadd.f32 %v18645_v48, %v9079_v42  ;;  %v15039_v13 = vpop.f32.mrb[113].mxu0  ;;  %v24188_v42 = vld [vmem:[#allocation75_spill] sm:$0xff]  ;;  %v24189_v48 = vld [vmem:[#allocation76_spill] sm:$0xff] }
0x1866   : > { %v24191_v13 = vld [vmem:[#allocation78_spill] sm:$0xff] }
0x1867   : > { %v9083_v30 = vmax.f32 %v9080_v60, 0.0  ;;  %v24190_v60 = vld [vmem:[#allocation77_spill] sm:$0xff] }
0x1869   : > { %10847 = vmatmul.mubr.msk.f32.vlgmr.msra.gmra.mrb[114].mxu0 %vm891_vm4, %v9083_v30  ;;  %10848 = vmatmul.mubr.msk.f32.vlgmr.msra.gmra.mrb[112].mxu1 %vm891_vm4, %v9083_v30 }
0x186a   : > { %18113 = vmatpush3.bf16.msra.mxu0 %v18950_v19  ;;  %15056 = vmatprep.mubr.msk.f32.mxu0 %vm18657_vm1, %v23121_v11  ;;  %v24151_v19 = vld [vmem:[#allocation37_spill] sm:$0xff] }
0x186b   : > { %18114 = vmatprep.subr.bf16.mxu0 %v23119_v55  ;;  %18126 = vmatpush3.bf16.msra.mxu1 %v18960_v24  ;;  %v24152_v24 = vld [vmem:[#allocation39_spill] sm:$0xff] }
0x186c   : > { %18128 = vmatprep.subr.bf16.mxu1 %v18962_v28  ;;  %v24153_v28 = vld [vmem:[#allocation40_spill] sm:$0xff] }
0x186e   : > { %18116 = vmatpush3.bf16.msra.mxu0 %v18981_v35 }
0x186f   : > { %18117 = vmatprep.subr.bf16.mxu0 %v23119_v55  ;;  %18130 = vmatpush3.bf16.msra.mxu1 %v18993_v38 }
0x1870   : > { %18132 = vmatprep.subr.bf16.mxu1 %v18996_v40  ;;  %v24154_v40 = vld [vmem:[#allocation41_spill] sm:$0xff] }
0x1872   : > { %18119 = vmatpush3.bf16.msra.mxu0 %v19011_v46 }
0x1873   : > { %18120 = vmatprep.subr.bf16.mxu0 %v23119_v55  ;;  %18134 = vmatpush3.bf16.msra.mxu1 %v19024_v53  ;;  %v24155_v53 = vld [vmem:[#allocation42_spill] sm:$0xff] }
0x1874   : > { %18136 = vmatprep.subr.bf16.mxu1 %v19030_v56 }
0x1876   : > { %18122 = vmatpush3.bf16.msra.mxu0 %v19045_v0 }
0x1877   : > { %18156 = vmatprep.subr.bf16.mxu0 %v19048_v1  ;;  %18138 = vmatpush3.bf16.msra.mxu1 %v19060_v9  ;;  %v24156_v9 = vld [vmem:[#allocation43_spill] sm:$0xff] }
0x1878   : > { %18140 = vmatprep.subr.bf16.mxu1 %v19066_v12 }
0x1879   : > { %15057 = vmatmul.mubr.msk.f32.vlgmr.msra.gmra.mrb[116].mxu0 %vm891_vm4, %v9083_v30  ;;  %v24192_v30 = vld [vmem:[#allocation79_spill] sm:$0xff] }
0x187a   : > { %18158 = vmatpush3.bf16.msra.mxu0 %v19081_v21  ;;  %v24157_v21 = vld [vmem:[#allocation44_spill] sm:$0xff] }
0x187b   : > { %18160 = vmatprep.subr.bf16.mxu0 %v19084_v23  ;;  %18142 = vmatpush3.bf16.msra.mxu1 %v19096_v34 }
0x187c   : > { %18144 = vmatprep.subr.bf16.mxu1 %v19102_v37 }
0x187e   : > { %18162 = vmatpush3.bf16.msra.mxu0 %v19119_v49 }
0x187f   : > { %18164 = vmatprep.subr.bf16.mxu0 %v19122_v50  ;;  %18146 = vmatpush3.bf16.msra.mxu1 %v19134_v57  ;;  %v24158_v57 = vld [vmem:[#allocation45_spill] sm:$0xff] }
0x1880   : > { %18148 = vmatprep.subr.bf16.mxu1 %v23395_v44  ;;  %v24159_v44 = vld [vmem:[#allocation46_spill] sm:$0xff] }
0x1882   : > { %18166 = vmatpush3.bf16.msra.mxu0 %v23396_v3  ;;  %v24160_v3 = vld [vmem:[#allocation47_spill] sm:$0xff] }
0x1883   : > { %18168 = vmatprep.subr.bf16.mxu0 %v23397_v25  ;;  %18150 = vmatpush3.bf16.msra.mxu1 %v23398_v27  ;;  %v24161_v25 = vld [vmem:[#allocation48_spill] sm:$0xff]  ;;  %v24162_v27 = vld [vmem:[#allocation49_spill] sm:$0xff] }
0x1884   : > { %18152 = vmatprep.subr.bf16.mxu1 %v23399_v32  ;;  %v24163_v32 = vld [vmem:[#allocation50_spill] sm:$0xff] }
0x1886   : > { %18170 = vmatpush3.bf16.msra.mxu0 %v23400_v4 }
0x1887   : > { %18172 = vmatprep.subr.bf16.mxu0 %v23692_v54  ;;  %18154 = vmatpush3.bf16.msra.mxu1 %v23996_v10  ;;  %v24168_v54 = vld [vmem:[#allocation55_spill] sm:$0xff]  ;;  %v24169_v10 = vld [vmem:[#allocation56_spill] sm:$0xff] }
0x1888   : > { %18187 = vmatprep.subr.bf16.mxu1 %v23119_v55 }
0x188a   : > { %18174 = vmatpush3.bf16.msra.mxu0 %v23997_v43  ;;  %v24170_v43 = vld [vmem:[#allocation57_spill] sm:$0xff] }
0x188b   : > { %18176 = vmatprep.subr.bf16.mxu0 %v23998_v51  ;;  %v24171_v51 = vld [vmem:[#allocation58_spill] sm:$0xff] }
0x188e   : > { %18178 = vmatpush3.bf16.msra.mxu0 %v23999_v8  ;;  %v24172_v8 = vld [vmem:[#allocation59_spill] sm:$0xff] }
0x188f   : > { %18180 = vmatprep.subr.bf16.mxu0 %v24000_v52  ;;  %v24173_v52 = vld [vmem:[#allocation60_spill] sm:$0xff] }
0x1892   : > { %18182 = vmatpush3.bf16.msra.mxu0 %v24001_v63  ;;  %v24174_v63 = vld [vmem:[#allocation61_spill] sm:$0xff] }
0x1893   : > { %18184 = vmatprep.subr.bf16.mxu0 %v24151_v19  ;;  %v24193_v19 = vld [vmem:[#allocation80_spill] sm:$0xff] }
0x1896   : > { %18186 = vmatpush3.bf16.msra.mxu0 %v24152_v24  ;;  %v24194_v24 = vld [vmem:[#allocation81_spill] sm:$0xff] }
0x1897   : > { %18212 = vmatprep.subr.bf16.mxu0 %v24153_v28  ;;  %v24195_v28 = vld [vmem:[#allocation82_spill] sm:$0xff] }
0x193c   : > { %v9153_v35 = vpop.f32.mrb[114].mxu0  ;;  %v9224_v38 = vpop.f32.mrb[112].mxu1 }
0x193d   : > { %v9154_v46 = vadd.f32 %v9153_v35, %v24154_v40  ;;  %v9225_v56 = vadd.f32 %v9224_v38, %v24155_v53  ;;  %v9155_v0 = vpop.f32.mrb[115].mxu0  ;;  %v9226_v1 = vpop.f32.mrb[113].mxu1  ;;  %v24196_v35 = vld [vmem:[#allocation83_spill] sm:$0xff]  ;;  %v24197_v38 = vld [vmem:[#allocation84_spill] sm:$0xff]  ;;  %v24198_v40 = vld [vmem:[#allocation85_spill] sm:$0xff] }
0x193e   : > { %v9156_v12 = vadd.f32 %v9155_v0, %v24156_v9  ;;  %v9227_v23 = vadd.f32 %v9226_v1, %v24157_v21  ;;  %v24200_v53 = vld [vmem:[#allocation87_spill] sm:$0xff]  ;;  %v24202_v0 = vld [vmem:[#allocation89_spill] sm:$0xff]  ;;  %v24203_v1 = vld [vmem:[#allocation90_spill] sm:$0xff] }
0x193f   : > { %v22433_v49 = vmax.f32 %v9154_v46, 0.0  ;;  %v22435_v50 = vmax.f32 %v9225_v56, 0.0  ;;  %v24199_v46 = vld [vmem:[#allocation86_spill] sm:$0xff]  ;;  %v24201_v56 = vld [vmem:[#allocation88_spill] sm:$0xff]  ;;  %v24204_v9 = vld [vmem:[#allocation91_spill] sm:$0xff] }
0x1940   : > { %v22429_v34 = vmax.f32 %v9156_v12, 0.0  ;;  %v22431_v37 = vmax.f32 %v9227_v23, 0.0  ;;  %v24205_v12 = vld [vmem:[#allocation92_spill] sm:$0xff]  ;;  %v24206_v21 = vld [vmem:[#allocation93_spill] sm:$0xff]  ;;  %v24207_v23 = vld [vmem:[#allocation94_spill] sm:$0xff] }
0x1942   : > { %9368 = vmatprep.mubr.f32.mxu1 %v22429_v34  ;;  %9438 = vmatprep.mubr.f32.mxu0 %v22431_v37 }
0x1943   : > { %9369 = vmatmul.mubr.f32.vlgmr.msra.gmra.mrb[114].mxu1 %v22433_v49  ;;  %9439 = vmatmul.mubr.f32.vlgmr.msra.gmra.mrb[118].mxu0 %v22435_v50 }
0x1944   : > { %18189 = vmatpush3.bf16.msra.mxu1 %v24158_v57  ;;  %18214 = vmatpush3.bf16.msra.mxu0 %v24159_v44  ;;  %v24208_v57 = vld [vmem:[#allocation95_spill] sm:$0xff]  ;;  %v24209_v44 = vld [vmem:[#allocation96_spill] sm:$0xff] }
0x1945   : > { %9584 = vmatprep.mubr.f32.mxu0 %v22429_v34  ;;  %18190 = vmatprep.subr.bf16.mxu1 %v23119_v55 }
0x1946   : > { %18216 = vmatprep.subr.bf16.mxu0 %v24160_v3  ;;  %15091 = vmatprep.mubr.msk.f32.mxu1 %vm18657_vm1, %v23121_v11  ;;  %v24210_v3 = vld [vmem:[#allocation97_spill] sm:$0xff] }
0x1948   : > { %18192 = vmatpush3.bf16.msra.mxu1 %v24161_v25  ;;  %18218 = vmatpush3.bf16.msra.mxu0 %v24162_v27  ;;  %v24211_v25 = vld [vmem:[#allocation98_spill] sm:$0xff]  ;;  %v24212_v27 = vld [vmem:[#allocation99_spill] sm:$0xff] }
0x1949   : > { %18193 = vmatprep.subr.bf16.mxu1 %v23119_v55  ;;  %18220 = vmatprep.subr.bf16.mxu0 %v24163_v32  ;;  %v24213_v32 = vld [vmem:[#allocation100_spill] sm:$0xff] }
0x194c   : > { %v9295_v4 = vpop.f32.mrb[116].mxu0  ;;  %18195 = vmatpush3.bf16.msra.mxu1 %v24164_v62  ;;  %18222 = vmatpush3.bf16.msra.mxu0 %v24165_v2  ;;  %v24215_v62 = vld [vmem:[#allocation102_spill] sm:$0xff]  ;;  %v24216_v2 = vld [vmem:[#allocation103_spill] sm:$0xff] }
0x194d   : > { %v15058_v6 = vpop.f32.mrb[117].mxu0  ;;  %18196 = vmatprep.subr.bf16.mxu1 %v23119_v55  ;;  %18224 = vmatprep.subr.bf16.mxu0 %v24166_v45  ;;  %v9296_v47 = vadd.f32 %v9295_v4, %v24178_v16  ;;  %v24214_v4 = vld [vmem:[#allocation101_spill] sm:$0xff] }
0x194e   : > { %v24217_v6 = vld [vmem:[#allocation104_spill] sm:$0xff]  ;;  %v24218_v45 = vld [vmem:[#allocation105_spill] sm:$0xff] }
0x194f   : > { %v22475_v36 = vmax.f32 %v9296_v47, 0.0  ;;  %v24230_v16 = vld [vmem:[#allocation117_spill] sm:$0xff]  ;;  %v24231_v47 = vld [vmem:[#allocation118_spill] sm:$0xff] }
0x1950   : > { %18198 = vmatpush3.bf16.msra.mxu1 %v24167_v14  ;;  %18226 = vmatpush3.bf16.msra.mxu0 %v24168_v54  ;;  %v24219_v14 = vld [vmem:[#allocation106_spill] sm:$0xff]  ;;  %v24220_v54 = vld [vmem:[#allocation107_spill] sm:$0xff] }
0x1951   : > { %18199 = vmatprep.subr.bf16.mxu1 %v23119_v55  ;;  %18228 = vmatprep.subr.bf16.mxu0 %v24169_v10  ;;  %v24221_v10 = vld [vmem:[#allocation108_spill] sm:$0xff] }
0x1954   : > { %18201 = vmatpush3.bf16.msra.mxu1 %v24170_v43  ;;  %18230 = vmatpush3.bf16.msra.mxu0 %v24171_v51  ;;  %v24222_v43 = vld [vmem:[#allocation109_spill] sm:$0xff]  ;;  %v24223_v51 = vld [vmem:[#allocation110_spill] sm:$0xff] }
0x1955   : > { %18202 = vmatprep.subr.bf16.mxu1 %v23119_v55  ;;  %18232 = vmatprep.subr.bf16.mxu0 %v24172_v8  ;;  %v24224_v8 = vld [vmem:[#allocation111_spill] sm:$0xff] }
0x1958   : > { %18204 = vmatpush3.bf16.msra.mxu1 %v24173_v52  ;;  %18234 = vmatpush3.bf16.msra.mxu0 %v24174_v63  ;;  %v24225_v52 = vld [vmem:[#allocation112_spill] sm:$0xff]  ;;  %v24226_v63 = vld [vmem:[#allocation113_spill] sm:$0xff] }
0x1959   : > { %18205 = vmatprep.subr.bf16.mxu1 %v23119_v55  ;;  %18236 = vmatprep.subr.bf16.mxu0 %v24175_v59  ;;  %v24227_v59 = vld [vmem:[#allocation114_spill] sm:$0xff] }
0x195c   : > { %18207 = vmatpush3.bf16.msra.mxu1 %v24176_v20  ;;  %18238 = vmatpush3.bf16.msra.mxu0 %v24177_v58  ;;  %v24228_v20 = vld [vmem:[#allocation115_spill] sm:$0xff]  ;;  %v24229_v58 = vld [vmem:[#allocation116_spill] sm:$0xff] }
0x195d   : > { %18208 = vmatprep.subr.bf16.mxu1 %v23119_v55  ;;  %18240 = vmatprep.subr.bf16.mxu0 %v24179_v26  ;;  %v24232_v26 = vld [vmem:[#allocation119_spill] sm:$0xff] }
0x1960   : > { %18210 = vmatpush3.bf16.msra.mxu1 %v24180_v18  ;;  %18242 = vmatpush3.bf16.msra.mxu0 %v24181_v41  ;;  %v24233_v18 = vld [vmem:[#allocation120_spill] sm:$0xff]  ;;  %v24234_v41 = vld [vmem:[#allocation121_spill] sm:$0xff] }
0x1961   : > { %18244 = vmatprep.subr.bf16.mxu1 %v24182_v31  ;;  %18275 = vmatprep.subr.bf16.mxu0 %v23119_v55  ;;  %v24235_v31 = vld [vmem:[#allocation122_spill] sm:$0xff] }
0x1963   : > { %15092 = vmatmul.mubr.f32.vlgmr.msra.gmra.mrb[116].mxu1 %v22475_v36  ;;  %9585 = vmatmul.mubr.f32.vlgmr.msra.gmra.mrb[120].mxu0 %v22433_v49 }
0x1964   : > { %18246 = vmatpush3.bf16.msra.mxu1 %v24183_v39  ;;  %9654 = vmatprep.mubr.f32.mxu1 %v22431_v37  ;;  %v24236_v39 = vld [vmem:[#allocation123_spill] sm:$0xff] }
0x1965   : > { %18277 = vmatpush3.bf16.msra.mxu0 %v24184_v22  ;;  %18248 = vmatprep.subr.bf16.mxu1 %v24185_v17  ;;  %v24237_v22 = vld [vmem:[#allocation124_spill] sm:$0xff]  ;;  %v24238_v17 = vld [vmem:[#allocation125_spill] sm:$0xff] }
0x1966   : > { %18278 = vmatprep.subr.bf16.mxu0 %v23119_v55  ;;  %15126 = vmatprep.mubr.msk.f32.mxu0 %vm18657_vm1, %v23121_v11 }
0x1968   : > { %18250 = vmatpush3.bf16.msra.mxu1 %v24186_v7  ;;  %v24239_v7 = vld [vmem:[#allocation126_spill] sm:$0xff] }
0x1969   : > { %18280 = vmatpush3.bf16.msra.mxu0 %v24187_v61  ;;  %18252 = vmatprep.subr.bf16.mxu1 %v24188_v42  ;;  %v24240_v61 = vld [vmem:[#allocation127_spill] sm:$0xff]  ;;  %v24241_v42 = vld [vmem:[#allocation128_spill] sm:$0xff] }
0x196a   : > { %18281 = vmatprep.subr.bf16.mxu0 %v23119_v55 }
0x196c   : > { %18254 = vmatpush3.bf16.msra.mxu1 %v24189_v48  ;;  %v24242_v48 = vld [vmem:[#allocation129_spill] sm:$0xff] }
0x196d   : > { %18283 = vmatpush3.bf16.msra.mxu0 %v24190_v60  ;;  %18256 = vmatprep.subr.bf16.mxu1 %v24191_v13  ;;  %v24243_v60 = vld [vmem:[#allocation130_spill] sm:$0xff]  ;;  %v24244_v13 = vld [vmem:[#allocation131_spill] sm:$0xff] }
0x196e   : > { %18284 = vmatprep.subr.bf16.mxu0 %v23119_v55 }
0x1970   : > { %18258 = vmatpush3.bf16.msra.mxu1 %v24192_v30  ;;  %v24245_v30 = vld [vmem:[#allocation132_spill] sm:$0xff] }
0x1971   : > { %18286 = vmatpush3.bf16.msra.mxu0 %v24193_v19  ;;  %18260 = vmatprep.subr.bf16.mxu1 %v24194_v24  ;;  %v24246_v19 = vld [vmem:[#allocation133_spill] sm:$0xff]  ;;  %v24248_v24 = vld [vmem:[#allocation135_spill] sm:$0xff] }
0x1972   : > { %18287 = vmatprep.subr.bf16.mxu0 %v23119_v55 }
0x1974   : > { %18262 = vmatpush3.bf16.msra.mxu1 %v24195_v28  ;;  %v24249_v28 = vld [vmem:[#allocation136_spill] sm:$0xff] }
0x1975   : > { %18289 = vmatpush3.bf16.msra.mxu0 %v24196_v35  ;;  %18264 = vmatprep.subr.bf16.mxu1 %v24197_v38  ;;  %v24250_v35 = vld [vmem:[#allocation137_spill] sm:$0xff]  ;;  %v24251_v38 = vld [vmem:[#allocation138_spill] sm:$0xff] }
0x1976   : > { %18290 = vmatprep.subr.bf16.mxu0 %v23119_v55 }
0x1978   : > { %18266 = vmatpush3.bf16.msra.mxu1 %v24198_v40  ;;  %v24252_v40 = vld [vmem:[#allocation139_spill] sm:$0xff] }
0x1979   : > { %18292 = vmatpush3.bf16.msra.mxu0 %v24199_v46  ;;  %18268 = vmatprep.subr.bf16.mxu1 %v24200_v53  ;;  %v24253_v46 = vld [vmem:[#allocation140_spill] sm:$0xff]  ;;  %v24254_v53 = vld [vmem:[#allocation141_spill] sm:$0xff] }
0x197a   : > { %18293 = vmatprep.subr.bf16.mxu0 %v23119_v55 }
0x197c   : > { %18270 = vmatpush3.bf16.msra.mxu1 %v24201_v56  ;;  %v24255_v56 = vld [vmem:[#allocation142_spill] sm:$0xff] }
0x197d   : > { %18295 = vmatpush3.bf16.msra.mxu0 %v24202_v0  ;;  %18272 = vmatprep.subr.bf16.mxu1 %v24203_v1  ;;  %v24256_v0 = vld [vmem:[#allocation143_spill] sm:$0xff]  ;;  %v24257_v1 = vld [vmem:[#allocation144_spill] sm:$0xff] }
0x197e   : > { %18296 = vmatprep.subr.bf16.mxu0 %v23119_v55 }
0x1980   : > { %18274 = vmatpush3.bf16.msra.mxu1 %v24204_v9  ;;  %v24258_v9 = vld [vmem:[#allocation145_spill] sm:$0xff] }
0x1981   : > { %18298 = vmatpush3.bf16.msra.mxu0 %v24205_v12  ;;  %18300 = vmatprep.subr.bf16.mxu1 %v24206_v21  ;;  %v24259_v12 = vld [vmem:[#allocation146_spill] sm:$0xff]  ;;  %v24260_v21 = vld [vmem:[#allocation147_spill] sm:$0xff] }
0x1982   : > { %18332 = vmatprep.subr.bf16.mxu0 %v24207_v23  ;;  %v24261_v23 = vld [vmem:[#allocation148_spill] sm:$0xff] }
0x1983   : > { %9655 = vmatmul.mubr.f32.vlgmr.msra.gmra.mrb[118].mxu1 %v22435_v50 }
0x1984   : > { %15127 = vmatmul.mubr.f32.vlgmr.msra.gmra.mrb[122].mxu0 %v22475_v36  ;;  %18302 = vmatpush3.bf16.msra.mxu1 %v24208_v57  ;;  %v24262_v57 = vld [vmem:[#allocation149_spill] sm:$0xff] }
0x1985   : > { %9800 = vmatprep.mubr.f32.mxu1 %v22429_v34  ;;  %18334 = vmatpush3.bf16.msra.mxu0 %v24209_v44  ;;  %v24263_v44 = vld [vmem:[#allocation150_spill] sm:$0xff] }
0x1986   : > { %9870 = vmatprep.mubr.f32.mxu0 %v22431_v37  ;;  %18304 = vmatprep.subr.bf16.mxu1 %v24210_v3  ;;  %v24264_v3 = vld [vmem:[#allocation151_spill] sm:$0xff] }
0x1987   : > { %18336 = vmatprep.subr.bf16.mxu0 %v24211_v25  ;;  %v24265_v25 = vld [vmem:[#allocation152_spill] sm:$0xff] }
0x1988   : > { %18306 = vmatpush3.bf16.msra.mxu1 %v24212_v27  ;;  %v24266_v27 = vld [vmem:[#allocation153_spill] sm:$0xff] }
0x1989   : > { %18338 = vmatpush3.bf16.msra.mxu0 %v24213_v32  ;;  %18308 = vmatprep.subr.bf16.mxu1 %v24214_v4  ;;  %v24267_v32 = vld [vmem:[#allocation154_spill] sm:$0xff]  ;;  %v24268_v4 = vld [vmem:[#allocation155_spill] sm:$0xff] }
0x198a   : > { %18340 = vmatprep.subr.bf16.mxu0 %v24215_v62  ;;  %v24271_v62 = vld [vmem:[#allocation158_spill] sm:$0xff] }
0x198c   : > { %18310 = vmatpush3.bf16.msra.mxu1 %v24216_v2  ;;  %v24272_v2 = vld [vmem:[#allocation159_spill] sm:$0xff] }
0x198d   : > { %18342 = vmatpush3.bf16.msra.mxu0 %v24217_v6  ;;  %18312 = vmatprep.subr.bf16.mxu1 %v24218_v45  ;;  %v24273_v6 = vld [vmem:[#allocation160_spill] sm:$0xff]  ;;  %v24275_v45 = vld [vmem:[#allocation162_spill] sm:$0xff] }
0x198e   : > { %18344 = vmatprep.subr.bf16.mxu0 %v24219_v14  ;;  %v24276_v14 = vld [vmem:[#allocation163_spill] sm:$0xff] }
0x1990   : > { %18314 = vmatpush3.bf16.msra.mxu1 %v24220_v54  ;;  %v24277_v54 = vld [vmem:[#allocation164_spill] sm:$0xff] }
0x1991   : > { %18346 = vmatpush3.bf16.msra.mxu0 %v24221_v10  ;;  %18316 = vmatprep.subr.bf16.mxu1 %v24222_v43  ;;  %v24278_v10 = vld [vmem:[#allocation165_spill] sm:$0xff]  ;;  %v24279_v43 = vld [vmem:[#allocation166_spill] sm:$0xff] }
0x1992   : > { %18348 = vmatprep.subr.bf16.mxu0 %v24223_v51  ;;  %v24280_v51 = vld [vmem:[#allocation167_spill] sm:$0xff] }
0x1994   : > { %18318 = vmatpush3.bf16.msra.mxu1 %v24224_v8  ;;  %v10180_v8 = vld [vmem:[%s22700_s7] sm:$0xff] }
0x1995   : > { %18350 = vmatpush3.bf16.msra.mxu0 %v24225_v52  ;;  %18320 = vmatprep.subr.bf16.mxu1 %v24226_v63  ;;  %v10181_v52 = vld [vmem:[%s22700_s7 + $0x8] sm:$0xff] }
0x1996   : > { %18352 = vmatprep.subr.bf16.mxu0 %v24227_v59  ;;  %v24281_v63 = vld [vmem:[#allocation168_spill] sm:$0xff]  ;;  %v24282_v59 = vld [vmem:[#allocation169_spill] sm:$0xff] }
0x1998   : > { %18322 = vmatpush3.bf16.msra.mxu1 %v24228_v20  ;;  %v24283_v20 = vld [vmem:[#allocation170_spill] sm:$0xff] }
0x1999   : > { %18354 = vmatpush3.bf16.msra.mxu0 %v24229_v58  ;;  %18324 = vmatprep.subr.bf16.mxu1 %v24230_v16  ;;  %v18475_v58 = vpack.c.bf16 %v10181_v52, %v10180_v8  ;;  %v10182_v16 = vld [vmem:[%s22700_s7 + $0x10] sm:$0xff] }
0x199a   : > { %18356 = vmatprep.subr.bf16.mxu0 %v24231_v47  ;;  %v10183_v47 = vld [vmem:[%s22700_s7 + $0x18] sm:$0xff] }
0x199c   : > { %18326 = vmatpush3.bf16.msra.mxu1 %v24232_v26  ;;  %v24284_v26 = vld [vmem:[#allocation171_spill] sm:$0xff] }
0x199d   : > { %18358 = vmatpush3.bf16.msra.mxu0 %v24233_v18  ;;  %18328 = vmatprep.subr.bf16.mxu1 %v24234_v41  ;;  %v24285_v18 = vld [vmem:[#allocation172_spill] sm:$0xff]  ;;  %v18479_v41 = vpack.c.bf16 %v10183_v47, %v10182_v16 }
0x199e   : > { %18360 = vmatprep.subr.bf16.mxu0 %v24235_v31  ;;  %v10173_v31 = vld [vmem:[#allocation4 + $0x8] sm:$0xff] }
0x19a0   : > { %18330 = vmatpush3.bf16.msra.mxu1 %v24236_v39  ;;  %v10174_v39 = vld [vmem:[#allocation4 + $0x10] sm:$0xff] }
0x19a1   : > { %18362 = vmatpush3.bf16.msra.mxu0 %v24237_v22  ;;  %18363 = vmatprep.subr.bf16.mxu1 %v23119_v55  ;;  %v10175_v22 = vld [vmem:[#allocation4 + $0x18] sm:$0xff] }
0x19a2   : > { %18388 = vmatprep.subr.bf16.mxu0 %v24238_v17  ;;  %v10176_v17 = vld [vmem:[#allocation4 + $0x20] sm:$0xff] }
0x19a3   : > { %9801 = vmatmul.mubr.f32.vlgmr.msra.gmra.mrb[120].mxu1 %v22433_v49 }
0x19a4   : > { %9871 = vmatmul.mubr.f32.vlgmr.msra.gmra.mrb[124].mxu0 %v22435_v50  ;;  %18365 = vmatpush3.bf16.msra.mxu1 %v24239_v7 }
0x19a5   : > { %18390 = vmatpush3.bf16.msra.mxu0 %v24240_v61  ;;  %10011 = vmatprep.mubr.f32.mxu0 %v22429_v34  ;;  %v24247_v34 = vld [vmem:[#allocation134_spill] sm:$0xff] }
0x19a6   : > { %18366 = vmatprep.subr.bf16.mxu1 %v23119_v55  ;;  %18392 = vmatprep.subr.bf16.mxu0 %v24241_v42 }
0x19a7   : > { %15161 = vmatprep.mubr.msk.f32.mxu1 %vm18657_vm1, %v23121_v11 }
0x19a8   : > { %18368 = vmatpush3.bf16.msra.mxu1 %v24242_v48 }
0x19a9   : > { %18394 = vmatpush3.bf16.msra.mxu0 %v24243_v60  ;;  %18369 = vmatprep.subr.bf16.mxu1 %v23119_v55 }
0x19aa   : > { %18396 = vmatprep.subr.bf16.mxu0 %v24244_v13 }
0x19ac   : > { %18371 = vmatpush3.bf16.msra.mxu1 %v24245_v30  ;;  %v24286_v30 = vld [vmem:[#allocation25_spill] sm:$0xff] }
0x19ad   : > { %18398 = vmatpush3.bf16.msra.mxu0 %v24246_v19  ;;  %18372 = vmatprep.subr.bf16.mxu1 %v23119_v55 }
0x19ae   : > { %18400 = vmatprep.subr.bf16.mxu0 %v24247_v34 }
0x19b0   : > { %18374 = vmatpush3.bf16.msra.mxu1 %v24248_v24 }
0x19b1   : > { %18402 = vmatpush3.bf16.msra.mxu0 %v24249_v28  ;;  %18375 = vmatprep.subr.bf16.mxu1 %v23119_v55 }
0x19b2   : > { %18404 = vmatprep.subr.bf16.mxu0 %v24250_v35 }
0x19b4   : > { %18377 = vmatpush3.bf16.msra.mxu1 %v24251_v38 }
0x19b5   : > { %18406 = vmatpush3.bf16.msra.mxu0 %v24252_v40  ;;  %18378 = vmatprep.subr.bf16.mxu1 %v23119_v55 }
0x19b6   : > { %18408 = vmatprep.subr.bf16.mxu0 %v24253_v46 }
0x19b8   : > { %18380 = vmatpush3.bf16.msra.mxu1 %v24254_v53  ;;  %v10328_v53 = vld [vmem:[%s22702_s9] sm:$0xff] }
0x19b9   : > { %18410 = vmatpush3.bf16.msra.mxu0 %v24255_v56  ;;  %18381 = vmatprep.subr.bf16.mxu1 %v23119_v55  ;;  %v10329_v56 = vld [vmem:[%s22702_s9 + $0x8] sm:$0xff] }
0x19ba   : > { %18412 = vmatprep.subr.bf16.mxu0 %v24256_v0  ;;  %v18483_v0 = vpack.c.bf16 %v10329_v56, %v10328_v53 }
0x19bc   : > { %18383 = vmatpush3.bf16.msra.mxu1 %v24257_v1 }
0x19bd   : > { %18414 = vmatpush3.bf16.msra.mxu0 %v24258_v9  ;;  %18384 = vmatprep.subr.bf16.mxu1 %v23119_v55 }
0x19be   : > { %18416 = vmatprep.subr.bf16.mxu0 %v24259_v12 }
0x19c0   : > { %18386 = vmatpush3.bf16.msra.mxu1 %v24260_v21 }
0x19c1   : > { %18418 = vmatpush3.bf16.msra.mxu0 %v24261_v23  ;;  %18420 = vmatprep.subr.bf16.mxu1 %v24262_v57 }
0x19c2   : > { %18451 = vmatprep.subr.bf16.mxu0 %v23119_v55 }
0x19c3   : > { %15162 = vmatmul.mubr.f32.vlgmr.msra.gmra.mrb[122].mxu1 %v22475_v36 }
0x19c4   : > { %10012 = vmatmul.mubr.f32.vlgmr.msra.gmra.mrb[126].mxu0 %v22433_v49  ;;  %18422 = vmatpush3.bf16.msra.mxu1 %v24263_v44  ;;  %v24269_v49 = vld [vmem:[#allocation156_spill] sm:$0xff] }
0x19c5   : > { %10081 = vmatprep.mubr.f32.mxu1 %v22431_v37  ;;  %18453 = vmatpush3.bf16.msra.mxu0 %v24264_v3  ;;  %v24270_v37 = vld [vmem:[#allocation157_spill] sm:$0xff] }
0x19c6   : > { %18424 = vmatprep.subr.bf16.mxu1 %v24265_v25  ;;  %18454 = vmatprep.subr.bf16.mxu0 %v23119_v55 }
0x19c7   : > { %15196 = vmatprep.mubr.msk.f32.mxu0 %vm18657_vm1, %v23121_v11  ;;  %v24274_v11 = vld [vmem:[#allocation161_spill] sm:$0xff] }
0x19c8   : > { %18426 = vmatpush3.bf16.msra.mxu1 %v24266_v27 }
0x19c9   : > { %18456 = vmatpush3.bf16.msra.mxu0 %v24267_v32  ;;  %18428 = vmatprep.subr.bf16.mxu1 %v24268_v4 }
0x19ca   : > { %18457 = vmatprep.subr.bf16.mxu0 %v23119_v55 }
0x19cc   : > { %18430 = vmatpush3.bf16.msra.mxu1 %v24269_v49 }
0x19cd   : > { %18459 = vmatpush3.bf16.msra.mxu0 %v24270_v37  ;;  %18432 = vmatprep.subr.bf16.mxu1 %v24271_v62 }
0x19ce   : > { %18460 = vmatprep.subr.bf16.mxu0 %v23119_v55 }
0x19d0   : > { %18434 = vmatpush3.bf16.msra.mxu1 %v24272_v2 }
0x19d1   : > { %18462 = vmatpush3.bf16.msra.mxu0 %v24273_v6  ;;  %18436 = vmatprep.subr.bf16.mxu1 %v24274_v11 }
0x19d2   : > { %18463 = vmatprep.subr.bf16.mxu0 %v23119_v55 }
0x19d4   : > { %18438 = vmatpush3.bf16.msra.mxu1 %v24275_v45 }
0x19d5   : > { %18465 = vmatpush3.bf16.msra.mxu0 %v24276_v14  ;;  %18440 = vmatprep.subr.bf16.mxu1 %v24277_v54 }
0x19d6   : > { %18466 = vmatprep.subr.bf16.mxu0 %v23119_v55 }
0x19d8   : > { %18442 = vmatpush3.bf16.msra.mxu1 %v24278_v10 }
0x19d9   : > { %18468 = vmatpush3.bf16.msra.mxu0 %v24279_v43  ;;  %18444 = vmatprep.subr.bf16.mxu1 %v24280_v51 }
0x19da   : > { %18469 = vmatprep.subr.bf16.mxu0 %v23119_v55 }
0x19dc   : > { %18446 = vmatpush3.bf16.msra.mxu1 %v24281_v63 }
0x19dd   : > { %18471 = vmatpush3.bf16.msra.mxu0 %v24282_v59  ;;  %18448 = vmatprep.subr.bf16.mxu1 %v24283_v20 }
0x19de   : > { %18472 = vmatprep.subr.bf16.mxu0 %v23119_v55  ;;  %v10172_v55 = vld [vmem:[#allocation4] sm:$0xff] }
0x19e0   : > { %18450 = vmatpush3.bf16.msra.mxu1 %v24284_v26 }
0x19e1   : > { %18474 = vmatpush3.bf16.msra.mxu0 %v24285_v18  ;;  %18476 = vmatprep.subr.bf16.mxu1 %v18475_v58 }
0x19e2   : > { %18484 = vmatprep.subr.bf16.mxu0 %v18483_v0 }
0x19e3   : > { %10082 = vmatmul.mubr.f32.vlgmr.msra.gmra.mrb[124].mxu1 %v22435_v50  ;;  %v10177_v50 = vld [vmem:[#allocation4 + $0x28] sm:$0xff] }
0x19e4   : > { %15197 = vmatmul.mubr.f32.vlgmr.msra.gmra.mrb[128].mxu0 %v22475_v36  ;;  %18478 = vmatpush3.bf16.msra.mxu1 %v18475_v58  ;;  %v10178_v36 = vld [vmem:[#allocation4 + $0x30] sm:$0xff] }
0x19e5   : > { %15207 = vmatprep.mubr.msk.f32.mxu1 %vm782_vm2, %v10172_v55  ;;  %18480 = vmatprep.subr.bf16.mxu1 %v18479_v41 }
0x19e6   : > { %18486 = vmatpush3.bf16.msra.mxu0 %v18483_v0 }
0x19e8   : > { %18482 = vmatpush3.bf16.msra.mxu1 %v18479_v41 }
0x19e9   : > { %18487 = vmatprep.subr.bf16.mxu1 %v18483_v0 }
0x19eb   : > { %15208 = vmatmul.mubr.msk.f32.vlgmr.msra.gmra.mrb[126].mxu1 %vm782_vm2, %v10173_v31 }
0x19ec   : > { %15210 = vmatprep.mubr.msk.f32.mxu1 %vm782_vm2, %v10174_v39  ;;  %18488 = vmatpush3.bf16.msra.mxu1 %v18483_v0 }
0x19ef   : > { %15211 = vmatmul.mubr.msk.f32.gmra.mrb[128].mxu1 %vm782_vm2, %v10175_v22 }
0x19f0   : > { %15213 = vmatprep.mubr.msk.f32.mxu1 %vm782_vm2, %v10176_v17 }
0x19f3   : > { %15214 = vmatmul.mubr.msk.f32.gmra.mrb[130].mxu1 %vm782_vm2, %v10177_v50  ;;  %v10853_v50 = vld [vmem:[%s22701_s8] ss:$0 sm:$0xff] }
0x19f4   : > { %15216 = vmatprep.mubr.msk.f32.mxu1 %vm782_vm2, %v10178_v36 }
0x1a16   : > { %v13469_v7 = vpop.f32.mrb[114].mxu1  ;;  %v13504_v61 = vpop.f32.mrb[118].mxu0 }
0x1a17   : > { %v13470_v42 = vpop.f32.mrb[115].mxu1  ;;  %v13505_v48 = vpop.f32.mrb[119].mxu0 }
0x1a18   : > { %v13471_v60 = vadd.f32 %v13470_v42, %v13469_v7  ;;  %v13506_v13 = vadd.f32 %v13505_v48, %v13504_v61 }
0x1a1a   : > { %v9371_v19 = vadd.f32 %v24286_v30, %v13471_v60 }
0x1a1c   : > { %v9441_v34 = vadd.f32 %v13506_v13, %v9371_v19 }
0x1a36   : > { %v9510_v24 = vpop.f32.mrb[116].mxu1  ;;  %v13556_v28 = vpop.f32.mrb[120].mxu0 }
0x1a37   : > { %v9511_v35 = vadd.f32 %v9510_v24, %v9441_v34  ;;  %v15093_v38 = vpop.f32.mrb[117].mxu1  ;;  %v13557_v40 = vpop.f32.mrb[121].mxu0 }
0x1a38   : > { %v13558_v46 = vadd.f32 %v13557_v40, %v13556_v28 }
0x1a39   : > { %v10850_v11 = vmul.f32 -1.442695, %v9511_v35 }
0x1a3a   : > { %v9587_v21 = vadd.f32 %v22346_v29, %v13558_v46 }
0x1a56   : > { %v13591_v1 = vpop.f32.mrb[118].mxu1 }
0x1a57   : > { %v9726_v9 = vpop.f32.mrb[122].mxu0  ;;  %v13592_v12 = vpop.f32.mrb[119].mxu1 }
0x1a58   : > { %v13593_v23 = vadd.f32 %v13592_v12, %v13591_v1  ;;  %v15128_v57 = vpop.f32.mrb[123].mxu0 }
0x1a5a   : > { %v9657_v44 = vadd.f32 %v13593_v23, %v9587_v21  ;;  %v10862_v23 = vld [vmem:[%s22703_s10] ss:$0 sm:$0xff] }
0x1a5c   : > { %v9727_v3 = vadd.f32 %v9726_v9, %v9657_v44 }
0x1a5e   : > { %v10851_v6 = vmul.f32 -1.442695, %v9727_v3 }
0x1a60   : > { %18614 = vpow2.f32 %v10851_v6 }
0x1a61   : > { %18616 = vpow2.f32 %v10850_v11 }
0x1a6a   : > { %v18615_v45 = vpop.eup %18614 }
0x1a6b   : > { %v18617_v14 = vpop.eup %18616  ;;  %v9733_v29 = vadd.f32 1.0, %v18615_v45 }
0x1a6c   : > { %v9517_v54 = vadd.f32 1.0, %v18617_v14 }
0x1a6d   : > { %18618 = vrcp.f32 %v9733_v29 }
0x1a6e   : > { %18620 = vrcp.f32 %v9517_v54 }
0x1a76   : > { %v13643_v25 = vpop.f32.mrb[120].mxu1 }
0x1a77   : > { %v13678_v27 = vpop.f32.mrb[124].mxu0  ;;  %v13644_v32 = vpop.f32.mrb[121].mxu1 }
0x1a78   : > { %v13645_v4 = vadd.f32 %v13644_v32, %v13643_v25  ;;  %v13679_v49 = vpop.f32.mrb[125].mxu0  ;;  %v18619_v59 = vpop.eup %18618 }
0x1a79   : > { %v13680_v37 = vadd.f32 %v13679_v49, %v13678_v27  ;;  %v10163_v58 = vmul.f32 %v18619_v59, %v22356_v5 }
0x1a7a   : > { %v9803_v62 = vadd.f32 %v22352_v33, %v13645_v4  ;;  %v18621_v33 = vpop.eup %18620 }
0x1a7c   : > { %v9873_v2 = vadd.f32 %v13680_v37, %v9803_v62 }
0x1a96   : > { %v9942_v10 = vpop.f32.mrb[122].mxu1 }
0x1a97   : > { %v9943_v43 = vadd.f32 %v9942_v10, %v9873_v2  ;;  %v13730_v51 = vpop.f32.mrb[126].mxu0  ;;  %v15163_v8 = vpop.f32.mrb[123].mxu1 }
0x1a98   : > { %v13731_v52 = vpop.f32.mrb[127].mxu0 }
0x1a99   : > { %18622 = vtanh.f32 %v9943_v43  ;;  %v13732_v63 = vadd.f32 %v13731_v52, %v13730_v51 }
0x1a9b   : > { %v10014_v55 = vadd.f32 %v22361_v15, %v13732_v63 }
0x1aa3   : > { %v18623_v20 = vpop.eup %18622 }
0x1aa4   : > { %v10164_v16 = vmul.f32 %v18623_v20, %v18621_v33 }
0x1aa6   : > { %v10165_v47 = vadd.f32 %v10164_v16, %v10163_v58 }
0x1aa8   : > { %10171 = vst.msk [vmem:[#allocation3] sm:$0xff] %vm782_vm2, %v10165_v47 }
0x1ab6   : > { %v13765_v26 = vpop.f32.mrb[124].mxu1 }
0x1ab7   : > { %v10153_v18 = vpop.f32.mrb[128].mxu0  ;;  %v13766_v41 = vpop.f32.mrb[125].mxu1 }
0x1ab8   : > { %v13767_v31 = vadd.f32 %v13766_v41, %v13765_v26  ;;  %v15198_v39 = vpop.f32.mrb[129].mxu0 }
0x1aba   : > { %v10084_v22 = vadd.f32 %v13767_v31, %v10014_v55 }
0x1abc   : > { %v10154_v17 = vadd.f32 %v10153_v18, %v10084_v22 }
0x1abe   : > { %v10852_v36 = vmul.f32 -1.442695, %v10154_v17  ;;  %v15209_v7 = vpop.f32.mrb[126].mxu1 }
0x1abf   : > { %v10287_v5 = vadd.f32 %v15209_v7, %v10853_v50  ;;  %v10281_v61 = vpop.f32.mrb[127].mxu1 }
0x1ac0   : > { %18624 = vpow2.f32 %v10852_v36  ;;  %v10282_v42 = vadd.f32 %v10853_v50, %v10281_v61 }
0x1ac1   : > { %v10321_v13 = vmax.f32 %v10287_v5, 0.0  ;;  %18626 = vtanh.f32 %v10165_v47 }
0x1ac2   : > { %v10320_v48 = vmax.f32 %v10282_v42, 0.0  ;;  %v15212_v60 = vpop.f32.mrb[128].mxu1 }
0x1ac3   : > { %v10297_v30 = vadd.f32 %v15212_v60, %v10853_v50  ;;  %v10291_v15 = vpop.f32.mrb[129].mxu1 }
0x1ac4   : > { %v10292_v19 = vadd.f32 %v10853_v50, %v10291_v15  ;;  %15223 = vmatprep.mubr.msk.f32.mxu0 %vm10337_vm5, %v10320_v48 }
0x1ac5   : > { %15224 = vmatmul.mubr.msk.f32.vlgmr.msra.gmra.mrb[130].mxu0 %vm10337_vm5, %v10321_v13  ;;  %v10323_v28 = vmax.f32 %v10297_v30, 0.0 }
0x1ac6   : > { %v10322_v34 = vmax.f32 %v10292_v19, 0.0  ;;  %v15215_v24 = vpop.f32.mrb[130].mxu1 }
0x1ac7   : > { %v10307_v35 = vadd.f32 %v15215_v24, %v10853_v50  ;;  %v10301_v38 = vpop.f32.mrb[131].mxu1 }
0x1ac8   : > { %v10302_v40 = vadd.f32 %v10853_v50, %v10301_v38  ;;  %15226 = vmatprep.mubr.msk.f32.mxu0 %vm10337_vm5, %v10322_v34 }
0x1ac9   : > { %15227 = vmatmul.mubr.msk.f32.gmra.mrb[132].mxu0 %vm10337_vm5, %v10323_v28  ;;  %v10325_v0 = vmax.f32 %v10307_v35, 0.0 }
0x1aca   : > { %v18625_v46 = vpop.eup %18624  ;;  %v10324_v53 = vmax.f32 %v10302_v40, 0.0 }
0x1acb   : > { %v10160_v56 = vadd.f32 1.0, %v18625_v46  ;;  %v18627_v1 = vpop.eup %18626 }
0x1acc   : > { %15229 = vmatprep.mubr.msk.f32.mxu0 %vm10337_vm5, %v10324_v53 }
0x1acd   : > { %18628 = vrcp.f32 %v10160_v56  ;;  %15230 = vmatmul.mubr.msk.f32.gmra.mrb[134].mxu0 %vm10337_vm5, %v10325_v0 }
0x1ad7   : > { %v18629_v9 = vpop.eup %18628 }
0x1ad8   : > { %v10167_v12 = vmul.f32 %v18629_v9, %v18627_v1 }
0x1ada   : > { %10169 = vst.msk [vmem:[#allocation4 + $0x38] sm:$0xff] %vm782_vm2, %v10167_v12  ;;  %10170 = vst.msk [vmem:[#allocation2] sm:$0xff] %vm782_vm2, %v10167_v12 }
0x1ae1   : > { %v10179_v21 = vld [vmem:[#allocation4 + $0x38] sm:$0xff] }
0x1ae2   : > { %15217 = vmatmul.mubr.msk.f32.gmra.mrb[132].mxu1 %vm782_vm2, %v10179_v21 }
0x1b98   : > { %v15225_v57 = vpop.f32.mrb[130].mxu0 }
0x1b99   : > { %v10434_v44 = vadd.f32 %v15225_v57, %v10862_v23  ;;  %v10428_v3 = vpop.f32.mrb[131].mxu0 }
0x1b9a   : > { %v10429_v25 = vadd.f32 %v10862_v23, %v10428_v3 }
0x1b9b   : > { %10469 = vst.msk [vmem:[%s18735_s26 + $0x8] sm:$0xff] %vm10467_vm6, %v10434_v44 }
0x1b9c   : > { %10468 = vst.msk [vmem:[%s18735_s26] sm:$0xff] %vm10467_vm6, %v10429_v25  ;;  %v15228_v27 = vpop.f32.mrb[132].mxu0 }
0x1b9d   : > { %v10444_v32 = vadd.f32 %v15228_v27, %v10862_v23  ;;  %v10438_v4 = vpop.f32.mrb[133].mxu0 }
0x1b9e   : > { %v10439_v49 = vadd.f32 %v10862_v23, %v10438_v4 }
0x1b9f   : > { %10471 = vst.msk [vmem:[%s18735_s26 + $0x18] sm:$0xff] %vm10467_vm6, %v10444_v32 }
0x1ba0   : > { %10470 = vst.msk [vmem:[%s18735_s26 + $0x10] sm:$0xff] %vm10467_vm6, %v10439_v49  ;;  %v15231_v37 = vpop.f32.mrb[134].mxu0 }
0x1ba1   : > { %v10454_v62 = vadd.f32 %v15231_v37, %v10862_v23  ;;  %v10448_v2 = vpop.f32.mrb[135].mxu0 }
0x1ba2   : > { %v10449_v6 = vadd.f32 %v10862_v23, %v10448_v2 }
0x1ba3   : > { %10473 = vst.msk [vmem:[%s18735_s26 + $0x28] sm:$0xff] %vm10467_vm6, %v10454_v62 }
0x1ba4   : > { %10472 = vst.msk [vmem:[%s18735_s26 + $0x20] sm:$0xff] %vm10467_vm6, %v10449_v6 }
0x1bb5   : > { %v15218_v11 = vpop.f32.mrb[132].mxu1 }
0x1bb6   : > { %v10317_v45 = vadd.f32 %v15218_v11, %v10853_v50  ;;  %v10311_v14 = vpop.f32.mrb[133].mxu1 }
0x1bb7   : > { %v10312_v29 = vadd.f32 %v10853_v50, %v10311_v14 }
0x1bb8   : > { %v10327_v10 = vmax.f32 %v10317_v45, 0.0 }
0x1bb9   : > { %v10326_v54 = vmax.f32 %v10312_v29, 0.0 }
0x1bbb   : > { %15232 = vmatprep.mubr.msk.f32.mxu1 %vm10337_vm5, %v10326_v54 }
0x1bbc   : > { %15233 = vmatmul.mubr.msk.f32.vlgmr.msra.gmra.mrb[134].mxu1 %vm10337_vm5, %v10327_v10 }
0x1c8f   : > { %v15234_v43 = vpop.f32.mrb[134].mxu1 }
0x1c90   : > { %v10464_v51 = vadd.f32 %v15234_v43, %v10862_v23  ;;  %v10458_v8 = vpop.f32.mrb[135].mxu1 }
0x1c91   : > { %v10459_v52 = vadd.f32 %v10862_v23, %v10458_v8 }
0x1c92   : > { %10475 = vst.msk [vmem:[%s18735_s26 + $0x38] sm:$0xff] %vm10467_vm6, %v10464_v51 }
0x1c93   : > { %10474 = vst.msk [vmem:[%s18735_s26 + $0x30] sm:$0xff] %vm10467_vm6, %v10459_v52 }
0x1c94 PF: > { %s21_s17 = sadd.s32 1, %s18652_s17  }
0x1c95   : > { %p18_p5 = scmp.ge.s32.totalorder %s21_s17, 4  }
0x1c97   :  { %20 = sbr.rel (!%p18_p5) target bundleno = 1 (0x1), region = 118 }

</bundles_post_ra>
